<compile_context>
chip_gen: v7x
topology: tpu7x:2x2x1
jax: 0.10.0
libtpu: 0.0.40
codegen_flags: <defaults>
</compile_context>

<pallas_src>
import functools

import numpy as np
import jax
import jax.numpy as jnp
from jax.experimental import pallas as pl
from jax.experimental.pallas import tpu as pltpu

# ----------------------- small, module-consistent sizes -----------------------
B = 2             # batch
L = 8             # num residues
SEQ_C = 16        # seq_channel
PAIR_C = 16       # pair_channel
MAX_REL = 8       # max_relative_feature
NUM_OUTER = 8     # outer_product_mean.num_outer_channel
INTER_FACTOR = 2  # transition.num_intermediate_factor
NUM_BLOCKS = 2    # seqformer_num_block
DIST_C = 20       # proj_pair_dis input channels (fixed in the module)
LN_EPS = 1e-5     # torch LayerNorm default eps
REL_DIM = 2 * MAX_REL + 2 + 1


# ------------------------------ fused Pallas kernel ----------------------------

def _normalize(x):
    # LayerNorm without affine params (gamma/beta are folded into the next Linear).
    mu = jnp.mean(x, axis=-1, keepdims=True)
    var = jnp.mean((x - mu) ** 2, axis=-1, keepdims=True)
    return (x - mu) * jax.lax.rsqrt(var + LN_EPS)


def fused_forward_kernel(
        rel_ref, dist_ref, si_ref, sm_ref, pm_ref,
        rit_ref, rjt_ref, ri_ref, rj_ref, cc_ref, cd_ref,
        prw_ref, prb_ref, pdw_ref, pdb_ref,
        sw1_ref, sb1_ref, sw2_ref, sb2_ref,
        owlr_ref, oblr_ref, owo_ref, obo_ref,
        pw1_ref, pb1_ref, pw2_ref, pb2_ref,
        seq_out_ref, pair_out_ref):
    dot = functools.partial(jnp.dot, preferred_element_type=jnp.float32)

    # initial pair activations: proj_rel_pos(rel_pos) + proj_pair_dis(dist)
    pair = (dot(rel_ref[0], prw_ref[...]) + prb_ref[...]
            + dot(dist_ref[0], pdw_ref[...]) + pdb_ref[...])      # (L*L, PAIR_C)
    seq = si_ref[0]                                               # (L, SEQ_C)
    pm = pm_ref[0]                                                # (L*L, 1)
    sm = sm_ref[0]                                                # (L, 1)
    rit, rjt = rit_ref[...], rjt_ref[...]                         # (L, L*L)
    ri, rj = ri_ref[...], rj_ref[...]                             # (L*L, L)
    cc, cd = cc_ref[...], cd_ref[...]                             # (CO, CO*CO)

    for blk in range(NUM_BLOCKS):
        # --- seq_left + seq_right transitions (shared normalize, concat weights) ---
        xhat = _normalize(pair)                                       # (L*L, PAIR_C)
        h = jnp.maximum(dot(xhat, sw1_ref[blk]) + sb1_ref[blk], 0.0)  # (L*L, 2*MID)
        o = (dot(h, sw2_ref[blk]) + sb2_ref[blk]) * pm                # (L*L, 2*SEQ_C)
        seq = seq + dot(rjt, o[:, :SEQ_C])    # sum over i  (torch dim=1)
        seq = seq + dot(rit, o[:, SEQ_C:])    # sum over j  (torch dim=2)

        # --- OuterProductMean (fused left/right proj, single out-proj matmul) ---
        shat = _normalize(seq)                                        # (L, SEQ_C)
        lr = (dot(shat, owlr_ref[blk]) + oblr_ref[blk]) * sm          # (L, 2*CO)
        l_big = dot(dot(ri, lr[:, :NUM_OUTER]), cc)                   # (L*L, CO*CO)
        r_big = dot(dot(rj, lr[:, NUM_OUTER:]), cd)                   # (L*L, CO*CO)
        pair = pair + dot(l_big * r_big, owo_ref[blk]) + obo_ref[blk]

        # TODO(synk): TriangleMultiplication / TriangleAttention residual updates
        # omitted (their class definitions were not provided with the module source).

        # --- pair transition ---
        phat = _normalize(pair)
        hp = jnp.maximum(dot(phat, pw1_ref[blk]) + pb1_ref[blk], 0.0)
        pair = pair + dot(hp, pw2_ref[blk]) + pb2_ref[blk]

    seq_out_ref[0] = seq
    pair_out_ref[0] = pair


# ------------------------------ wrapper / plumbing ------------------------------

def _selectors(l, co):
    """Constant 0/1 matrices turning the masked sums and the OPM outer product
    into plain MXU matmuls (no in-kernel reshapes/transposes needed)."""
    eye_l = np.eye(l, dtype=np.float32)
    ri = np.kron(eye_l, np.ones((l, 1), np.float32))   # ri[i*l+j, i] = 1
    rj = np.kron(np.ones((l, 1), np.float32), eye_l)   # rj[i*l+j, j] = 1
    eye_c = np.eye(co, dtype=np.float32)
    cc = np.kron(eye_c, np.ones((1, co), np.float32))  # cc[c, c*co+d] = 1
    cd = np.kron(np.ones((1, co), np.float32), eye_c)  # cd[d, c*co+d] = 1
    return (jnp.asarray(ri.T), jnp.asarray(rj.T), jnp.asarray(ri),
            jnp.asarray(rj), jnp.asarray(cc), jnp.asarray(cd))


def _fold_ln(gamma, beta, w1, b1):
    # norm(x) @ w1 + b1 == normalize(x) @ (gamma[:,None]*w1) + (beta @ w1 + b1)
    return gamma[0][:, None] * w1, b1 + beta @ w1


def _fold_params(params):
    per = []
    for blk in params['blocks']:
        sl, sr = blk['seq_left'], blk['seq_right']
        pt, op = blk['pair_trans'], blk['opm']
        lw1, lb1 = _fold_ln(sl['gamma'], sl['beta'], sl['w1'], sl['b1'])
        rw1, rb1 = _fold_ln(sr['gamma'], sr['beta'], sr['w1'], sr['b1'])
        mid, cout = sl['w2'].shape
        z = jnp.zeros((mid, cout), jnp.float32)
        owl, obl = _fold_ln(op['gamma'], op['beta'], op['wl'], op['bl'])
        owr, obr = _fold_ln(op['gamma'], op['beta'], op['wr'], op['br'])
        pw1, pb1 = _fold_ln(pt['gamma'], pt['beta'], pt['w1'], pt['b1'])
        per.append(dict(
            sw1=jnp.concatenate([lw1, rw1], axis=1),
            sb1=jnp.concatenate([lb1, rb1], axis=1),
            sw2=jnp.block([[sl['w2'], z], [z, sr['w2']]]),
            sb2=jnp.concatenate([sl['b2'], sr['b2']], axis=1),
            owlr=jnp.concatenate([owl, owr], axis=1),
            oblr=jnp.concatenate([obl, obr], axis=1),
            owo=op['wo3'].reshape(NUM_OUTER * NUM_OUTER, -1),
            obo=op['bo'],
            pw1=pw1, pb1=pb1, pw2=pt['w2'], pb2=pt['b2']))
    stacked = {k: jnp.stack([d[k] for d in per]) for k in per[0]}
    stacked.update(prw=params['proj_rel_pos_w'], prb=params['proj_rel_pos_b'],
                   pdw=params['proj_pair_dis_w'], pdb=params['proj_pair_dis_b'])
    return stacked


def _batched_spec(shape):
    n = len(shape)
    return pl.BlockSpec((1,) + tuple(shape[1:]),
                        lambda b, _n=n: (b,) + (0,) * (_n - 1))


def _shared_spec(shape):
    n = len(shape)
    return pl.BlockSpec(tuple(shape), lambda b, _n=n: (0,) * _n)


def _relpos_features(b, l):
    seq_pos = jnp.arange(l)
    offset = seq_pos[None, :, None] - seq_pos[None, None, :]
    clipped = jnp.clip(offset + MAX_REL, 0, 2 * MAX_REL)
    chain_id = jnp.zeros((b, l), jnp.int32)
    eq_chain = chain_id[:, None, :] == chain_id[:, :, None]
    final_offset = jnp.where(eq_chain, clipped.astype(jnp.float32),
                             jnp.float32(2 * MAX_REL + 1)).astype(jnp.int32)
    rel_pos = jax.nn.one_hot(final_offset, 2 * MAX_REL + 2, dtype=jnp.float32)
    rel_pos = jnp.concatenate(
        [rel_pos, eq_chain.astype(jnp.float32)[..., None]], axis=-1)
    return rel_pos  # (B, L, L, REL_DIM)


@jax.jit
def inverseformer_forward(params, seq, si, dist, mask, total_mask):
    b, l = seq.shape
    ll = l * l
    rel = _relpos_features(b, l).reshape(b, ll, REL_DIM)
    dist2 = dist.reshape(b, ll, DIST_C)
    sm3 = mask.reshape(b, l, 1).astype(jnp.float32)
    pm3 = total_mask.reshape(b, ll, 1).astype(jnp.float32)
    rit, rjt, ri, rj, cc, cd = _selectors(l, NUM_OUTER)
    fp = _fold_params(params)

    inputs = [rel, dist2, si, sm3, pm3,
              rit, rjt, ri, rj, cc, cd,
              fp['prw'], fp['prb'], fp['pdw'], fp['pdb'],
              fp['sw1'], fp['sb1'], fp['sw2'], fp['sb2'],
              fp['owlr'], fp['oblr'], fp['owo'], fp['obo'],
              fp['pw1'], fp['pb1'], fp['pw2'], fp['pb2']]
    in_specs = ([_batched_spec(x.shape) for x in inputs[:5]]
                + [_shared_spec(x.shape) for x in inputs[5:]])

    seq_out, pair_flat = pl.pallas_call(
        fused_forward_kernel,
        out_shape=(jax.ShapeDtypeStruct((b, l, SEQ_C), jnp.float32),
                   jax.ShapeDtypeStruct((b, ll, PAIR_C), jnp.float32)),
        grid=(b,),
        in_specs=in_specs,
        out_specs=(pl.BlockSpec((1, l, SEQ_C), lambda i: (i, 0, 0)),
                   pl.BlockSpec((1, ll, PAIR_C), lambda i: (i, 0, 0))),
        compiler_params=pltpu.CompilerParams(
            dimension_semantics=("parallel",)),
    )(*inputs)
    return seq_out, pair_flat.reshape(b, l, l, PAIR_C)


# ------------------------- pure-JAX reference (check) ---------------------------

def _ref_layernorm(x, gamma, beta):
    mu = jnp.mean(x, -1, keepdims=True)
    var = jnp.mean((x - mu) ** 2, -1, keepdims=True)
    return (x - mu) * jax.lax.rsqrt(var + LN_EPS) * gamma + beta


def _ref_transition(p, x):
    xn = _ref_layernorm(x, p['gamma'][0], p['beta'][0])
    h = jax.nn.relu(xn @ p['w1'] + p['b1'][0])
    return h @ p['w2'] + p['b2'][0]


def _ref_opm(p, act, mask):
    xn = _ref_layernorm(act, p['gamma'][0], p['beta'][0])
    m = mask[..., None]
    left = m * (xn @ p['wl'] + p['bl'][0])
    right = m * (xn @ p['wr'] + p['br'][0])
    outer = jnp.einsum('bic,bjd->bijcd', left, right)
    b, l = act.shape[:2]
    co = p['wl'].shape[1]
    outer = outer.reshape(b, l, l, co * co)
    return outer @ p['wo3'].reshape(co * co, -1) + p['bo'][0]


def _ref_iteration(p, seq_act, pair_act, seq_mask, pair_mask):
    seq_act = seq_act + jnp.sum(
        _ref_transition(p['seq_left'], pair_act) * pair_mask[..., None], axis=1)
    seq_act = seq_act + jnp.sum(
        _ref_transition(p['seq_right'], pair_act) * pair_mask[..., None], axis=2)
    pair_act = pair_act + _ref_opm(p['opm'], seq_act, seq_mask)
    pair_act = pair_act + _ref_transition(p['pair_trans'], pair_act)
    return seq_act, pair_act


def reference_forward(params, seq, si, dist, mask, total_mask):
    b, l = seq.shape
    rel_pos = _relpos_features(b, l)
    pair_act = rel_pos @ params['proj_rel_pos_w'] + params['proj_rel_pos_b'][0]
    pair_act = pair_act + dist @ params['proj_pair_dis_w'] + params['proj_pair_dis_b'][0]
    seq_act = si
    for blk in params['blocks']:
        seq_act, pair_act = _ref_iteration(blk, seq_act, pair_act, mask, total_mask)
    return seq_act, pair_act


# ------------------------------ parameter init ----------------------------------

def init_params(key):
    keys = iter(jax.random.split(key, 64))

    def w(shape, scale=0.1):
        return scale * jax.random.normal(next(keys), shape, jnp.float32)

    def transition_params(cin, cout, factor):
        cmid = cin * factor
        return dict(gamma=1.0 + w((1, cin)), beta=w((1, cin)),
                    w1=w((cin, cmid)), b1=w((1, cmid)),
                    w2=w((cmid, cout)), b2=w((1, cout)))

    def opm_params(cin, co, pc):
        return dict(gamma=1.0 + w((1, cin)), beta=w((1, cin)),
                    wl=w((cin, co)), bl=w((1, co)),
                    wr=w((cin, co)), br=w((1, co)),
                    wo3=w((co, co, pc)), bo=w((1, pc)))

    blocks = []
    for _ in range(NUM_BLOCKS):
        blocks.append(dict(
            opm=opm_params(SEQ_C, NUM_OUTER, PAIR_C),
            seq_left=transition_params(PAIR_C, SEQ_C, INTER_FACTOR),
            seq_right=transition_params(PAIR_C, SEQ_C, INTER_FACTOR),
            pair_trans=transition_params(PAIR_C, PAIR_C, INTER_FACTOR),
        ))
    return dict(
        proj_rel_pos_w=w((REL_DIM, PAIR_C)), proj_rel_pos_b=w((1, PAIR_C)),
        proj_pair_dis_w=w((DIST_C, PAIR_C)), proj_pair_dis_b=w((1, PAIR_C)),
        blocks=blocks,
    )


# ------------------------------------ main ---------------------------------------

if __name__ == "__main__":
    jax.config.update("jax_default_matmul_precision", "highest")

    key = jax.random.PRNGKey(0)
    kp, k1, k2, k3, k4, k5 = jax.random.split(key, 6)
    params = init_params(kp)

    seq = jax.random.randint(k1, (B, L), 0, 21)                        # batch['seq'] (shape only)
    si = jax.random.normal(k2, (B, L, SEQ_C), jnp.float32)             # seq embedding input
    dist = jax.random.normal(k3, (B, L, L, DIST_C), jnp.float32)       # pair distance features
    mask = (jax.random.uniform(k4, (B, L)) > 0.2).astype(jnp.float32)          # batch['mask']
    total_mask = (jax.random.uniform(k5, (B, L, L)) > 0.2).astype(jnp.float32)  # pair mask

    seq_out, pair_out = inverseformer_forward(params, seq, si, dist, mask, total_mask)
    jax.block_until_ready((seq_out, pair_out))

    seq_ref, pair_ref = reference_forward(params, seq, si, dist, mask, total_mask)
    assert seq_out.shape == (B, L, SEQ_C) and pair_out.shape == (B, L, L, PAIR_C)
    assert jnp.allclose(seq_out, seq_ref, atol=1e-2, rtol=1e-2)
    assert jnp.allclose(pair_out, pair_ref, atol=1e-2, rtol=1e-2)

    print("KERNEL_OK")
</pallas_src>

<mosaic_0001>
module attributes {stable_mosaic.version = 11 : i64} {
  func.func @fused_forward_kernel(%arg0: i32, %arg1: memref<1x64x19xf32, #tpu.memory_space<vmem>>, %arg2: memref<1x64x20xf32, #tpu.memory_space<vmem>>, %arg3: memref<1x8x16xf32, #tpu.memory_space<vmem>>, %arg4: memref<1x8x1xf32, #tpu.memory_space<vmem>>, %arg5: memref<1x64x1xf32, #tpu.memory_space<vmem>>, %arg6: memref<8x64xf32, #tpu.memory_space<vmem>>, %arg7: memref<8x64xf32, #tpu.memory_space<vmem>>, %arg8: memref<64x8xf32, #tpu.memory_space<vmem>>, %arg9: memref<64x8xf32, #tpu.memory_space<vmem>>, %arg10: memref<8x64xf32, #tpu.memory_space<vmem>>, %arg11: memref<8x64xf32, #tpu.memory_space<vmem>>, %arg12: memref<19x16xf32, #tpu.memory_space<vmem>>, %arg13: memref<1x16xf32, #tpu.memory_space<vmem>>, %arg14: memref<20x16xf32, #tpu.memory_space<vmem>>, %arg15: memref<1x16xf32, #tpu.memory_space<vmem>>, %arg16: memref<2x16x64xf32, #tpu.memory_space<vmem>>, %arg17: memref<2x1x64xf32, #tpu.memory_space<vmem>>, %arg18: memref<2x64x32xf32, #tpu.memory_space<vmem>>, %arg19: memref<2x1x32xf32, #tpu.memory_space<vmem>>, %arg20: memref<2x16x16xf32, #tpu.memory_space<vmem>>, %arg21: memref<2x1x16xf32, #tpu.memory_space<vmem>>, %arg22: memref<2x64x16xf32, #tpu.memory_space<vmem>>, %arg23: memref<2x1x16xf32, #tpu.memory_space<vmem>>, %arg24: memref<2x16x32xf32, #tpu.memory_space<vmem>>, %arg25: memref<2x1x32xf32, #tpu.memory_space<vmem>>, %arg26: memref<2x32x16xf32, #tpu.memory_space<vmem>>, %arg27: memref<2x1x16xf32, #tpu.memory_space<vmem>>, %arg28: memref<1x8x16xf32, #tpu.memory_space<vmem>>, %arg29: memref<1x64x16xf32, #tpu.memory_space<vmem>>) attributes {dimension_semantics = [#tpu.dimension_semantics<parallel>], iteration_bounds = array<i64: 2>, scalar_prefetch = 0 : i64, scratch_operands = 0 : i64, tpu.core_type = #tpu.core_type<tc>, window_params = [{transform_indices = @transform_0, window_bounds = array<i64: 1, 64, 19>}, {transform_indices = @transform_1, window_bounds = array<i64: 1, 64, 20>}, {transform_indices = @transform_2, window_bounds = array<i64: 1, 8, 16>}, {transform_indices = @transform_3, window_bounds = array<i64: 1, 8, 1>}, {transform_indices = @transform_4, window_bounds = array<i64: 1, 64, 1>}, {pipeline_mode = #tpu.pipeline_mode<synchronous>, transform_indices = @transform_5, window_bounds = array<i64: 8, 64>}, {pipeline_mode = #tpu.pipeline_mode<synchronous>, transform_indices = @transform_6, window_bounds = array<i64: 8, 64>}, {pipeline_mode = #tpu.pipeline_mode<synchronous>, transform_indices = @transform_7, window_bounds = array<i64: 64, 8>}, {pipeline_mode = #tpu.pipeline_mode<synchronous>, transform_indices = @transform_8, window_bounds = array<i64: 64, 8>}, {pipeline_mode = #tpu.pipeline_mode<synchronous>, transform_indices = @transform_9, window_bounds = array<i64: 8, 64>}, {pipeline_mode = #tpu.pipeline_mode<synchronous>, transform_indices = @transform_10, window_bounds = array<i64: 8, 64>}, {pipeline_mode = #tpu.pipeline_mode<synchronous>, transform_indices = @transform_11, window_bounds = array<i64: 19, 16>}, {pipeline_mode = #tpu.pipeline_mode<synchronous>, transform_indices = @transform_12, window_bounds = array<i64: 1, 16>}, {pipeline_mode = #tpu.pipeline_mode<synchronous>, transform_indices = @transform_13, window_bounds = array<i64: 20, 16>}, {pipeline_mode = #tpu.pipeline_mode<synchronous>, transform_indices = @transform_14, window_bounds = array<i64: 1, 16>}, {pipeline_mode = #tpu.pipeline_mode<synchronous>, transform_indices = @transform_15, window_bounds = array<i64: 2, 16, 64>}, {pipeline_mode = #tpu.pipeline_mode<synchronous>, transform_indices = @transform_16, window_bounds = array<i64: 2, 1, 64>}, {pipeline_mode = #tpu.pipeline_mode<synchronous>, transform_indices = @transform_17, window_bounds = array<i64: 2, 64, 32>}, {pipeline_mode = #tpu.pipeline_mode<synchronous>, transform_indices = @transform_18, window_bounds = array<i64: 2, 1, 32>}, {pipeline_mode = #tpu.pipeline_mode<synchronous>, transform_indices = @transform_19, window_bounds = array<i64: 2, 16, 16>}, {pipeline_mode = #tpu.pipeline_mode<synchronous>, transform_indices = @transform_20, window_bounds = array<i64: 2, 1, 16>}, {pipeline_mode = #tpu.pipeline_mode<synchronous>, transform_indices = @transform_21, window_bounds = array<i64: 2, 64, 16>}, {pipeline_mode = #tpu.pipeline_mode<synchronous>, transform_indices = @transform_22, window_bounds = array<i64: 2, 1, 16>}, {pipeline_mode = #tpu.pipeline_mode<synchronous>, transform_indices = @transform_23, window_bounds = array<i64: 2, 16, 32>}, {pipeline_mode = #tpu.pipeline_mode<synchronous>, transform_indices = @transform_24, window_bounds = array<i64: 2, 1, 32>}, {pipeline_mode = #tpu.pipeline_mode<synchronous>, transform_indices = @transform_25, window_bounds = array<i64: 2, 32, 16>}, {pipeline_mode = #tpu.pipeline_mode<synchronous>, transform_indices = @transform_26, window_bounds = array<i64: 2, 1, 16>}, {transform_indices = @transform_27, window_bounds = array<i64: 1, 8, 16>}, {transform_indices = @transform_28, window_bounds = array<i64: 1, 64, 16>}]} {
    %c0 = arith.constant 0 : index
    %c0_0 = arith.constant 0 : index
    %c0_1 = arith.constant 0 : index
    %0 = vector.load %arg1[%c0, %c0_0, %c0_1] : memref<1x64x19xf32, #tpu.memory_space<vmem>>, vector<1x64x19xf32>
    %1 = vector.shape_cast %0 : vector<1x64x19xf32> to vector<64x19xf32>
    %c0_2 = arith.constant 0 : index
    %c0_3 = arith.constant 0 : index
    %2 = vector.load %arg12[%c0_2, %c0_3] : memref<19x16xf32, #tpu.memory_space<vmem>>, vector<19x16xf32>
    %cst = arith.constant dense<0.000000e+00> : vector<64x16xf32>
    %3 = tpu.matmul %1, %2, %cst {dimension_numbers = #tpu.dot_dimension_numbers<[1], [0], [0], [1], [0, 0, 1, 1], [], []>, precision = #tpu.contract_precision<fp32>} : vector<64x19xf32>, vector<19x16xf32>, vector<64x16xf32> -> vector<64x16xf32>
    %c0_4 = arith.constant 0 : index
    %c0_5 = arith.constant 0 : index
    %4 = vector.load %arg13[%c0_4, %c0_5] : memref<1x16xf32, #tpu.memory_space<vmem>>, vector<1x16xf32>
    %5 = vector.broadcast %4 : vector<1x16xf32> to vector<64x16xf32>
    %6 = arith.addf %3, %5 : vector<64x16xf32>
    %c0_6 = arith.constant 0 : index
    %c0_7 = arith.constant 0 : index
    %c0_8 = arith.constant 0 : index
    %7 = vector.load %arg2[%c0_6, %c0_7, %c0_8] : memref<1x64x20xf32, #tpu.memory_space<vmem>>, vector<1x64x20xf32>
    %8 = vector.shape_cast %7 : vector<1x64x20xf32> to vector<64x20xf32>
    %c0_9 = arith.constant 0 : index
    %c0_10 = arith.constant 0 : index
    %9 = vector.load %arg14[%c0_9, %c0_10] : memref<20x16xf32, #tpu.memory_space<vmem>>, vector<20x16xf32>
    %cst_11 = arith.constant dense<0.000000e+00> : vector<64x16xf32>
    %10 = tpu.matmul %8, %9, %cst_11 {dimension_numbers = #tpu.dot_dimension_numbers<[1], [0], [0], [1], [0, 0, 1, 1], [], []>, precision = #tpu.contract_precision<fp32>} : vector<64x20xf32>, vector<20x16xf32>, vector<64x16xf32> -> vector<64x16xf32>
    %11 = arith.addf %6, %10 : vector<64x16xf32>
    %c0_12 = arith.constant 0 : index
    %c0_13 = arith.constant 0 : index
    %12 = vector.load %arg15[%c0_12, %c0_13] : memref<1x16xf32, #tpu.memory_space<vmem>>, vector<1x16xf32>
    %13 = vector.broadcast %12 : vector<1x16xf32> to vector<64x16xf32>
    %14 = arith.addf %11, %13 : vector<64x16xf32>
    %c0_14 = arith.constant 0 : index
    %c0_15 = arith.constant 0 : index
    %c0_16 = arith.constant 0 : index
    %15 = vector.load %arg3[%c0_14, %c0_15, %c0_16] : memref<1x8x16xf32, #tpu.memory_space<vmem>>, vector<1x8x16xf32>
    %16 = vector.shape_cast %15 : vector<1x8x16xf32> to vector<8x16xf32>
    %c0_17 = arith.constant 0 : index
    %c0_18 = arith.constant 0 : index
    %c0_19 = arith.constant 0 : index
    %17 = vector.load %arg5[%c0_17, %c0_18, %c0_19] : memref<1x64x1xf32, #tpu.memory_space<vmem>>, vector<1x64x1xf32>
    %18 = vector.shape_cast %17 : vector<1x64x1xf32> to vector<64x1xf32>
    %c0_20 = arith.constant 0 : index
    %c0_21 = arith.constant 0 : index
    %c0_22 = arith.constant 0 : index
    %19 = vector.load %arg4[%c0_20, %c0_21, %c0_22] : memref<1x8x1xf32, #tpu.memory_space<vmem>>, vector<1x8x1xf32>
    %20 = vector.shape_cast %19 : vector<1x8x1xf32> to vector<8x1xf32>
    %c0_23 = arith.constant 0 : index
    %c0_24 = arith.constant 0 : index
    %21 = vector.load %arg6[%c0_23, %c0_24] : memref<8x64xf32, #tpu.memory_space<vmem>>, vector<8x64xf32>
    %c0_25 = arith.constant 0 : index
    %c0_26 = arith.constant 0 : index
    %22 = vector.load %arg7[%c0_25, %c0_26] : memref<8x64xf32, #tpu.memory_space<vmem>>, vector<8x64xf32>
    %c0_27 = arith.constant 0 : index
    %c0_28 = arith.constant 0 : index
    %23 = vector.load %arg8[%c0_27, %c0_28] : memref<64x8xf32, #tpu.memory_space<vmem>>, vector<64x8xf32>
    %c0_29 = arith.constant 0 : index
    %c0_30 = arith.constant 0 : index
    %24 = vector.load %arg9[%c0_29, %c0_30] : memref<64x8xf32, #tpu.memory_space<vmem>>, vector<64x8xf32>
    %c0_31 = arith.constant 0 : index
    %c0_32 = arith.constant 0 : index
    %25 = vector.load %arg10[%c0_31, %c0_32] : memref<8x64xf32, #tpu.memory_space<vmem>>, vector<8x64xf32>
    %c0_33 = arith.constant 0 : index
    %c0_34 = arith.constant 0 : index
    %26 = vector.load %arg11[%c0_33, %c0_34] : memref<8x64xf32, #tpu.memory_space<vmem>>, vector<8x64xf32>
    %cst_35 = arith.constant dense<0.000000e+00> : vector<64xf32>
    %27 = vector.multi_reduction <add>, %14, %cst_35 [1] : vector<64x16xf32> to vector<64xf32>
    %28 = vector.shape_cast %27 : vector<64xf32> to vector<64x1xf32>
    %cst_36 = arith.constant 1.600000e+01 : f32
    %29 = vector.broadcast %cst_36 : f32 to vector<64x1xf32>
    %30 = arith.divf %28, %29 : vector<64x1xf32>
    %31 = vector.broadcast %30 : vector<64x1xf32> to vector<64x16xf32>
    %32 = arith.subf %14, %31 : vector<64x16xf32>
    %33 = arith.mulf %32, %32 : vector<64x16xf32>
    %cst_37 = arith.constant dense<0.000000e+00> : vector<64xf32>
    %34 = vector.multi_reduction <add>, %33, %cst_37 [1] : vector<64x16xf32> to vector<64xf32>
    %35 = vector.shape_cast %34 : vector<64xf32> to vector<64x1xf32>
    %cst_38 = arith.constant 1.600000e+01 : f32
    %36 = vector.broadcast %cst_38 : f32 to vector<64x1xf32>
    %37 = arith.divf %35, %36 : vector<64x1xf32>
    %38 = vector.broadcast %30 : vector<64x1xf32> to vector<64x16xf32>
    %39 = arith.subf %14, %38 : vector<64x16xf32>
    %cst_39 = arith.constant 9.99999974E-6 : f32
    %40 = vector.broadcast %cst_39 : f32 to vector<64x1xf32>
    %41 = arith.addf %37, %40 : vector<64x1xf32>
    %42 = math.rsqrt %41 : vector<64x1xf32>
    %43 = vector.broadcast %42 : vector<64x1xf32> to vector<64x16xf32>
    %44 = arith.mulf %39, %43 : vector<64x16xf32>
    %c0_40 = arith.constant 0 : index
    %c0_41 = arith.constant 0 : index
    %c0_42 = arith.constant 0 : index
    %45 = vector.load %arg16[%c0_40, %c0_41, %c0_42] : memref<2x16x64xf32, #tpu.memory_space<vmem>>, vector<1x16x64xf32>
    %46 = vector.shape_cast %45 : vector<1x16x64xf32> to vector<16x64xf32>
    %cst_43 = arith.constant dense<0.000000e+00> : vector<64x64xf32>
    %47 = tpu.matmul %44, %46, %cst_43 {dimension_numbers = #tpu.dot_dimension_numbers<[1], [0], [0], [1], [0, 0, 1, 1], [], []>, precision = #tpu.contract_precision<fp32>} : vector<64x16xf32>, vector<16x64xf32>, vector<64x64xf32> -> vector<64x64xf32>
    %c0_44 = arith.constant 0 : index
    %c0_45 = arith.constant 0 : index
    %c0_46 = arith.constant 0 : index
    %48 = vector.load %arg17[%c0_44, %c0_45, %c0_46] : memref<2x1x64xf32, #tpu.memory_space<vmem>>, vector<1x1x64xf32>
    %49 = vector.shape_cast %48 : vector<1x1x64xf32> to vector<1x64xf32>
    %50 = vector.broadcast %49 : vector<1x64xf32> to vector<64x64xf32>
    %51 = arith.addf %47, %50 : vector<64x64xf32>
    %cst_47 = arith.constant 0.000000e+00 : f32
    %52 = vector.broadcast %cst_47 : f32 to vector<64x64xf32>
    %53 = arith.maximumf %51, %52 : vector<64x64xf32>
    %c0_48 = arith.constant 0 : index
    %c0_49 = arith.constant 0 : index
    %c0_50 = arith.constant 0 : index
    %54 = vector.load %arg18[%c0_48, %c0_49, %c0_50] : memref<2x64x32xf32, #tpu.memory_space<vmem>>, vector<1x64x32xf32>
    %55 = vector.shape_cast %54 : vector<1x64x32xf32> to vector<64x32xf32>
    %cst_51 = arith.constant dense<0.000000e+00> : vector<64x32xf32>
    %56 = tpu.matmul %53, %55, %cst_51 {dimension_numbers = #tpu.dot_dimension_numbers<[1], [0], [0], [1], [0, 0, 1, 1], [], []>, precision = #tpu.contract_precision<fp32>} : vector<64x64xf32>, vector<64x32xf32>, vector<64x32xf32> -> vector<64x32xf32>
    %c0_52 = arith.constant 0 : index
    %c0_53 = arith.constant 0 : index
    %c0_54 = arith.constant 0 : index
    %57 = vector.load %arg19[%c0_52, %c0_53, %c0_54] : memref<2x1x32xf32, #tpu.memory_space<vmem>>, vector<1x1x32xf32>
    %58 = vector.shape_cast %57 : vector<1x1x32xf32> to vector<1x32xf32>
    %59 = vector.broadcast %58 : vector<1x32xf32> to vector<64x32xf32>
    %60 = arith.addf %56, %59 : vector<64x32xf32>
    %61 = vector.broadcast %18 : vector<64x1xf32> to vector<64x32xf32>
    %62 = arith.mulf %60, %61 : vector<64x32xf32>
    %63 = vector.extract_strided_slice %62 {offsets = [0, 0], sizes = [64, 16], strides = [1, 1]} : vector<64x32xf32> to vector<64x16xf32>
    %cst_55 = arith.constant dense<0.000000e+00> : vector<8x16xf32>
    %64 = tpu.matmul %22, %63, %cst_55 {dimension_numbers = #tpu.dot_dimension_numbers<[1], [0], [0], [1], [0, 0, 1, 1], [], []>, precision = #tpu.contract_precision<fp32>} : vector<8x64xf32>, vector<64x16xf32>, vector<8x16xf32> -> vector<8x16xf32>
    %65 = arith.addf %16, %64 : vector<8x16xf32>
    %66 = vector.extract_strided_slice %62 {offsets = [0, 16], sizes = [64, 16], strides = [1, 1]} : vector<64x32xf32> to vector<64x16xf32>
    %cst_56 = arith.constant dense<0.000000e+00> : vector<8x16xf32>
    %67 = tpu.matmul %21, %66, %cst_56 {dimension_numbers = #tpu.dot_dimension_numbers<[1], [0], [0], [1], [0, 0, 1, 1], [], []>, precision = #tpu.contract_precision<fp32>} : vector<8x64xf32>, vector<64x16xf32>, vector<8x16xf32> -> vector<8x16xf32>
    %68 = arith.addf %65, %67 : vector<8x16xf32>
    %cst_57 = arith.constant dense<0.000000e+00> : vector<8xf32>
    %69 = vector.multi_reduction <add>, %68, %cst_57 [1] : vector<8x16xf32> to vector<8xf32>
    %70 = vector.shape_cast %69 : vector<8xf32> to vector<8x1xf32>
    %cst_58 = arith.constant 1.600000e+01 : f32
    %71 = vector.broadcast %cst_58 : f32 to vector<8x1xf32>
    %72 = arith.divf %70, %71 : vector<8x1xf32>
    %73 = vector.broadcast %72 : vector<8x1xf32> to vector<8x16xf32>
    %74 = arith.subf %68, %73 : vector<8x16xf32>
    %75 = arith.mulf %74, %74 : vector<8x16xf32>
    %cst_59 = arith.constant dense<0.000000e+00> : vector<8xf32>
    %76 = vector.multi_reduction <add>, %75, %cst_59 [1] : vector<8x16xf32> to vector<8xf32>
    %77 = vector.shape_cast %76 : vector<8xf32> to vector<8x1xf32>
    %cst_60 = arith.constant 1.600000e+01 : f32
    %78 = vector.broadcast %cst_60 : f32 to vector<8x1xf32>
    %79 = arith.divf %77, %78 : vector<8x1xf32>
    %80 = vector.broadcast %72 : vector<8x1xf32> to vector<8x16xf32>
    %81 = arith.subf %68, %80 : vector<8x16xf32>
    %cst_61 = arith.constant 9.99999974E-6 : f32
    %82 = vector.broadcast %cst_61 : f32 to vector<8x1xf32>
    %83 = arith.addf %79, %82 : vector<8x1xf32>
    %84 = math.rsqrt %83 : vector<8x1xf32>
    %85 = vector.broadcast %84 : vector<8x1xf32> to vector<8x16xf32>
    %86 = arith.mulf %81, %85 : vector<8x16xf32>
    %c0_62 = arith.constant 0 : index
    %c0_63 = arith.constant 0 : index
    %c0_64 = arith.constant 0 : index
    %87 = vector.load %arg20[%c0_62, %c0_63, %c0_64] : memref<2x16x16xf32, #tpu.memory_space<vmem>>, vector<1x16x16xf32>
    %88 = vector.shape_cast %87 : vector<1x16x16xf32> to vector<16x16xf32>
    %cst_65 = arith.constant dense<0.000000e+00> : vector<8x16xf32>
    %89 = tpu.matmul %86, %88, %cst_65 {dimension_numbers = #tpu.dot_dimension_numbers<[1], [0], [0], [1], [0, 0, 1, 1], [], []>, precision = #tpu.contract_precision<fp32>} : vector<8x16xf32>, vector<16x16xf32>, vector<8x16xf32> -> vector<8x16xf32>
    %c0_66 = arith.constant 0 : index
    %c0_67 = arith.constant 0 : index
    %c0_68 = arith.constant 0 : index
    %90 = vector.load %arg21[%c0_66, %c0_67, %c0_68] : memref<2x1x16xf32, #tpu.memory_space<vmem>>, vector<1x1x16xf32>
    %91 = vector.shape_cast %90 : vector<1x1x16xf32> to vector<1x16xf32>
    %92 = vector.broadcast %91 : vector<1x16xf32> to vector<8x16xf32>
    %93 = arith.addf %89, %92 : vector<8x16xf32>
    %94 = vector.broadcast %20 : vector<8x1xf32> to vector<8x16xf32>
    %95 = arith.mulf %93, %94 : vector<8x16xf32>
    %96 = vector.extract_strided_slice %95 {offsets = [0, 0], sizes = [8, 8], strides = [1, 1]} : vector<8x16xf32> to vector<8x8xf32>
    %cst_69 = arith.constant dense<0.000000e+00> : vector<64x8xf32>
    %97 = tpu.matmul %23, %96, %cst_69 {dimension_numbers = #tpu.dot_dimension_numbers<[1], [0], [0], [1], [0, 0, 1, 1], [], []>, precision = #tpu.contract_precision<fp32>} : vector<64x8xf32>, vector<8x8xf32>, vector<64x8xf32> -> vector<64x8xf32>
    %cst_70 = arith.constant dense<0.000000e+00> : vector<64x64xf32>
    %98 = tpu.matmul %97, %25, %cst_70 {dimension_numbers = #tpu.dot_dimension_numbers<[1], [0], [0], [1], [0, 0, 1, 1], [], []>, precision = #tpu.contract_precision<fp32>} : vector<64x8xf32>, vector<8x64xf32>, vector<64x64xf32> -> vector<64x64xf32>
    %99 = vector.extract_strided_slice %95 {offsets = [0, 8], sizes = [8, 8], strides = [1, 1]} : vector<8x16xf32> to vector<8x8xf32>
    %cst_71 = arith.constant dense<0.000000e+00> : vector<64x8xf32>
    %100 = tpu.matmul %24, %99, %cst_71 {dimension_numbers = #tpu.dot_dimension_numbers<[1], [0], [0], [1], [0, 0, 1, 1], [], []>, precision = #tpu.contract_precision<fp32>} : vector<64x8xf32>, vector<8x8xf32>, vector<64x8xf32> -> vector<64x8xf32>
    %cst_72 = arith.constant dense<0.000000e+00> : vector<64x64xf32>
    %101 = tpu.matmul %100, %26, %cst_72 {dimension_numbers = #tpu.dot_dimension_numbers<[1], [0], [0], [1], [0, 0, 1, 1], [], []>, precision = #tpu.contract_precision<fp32>} : vector<64x8xf32>, vector<8x64xf32>, vector<64x64xf32> -> vector<64x64xf32>
    %102 = arith.mulf %98, %101 : vector<64x64xf32>
    %c0_73 = arith.constant 0 : index
    %c0_74 = arith.constant 0 : index
    %c0_75 = arith.constant 0 : index
    %103 = vector.load %arg22[%c0_73, %c0_74, %c0_75] : memref<2x64x16xf32, #tpu.memory_space<vmem>>, vector<1x64x16xf32>
    %104 = vector.shape_cast %103 : vector<1x64x16xf32> to vector<64x16xf32>
    %cst_76 = arith.constant dense<0.000000e+00> : vector<64x16xf32>
    %105 = tpu.matmul %102, %104, %cst_76 {dimension_numbers = #tpu.dot_dimension_numbers<[1], [0], [0], [1], [0, 0, 1, 1], [], []>, precision = #tpu.contract_precision<fp32>} : vector<64x64xf32>, vector<64x16xf32>, vector<64x16xf32> -> vector<64x16xf32>
    %106 = arith.addf %14, %105 : vector<64x16xf32>
    %c0_77 = arith.constant 0 : index
    %c0_78 = arith.constant 0 : index
    %c0_79 = arith.constant 0 : index
    %107 = vector.load %arg23[%c0_77, %c0_78, %c0_79] : memref<2x1x16xf32, #tpu.memory_space<vmem>>, vector<1x1x16xf32>
    %108 = vector.shape_cast %107 : vector<1x1x16xf32> to vector<1x16xf32>
    %109 = vector.broadcast %108 : vector<1x16xf32> to vector<64x16xf32>
    %110 = arith.addf %106, %109 : vector<64x16xf32>
    %cst_80 = arith.constant dense<0.000000e+00> : vector<64xf32>
    %111 = vector.multi_reduction <add>, %110, %cst_80 [1] : vector<64x16xf32> to vector<64xf32>
    %112 = vector.shape_cast %111 : vector<64xf32> to vector<64x1xf32>
    %cst_81 = arith.constant 1.600000e+01 : f32
    %113 = vector.broadcast %cst_81 : f32 to vector<64x1xf32>
    %114 = arith.divf %112, %113 : vector<64x1xf32>
    %115 = vector.broadcast %114 : vector<64x1xf32> to vector<64x16xf32>
    %116 = arith.subf %110, %115 : vector<64x16xf32>
    %117 = arith.mulf %116, %116 : vector<64x16xf32>
    %cst_82 = arith.constant dense<0.000000e+00> : vector<64xf32>
    %118 = vector.multi_reduction <add>, %117, %cst_82 [1] : vector<64x16xf32> to vector<64xf32>
    %119 = vector.shape_cast %118 : vector<64xf32> to vector<64x1xf32>
    %cst_83 = arith.constant 1.600000e+01 : f32
    %120 = vector.broadcast %cst_83 : f32 to vector<64x1xf32>
    %121 = arith.divf %119, %120 : vector<64x1xf32>
    %122 = vector.broadcast %114 : vector<64x1xf32> to vector<64x16xf32>
    %123 = arith.subf %110, %122 : vector<64x16xf32>
    %cst_84 = arith.constant 9.99999974E-6 : f32
    %124 = vector.broadcast %cst_84 : f32 to vector<64x1xf32>
    %125 = arith.addf %121, %124 : vector<64x1xf32>
    %126 = math.rsqrt %125 : vector<64x1xf32>
    %127 = vector.broadcast %126 : vector<64x1xf32> to vector<64x16xf32>
    %128 = arith.mulf %123, %127 : vector<64x16xf32>
    %c0_85 = arith.constant 0 : index
    %c0_86 = arith.constant 0 : index
    %c0_87 = arith.constant 0 : index
    %129 = vector.load %arg24[%c0_85, %c0_86, %c0_87] : memref<2x16x32xf32, #tpu.memory_space<vmem>>, vector<1x16x32xf32>
    %130 = vector.shape_cast %129 : vector<1x16x32xf32> to vector<16x32xf32>
    %cst_88 = arith.constant dense<0.000000e+00> : vector<64x32xf32>
    %131 = tpu.matmul %128, %130, %cst_88 {dimension_numbers = #tpu.dot_dimension_numbers<[1], [0], [0], [1], [0, 0, 1, 1], [], []>, precision = #tpu.contract_precision<fp32>} : vector<64x16xf32>, vector<16x32xf32>, vector<64x32xf32> -> vector<64x32xf32>
    %c0_89 = arith.constant 0 : index
    %c0_90 = arith.constant 0 : index
    %c0_91 = arith.constant 0 : index
    %132 = vector.load %arg25[%c0_89, %c0_90, %c0_91] : memref<2x1x32xf32, #tpu.memory_space<vmem>>, vector<1x1x32xf32>
    %133 = vector.shape_cast %132 : vector<1x1x32xf32> to vector<1x32xf32>
    %134 = vector.broadcast %133 : vector<1x32xf32> to vector<64x32xf32>
    %135 = arith.addf %131, %134 : vector<64x32xf32>
    %cst_92 = arith.constant 0.000000e+00 : f32
    %136 = vector.broadcast %cst_92 : f32 to vector<64x32xf32>
    %137 = arith.maximumf %135, %136 : vector<64x32xf32>
    %c0_93 = arith.constant 0 : index
    %c0_94 = arith.constant 0 : index
    %c0_95 = arith.constant 0 : index
    %138 = vector.load %arg26[%c0_93, %c0_94, %c0_95] : memref<2x32x16xf32, #tpu.memory_space<vmem>>, vector<1x32x16xf32>
    %139 = vector.shape_cast %138 : vector<1x32x16xf32> to vector<32x16xf32>
    %cst_96 = arith.constant dense<0.000000e+00> : vector<64x16xf32>
    %140 = tpu.matmul %137, %139, %cst_96 {dimension_numbers = #tpu.dot_dimension_numbers<[1], [0], [0], [1], [0, 0, 1, 1], [], []>, precision = #tpu.contract_precision<fp32>} : vector<64x32xf32>, vector<32x16xf32>, vector<64x16xf32> -> vector<64x16xf32>
    %141 = arith.addf %110, %140 : vector<64x16xf32>
    %c0_97 = arith.constant 0 : index
    %c0_98 = arith.constant 0 : index
    %c0_99 = arith.constant 0 : index
    %142 = vector.load %arg27[%c0_97, %c0_98, %c0_99] : memref<2x1x16xf32, #tpu.memory_space<vmem>>, vector<1x1x16xf32>
    %143 = vector.shape_cast %142 : vector<1x1x16xf32> to vector<1x16xf32>
    %144 = vector.broadcast %143 : vector<1x16xf32> to vector<64x16xf32>
    %145 = arith.addf %141, %144 : vector<64x16xf32>
    %cst_100 = arith.constant dense<0.000000e+00> : vector<64xf32>
    %146 = vector.multi_reduction <add>, %145, %cst_100 [1] : vector<64x16xf32> to vector<64xf32>
    %147 = vector.shape_cast %146 : vector<64xf32> to vector<64x1xf32>
    %cst_101 = arith.constant 1.600000e+01 : f32
    %148 = vector.broadcast %cst_101 : f32 to vector<64x1xf32>
    %149 = arith.divf %147, %148 : vector<64x1xf32>
    %150 = vector.broadcast %149 : vector<64x1xf32> to vector<64x16xf32>
    %151 = arith.subf %145, %150 : vector<64x16xf32>
    %152 = arith.mulf %151, %151 : vector<64x16xf32>
    %cst_102 = arith.constant dense<0.000000e+00> : vector<64xf32>
    %153 = vector.multi_reduction <add>, %152, %cst_102 [1] : vector<64x16xf32> to vector<64xf32>
    %154 = vector.shape_cast %153 : vector<64xf32> to vector<64x1xf32>
    %cst_103 = arith.constant 1.600000e+01 : f32
    %155 = vector.broadcast %cst_103 : f32 to vector<64x1xf32>
    %156 = arith.divf %154, %155 : vector<64x1xf32>
    %157 = vector.broadcast %149 : vector<64x1xf32> to vector<64x16xf32>
    %158 = arith.subf %145, %157 : vector<64x16xf32>
    %cst_104 = arith.constant 9.99999974E-6 : f32
    %159 = vector.broadcast %cst_104 : f32 to vector<64x1xf32>
    %160 = arith.addf %156, %159 : vector<64x1xf32>
    %161 = math.rsqrt %160 : vector<64x1xf32>
    %162 = vector.broadcast %161 : vector<64x1xf32> to vector<64x16xf32>
    %163 = arith.mulf %158, %162 : vector<64x16xf32>
    %c1 = arith.constant 1 : index
    %c0_105 = arith.constant 0 : index
    %c0_106 = arith.constant 0 : index
    %164 = vector.load %arg16[%c1, %c0_105, %c0_106] : memref<2x16x64xf32, #tpu.memory_space<vmem>>, vector<1x16x64xf32>
    %165 = vector.shape_cast %164 : vector<1x16x64xf32> to vector<16x64xf32>
    %cst_107 = arith.constant dense<0.000000e+00> : vector<64x64xf32>
    %166 = tpu.matmul %163, %165, %cst_107 {dimension_numbers = #tpu.dot_dimension_numbers<[1], [0], [0], [1], [0, 0, 1, 1], [], []>, precision = #tpu.contract_precision<fp32>} : vector<64x16xf32>, vector<16x64xf32>, vector<64x64xf32> -> vector<64x64xf32>
    %c1_108 = arith.constant 1 : index
    %c0_109 = arith.constant 0 : index
    %c0_110 = arith.constant 0 : index
    %167 = vector.load %arg17[%c1_108, %c0_109, %c0_110] : memref<2x1x64xf32, #tpu.memory_space<vmem>>, vector<1x1x64xf32>
    %168 = vector.shape_cast %167 : vector<1x1x64xf32> to vector<1x64xf32>
    %169 = vector.broadcast %168 : vector<1x64xf32> to vector<64x64xf32>
    %170 = arith.addf %166, %169 : vector<64x64xf32>
    %cst_111 = arith.constant 0.000000e+00 : f32
    %171 = vector.broadcast %cst_111 : f32 to vector<64x64xf32>
    %172 = arith.maximumf %170, %171 : vector<64x64xf32>
    %c1_112 = arith.constant 1 : index
    %c0_113 = arith.constant 0 : index
    %c0_114 = arith.constant 0 : index
    %173 = vector.load %arg18[%c1_112, %c0_113, %c0_114] : memref<2x64x32xf32, #tpu.memory_space<vmem>>, vector<1x64x32xf32>
    %174 = vector.shape_cast %173 : vector<1x64x32xf32> to vector<64x32xf32>
    %cst_115 = arith.constant dense<0.000000e+00> : vector<64x32xf32>
    %175 = tpu.matmul %172, %174, %cst_115 {dimension_numbers = #tpu.dot_dimension_numbers<[1], [0], [0], [1], [0, 0, 1, 1], [], []>, precision = #tpu.contract_precision<fp32>} : vector<64x64xf32>, vector<64x32xf32>, vector<64x32xf32> -> vector<64x32xf32>
    %c1_116 = arith.constant 1 : index
    %c0_117 = arith.constant 0 : index
    %c0_118 = arith.constant 0 : index
    %176 = vector.load %arg19[%c1_116, %c0_117, %c0_118] : memref<2x1x32xf32, #tpu.memory_space<vmem>>, vector<1x1x32xf32>
    %177 = vector.shape_cast %176 : vector<1x1x32xf32> to vector<1x32xf32>
    %178 = vector.broadcast %177 : vector<1x32xf32> to vector<64x32xf32>
    %179 = arith.addf %175, %178 : vector<64x32xf32>
    %180 = vector.broadcast %18 : vector<64x1xf32> to vector<64x32xf32>
    %181 = arith.mulf %179, %180 : vector<64x32xf32>
    %182 = vector.extract_strided_slice %181 {offsets = [0, 0], sizes = [64, 16], strides = [1, 1]} : vector<64x32xf32> to vector<64x16xf32>
    %cst_119 = arith.constant dense<0.000000e+00> : vector<8x16xf32>
    %183 = tpu.matmul %22, %182, %cst_119 {dimension_numbers = #tpu.dot_dimension_numbers<[1], [0], [0], [1], [0, 0, 1, 1], [], []>, precision = #tpu.contract_precision<fp32>} : vector<8x64xf32>, vector<64x16xf32>, vector<8x16xf32> -> vector<8x16xf32>
    %184 = arith.addf %68, %183 : vector<8x16xf32>
    %185 = vector.extract_strided_slice %181 {offsets = [0, 16], sizes = [64, 16], strides = [1, 1]} : vector<64x32xf32> to vector<64x16xf32>
    %cst_120 = arith.constant dense<0.000000e+00> : vector<8x16xf32>
    %186 = tpu.matmul %21, %185, %cst_120 {dimension_numbers = #tpu.dot_dimension_numbers<[1], [0], [0], [1], [0, 0, 1, 1], [], []>, precision = #tpu.contract_precision<fp32>} : vector<8x64xf32>, vector<64x16xf32>, vector<8x16xf32> -> vector<8x16xf32>
    %187 = arith.addf %184, %186 : vector<8x16xf32>
    %cst_121 = arith.constant dense<0.000000e+00> : vector<8xf32>
    %188 = vector.multi_reduction <add>, %187, %cst_121 [1] : vector<8x16xf32> to vector<8xf32>
    %189 = vector.shape_cast %188 : vector<8xf32> to vector<8x1xf32>
    %cst_122 = arith.constant 1.600000e+01 : f32
    %190 = vector.broadcast %cst_122 : f32 to vector<8x1xf32>
    %191 = arith.divf %189, %190 : vector<8x1xf32>
    %192 = vector.broadcast %191 : vector<8x1xf32> to vector<8x16xf32>
    %193 = arith.subf %187, %192 : vector<8x16xf32>
    %194 = arith.mulf %193, %193 : vector<8x16xf32>
    %cst_123 = arith.constant dense<0.000000e+00> : vector<8xf32>
    %195 = vector.multi_reduction <add>, %194, %cst_123 [1] : vector<8x16xf32> to vector<8xf32>
    %196 = vector.shape_cast %195 : vector<8xf32> to vector<8x1xf32>
    %cst_124 = arith.constant 1.600000e+01 : f32
    %197 = vector.broadcast %cst_124 : f32 to vector<8x1xf32>
    %198 = arith.divf %196, %197 : vector<8x1xf32>
    %199 = vector.broadcast %191 : vector<8x1xf32> to vector<8x16xf32>
    %200 = arith.subf %187, %199 : vector<8x16xf32>
    %cst_125 = arith.constant 9.99999974E-6 : f32
    %201 = vector.broadcast %cst_125 : f32 to vector<8x1xf32>
    %202 = arith.addf %198, %201 : vector<8x1xf32>
    %203 = math.rsqrt %202 : vector<8x1xf32>
    %204 = vector.broadcast %203 : vector<8x1xf32> to vector<8x16xf32>
    %205 = arith.mulf %200, %204 : vector<8x16xf32>
    %c1_126 = arith.constant 1 : index
    %c0_127 = arith.constant 0 : index
    %c0_128 = arith.constant 0 : index
    %206 = vector.load %arg20[%c1_126, %c0_127, %c0_128] : memref<2x16x16xf32, #tpu.memory_space<vmem>>, vector<1x16x16xf32>
    %207 = vector.shape_cast %206 : vector<1x16x16xf32> to vector<16x16xf32>
    %cst_129 = arith.constant dense<0.000000e+00> : vector<8x16xf32>
    %208 = tpu.matmul %205, %207, %cst_129 {dimension_numbers = #tpu.dot_dimension_numbers<[1], [0], [0], [1], [0, 0, 1, 1], [], []>, precision = #tpu.contract_precision<fp32>} : vector<8x16xf32>, vector<16x16xf32>, vector<8x16xf32> -> vector<8x16xf32>
    %c1_130 = arith.constant 1 : index
    %c0_131 = arith.constant 0 : index
    %c0_132 = arith.constant 0 : index
    %209 = vector.load %arg21[%c1_130, %c0_131, %c0_132] : memref<2x1x16xf32, #tpu.memory_space<vmem>>, vector<1x1x16xf32>
    %210 = vector.shape_cast %209 : vector<1x1x16xf32> to vector<1x16xf32>
    %211 = vector.broadcast %210 : vector<1x16xf32> to vector<8x16xf32>
    %212 = arith.addf %208, %211 : vector<8x16xf32>
    %213 = vector.broadcast %20 : vector<8x1xf32> to vector<8x16xf32>
    %214 = arith.mulf %212, %213 : vector<8x16xf32>
    %215 = vector.extract_strided_slice %214 {offsets = [0, 0], sizes = [8, 8], strides = [1, 1]} : vector<8x16xf32> to vector<8x8xf32>
    %cst_133 = arith.constant dense<0.000000e+00> : vector<64x8xf32>
    %216 = tpu.matmul %23, %215, %cst_133 {dimension_numbers = #tpu.dot_dimension_numbers<[1], [0], [0], [1], [0, 0, 1, 1], [], []>, precision = #tpu.contract_precision<fp32>} : vector<64x8xf32>, vector<8x8xf32>, vector<64x8xf32> -> vector<64x8xf32>
    %cst_134 = arith.constant dense<0.000000e+00> : vector<64x64xf32>
    %217 = tpu.matmul %216, %25, %cst_134 {dimension_numbers = #tpu.dot_dimension_numbers<[1], [0], [0], [1], [0, 0, 1, 1], [], []>, precision = #tpu.contract_precision<fp32>} : vector<64x8xf32>, vector<8x64xf32>, vector<64x64xf32> -> vector<64x64xf32>
    %218 = vector.extract_strided_slice %214 {offsets = [0, 8], sizes = [8, 8], strides = [1, 1]} : vector<8x16xf32> to vector<8x8xf32>
    %cst_135 = arith.constant dense<0.000000e+00> : vector<64x8xf32>
    %219 = tpu.matmul %24, %218, %cst_135 {dimension_numbers = #tpu.dot_dimension_numbers<[1], [0], [0], [1], [0, 0, 1, 1], [], []>, precision = #tpu.contract_precision<fp32>} : vector<64x8xf32>, vector<8x8xf32>, vector<64x8xf32> -> vector<64x8xf32>
    %cst_136 = arith.constant dense<0.000000e+00> : vector<64x64xf32>
    %220 = tpu.matmul %219, %26, %cst_136 {dimension_numbers = #tpu.dot_dimension_numbers<[1], [0], [0], [1], [0, 0, 1, 1], [], []>, precision = #tpu.contract_precision<fp32>} : vector<64x8xf32>, vector<8x64xf32>, vector<64x64xf32> -> vector<64x64xf32>
    %221 = arith.mulf %217, %220 : vector<64x64xf32>
    %c1_137 = arith.constant 1 : index
    %c0_138 = arith.constant 0 : index
    %c0_139 = arith.constant 0 : index
    %222 = vector.load %arg22[%c1_137, %c0_138, %c0_139] : memref<2x64x16xf32, #tpu.memory_space<vmem>>, vector<1x64x16xf32>
    %223 = vector.shape_cast %222 : vector<1x64x16xf32> to vector<64x16xf32>
    %cst_140 = arith.constant dense<0.000000e+00> : vector<64x16xf32>
    %224 = tpu.matmul %221, %223, %cst_140 {dimension_numbers = #tpu.dot_dimension_numbers<[1], [0], [0], [1], [0, 0, 1, 1], [], []>, precision = #tpu.contract_precision<fp32>} : vector<64x64xf32>, vector<64x16xf32>, vector<64x16xf32> -> vector<64x16xf32>
    %225 = arith.addf %145, %224 : vector<64x16xf32>
    %c1_141 = arith.constant 1 : index
    %c0_142 = arith.constant 0 : index
    %c0_143 = arith.constant 0 : index
    %226 = vector.load %arg23[%c1_141, %c0_142, %c0_143] : memref<2x1x16xf32, #tpu.memory_space<vmem>>, vector<1x1x16xf32>
    %227 = vector.shape_cast %226 : vector<1x1x16xf32> to vector<1x16xf32>
    %228 = vector.broadcast %227 : vector<1x16xf32> to vector<64x16xf32>
    %229 = arith.addf %225, %228 : vector<64x16xf32>
    %cst_144 = arith.constant dense<0.000000e+00> : vector<64xf32>
    %230 = vector.multi_reduction <add>, %229, %cst_144 [1] : vector<64x16xf32> to vector<64xf32>
    %231 = vector.shape_cast %230 : vector<64xf32> to vector<64x1xf32>
    %cst_145 = arith.constant 1.600000e+01 : f32
    %232 = vector.broadcast %cst_145 : f32 to vector<64x1xf32>
    %233 = arith.divf %231, %232 : vector<64x1xf32>
    %234 = vector.broadcast %233 : vector<64x1xf32> to vector<64x16xf32>
    %235 = arith.subf %229, %234 : vector<64x16xf32>
    %236 = arith.mulf %235, %235 : vector<64x16xf32>
    %cst_146 = arith.constant dense<0.000000e+00> : vector<64xf32>
    %237 = vector.multi_reduction <add>, %236, %cst_146 [1] : vector<64x16xf32> to vector<64xf32>
    %238 = vector.shape_cast %237 : vector<64xf32> to vector<64x1xf32>
    %cst_147 = arith.constant 1.600000e+01 : f32
    %239 = vector.broadcast %cst_147 : f32 to vector<64x1xf32>
    %240 = arith.divf %238, %239 : vector<64x1xf32>
    %241 = vector.broadcast %233 : vector<64x1xf32> to vector<64x16xf32>
    %242 = arith.subf %229, %241 : vector<64x16xf32>
    %cst_148 = arith.constant 9.99999974E-6 : f32
    %243 = vector.broadcast %cst_148 : f32 to vector<64x1xf32>
    %244 = arith.addf %240, %243 : vector<64x1xf32>
    %245 = math.rsqrt %244 : vector<64x1xf32>
    %246 = vector.broadcast %245 : vector<64x1xf32> to vector<64x16xf32>
    %247 = arith.mulf %242, %246 : vector<64x16xf32>
    %c1_149 = arith.constant 1 : index
    %c0_150 = arith.constant 0 : index
    %c0_151 = arith.constant 0 : index
    %248 = vector.load %arg24[%c1_149, %c0_150, %c0_151] : memref<2x16x32xf32, #tpu.memory_space<vmem>>, vector<1x16x32xf32>
    %249 = vector.shape_cast %248 : vector<1x16x32xf32> to vector<16x32xf32>
    %cst_152 = arith.constant dense<0.000000e+00> : vector<64x32xf32>
    %250 = tpu.matmul %247, %249, %cst_152 {dimension_numbers = #tpu.dot_dimension_numbers<[1], [0], [0], [1], [0, 0, 1, 1], [], []>, precision = #tpu.contract_precision<fp32>} : vector<64x16xf32>, vector<16x32xf32>, vector<64x32xf32> -> vector<64x32xf32>
    %c1_153 = arith.constant 1 : index
    %c0_154 = arith.constant 0 : index
    %c0_155 = arith.constant 0 : index
    %251 = vector.load %arg25[%c1_153, %c0_154, %c0_155] : memref<2x1x32xf32, #tpu.memory_space<vmem>>, vector<1x1x32xf32>
    %252 = vector.shape_cast %251 : vector<1x1x32xf32> to vector<1x32xf32>
    %253 = vector.broadcast %252 : vector<1x32xf32> to vector<64x32xf32>
    %254 = arith.addf %250, %253 : vector<64x32xf32>
    %cst_156 = arith.constant 0.000000e+00 : f32
    %255 = vector.broadcast %cst_156 : f32 to vector<64x32xf32>
    %256 = arith.maximumf %254, %255 : vector<64x32xf32>
    %c1_157 = arith.constant 1 : index
    %c0_158 = arith.constant 0 : index
    %c0_159 = arith.constant 0 : index
    %257 = vector.load %arg26[%c1_157, %c0_158, %c0_159] : memref<2x32x16xf32, #tpu.memory_space<vmem>>, vector<1x32x16xf32>
    %258 = vector.shape_cast %257 : vector<1x32x16xf32> to vector<32x16xf32>
    %cst_160 = arith.constant dense<0.000000e+00> : vector<64x16xf32>
    %259 = tpu.matmul %256, %258, %cst_160 {dimension_numbers = #tpu.dot_dimension_numbers<[1], [0], [0], [1], [0, 0, 1, 1], [], []>, precision = #tpu.contract_precision<fp32>} : vector<64x32xf32>, vector<32x16xf32>, vector<64x16xf32> -> vector<64x16xf32>
    %260 = arith.addf %229, %259 : vector<64x16xf32>
    %c1_161 = arith.constant 1 : index
    %c0_162 = arith.constant 0 : index
    %c0_163 = arith.constant 0 : index
    %261 = vector.load %arg27[%c1_161, %c0_162, %c0_163] : memref<2x1x16xf32, #tpu.memory_space<vmem>>, vector<1x1x16xf32>
    %262 = vector.shape_cast %261 : vector<1x1x16xf32> to vector<1x16xf32>
    %263 = vector.broadcast %262 : vector<1x16xf32> to vector<64x16xf32>
    %264 = arith.addf %260, %263 : vector<64x16xf32>
    %c0_164 = arith.constant 0 : index
    %c0_165 = arith.constant 0 : index
    %c0_166 = arith.constant 0 : index
    %265 = vector.load %arg28[%c0_164, %c0_165, %c0_166] : memref<1x8x16xf32, #tpu.memory_space<vmem>>, vector<1x8x16xf32>
    %266 = vector.shape_cast %265 : vector<1x8x16xf32> to vector<8x16xf32>
    %267 = vector.shape_cast %187 : vector<8x16xf32> to vector<1x8x16xf32>
    tpu.vector_store %arg28[%c0_164, %c0_165, %c0_166], %267 {strides = array<i32>} : memref<1x8x16xf32, #tpu.memory_space<vmem>>, vector<1x8x16xf32>,
    %c0_167 = arith.constant 0 : index
    %c0_168 = arith.constant 0 : index
    %c0_169 = arith.constant 0 : index
    %268 = vector.load %arg29[%c0_167, %c0_168, %c0_169] : memref<1x64x16xf32, #tpu.memory_space<vmem>>, vector<1x64x16xf32>
    %269 = vector.shape_cast %268 : vector<1x64x16xf32> to vector<64x16xf32>
    %270 = vector.shape_cast %264 : vector<64x16xf32> to vector<1x64x16xf32>
    tpu.vector_store %arg29[%c0_167, %c0_168, %c0_169], %270 {strides = array<i32>} : memref<1x64x16xf32, #tpu.memory_space<vmem>>, vector<1x64x16xf32>,
    return
  }
  func.func @transform_0(%arg0: i32) -> (i32, i32, i32) {
    %c0_i32 = arith.constant 0 : i32
    %c0_i32_0 = arith.constant 0 : i32
    %c0_i32_1 = arith.constant 0 : i32
    return %arg0, %c0_i32, %c0_i32_0 : i32, i32, i32
  }
  func.func @transform_1(%arg0: i32) -> (i32, i32, i32) {
    %c0_i32 = arith.constant 0 : i32
    %c0_i32_0 = arith.constant 0 : i32
    %c0_i32_1 = arith.constant 0 : i32
    return %arg0, %c0_i32, %c0_i32_0 : i32, i32, i32
  }
  func.func @transform_2(%arg0: i32) -> (i32, i32, i32) {
    %c0_i32 = arith.constant 0 : i32
    %c0_i32_0 = arith.constant 0 : i32
    %c0_i32_1 = arith.constant 0 : i32
    return %arg0, %c0_i32, %c0_i32_0 : i32, i32, i32
  }
  func.func @transform_3(%arg0: i32) -> (i32, i32, i32) {
    %c0_i32 = arith.constant 0 : i32
    %c0_i32_0 = arith.constant 0 : i32
    %c0_i32_1 = arith.constant 0 : i32
    return %arg0, %c0_i32, %c0_i32_0 : i32, i32, i32
  }
  func.func @transform_4(%arg0: i32) -> (i32, i32, i32) {
    %c0_i32 = arith.constant 0 : i32
    %c0_i32_0 = arith.constant 0 : i32
    %c0_i32_1 = arith.constant 0 : i32
    return %arg0, %c0_i32, %c0_i32_0 : i32, i32, i32
  }
  func.func @transform_5(%arg0: i32) -> (i32, i32) {
    %c0_i32 = arith.constant 0 : i32
    %c0_i32_0 = arith.constant 0 : i32
    %c0_i32_1 = arith.constant 0 : i32
    return %c0_i32, %c0_i32_0 : i32, i32
  }
  func.func @transform_6(%arg0: i32) -> (i32, i32) {
    %c0_i32 = arith.constant 0 : i32
    %c0_i32_0 = arith.constant 0 : i32
    %c0_i32_1 = arith.constant 0 : i32
    return %c0_i32, %c0_i32_0 : i32, i32
  }
  func.func @transform_7(%arg0: i32) -> (i32, i32) {
    %c0_i32 = arith.constant 0 : i32
    %c0_i32_0 = arith.constant 0 : i32
    %c0_i32_1 = arith.constant 0 : i32
    return %c0_i32, %c0_i32_0 : i32, i32
  }
  func.func @transform_8(%arg0: i32) -> (i32, i32) {
    %c0_i32 = arith.constant 0 : i32
    %c0_i32_0 = arith.constant 0 : i32
    %c0_i32_1 = arith.constant 0 : i32
    return %c0_i32, %c0_i32_0 : i32, i32
  }
  func.func @transform_9(%arg0: i32) -> (i32, i32) {
    %c0_i32 = arith.constant 0 : i32
    %c0_i32_0 = arith.constant 0 : i32
    %c0_i32_1 = arith.constant 0 : i32
    return %c0_i32, %c0_i32_0 : i32, i32
  }
  func.func @transform_10(%arg0: i32) -> (i32, i32) {
    %c0_i32 = arith.constant 0 : i32
    %c0_i32_0 = arith.constant 0 : i32
    %c0_i32_1 = arith.constant 0 : i32
    return %c0_i32, %c0_i32_0 : i32, i32
  }
  func.func @transform_11(%arg0: i32) -> (i32, i32) {
    %c0_i32 = arith.constant 0 : i32
    %c0_i32_0 = arith.constant 0 : i32
    %c0_i32_1 = arith.constant 0 : i32
    return %c0_i32, %c0_i32_0 : i32, i32
  }
  func.func @transform_12(%arg0: i32) -> (i32, i32) {
    %c0_i32 = arith.constant 0 : i32
    %c0_i32_0 = arith.constant 0 : i32
    %c0_i32_1 = arith.constant 0 : i32
    return %c0_i32, %c0_i32_0 : i32, i32
  }
  func.func @transform_13(%arg0: i32) -> (i32, i32) {
    %c0_i32 = arith.constant 0 : i32
    %c0_i32_0 = arith.constant 0 : i32
    %c0_i32_1 = arith.constant 0 : i32
    return %c0_i32, %c0_i32_0 : i32, i32
  }
  func.func @transform_14(%arg0: i32) -> (i32, i32) {
    %c0_i32 = arith.constant 0 : i32
    %c0_i32_0 = arith.constant 0 : i32
    %c0_i32_1 = arith.constant 0 : i32
    return %c0_i32, %c0_i32_0 : i32, i32
  }
  func.func @transform_15(%arg0: i32) -> (i32, i32, i32) {
    %c0_i32 = arith.constant 0 : i32
    %c0_i32_0 = arith.constant 0 : i32
    %c0_i32_1 = arith.constant 0 : i32
    %c0_i32_2 = arith.constant 0 : i32
    return %c0_i32, %c0_i32_0, %c0_i32_1 : i32, i32, i32
  }
  func.func @transform_16(%arg0: i32) -> (i32, i32, i32) {
    %c0_i32 = arith.constant 0 : i32
    %c0_i32_0 = arith.constant 0 : i32
    %c0_i32_1 = arith.constant 0 : i32
    %c0_i32_2 = arith.constant 0 : i32
    return %c0_i32, %c0_i32_0, %c0_i32_1 : i32, i32, i32
  }
  func.func @transform_17(%arg0: i32) -> (i32, i32, i32) {
    %c0_i32 = arith.constant 0 : i32
    %c0_i32_0 = arith.constant 0 : i32
    %c0_i32_1 = arith.constant 0 : i32
    %c0_i32_2 = arith.constant 0 : i32
    return %c0_i32, %c0_i32_0, %c0_i32_1 : i32, i32, i32
  }
  func.func @transform_18(%arg0: i32) -> (i32, i32, i32) {
    %c0_i32 = arith.constant 0 : i32
    %c0_i32_0 = arith.constant 0 : i32
    %c0_i32_1 = arith.constant 0 : i32
    %c0_i32_2 = arith.constant 0 : i32
    return %c0_i32, %c0_i32_0, %c0_i32_1 : i32, i32, i32
  }
  func.func @transform_19(%arg0: i32) -> (i32, i32, i32) {
    %c0_i32 = arith.constant 0 : i32
    %c0_i32_0 = arith.constant 0 : i32
    %c0_i32_1 = arith.constant 0 : i32
    %c0_i32_2 = arith.constant 0 : i32
    return %c0_i32, %c0_i32_0, %c0_i32_1 : i32, i32, i32
  }
  func.func @transform_20(%arg0: i32) -> (i32, i32, i32) {
    %c0_i32 = arith.constant 0 : i32
    %c0_i32_0 = arith.constant 0 : i32
    %c0_i32_1 = arith.constant 0 : i32
    %c0_i32_2 = arith.constant 0 : i32
    return %c0_i32, %c0_i32_0, %c0_i32_1 : i32, i32, i32
  }
  func.func @transform_21(%arg0: i32) -> (i32, i32, i32) {
    %c0_i32 = arith.constant 0 : i32
    %c0_i32_0 = arith.constant 0 : i32
    %c0_i32_1 = arith.constant 0 : i32
    %c0_i32_2 = arith.constant 0 : i32
    return %c0_i32, %c0_i32_0, %c0_i32_1 : i32, i32, i32
  }
  func.func @transform_22(%arg0: i32) -> (i32, i32, i32) {
    %c0_i32 = arith.constant 0 : i32
    %c0_i32_0 = arith.constant 0 : i32
    %c0_i32_1 = arith.constant 0 : i32
    %c0_i32_2 = arith.constant 0 : i32
    return %c0_i32, %c0_i32_0, %c0_i32_1 : i32, i32, i32
  }
  func.func @transform_23(%arg0: i32) -> (i32, i32, i32) {
    %c0_i32 = arith.constant 0 : i32
    %c0_i32_0 = arith.constant 0 : i32
    %c0_i32_1 = arith.constant 0 : i32
    %c0_i32_2 = arith.constant 0 : i32
    return %c0_i32, %c0_i32_0, %c0_i32_1 : i32, i32, i32
  }
  func.func @transform_24(%arg0: i32) -> (i32, i32, i32) {
    %c0_i32 = arith.constant 0 : i32
    %c0_i32_0 = arith.constant 0 : i32
    %c0_i32_1 = arith.constant 0 : i32
    %c0_i32_2 = arith.constant 0 : i32
    return %c0_i32, %c0_i32_0, %c0_i32_1 : i32, i32, i32
  }
  func.func @transform_25(%arg0: i32) -> (i32, i32, i32) {
    %c0_i32 = arith.constant 0 : i32
    %c0_i32_0 = arith.constant 0 : i32
    %c0_i32_1 = arith.constant 0 : i32
    %c0_i32_2 = arith.constant 0 : i32
    return %c0_i32, %c0_i32_0, %c0_i32_1 : i32, i32, i32
  }
  func.func @transform_26(%arg0: i32) -> (i32, i32, i32) {
    %c0_i32 = arith.constant 0 : i32
    %c0_i32_0 = arith.constant 0 : i32
    %c0_i32_1 = arith.constant 0 : i32
    %c0_i32_2 = arith.constant 0 : i32
    return %c0_i32, %c0_i32_0, %c0_i32_1 : i32, i32, i32
  }
  func.func @transform_27(%arg0: i32) -> (i32, i32, i32) {
    %c0_i32 = arith.constant 0 : i32
    %c0_i32_0 = arith.constant 0 : i32
    %c0_i32_1 = arith.constant 0 : i32
    return %arg0, %c0_i32, %c0_i32_0 : i32, i32, i32
  }
  func.func @transform_28(%arg0: i32) -> (i32, i32, i32) {
    %c0_i32 = arith.constant 0 : i32
    %c0_i32_0 = arith.constant 0 : i32
    %c0_i32_1 = arith.constant 0 : i32
    return %arg0, %c0_i32, %c0_i32_0 : i32, i32, i32
  }
}

</mosaic_0001>

<bundles_post_ra>
// kernel: inverseformer_forward.1
= control target key start
LH: loop header
LB: loop body
LE: loop exit
PB: predicated region body
PF: predicated region fallthrough
CT: control target
= control target key end

     0   :  { %s31760_s0 = inlined_call_operand.vmem [shape: f32[2,64,19], index: 0, kind: input, shape index: {}]   ;;  %s31761_s1 = inlined_call_operand.vmem [shape: f32[2,64,20], index: 1, kind: input, shape index: {}]   ;;  %s31762_s2 = inlined_call_operand.vmem [shape: f32[2,8,16], index: 2, kind: input, shape index: {}]   ;;  %s31763_s3 = inlined_call_operand.vmem [shape: f32[2,8,1], index: 3, kind: input, shape index: {}]   ;;  %s31764_s4 = inlined_call_operand.vmem [shape: f32[2,64,1], index: 4, kind: input, shape index: {}]   ;;  %s31765_s5 = inlined_call_operand.vmem [shape: f32[8,64], index: 5, kind: input, shape index: {}, may-alias: {5,9}]   ;;  %s31766_s6 = inlined_call_operand.vmem [shape: f32[8,64], index: 6, kind: input, shape index: {}, may-alias: {6,10}]   ;;  %s31767_s7 = inlined_call_operand.vmem [shape: f32[64,8], index: 7, kind: input, shape index: {}]   ;;  %s31768_s8 = inlined_call_operand.vmem [shape: f32[64,8], index: 8, kind: input, shape index: {}]   ;;  %s31769_s9 = inlined_call_operand.vmem [shape: f32[8,64], index: 9, kind: input, shape index: {}, may-alias: {5,9}]   ;;  %s31770_s10 = inlined_call_operand.vmem [shape: f32[8,64], index: 10, kind: input, shape index: {}, may-alias: {6,10}]   ;;  %s31771_s11 = inlined_call_operand.vmem [shape: f32[19,16], index: 11, kind: input, shape index: {}]   ;;  %s31772_s12 = inlined_call_operand.vmem [shape: f32[1,16], index: 12, kind: input, shape index: {}]   ;;  %s31773_s13 = inlined_call_operand.vmem [shape: f32[20,16], index: 13, kind: input, shape index: {}]   ;;  %s31774_s14 = inlined_call_operand.vmem [shape: f32[1,16], index: 14, kind: input, shape index: {}]   ;;  %s31775_s15 = inlined_call_operand.vmem [shape: f32[2,16,64], index: 15, kind: input, shape index: {}]   ;;  %s31776_s16 = inlined_call_operand.vmem [shape: f32[2,1,64], index: 16, kind: input, shape index: {}]   ;;  %s31777_s17 = inlined_call_operand.vmem [shape: f32[2,64,32], index: 17, kind: input, shape index: {}]   ;;  %s31778_s18 = inlined_call_operand.vmem [shape: f32[2,1,32], index: 18, kind: input, shape index: {}]   ;;  %s31779_s19 = inlined_call_operand.vmem [shape: f32[2,16,16], index: 19, kind: input, shape index: {}]   ;;  %s31780_s20 = inlined_call_operand.vmem [shape: f32[2,1,16], index: 20, kind: input, shape index: {}]   ;;  %s31781_s21 = inlined_call_operand.vmem [shape: f32[2,64,16], index: 21, kind: input, shape index: {}]   ;;  %s31782_s22 = inlined_call_operand.vmem [shape: f32[2,1,16], index: 22, kind: input, shape index: {}]   ;;  %s31783_s23 = inlined_call_operand.vmem [shape: f32[2,16,32], index: 23, kind: input, shape index: {}]   ;;  %s31784_s24 = inlined_call_operand.vmem [shape: f32[2,1,32], index: 24, kind: input, shape index: {}]   ;;  %s31785_s25 = inlined_call_operand.vmem [shape: f32[2,32,16], index: 25, kind: input, shape index: {}]   ;;  %s31786_s26 = inlined_call_operand.vmem [shape: f32[2,1,16], index: 26, kind: input, shape index: {}]   ;;  %s31787_s27 = inlined_call_operand.hbm [shape: f32[2,8,16], index: 27, kind: output, shape index: {0}]   ;;  %s31788_s28 = inlined_call_operand.hbm [shape: f32[2,64,16], index: 28, kind: output, shape index: {1}]  }
   0x1   :  { %31921 = sst [smem:[#allocation93_spill]] %s31760_s0 }
   0x2   :  { %31922 = sst [smem:[#allocation94_spill]] %s31761_s1 }
   0x3   :  { %31923 = sst [smem:[#allocation95_spill]] %s31762_s2 }
   0x4   :  { %31924 = sst [smem:[#allocation96_spill]] %s31763_s3 }
   0x5   :  { %31925 = sst [smem:[#allocation97_spill]] %s31764_s4 }
   0x6   :  { %31926 = sst [smem:[#allocation98_spill]] %s31765_s5 }
   0x7   :  { %31927 = sst [smem:[#allocation99_spill]] %s31766_s6 }
   0x8   :  { %31928 = sst [smem:[#allocation100_spill]] %s31767_s7 }
   0x9   :  { %31929 = sst [smem:[#allocation101_spill]] %s31768_s8 }
   0xa   :  { %31930 = sst [smem:[#allocation102_spill]] %s31769_s9 }
   0xb   :  { %31931 = sst [smem:[#allocation103_spill]] %s31770_s10 }
   0xc   :  { %31932 = sst [smem:[#allocation104_spill]] %s31771_s11 }
   0xd   :  { %31933 = sst [smem:[#allocation105_spill]] %s31772_s12 }
   0xe   :  { %31934 = sst [smem:[#allocation106_spill]] %s31773_s13 }
   0xf   :  { %31935 = sst [smem:[#allocation107_spill]] %s31774_s14 }
  0x10   :  { %34 = vsyncpa [#allocation3], 0 }
  0x11   :  { %36 = vsyncpa [#allocation3 + $0x1], 0 }
  0x12   :  { %37 = vsyncpa [#allocation5], 0 }
  0x13   :  { %39 = vsyncpa [#allocation5 + $0x1], 0  ;;  %s27679_s8 = smov 0   ;;  %s27681_s5 = smov 0  }
  0x14   :  { %s27683_s9 = smov 0   ;;  %s27685_s30 = smov 0  }
  0x15 LB: > { %31936 = sst [smem:[#allocation8_spill]] %s27518_s9  ;;  %s27700_s3 = sadd.s32 4294967295, %s27522_s30   ;;  %s27522_s30 = sphi %s27685_s30, %s32133_s30   ;;  %s27518_s9 = sphi %s27683_s9, %s32135_s9   ;;  %s27514_s5 = sphi %s27681_s5, %s32137_s5   ;;  %s27510_s8 = sphi %s27679_s8, %s32136_s8  }
  0x16   : > { %s21046_s6 = sadd.s32 4294967294, %s27522_s30   ;;  %s27704_s10 = sadd.s32 1, %s27522_s30  }
  0x17   : > { %31937 = sst [smem:[#allocation9_spill]] %s27704_s10  ;;  %s644_s0 = sadd.s32 1, %s27518_s9 }
  0x18   : > { %s641_s11 = ssub.s32 %s27522_s30, %s27704_s10  ;;  %p654_p0 = scmp.ne.s32.totalorder %s27518_s9, %s27514_s5 }
  0x19   : > { %p642_p1 = scmp.eq.s32.totalorder %s641_s11, 0  ;;  %p655_p2 = scmp.eq.s32.totalorder %s27700_s3, 1 }
  0x1a   : > { %p660_p3 = scmp.ne.s32.totalorder %s27514_s5, %s27510_s8  ;;  %p661_p4 = scmp.eq.s32.totalorder %s21046_s6, 1 }
  0x1b   : > { %s27715_s29 = scalar_select %p642_p1, %s27518_s9, %s644_s0  }
  0x1c   : > { %p27717_p5 = por %p655_p2, %p654_p0  ;;  %p27721_p6 = por %p661_p4, %p660_p3 }
  0x1d   : > { %31938 = sst [smem:[#allocation10_spill]] %s27715_s29  ;;  %p21049_p7 = scmp.ge.s32.totalorder %s27522_s30, 1 }
  0x1e   : > { %s31940_s7 = scalar_select %p27721_p6, 1, 0 }
  0x1f   : > { %p809_p8 = scmp.lt.s32.totalorder %s27522_s30, 3 }
  0x20   : > { %31941 = sst [smem:[#allocation11_spill]] %s31940_s7 }
  0x21   : > { %p810_p9 = pnand %p21049_p7, %p809_p8 }
  0x23   : > { %813 = sbr.rel (%p810_p9) target bundleno = 8271 (0x204f), region = 128 }
  0x2a   : > { %s31942_s4 = sld [smem:[#allocation104_spill]]  ;;  %vm972_vm0 = vcmask 1042432   ;;  %p906_p10 = scmp.lt.s32.totalorder %s27700_s3, 1  ;;  %vm947_vm1 = vcmask 154624   ;;  %vm1760_vm2 = vcmask 162816   ;;  %vm1785_vm3 = vcmask 1043456  }
  0x2b   : > { %s31943_s6 = sld [smem:[#allocation93_spill]]  ;;  %s31944_s13 = sld [smem:[#allocation106_spill]]  ;;  %vm2615_vm4 = vcmask 130048   ;;  %vm3537_vm5 = vcmask 523264   ;;  %vm27526_vm6 = vmmov 0   ;;  %vm6052_vm7 = vcmask 64512  }
  0x2c   : > { %s27740_s9 = scalar_select %p906_p10, %s27700_s3, 1  ;;  %vm10951_vm8 = vcmask 261120  }
  0x2d   : > { %s31945_s10 = sld [smem:[#allocation94_spill]]  ;;  %s31946_s29 = sld [smem:[#allocation105_spill]] }
  0x2e   : > { %s27749_s12 = sshll.u32 %s27740_s9, 6  ;;  %s31947_s14 = sld [smem:[#allocation107_spill]] }
  0x2f   : > { %s31948_s1 = sld [smem:[#allocation97_spill]]  ;;  %s31958_s11 = sld [smem:[#allocation95_spill]] }
  0x30   : > { %v937_v0 = vld [vmem:[%s31942_s4] sm:$0xff]  ;;  %v938_v1 = vld [vmem:[%s31942_s4 + $0x8] sm:$0xff]  ;;  %v939_v2 = vld [vmem:[%s31942_s4 + $0x10] sm:$0x7]  ;;  %s31895_s4 = smov 120  }
  0x31   : > { %v977_v3 = vand.u32 4294901760, %v937_v0  ;;  %v980_v4 = vand.u32 4294901760, %v938_v1  ;;  %v974_v5 = vsel %vm972_vm0, %v939_v2, 0  ;;  %s27759_s0 = scalar_lea.vmem %s31943_s6, %s27749_s12 }
  0x32   : > { %v27737_v6 = vand.u32 4294901760, %v974_v5  ;;  %v929_v13 = vld [vmem:[%s27759_s0] sm:$0xff]  ;;  %v930_v14 = vld [vmem:[%s27759_s0 + $0x8] sm:$0xff]  ;;  %v931_v15 = vld [vmem:[%s27759_s0 + $0x10] sm:$0xff] }
  0x33   : > { %v27742_v7 = vpack.c.bf16 %v980_v4, %v977_v3  ;;  %v27744_v8 = vsub.f32 %v937_v0, %v977_v3  ;;  %v27746_v9 = vsub.f32 %v938_v1, %v980_v4  ;;  %v949_v17 = vsel %vm947_vm1, %v929_v13, 0  ;;  %v932_v20 = vld [vmem:[%s27759_s0 + $0x18] sm:$0xff]  ;;  %v933_v22 = vld [vmem:[%s27759_s0 + $0x20] sm:$0xff]  ;;  %v934_v27 = vld [vmem:[%s27759_s0 + $0x28] sm:$0xff]  ;;  %s27906_s7 = scalar_lea.vmem %s31945_s10, %s27749_s12  ;;  %s31953_s10 = sld [smem:[#allocation98_spill]] }
  0x34   : > { %v27752_v10 = vsub.f32 %v974_v5, %v27737_v6  ;;  %v952_v18 = vsel %vm947_vm1, %v930_v14, 0  ;;  %v955_v19 = vsel %vm947_vm1, %v931_v15, 0  ;;  %v27779_v23 = vand.u32 4294901760, %v949_v17  ;;  %v935_v28 = vld [vmem:[%s27759_s0 + $0x30] sm:$0xff]  ;;  %v936_v45 = vld [vmem:[%s27759_s0 + $0x38] sm:$0xff]  ;;  %s31960_s0 = sld [smem:[#allocation96_spill]] }
  0x35   : > { %25426 = vmatprep.subr.bf16.mxu0 %v27742_v7  ;;  %v1127_v11 = vand.u32 4294901760, %v27744_v8  ;;  %v1134_v12 = vand.u32 4294901760, %v27746_v9  ;;  %v27781_v24 = vand.u32 4294901760, %v952_v18  ;;  %v27783_v25 = vand.u32 4294901760, %v955_v19  ;;  %s928_s6 = scalar_lea.vmem %s31948_s1, %s27749_s12  ;;  %s31797_s1 = smov 112  }
  0x36   : > { %25428 = vmatpush3.bf16.msra.mxu0 %v27742_v7  ;;  %v27768_v16 = vand.u32 4294901760, %v27752_v10  ;;  %v958_v26 = vsel %vm947_vm1, %v932_v20, 0  ;;  %v961_v32 = vsel %vm947_vm1, %v933_v22, 0  ;;  %v27796_v33 = vsub.f32 %v949_v17, %v27779_v23  ;;  %v1749_v22 = vld [vmem:[%s27906_s7] sm:$0xff]  ;;  %s21056_s12 = sshll.u32 %s27740_s9, 3  ;;  %s31961_s9 = sld [smem:[#allocation100_spill]] }
  0x37   : > { %22705 = vmatprep.subr.mxu0 %v27737_v6  ;;  %v1128_v21 = vsub.f32 %v27744_v8, %v1127_v11  ;;  %v27788_v29 = vand.u32 4294901760, %v958_v26  ;;  %v1135_v31 = vsub.f32 %v27746_v9, %v1134_v12  ;;  %v27799_v34 = vsub.f32 %v952_v18, %v27781_v24 }
  0x38   : > { %v27802_v35 = vsub.f32 %v955_v19, %v27783_v25  ;;  %v27804_v36 = vand.u32 4294901760, %v961_v32  ;;  %v964_v39 = vsel %vm947_vm1, %v934_v27, 0  ;;  %v967_v40 = vsel %vm947_vm1, %v935_v28, 0 }
  0x39   : > { %v1129_v30 = vand.u32 4294901760, %v1128_v21  ;;  %v27807_v37 = vsub.f32 %v958_v26, %v27788_v29  ;;  %v1136_v38 = vand.u32 4294901760, %v1135_v31  ;;  %v1046_v41 = vand.u32 4294901760, %v27796_v33 }
  0x3a   : > { %22706 = vmatpush3.msra.mxu0 %v27737_v6  ;;  %v1056_v42 = vand.u32 4294901760, %v27799_v34  ;;  %v1066_v43 = vand.u32 4294901760, %v27802_v35  ;;  %v27815_v44 = vsub.f32 %v961_v32, %v27804_v36  ;;  %v27819_v48 = vand.u32 4294901760, %v964_v39  ;;  %v1751_v32 = vld [vmem:[%s27906_s7 + $0x10] sm:$0xff] }
  0x3b   : > { %v1076_v46 = vand.u32 4294901760, %v27807_v37  ;;  %v25429_v47 = vpack.c.bf16 %v1136_v38, %v1129_v30  ;;  %v27821_v49 = vand.u32 4294901760, %v967_v40  ;;  %v1047_v50 = vsub.f32 %v27796_v33, %v1046_v41 }
  0x3c   : > { %v1057_v51 = vsub.f32 %v27799_v34, %v1056_v42  ;;  %v1067_v52 = vsub.f32 %v27802_v35, %v1066_v43  ;;  %v1086_v53 = vand.u32 4294901760, %v27815_v44  ;;  %v27837_v55 = vsub.f32 %v964_v39, %v27819_v48 }
  0x3d   : > { %v1077_v54 = vsub.f32 %v27807_v37, %v1076_v46  ;;  %25430 = vmatprep.subr.bf16.mxu0 %v25429_v47  ;;  %v27840_v56 = vsub.f32 %v967_v40, %v27821_v49  ;;  %v970_v57 = vsel %vm947_vm1, %v936_v45, 0  ;;  %v1048_v58 = vand.u32 4294901760, %v1047_v50 }
  0x3e   : > { %v1058_v59 = vand.u32 4294901760, %v1057_v51  ;;  %v1068_v60 = vand.u32 4294901760, %v1067_v52  ;;  %v1087_v61 = vsub.f32 %v27815_v44, %v1086_v53  ;;  %v1096_v62 = vand.u32 4294901760, %v27837_v55  ;;  %v1754_v52 = vld [vmem:[%s27906_s7 + $0x28] sm:$0xff] }
  0x3f   : > { %v1106_v63 = vand.u32 4294901760, %v27840_v56  ;;  %v27848_v0 = vand.u32 4294901760, %v970_v57  ;;  %22707 = vmatprep.mubr.f32.mxu0 %v1048_v58  ;;  %v1142_v1 = vsub.f32 %v27752_v10, %v27768_v16  ;;  %v1078_v2 = vand.u32 4294901760, %v1077_v54 }
  0x40   : > { %22708 = vmatmul.mubr.f32.vlgmr.msra.gmra.mrb[0].mxu0 %v1058_v59  ;;  %v1097_v3 = vsub.f32 %v27837_v55, %v1096_v62  ;;  %v1088_v5 = vand.u32 4294901760, %v1087_v61  ;;  %v25433_v17 = vpack.c.bf16 %v27746_v9, %v27744_v8  ;;  %v1757_v8 = vld [vmem:[%s31944_s13] sm:$0xff]  ;;  %v1758_v9 = vld [vmem:[%s31944_s13 + $0x8] sm:$0xff]  ;;  %v1762_v28 = vsel %vm1760_vm2, %v1749_v22, 0 }
  0x41   : > { %v1115_v4 = vsub.f32 %v970_v57, %v27848_v0  ;;  %22710 = vmatprep.mubr.f32.mxu0 %v1068_v60  ;;  %25432 = vmatpush3.bf16.msra.mxu0 %v25429_v47  ;;  %v1107_v13 = vsub.f32 %v27840_v56, %v1106_v63  ;;  %v1143_v14 = vand.u32 4294901760, %v1142_v1  ;;  %v1777_v58 = vsel %vm1760_vm2, %v1754_v52, 0  ;;  %v1756_v60 = vld [vmem:[%s27906_s7 + $0x38] sm:$0xff] }
  0x42   : > { %v1098_v18 = vand.u32 4294901760, %v1097_v3  ;;  %v27987_v1 = vand.u32 4294901760, %v1777_v58 }
  0x43   : > { %v1116_v15 = vand.u32 4294901760, %v1115_v4  ;;  %22723 = vmatprep.subr.mxu0 %v1143_v14  ;;  %v1108_v20 = vand.u32 4294901760, %v1107_v13 }
  0x44   : > { %22711 = vmatmul.mubr.f32.gmra.mrb[2].mxu0 %v1078_v2 }
  0x45   : > { %v1117_v19 = vsub.f32 %v1115_v4, %v1116_v15  ;;  %22713 = vmatprep.mubr.f32.mxu0 %v1088_v5  ;;  %22724 = vmatpush3.msra.mxu0 %v1143_v14  ;;  %v28006_v14 = vsub.f32 %v1777_v58, %v27987_v1 }
  0x46   : > { %25434 = vmatprep.subr.bf16.mxu0 %v25433_v17 }
  0x47   : > { %v1118_v21 = vand.u32 4294901760, %v1117_v19 }
  0x48   : > { %22714 = vmatmul.mubr.f32.gmra.mrb[4].mxu0 %v1098_v18 }
  0x49   : > { %22716 = vmatprep.mubr.f32.mxu0 %v1108_v20 }
  0x4c   : > { %22717 = vmatmul.mubr.f32.gmra.mrb[6].mxu0 %v1118_v21 }
  0x4d   : > { %22725 = vmatprep.mubr.f32.mxu0 %v27779_v23 }
  0x50   : > { %22726 = vmatmul.mubr.f32.vlgmr.msra.gmra.mrb[0].mxu0 %v27781_v24 }
  0x51   : > { %22728 = vmatprep.mubr.f32.mxu0 %v27783_v25  ;;  %25436 = vmatpush3.bf16.msra.mxu0 %v25433_v17 }
  0x52   : > { %22741 = vmatprep.subr.mxu0 %v27752_v10 }
  0x54   : > { %22729 = vmatmul.mubr.f32.gmra.mrb[2].mxu0 %v27788_v29 }
  0x55   : > { %22731 = vmatprep.mubr.f32.mxu0 %v27804_v36  ;;  %22742 = vmatpush3.msra.mxu0 %v27752_v10  ;;  %v25441_v10 = vpack.c.bf16 %v1134_v12, %v1127_v11  ;;  %v1790_v11 = vand.u32 4294901760, %v1757_v8  ;;  %v1793_v12 = vand.u32 4294901760, %v1758_v9 }
  0x56   : > { %25438 = vmatprep.subr.bf16.mxu0 %v27742_v7 }
  0x57   : > { %v27915_v26 = vsub.f32 %v1757_v8, %v1790_v11  ;;  %v27917_v27 = vsub.f32 %v1758_v9, %v1793_v12 }
  0x58   : > { %22732 = vmatmul.mubr.f32.gmra.mrb[4].mxu0 %v27819_v48 }
  0x59   : > { %22734 = vmatprep.mubr.f32.mxu0 %v27821_v49  ;;  %v1940_v30 = vand.u32 4294901760, %v27915_v26  ;;  %v1947_v31 = vand.u32 4294901760, %v27917_v27 }
  0x5b   : > { %v1941_v38 = vsub.f32 %v27915_v26, %v1940_v30  ;;  %v1948_v39 = vsub.f32 %v27917_v27, %v1947_v31 }
  0x5c   : > { %22735 = vmatmul.mubr.f32.gmra.mrb[6].mxu0 %v27848_v0 }
  0x5d   : > { %22743 = vmatprep.mubr.f32.mxu0 %v27796_v33  ;;  %v1759_v33 = vld [vmem:[%s31944_s13 + $0x10] sm:$0xf]  ;;  %v1942_v47 = vand.u32 4294901760, %v1941_v38  ;;  %v1949_v50 = vand.u32 4294901760, %v1948_v39  ;;  %s31968_s13 = sld [smem:[#allocation101_spill]] }
  0x5e   : > { %v1787_v40 = vsel %vm1785_vm3, %v1759_v33, 0 }
  0x60   : > { %22744 = vmatmul.mubr.f32.vlgmr.msra.gmra.mrb[0].mxu0 %v27799_v34  ;;  %v27932_v34 = vand.u32 4294901760, %v1762_v28 }
  0x61   : > { %22746 = vmatprep.mubr.f32.mxu0 %v27802_v35  ;;  %25440 = vmatpush3.bf16.msra.mxu0 %v27742_v7  ;;  %v1768_v35 = vsel %vm1760_vm2, %v1751_v32, 0 }
  0x62   : > { %22759 = vmatprep.subr.mxu0 %v27737_v6 }
  0x64   : > { %22747 = vmatmul.mubr.f32.gmra.mrb[2].mxu0 %v27807_v37  ;;  %v1752_v37 = vld [vmem:[%s27906_s7 + $0x18] sm:$0xff] }
  0x65   : > { %22749 = vmatprep.mubr.f32.mxu0 %v27815_v44  ;;  %22760 = vmatpush3.msra.mxu0 %v27737_v6  ;;  %v27952_v44 = vand.u32 4294901760, %v1768_v35  ;;  %v1771_v45 = vsel %vm1760_vm2, %v1752_v37, 0 }
  0x66   : > { %25442 = vmatprep.subr.bf16.mxu0 %v25441_v10 }
  0x68   : > { %22750 = vmatmul.mubr.f32.gmra.mrb[4].mxu0 %v27837_v55 }
  0x69   : > { %22752 = vmatprep.mubr.f32.mxu0 %v27840_v56  ;;  %v27970_v56 = vsub.f32 %v1768_v35, %v27952_v44 }
  0x6b   : > { %v1879_v2 = vand.u32 4294901760, %v27970_v56 }
  0x6c   : > { %22753 = vmatmul.mubr.f32.gmra.mrb[6].mxu0 %v1115_v4  ;;  %v1783_v4 = vsel %vm1760_vm2, %v1756_v60, 0 }
  0x6d   : > { %22761 = vmatprep.mubr.f32.mxu0 %v1046_v41  ;;  %v1753_v41 = vld [vmem:[%s27906_s7 + $0x20] sm:$0xff]  ;;  %v1880_v18 = vsub.f32 %v27970_v56, %v1879_v2 }
  0x6e   : > { %v1774_v51 = vsel %vm1760_vm2, %v1753_v41, 0 }
  0x6f   : > { %v27972_v57 = vand.u32 4294901760, %v1774_v51  ;;  %v1881_v9 = vand.u32 4294901760, %v1880_v18 }
  0x70   : > { %22762 = vmatmul.mubr.f32.vlgmr.msra.gmra.mrb[0].mxu0 %v1056_v42  ;;  %v27947_v42 = vsub.f32 %v1762_v28, %v27932_v34 }
  0x71   : > { %22764 = vmatprep.mubr.f32.mxu0 %v1066_v43  ;;  %25444 = vmatpush3.bf16.msra.mxu0 %v25441_v10  ;;  %v27993_v3 = vsub.f32 %v1774_v51, %v27972_v57 }
  0x72   : > { %22777 = vmatprep.subr.mxu0 %v27768_v16  ;;  %v1859_v54 = vand.u32 4294901760, %v27947_v42 }
  0x74   : > { %22765 = vmatmul.mubr.f32.gmra.mrb[2].mxu0 %v1076_v46  ;;  %v27955_v46 = vand.u32 4294901760, %v1787_v40 }
  0x75   : > { %22767 = vmatprep.mubr.f32.mxu0 %v1086_v53  ;;  %22778 = vmatpush3.msra.mxu0 %v27768_v16  ;;  %v27912_v16 = vpack.c.bf16 %v1793_v12, %v1790_v11  ;;  %v1755_v53 = vld [vmem:[%s27906_s7 + $0x30] sm:$0xff] }
  0x76   : > { %25446 = vmatprep.subr.bf16.mxu0 %v27742_v7  ;;  %v1780_v59 = vsel %vm1760_vm2, %v1755_v53, 0  ;;  %v1953_v61 = vsub.f32 %v1787_v40, %v27955_v46  ;;  %v25465_v40 = vpack.c.bf16 %v1947_v31, %v1940_v30 }
  0x78   : > { %22768 = vmatmul.mubr.f32.gmra.mrb[4].mxu0 %v1096_v62  ;;  %v27998_v5 = vand.u32 4294901760, %v1953_v61 }
  0x79   : > { %22770 = vmatprep.mubr.f32.mxu0 %v1106_v63 }
  0x7a   : > { %v1955_v20 = vsub.f32 %v1953_v61, %v27998_v5 }
  0x7c   : > { %22771 = vmatmul.mubr.f32.gmra.mrb[6].mxu0 %v1116_v15  ;;  %v28008_v15 = vand.u32 4294901760, %v1783_v4  ;;  %v1956_v22 = vand.u32 4294901760, %v1955_v20 }
  0x7d   : > { %22779 = vmatprep.mubr.f32.mxu0 %v27779_v23 }
  0x7e   : > { %v28025_v8 = vsub.f32 %v1783_v4, %v28008_v15 }
  0x80   : > { %22780 = vmatmul.mubr.f32.vlgmr.msra.gmra.mrb[0].mxu0 %v27781_v24 }
  0x81   : > { %22782 = vmatprep.mubr.f32.mxu0 %v27783_v25  ;;  %25448 = vmatpush3.bf16.msra.mxu0 %v27742_v7  ;;  %v1750_v7 = vld [vmem:[%s27906_s7 + $0x8] sm:$0xff]  ;;  %s31949_s7 = sld [smem:[#allocation99_spill]] }
  0x82   : > { %22795 = vmatprep.subr.mxu0 %v27737_v6 }
  0x84   : > { %22783 = vmatmul.mubr.f32.gmra.mrb[2].mxu0 %v27788_v29 }
  0x85   : > { %22785 = vmatprep.mubr.f32.mxu0 %v27804_v36  ;;  %22796 = vmatpush3.msra.mxu0 %v27737_v6  ;;  %v1765_v6 = vsel %vm1760_vm2, %v1750_v7, 0  ;;  %v1929_v7 = vand.u32 4294901760, %v28025_v8 }
  0x86   : > { %25450 = vmatprep.subr.bf16.mxu0 %v27912_v16  ;;  %v27949_v43 = vand.u32 4294901760, %v1765_v6 }
  0x87   : > { %v1930_v37 = vsub.f32 %v28025_v8, %v1929_v7 }
  0x88   : > { %22786 = vmatmul.mubr.f32.gmra.mrb[4].mxu0 %v27819_v48  ;;  %v27963_v55 = vsub.f32 %v1765_v6, %v27949_v43  ;;  %v25457_v6 = vpack.c.bf16 %v27917_v27, %v27915_v26  ;;  %v21061_v27 = vld [vmem:[%s31947_s14] ss:$0 sm:$0xff] }
  0x89   : > { %22788 = vmatprep.mubr.f32.mxu0 %v27821_v49  ;;  %v1931_v39 = vand.u32 4294901760, %v1930_v37 }
  0x8a   : > { %v1869_v62 = vand.u32 4294901760, %v27963_v55 }
  0x8c   : > { %22789 = vmatmul.mubr.f32.gmra.mrb[6].mxu0 %v27848_v0 }
  0x8d   : > { %22797 = vmatprep.mubr.f32.mxu0 %v27779_v23  ;;  %v27965_v23 = vand.u32 4294901760, %v1771_v45 }
  0x8f   : > { %v27985_v63 = vsub.f32 %v1771_v45, %v27965_v23 }
  0x90   : > { %22798 = vmatmul.mubr.f32.vlgmr.msra.gmra.mrb[0].mxu0 %v27781_v24  ;;  %v25453_v24 = vpack.c.bf16 %v1949_v50, %v1942_v47 }
  0x91   : > { %22800 = vmatprep.mubr.f32.mxu0 %v27783_v25  ;;  %25452 = vmatpush3.bf16.msra.mxu0 %v27912_v16  ;;  %v1860_v25 = vsub.f32 %v27947_v42, %v1859_v54  ;;  %v1889_v13 = vand.u32 4294901760, %v27985_v63 }
  0x92   : > { %22813 = vmatprep.subr.mxu0 %v27955_v46 }
  0x93   : > { %v1861_v17 = vand.u32 4294901760, %v1860_v25  ;;  %v1890_v10 = vsub.f32 %v27985_v63, %v1889_v13 }
  0x94   : > { %22801 = vmatmul.mubr.f32.gmra.mrb[2].mxu0 %v27788_v29  ;;  %v27995_v29 = vand.u32 4294901760, %v1780_v59 }
  0x95   : > { %22803 = vmatprep.mubr.f32.mxu0 %v27804_v36  ;;  %22814 = vmatpush3.msra.mxu0 %v27955_v46  ;;  %v1870_v36 = vsub.f32 %v27963_v55, %v1869_v62 }
  0x96   : > { %25454 = vmatprep.subr.bf16.mxu0 %v25453_v24  ;;  %v28016_v19 = vsub.f32 %v1780_v59, %v27995_v29 }
  0x97   : > { %v1871_v21 = vand.u32 4294901760, %v1870_v36 }
  0x98   : > { %22804 = vmatmul.mubr.f32.gmra.mrb[4].mxu0 %v27819_v48  ;;  %v1899_v48 = vand.u32 4294901760, %v27993_v3  ;;  %v1919_v12 = vand.u32 4294901760, %v28016_v19 }
  0x99   : > { %22806 = vmatprep.mubr.f32.mxu0 %v27821_v49  ;;  %v1909_v49 = vand.u32 4294901760, %v28006_v14 }
  0x9a   : > { %v1900_v11 = vsub.f32 %v27993_v3, %v1899_v48  ;;  %v1920_v33 = vsub.f32 %v28016_v19, %v1919_v12 }
  0x9b   : > { %v1910_v28 = vsub.f32 %v28006_v14, %v1909_v49 }
  0x9c   : > { %22807 = vmatmul.mubr.f32.gmra.mrb[6].mxu0 %v27848_v0  ;;  %v1891_v0 = vand.u32 4294901760, %v1890_v10  ;;  %v1901_v32 = vand.u32 4294901760, %v1900_v11  ;;  %v1921_v38 = vand.u32 4294901760, %v1920_v33 }
  0x9d   : > { %22815 = vmatprep.mubr.f32.mxu0 %v1861_v17  ;;  %v1911_v35 = vand.u32 4294901760, %v1910_v28 }
  0xa0   : > { %22816 = vmatmul.mubr.f32.vlgmr.msra.gmra.mrb[0].mxu0 %v1871_v21 }
  0xa1   : > { %22818 = vmatprep.mubr.f32.mxu0 %v1881_v9  ;;  %25456 = vmatpush3.bf16.msra.mxu0 %v25453_v24 }
  0xa2   : > { %22831 = vmatprep.subr.mxu0 %v1956_v22 }
  0xa4   : > { %22819 = vmatmul.mubr.f32.gmra.mrb[2].mxu0 %v1891_v0 }
  0xa5   : > { %22821 = vmatprep.mubr.f32.mxu0 %v1901_v32  ;;  %22832 = vmatpush3.msra.mxu0 %v1956_v22 }
  0xa6   : > { %25458 = vmatprep.subr.bf16.mxu0 %v25457_v6 }
  0xa8   : > { %22822 = vmatmul.mubr.f32.gmra.mrb[4].mxu0 %v1911_v35 }
  0xa9   : > { %22824 = vmatprep.mubr.f32.mxu0 %v1921_v38 }
  0xac   : > { %22825 = vmatmul.mubr.f32.gmra.mrb[6].mxu0 %v1931_v39 }
  0xad   : > { %22833 = vmatprep.mubr.f32.mxu0 %v27932_v34 }
  0xb0   : > { %22834 = vmatmul.mubr.f32.vlgmr.msra.gmra.mrb[0].mxu0 %v27949_v43 }
  0xb1   : > { %22836 = vmatprep.mubr.f32.mxu0 %v27952_v44  ;;  %25460 = vmatpush3.bf16.msra.mxu0 %v25457_v6 }
  0xb2   : > { %22849 = vmatprep.subr.mxu0 %v1953_v61 }
  0xb4   : > { %22837 = vmatmul.mubr.f32.gmra.mrb[2].mxu0 %v27965_v23 }
  0xb5   : > { %22839 = vmatprep.mubr.f32.mxu0 %v27972_v57  ;;  %22850 = vmatpush3.msra.mxu0 %v1953_v61 }
  0xb6   : > { %25462 = vmatprep.subr.bf16.mxu0 %v27912_v16 }
  0xb8   : > { %22840 = vmatmul.mubr.f32.gmra.mrb[4].mxu0 %v27987_v1 }
  0xb9   : > { %22842 = vmatprep.mubr.f32.mxu0 %v27995_v29 }
  0xbc   : > { %22843 = vmatmul.mubr.f32.gmra.mrb[6].mxu0 %v28008_v15 }
  0xbd   : > { %22851 = vmatprep.mubr.f32.mxu0 %v27947_v42 }
  0xc0   : > { %22852 = vmatmul.mubr.f32.vlgmr.msra.gmra.mrb[0].mxu0 %v27963_v55 }
  0xc1   : > { %22854 = vmatprep.mubr.f32.mxu0 %v27970_v56  ;;  %25464 = vmatpush3.bf16.msra.mxu0 %v27912_v16 }
  0xc2   : > { %22867 = vmatprep.subr.mxu0 %v27955_v46 }
  0xc4   : > { %22855 = vmatmul.mubr.f32.gmra.mrb[2].mxu0 %v27985_v63 }
  0xc5   : > { %22857 = vmatprep.mubr.f32.mxu0 %v27993_v3  ;;  %22868 = vmatpush3.msra.mxu0 %v27955_v46 }
  0xc6   : > { %25466 = vmatprep.subr.bf16.mxu0 %v25465_v40 }
  0xc8   : > { %22858 = vmatmul.mubr.f32.gmra.mrb[4].mxu0 %v28006_v14 }
  0xc9   : > { %22860 = vmatprep.mubr.f32.mxu0 %v28016_v19 }
  0xcc   : > { %22861 = vmatmul.mubr.f32.gmra.mrb[6].mxu0 %v28025_v8 }
  0xcd   : > { %22869 = vmatprep.mubr.f32.mxu0 %v1859_v54 }
  0xd0   : > { %22870 = vmatmul.mubr.f32.vlgmr.msra.gmra.mrb[0].mxu0 %v1869_v62 }
  0xd1   : > { %22872 = vmatprep.mubr.f32.mxu0 %v1879_v2  ;;  %25468 = vmatpush3.bf16.msra.mxu0 %v25465_v40 }
  0xd2   : > { %22885 = vmatprep.subr.mxu0 %v27998_v5 }
  0xd4   : > { %22873 = vmatmul.mubr.f32.gmra.mrb[2].mxu0 %v1889_v13 }
  0xd5   : > { %22875 = vmatprep.mubr.f32.mxu0 %v1899_v48  ;;  %22886 = vmatpush3.msra.mxu0 %v27998_v5 }
  0xd6   : > { %25470 = vmatprep.subr.bf16.mxu0 %v27912_v16 }
  0xd8   : > { %22876 = vmatmul.mubr.f32.gmra.mrb[4].mxu0 %v1909_v49 }
  0xd9   : > { %22878 = vmatprep.mubr.f32.mxu0 %v1919_v12 }
  0xdc   : > { %22879 = vmatmul.mubr.f32.gmra.mrb[6].mxu0 %v1929_v7 }
  0xdd   : > { %22887 = vmatprep.mubr.f32.mxu0 %v27932_v34 }
  0xe0   : > { %22888 = vmatmul.mubr.f32.vlgmr.msra.gmra.mrb[0].mxu0 %v27949_v43 }
  0xe1   : > { %22890 = vmatprep.mubr.f32.mxu0 %v27952_v44  ;;  %25472 = vmatpush3.bf16.msra.mxu0 %v27912_v16  ;;  %v21060_v16 = vld [vmem:[%s31946_s29] ss:$0 sm:$0xff]  ;;  %s28816_s29 = scalar_lea.vmem %s31958_s11, %s21056_s12  ;;  %s32049_s11 = smov 112  }
  0xe2   : > { %22903 = vmatprep.subr.mxu0 %v27955_v46 }
  0xe4   : > { %22891 = vmatmul.mubr.f32.gmra.mrb[2].mxu0 %v27965_v23 }
  0xe5   : > { %22893 = vmatprep.mubr.f32.mxu0 %v27972_v57  ;;  %22904 = vmatpush3.msra.mxu0 %v27955_v46 }
  0xe8   : > { %22894 = vmatmul.mubr.f32.gmra.mrb[4].mxu0 %v27987_v1 }
  0xe9   : > { %22896 = vmatprep.mubr.f32.mxu0 %v27995_v29 }
  0xec   : > { %22897 = vmatmul.mubr.f32.gmra.mrb[6].mxu0 %v28008_v15 }
  0xed   : > { %22905 = vmatprep.mubr.f32.mxu0 %v27932_v34 }
  0xf0   : > { %22906 = vmatmul.mubr.f32.vlgmr.msra.gmra.mrb[0].mxu0 %v27949_v43 }
  0xf1   : > { %22908 = vmatprep.mubr.f32.mxu0 %v27952_v44 }
  0xf4   : > { %22909 = vmatmul.mubr.f32.gmra.mrb[2].mxu0 %v27965_v23 }
  0xf5   : > { %22911 = vmatprep.mubr.f32.mxu0 %v27972_v57 }
  0xf8   : > { %22912 = vmatmul.mubr.f32.gmra.mrb[4].mxu0 %v27987_v1 }
  0xf9   : > { %22914 = vmatprep.mubr.f32.mxu0 %v27995_v29 }
  0xfc   : > { %22915 = vmatmul.mubr.f32.gmra.mrb[6].mxu0 %v28008_v15 }
 0x1c3   : > { %v22907_v26 = vpop.f32.mrb[0].mxu0 }
 0x1c4   : > { %v2516_v30 = vpop.f32.mrb[1].mxu0  ;;  %v26373_v31 = vadd.f32 %v22907_v26, %v21060_v16 }
 0x1c5   : > { %v26374_v34 = vadd.f32 %v21060_v16, %v2516_v30 }
 0x1c6   : > { %v28101_v45 = vadd.f32 %v26373_v31, %v21061_v27 }
 0x1c7   : > { %v28099_v41 = vadd.f32 %v26374_v34, %v21061_v27  ;;  %v22910_v42 = vpop.f32.mrb[2].mxu0 }
 0x1c8   : > { %v26375_v43 = vadd.f32 %v22910_v42, %v21060_v16  ;;  %v2528_v44 = vpop.f32.mrb[3].mxu0  ;;  %v2619_v23 = vsel %vm2615_vm4, %v28101_v45, 0.0 }
 0x1c9   : > { %v26376_v46 = vadd.f32 %v21060_v16, %v2528_v44  ;;  %v2616_v47 = vsel %vm2615_vm4, %v28099_v41, 0.0 }
 0x1ca   : > { %2617 = vadd.xlane.f32.xlu0 %v2616_v47  ;;  %v28107_v52 = vadd.f32 %v26375_v43, %v21061_v27  ;;  %v2721_v47 = vld [vmem:[%s31775_s15] sm:$0xff] }
 0x1cb   : > { %v28105_v50 = vadd.f32 %v26376_v46, %v21061_v27  ;;  %v22913_v51 = vpop.f32.mrb[4].mxu0 }
 0x1cc   : > { %v2540_v53 = vpop.f32.mrb[5].mxu0  ;;  %v26377_v54 = vadd.f32 %v22913_v51, %v21060_v16  ;;  %v2625_v59 = vsel %vm2615_vm4, %v28107_v52, 0.0  ;;  %v2722_v51 = vld [vmem:[%s31775_s15 + $0x8] sm:$0xff] }
 0x1cd   : > { %v26378_v55 = vadd.f32 %v21060_v16, %v2540_v53  ;;  %v2622_v56 = vsel %vm2615_vm4, %v28105_v50, 0.0  ;;  %v2755_v53 = vand.u32 4294901760, %v2721_v47 }
 0x1ce   : > { %2620 = vadd.xlane.f32.xlu0 %v2619_v23  ;;  %2623 = vadd.xlane.f32.xlu1 %v2622_v56  ;;  %v28117_v60 = vadd.f32 %v26377_v54, %v21061_v27  ;;  %v2758_v54 = vand.u32 4294901760, %v2722_v51 }
 0x1cf   : > { %v28113_v57 = vadd.f32 %v26378_v55, %v21061_v27  ;;  %v22916_v58 = vpop.f32.mrb[6].mxu0  ;;  %v2903_v23 = vsub.f32 %v2721_v47, %v2755_v53 }
 0x1d0   : > { %v2552_v24 = vpop.f32.mrb[7].mxu0  ;;  %v26379_v61 = vadd.f32 %v22916_v58, %v21060_v16  ;;  %v2631_v2 = vsel %vm2615_vm4, %v28117_v60, 0.0  ;;  %v28185_v55 = vpack.c.bf16 %v2758_v54, %v2755_v53  ;;  %v2910_v56 = vsub.f32 %v2722_v51, %v2758_v54 }
 0x1d1   : > { %v26380_v25 = vadd.f32 %v21060_v16, %v2552_v24  ;;  %v2628_v62 = vsel %vm2615_vm4, %v28113_v57, 0.0  ;;  %v2904_v58 = vand.u32 4294901760, %v2903_v23 }
 0x1d2   : > { %2626 = vadd.xlane.f32.xlu1 %v2625_v59  ;;  %2629 = vadd.xlane.f32.xlu0 %v2628_v62  ;;  %v28123_v1 = vadd.f32 %v26379_v61, %v21061_v27  ;;  %v2911_v24 = vand.u32 4294901760, %v2910_v56 }
 0x1d3   : > { %v28121_v63 = vadd.f32 %v26380_v25, %v21061_v27  ;;  %25474 = vmatprep.subr.bf16.mxu1 %v28185_v55  ;;  %v2905_v59 = vsub.f32 %v2903_v23, %v2904_v58 }
 0x1d4   : > { %v2637_v29 = vsel %vm2615_vm4, %v28123_v1, 0.0  ;;  %25476 = vmatpush3.bf16.msra.mxu1 %v28185_v55  ;;  %v2912_v61 = vsub.f32 %v2910_v56, %v2911_v24 }
 0x1d5   : > { %v2634_v3 = vsel %vm2615_vm4, %v28121_v63, 0.0  ;;  %v2906_v25 = vand.u32 4294901760, %v2905_v59 }
 0x1d6   : > { %2632 = vadd.xlane.f32.xlu1 %v2631_v2  ;;  %2635 = vadd.xlane.f32.xlu0 %v2634_v3  ;;  %v2913_v62 = vand.u32 4294901760, %v2912_v61  ;;  %v28192_v3 = vpack.c.bf16 %v2910_v56, %v2903_v23 }
 0x1d8   : > { %v28189_v2 = vpack.c.bf16 %v2913_v62, %v2906_v25 }
 0x1da   : > { %2638 = vadd.xlane.f32.xlu1 %v2637_v29  ;;  %25478 = vmatprep.subr.bf16.mxu1 %v28189_v2  ;;  %v28194_v29 = vpack.c.bf16 %v2911_v24, %v2904_v58 }
 0x257   : > { %v2618_v4 = vpop.xlane.xlu0 %2617 }
 0x258   : > { %v2641_v5 = vmul.f32 0.0625, %v2618_v4 }
 0x25a   : > { %v28132_v36 = vsub.f32 %v28099_v41, %v2641_v5 }
 0x25b   : > { %v2621_v13 = vpop.xlane.xlu0 %2620  ;;  %v2624_v14 = vpop.xlane.xlu1 %2623 }
 0x25c   : > { %v2642_v15 = vmul.f32 0.0625, %v2621_v13  ;;  %v2643_v17 = vmul.f32 0.0625, %v2624_v14  ;;  %v2657_v18 = vmul.f32 %v28132_v36, %v28132_v36 }
 0x25e   : > { %v28137_v48 = vsub.f32 %v28101_v45, %v2642_v15  ;;  %v28140_v19 = vsub.f32 %v28105_v50, %v2643_v17  ;;  %v2665_v20 = vsel %vm2615_vm4, %v2657_v18, 0.0 }
 0x25f   : > { %v2627_v21 = vpop.xlane.xlu1 %2626  ;;  %v2630_v10 = vpop.xlane.xlu0 %2629  ;;  %2666 = vadd.xlane.f32.xlu0 %v2665_v20 }
 0x260   : > { %v2644_v49 = vmul.f32 0.0625, %v2627_v21  ;;  %v2645_v8 = vmul.f32 0.0625, %v2630_v10  ;;  %v2658_v9 = vmul.f32 %v28137_v48, %v28137_v48  ;;  %v2659_v11 = vmul.f32 %v28140_v19, %v28140_v19 }
 0x262   : > { %v28148_v12 = vsub.f32 %v28107_v52, %v2644_v49  ;;  %v28151_v22 = vsub.f32 %v28113_v57, %v2645_v8  ;;  %v2668_v0 = vsel %vm2615_vm4, %v2658_v9, 0.0  ;;  %v2671_v28 = vsel %vm2615_vm4, %v2659_v11, 0.0 }
 0x263   : > { %v2633_v7 = vpop.xlane.xlu1 %2632  ;;  %2669 = vadd.xlane.f32.xlu1 %v2668_v0  ;;  %2672 = vadd.xlane.f32.xlu0 %v2671_v28  ;;  %v2636_v32 = vpop.xlane.xlu0 %2635 }
 0x264   : > { %v2646_v33 = vmul.f32 0.0625, %v2633_v7  ;;  %v2647_v6 = vmul.f32 0.0625, %v2636_v32  ;;  %v2660_v35 = vmul.f32 %v28148_v12, %v28148_v12  ;;  %v2661_v37 = vmul.f32 %v28151_v22, %v28151_v22 }
 0x266   : > { %v28160_v38 = vsub.f32 %v28117_v60, %v2646_v33  ;;  %v28163_v39 = vsub.f32 %v28121_v63, %v2647_v6  ;;  %v2674_v40 = vsel %vm2615_vm4, %v2660_v35, 0.0  ;;  %v2677_v16 = vsel %vm2615_vm4, %v2661_v37, 0.0 }
 0x267   : > { %2675 = vadd.xlane.f32.xlu1 %v2674_v40  ;;  %v2639_v26 = vpop.xlane.xlu1 %2638  ;;  %2678 = vadd.xlane.f32.xlu0 %v2677_v16 }
 0x268   : > { %v2648_v27 = vmul.f32 0.0625, %v2639_v26  ;;  %v2662_v30 = vmul.f32 %v28160_v38, %v28160_v38  ;;  %v2663_v31 = vmul.f32 %v28163_v39, %v28163_v39 }
 0x26a   : > { %v28172_v34 = vsub.f32 %v28123_v1, %v2648_v27  ;;  %v2680_v42 = vsel %vm2615_vm4, %v2662_v30, 0.0  ;;  %v2683_v43 = vsel %vm2615_vm4, %v2663_v31, 0.0 }
 0x26b   : > { %2681 = vadd.xlane.f32.xlu1 %v2680_v42  ;;  %2684 = vadd.xlane.f32.xlu0 %v2683_v43 }
 0x26c   : > { %v2664_v44 = vmul.f32 %v28172_v34, %v28172_v34 }
 0x26e   : > { %v2686_v46 = vsel %vm2615_vm4, %v2664_v44, 0.0 }
 0x26f   : > { %2687 = vadd.xlane.f32.xlu1 %v2686_v46 }
 0x2ec   : > { %v2667_v4 = vpop.xlane.xlu0 %2666 }
 0x2ed   : > { %v2689_v5 = vmul.f32 0.0625, %v2667_v4 }
 0x2ef   : > { %v2697_v13 = vadd.f32 1e-05, %v2689_v5 }
 0x2f0   : > { %v2670_v14 = vpop.xlane.xlu1 %2669  ;;  %v2673_v15 = vpop.xlane.xlu0 %2672 }
 0x2f1   : > { %27359 = vrsqrt.f32 %v2697_v13  ;;  %v2690_v17 = vmul.f32 0.0625, %v2670_v14  ;;  %v2691_v18 = vmul.f32 0.0625, %v2673_v15 }
 0x2f3   : > { %v2698_v20 = vadd.f32 1e-05, %v2690_v17  ;;  %v2699_v21 = vadd.f32 1e-05, %v2691_v18 }
 0x2f4   : > { %v2676_v10 = vpop.xlane.xlu1 %2675  ;;  %v2679_v49 = vpop.xlane.xlu0 %2678 }
 0x2f5   : > { %27361 = vrsqrt.f32 %v2698_v20  ;;  %v2692_v8 = vmul.f32 0.0625, %v2676_v10  ;;  %v2693_v9 = vmul.f32 0.0625, %v2679_v49 }
 0x2f6   : > { %27363 = vrsqrt.f32 %v2699_v21 }
 0x2f7   : > { %v2700_v11 = vadd.f32 1e-05, %v2692_v8  ;;  %v2701_v0 = vadd.f32 1e-05, %v2693_v9 }
 0x2f8   : > { %v2682_v28 = vpop.xlane.xlu1 %2681  ;;  %v2685_v7 = vpop.xlane.xlu0 %2684 }
 0x2f9   : > { %27365 = vrsqrt.f32 %v2700_v11  ;;  %v2694_v32 = vmul.f32 0.0625, %v2682_v28  ;;  %v2695_v33 = vmul.f32 0.0625, %v2685_v7 }
 0x2fa   : > { %27367 = vrsqrt.f32 %v2701_v0 }
 0x2fb   : > { %v27360_v6 = vpop.eup %27359  ;;  %v2702_v35 = vadd.f32 1e-05, %v2694_v32  ;;  %v2703_v37 = vadd.f32 1e-05, %v2695_v33 }
 0x2fc   : > { %v2688_v40 = vpop.xlane.xlu1 %2687  ;;  %v2713_v16 = vmul.f32 %v27360_v6, %v28132_v36 }
 0x2fd   : > { %27369 = vrsqrt.f32 %v2702_v35  ;;  %v2696_v26 = vmul.f32 0.0625, %v2688_v40 }
 0x2fe   : > { %27371 = vrsqrt.f32 %v2703_v37  ;;  %v2731_v27 = vsel %vm2615_vm4, %v2713_v16, 0 }
 0x2ff   : > { %v27362_v30 = vpop.eup %27361  ;;  %v2704_v31 = vadd.f32 1e-05, %v2696_v26  ;;  %v28198_v42 = vand.u32 4294901760, %v2731_v27 }
 0x300   : > { %v27364_v43 = vpop.eup %27363  ;;  %v2714_v44 = vmul.f32 %v27362_v30, %v28137_v48 }
 0x301   : > { %27373 = vrsqrt.f32 %v2704_v31  ;;  %v28202_v46 = vsub.f32 %v2731_v27, %v28198_v42  ;;  %v2715_v47 = vmul.f32 %v27364_v43, %v28140_v19 }
 0x302   : > { %v2734_v36 = vsel %vm2615_vm4, %v2714_v44, 0 }
 0x303   : > { %v27366_v51 = vpop.eup %27365  ;;  %v2823_v53 = vand.u32 4294901760, %v28202_v46  ;;  %v28207_v54 = vand.u32 4294901760, %v2734_v36  ;;  %v2737_v23 = vsel %vm2615_vm4, %v2715_v47, 0 }
 0x304   : > { %v27368_v56 = vpop.eup %27367  ;;  %v28210_v58 = vand.u32 4294901760, %v2737_v23  ;;  %v2716_v48 = vmul.f32 %v27366_v51, %v28148_v12 }
 0x305   : > { %v2824_v24 = vsub.f32 %v28202_v46, %v2823_v53  ;;  %v28217_v19 = vsub.f32 %v2734_v36, %v28207_v54  ;;  %v2717_v59 = vmul.f32 %v27368_v56, %v28151_v22 }
 0x306   : > { %v28221_v61 = vsub.f32 %v2737_v23, %v28210_v58  ;;  %v2740_v25 = vsel %vm2615_vm4, %v2716_v48, 0 }
 0x307   : > { %v27370_v62 = vpop.eup %27369  ;;  %v2825_v4 = vand.u32 4294901760, %v2824_v24  ;;  %v2833_v5 = vand.u32 4294901760, %v28217_v19  ;;  %v28225_v13 = vand.u32 4294901760, %v2740_v25  ;;  %v2743_v12 = vsel %vm2615_vm4, %v2717_v59, 0  ;;  %v3527_v59 = vld [vmem:[%s31777_s17 + $0x28] sm:$0xff] }
 0x308   : > { %v27372_v14 = vpop.eup %27371  ;;  %v2843_v15 = vand.u32 4294901760, %v28221_v61  ;;  %v28229_v17 = vand.u32 4294901760, %v2743_v12  ;;  %v2718_v22 = vmul.f32 %v27370_v62, %v28160_v38 }
 0x309   : > { %22921 = vmatprep.mubr.f32.mxu1 %v2825_v4  ;;  %v2834_v18 = vsub.f32 %v28217_v19, %v2833_v5  ;;  %v28236_v20 = vsub.f32 %v2740_v25, %v28225_v13  ;;  %v2719_v21 = vmul.f32 %v27372_v14, %v28163_v39  ;;  %v3578_v25 = vand.u32 4294901760, %v3527_v59 }
 0x30a   : > { %v2844_v10 = vsub.f32 %v28221_v61, %v2843_v15  ;;  %v28243_v49 = vsub.f32 %v2743_v12, %v28229_v17  ;;  %v2746_v8 = vsel %vm2615_vm4, %v2718_v22, 0  ;;  %v3529_v12 = vld [vmem:[%s31777_s17 + $0x38] sm:$0xff] }
 0x30b   : > { %v27374_v38 = vpop.eup %27373  ;;  %v2835_v9 = vand.u32 4294901760, %v2834_v18  ;;  %v2853_v11 = vand.u32 4294901760, %v28236_v20  ;;  %v28247_v0 = vand.u32 4294901760, %v2746_v8  ;;  %v2749_v28 = vsel %vm2615_vm4, %v2719_v21, 0 }
 0x30c   : > { %v2845_v7 = vand.u32 4294901760, %v2844_v10  ;;  %v2863_v39 = vand.u32 4294901760, %v28243_v49  ;;  %v28251_v32 = vand.u32 4294901760, %v2749_v28  ;;  %v2720_v33 = vmul.f32 %v27374_v38, %v28172_v34 }
 0x30d   : > { %22922 = vmatmul.mubr.f32.vlgmr.msra.gmra.mrb[0].mxu1 %v2835_v9  ;;  %v2854_v6 = vsub.f32 %v28236_v20, %v2853_v11  ;;  %v2872_v35 = vsub.f32 %v2746_v8, %v28247_v0 }
 0x30e   : > { %22924 = vmatprep.mubr.f32.mxu1 %v2845_v7  ;;  %v2864_v37 = vsub.f32 %v28243_v49, %v2863_v39  ;;  %25480 = vmatpush3.bf16.msra.mxu1 %v28189_v2  ;;  %v2882_v40 = vsub.f32 %v2749_v28, %v28251_v32  ;;  %v2752_v16 = vsel %vm2615_vm4, %v2720_v33, 0 }
 0x30f   : > { %v2855_v26 = vand.u32 4294901760, %v2854_v6  ;;  %v2873_v27 = vand.u32 4294901760, %v2872_v35  ;;  %v2891_v30 = vand.u32 4294901760, %v2752_v16  ;;  %25482 = vmatprep.subr.bf16.mxu1 %v28192_v3 }
 0x310   : > { %v2865_v34 = vand.u32 4294901760, %v2864_v37  ;;  %v2883_v31 = vand.u32 4294901760, %v2882_v40 }
 0x311   : > { %22925 = vmatmul.mubr.f32.gmra.mrb[2].mxu1 %v2855_v26  ;;  %v2874_v43 = vsub.f32 %v2872_v35, %v2873_v27  ;;  %v2892_v44 = vsub.f32 %v2752_v16, %v2891_v30 }
 0x312   : > { %22927 = vmatprep.mubr.f32.mxu1 %v2865_v34  ;;  %v2884_v47 = vsub.f32 %v2882_v40, %v2883_v31 }
 0x313   : > { %v2875_v36 = vand.u32 4294901760, %v2874_v43  ;;  %v2893_v51 = vand.u32 4294901760, %v2892_v44 }
 0x314   : > { %v2885_v23 = vand.u32 4294901760, %v2884_v47 }
 0x315   : > { %22928 = vmatmul.mubr.f32.gmra.mrb[4].mxu1 %v2875_v36  ;;  %v2894_v2 = vsub.f32 %v2892_v44, %v2893_v51 }
 0x316   : > { %22930 = vmatprep.mubr.f32.mxu1 %v2885_v23 }
 0x317   : > { %v2895_v56 = vand.u32 4294901760, %v2894_v2 }
 0x319   : > { %22931 = vmatmul.mubr.f32.gmra.mrb[6].mxu1 %v2895_v56 }
 0x31a   : > { %22937 = vmatprep.mubr.f32.mxu1 %v28198_v42 }
 0x31d   : > { %22938 = vmatmul.mubr.f32.vlgmr.msra.gmra.mrb[0].mxu1 %v28207_v54 }
 0x31e   : > { %22940 = vmatprep.mubr.f32.mxu1 %v28210_v58  ;;  %25484 = vmatpush3.bf16.msra.mxu1 %v28192_v3  ;;  %v3523_v3 = vld [vmem:[%s31777_s17 + $0x8] sm:$0xff] }
 0x31f   : > { %25486 = vmatprep.subr.bf16.mxu1 %v28185_v55 }
 0x321   : > { %22941 = vmatmul.mubr.f32.gmra.mrb[2].mxu1 %v28225_v13 }
 0x322   : > { %22943 = vmatprep.mubr.f32.mxu1 %v28229_v17 }
 0x325   : > { %22944 = vmatmul.mubr.f32.gmra.mrb[4].mxu1 %v28247_v0 }
 0x326   : > { %22946 = vmatprep.mubr.f32.mxu1 %v28251_v32 }
 0x329   : > { %22947 = vmatmul.mubr.f32.gmra.mrb[6].mxu1 %v2891_v30 }
 0x32a   : > { %22953 = vmatprep.mubr.f32.mxu1 %v28202_v46 }
 0x32d   : > { %22954 = vmatmul.mubr.f32.vlgmr.msra.gmra.mrb[0].mxu1 %v28217_v19  ;;  %v3526_v19 = vld [vmem:[%s31777_s17 + $0x20] sm:$0xff] }
 0x32e   : > { %22956 = vmatprep.mubr.f32.mxu1 %v28221_v61  ;;  %25488 = vmatpush3.bf16.msra.mxu1 %v28185_v55  ;;  %v3575_v61 = vand.u32 4294901760, %v3526_v19 }
 0x32f   : > { %25490 = vmatprep.subr.bf16.mxu1 %v28194_v29 }
 0x330   : > { %v28326_v62 = vpack.c.bf16 %v3578_v25, %v3575_v61 }
 0x331   : > { %22957 = vmatmul.mubr.f32.gmra.mrb[2].mxu1 %v28236_v20 }
 0x332   : > { %22959 = vmatprep.mubr.f32.mxu1 %v28243_v49 }
 0x335   : > { %22960 = vmatmul.mubr.f32.gmra.mrb[4].mxu1 %v2872_v35 }
 0x336   : > { %22962 = vmatprep.mubr.f32.mxu1 %v2882_v40 }
 0x339   : > { %22963 = vmatmul.mubr.f32.gmra.mrb[6].mxu1 %v2892_v44 }
 0x33a   : > { %22969 = vmatprep.mubr.f32.mxu1 %v2823_v53  ;;  %v3524_v53 = vld [vmem:[%s31777_s17 + $0x10] sm:$0xff] }
 0x33d   : > { %22970 = vmatmul.mubr.f32.vlgmr.msra.gmra.mrb[0].mxu1 %v2833_v5 }
 0x33e   : > { %22972 = vmatprep.mubr.f32.mxu1 %v2843_v15  ;;  %25492 = vmatpush3.bf16.msra.mxu1 %v28194_v29  ;;  %v3584_v15 = vand.u32 4294901760, %v3529_v12 }
 0x33f   : > { %25494 = vmatprep.subr.bf16.mxu1 %v28185_v55 }
 0x341   : > { %22973 = vmatmul.mubr.f32.gmra.mrb[2].mxu1 %v2853_v11 }
 0x342   : > { %22975 = vmatprep.mubr.f32.mxu1 %v2863_v39  ;;  %v3745_v39 = vsub.f32 %v3526_v19, %v3575_v61  ;;  %v27524_v19 = vmov 0   ;;  %v2588_v61 = vld [vmem:[%s928_s6 + $0x10] sm:$0xff] }
 0x343   : > { %27358 = vset.pattern.permute.xlu1 %v27524_v19  ;;  %27357 = vset.pattern.permute.xlu0 %v27524_v19 }
 0x344   : > { %v3746_v35 = vand.u32 4294901760, %v3745_v39 }
 0x345   : > { %22976 = vmatmul.mubr.f32.gmra.mrb[4].mxu1 %v2873_v27 }
 0x346   : > { %22978 = vmatprep.mubr.f32.mxu1 %v2883_v31  ;;  %v3747_v16 = vsub.f32 %v3745_v39, %v3746_v35 }
 0x348   : > { %v3748_v34 = vand.u32 4294901760, %v3747_v16 }
 0x349   : > { %22979 = vmatmul.mubr.f32.gmra.mrb[6].mxu1 %v2893_v51 }
 0x34a   : > { %22985 = vmatprep.mubr.f32.mxu1 %v28198_v42 }
 0x34d   : > { %22986 = vmatmul.mubr.f32.vlgmr.msra.gmra.mrb[0].mxu1 %v28207_v54 }
 0x34e   : > { %22988 = vmatprep.mubr.f32.mxu1 %v28210_v58  ;;  %25496 = vmatpush3.bf16.msra.mxu1 %v28185_v55  ;;  %v3522_v55 = vld [vmem:[%s31777_s17] sm:$0xff] }
 0x34f   : > { %v3563_v29 = vand.u32 4294901760, %v3522_v55 }
 0x351   : > { %22989 = vmatmul.mubr.f32.gmra.mrb[2].mxu1 %v28225_v13  ;;  %v3717_v4 = vsub.f32 %v3522_v55, %v3563_v29 }
 0x352   : > { %22991 = vmatprep.mubr.f32.mxu1 %v28229_v17 }
 0x355   : > { %22992 = vmatmul.mubr.f32.gmra.mrb[4].mxu1 %v28247_v0 }
 0x356   : > { %22994 = vmatprep.mubr.f32.mxu1 %v28251_v32 }
 0x359   : > { %22995 = vmatmul.mubr.f32.gmra.mrb[6].mxu1 %v2891_v30 }
 0x35a   : > { %23001 = vmatprep.mubr.f32.mxu1 %v28198_v42  ;;  %v3566_v42 = vand.u32 4294901760, %v3523_v3 }
 0x35c   : > { %v28306_v46 = vpack.c.bf16 %v3566_v42, %v3563_v29  ;;  %v3724_v5 = vsub.f32 %v3523_v3, %v3566_v42 }
 0x35d   : > { %23002 = vmatmul.mubr.f32.vlgmr.msra.gmra.mrb[0].mxu1 %v28207_v54  ;;  %v3525_v54 = vld [vmem:[%s31777_s17 + $0x18] sm:$0xff] }
 0x35e   : > { %23004 = vmatprep.mubr.f32.mxu1 %v28210_v58  ;;  %25498 = vmatprep.subr.bf16.mxu1 %v28306_v46  ;;  %v3569_v58 = vand.u32 4294901760, %v3524_v53  ;;  %v3572_v48 = vand.u32 4294901760, %v3525_v54  ;;  %v3725_v22 = vand.u32 4294901760, %v3724_v5  ;;  %v28349_v55 = vpack.c.bf16 %v3724_v5, %v3717_v4 }
 0x35f   : > { %25500 = vmatpush3.bf16.msra.mxu1 %v28306_v46 }
 0x360   : > { %v28316_v24 = vpack.c.bf16 %v3572_v48, %v3569_v58  ;;  %v3726_v21 = vsub.f32 %v3724_v5, %v3725_v22  ;;  %v3731_v10 = vsub.f32 %v3524_v53, %v3569_v58  ;;  %v3738_v49 = vsub.f32 %v3525_v54, %v3572_v48  ;;  %v2590_v5 = vld [vmem:[%s928_s6 + $0x20] sm:$0xff] }
 0x361   : > { %23005 = vmatmul.mubr.f32.gmra.mrb[2].mxu1 %v28225_v13  ;;  %v3528_v13 = vld [vmem:[%s31777_s17 + $0x30] sm:$0xff] }
 0x362   : > { %23007 = vmatprep.mubr.f32.mxu1 %v28229_v17  ;;  %25502 = vmatprep.subr.bf16.mxu1 %v28316_v24  ;;  %v3581_v14 = vand.u32 4294901760, %v3528_v13  ;;  %v3718_v17 = vand.u32 4294901760, %v3717_v4  ;;  %v3727_v38 = vand.u32 4294901760, %v3726_v21  ;;  %v3732_v9 = vand.u32 4294901760, %v3731_v10 }
 0x363   : > { %25504 = vmatpush3.bf16.msra.mxu1 %v28316_v24  ;;  %v3739_v11 = vand.u32 4294901760, %v3738_v49  ;;  %v28351_v3 = vpack.c.bf16 %v3738_v49, %v3731_v10 }
 0x364   : > { %25506 = vmatprep.subr.bf16.mxu1 %v28326_v62  ;;  %v28336_v18 = vpack.c.bf16 %v3584_v15, %v3581_v14  ;;  %v3719_v20 = vsub.f32 %v3717_v4, %v3718_v17  ;;  %v3733_v28 = vsub.f32 %v3731_v10, %v3732_v9  ;;  %v3759_v27 = vsub.f32 %v3528_v13, %v3581_v14  ;;  %v2589_v4 = vld [vmem:[%s928_s6 + $0x18] sm:$0xff]  ;;  %v2591_v13 = vld [vmem:[%s928_s6 + $0x28] sm:$0xff] }
 0x365   : > { %23008 = vmatmul.mubr.f32.gmra.mrb[4].mxu1 %v28247_v0  ;;  %v3740_v7 = vsub.f32 %v3738_v49, %v3739_v11  ;;  %v28357_v53 = vpack.c.bf16 %v3725_v22, %v3718_v17  ;;  %v28359_v54 = vpack.c.bf16 %v3739_v11, %v3732_v9  ;;  %v2592_v22 = vld [vmem:[%s928_s6 + $0x30] sm:$0xff]  ;;  %v2593_v11 = vld [vmem:[%s928_s6 + $0x38] sm:$0xff] }
 0x366   : > { %23010 = vmatprep.mubr.f32.mxu1 %v28251_v32  ;;  %v3720_v8 = vand.u32 4294901760, %v3719_v20  ;;  %v3752_v32 = vsub.f32 %v3527_v59, %v3578_v25  ;;  %v3734_v33 = vand.u32 4294901760, %v3733_v28  ;;  %v3760_v43 = vand.u32 4294901760, %v3759_v27  ;;  %v2587_v59 = vld [vmem:[%s928_s6 + $0x8] sm:$0xff]  ;;  %v2586_v25 = vld [vmem:[%s928_s6] sm:$0xff]  ;;  %s31962_s6 = smov %s31961_s9 }
 0x367   : > { %25508 = vmatpush3.bf16.msra.mxu1 %v28326_v62  ;;  %v3741_v6 = vand.u32 4294901760, %v3740_v7  ;;  %4407 = vperm.xlu1 %27358, %v2587_v59  }
 0x368   : > { %25510 = vmatprep.subr.bf16.mxu1 %v28336_v18  ;;  %v28340_v0 = vpack.c.bf16 %v3727_v38, %v3720_v8  ;;  %v3753_v37 = vand.u32 4294901760, %v3752_v32  ;;  %v3761_v36 = vsub.f32 %v3759_v27, %v3760_v43  ;;  %v28353_v29 = vpack.c.bf16 %v3752_v32, %v3745_v39  ;;  %4402 = vperm.xlu0 %27357, %v2586_v25  }
 0x369   : > { %23011 = vmatmul.mubr.f32.gmra.mrb[6].mxu1 %v2891_v30  ;;  %v28343_v40 = vpack.c.bf16 %v3741_v6, %v3734_v33  ;;  %v3766_v30 = vsub.f32 %v3529_v12, %v3584_v15  ;;  %v21062_v12 = vld [vmem:[%s31776_s16] ss:$0 sm:$0xff] }
 0x36a   : > { %v3754_v26 = vsub.f32 %v3752_v32, %v3753_v37  ;;  %v3762_v23 = vand.u32 4294901760, %v3761_v36  ;;  %v28361_v58 = vpack.c.bf16 %v3753_v37, %v3746_v35 }
 0x36b   : > { %25512 = vmatpush3.bf16.msra.mxu1 %v28336_v18  ;;  %v3767_v44 = vand.u32 4294901760, %v3766_v30  ;;  %v28355_v42 = vpack.c.bf16 %v3766_v30, %v3759_v27  ;;  %4412 = vperm.xlu1 %27358, %v2588_v61  }
 0x36c   : > { %25514 = vmatprep.subr.bf16.mxu1 %v28340_v0  ;;  %v3755_v31 = vand.u32 4294901760, %v3754_v26 }
 0x36d   : > { %v3768_v51 = vsub.f32 %v3766_v30, %v3767_v44  ;;  %v28363_v48 = vpack.c.bf16 %v3767_v44, %v3760_v43 }
 0x36e   : > { %v28345_v47 = vpack.c.bf16 %v3755_v31, %v3748_v34 }
 0x36f   : > { %v3769_v2 = vand.u32 4294901760, %v3768_v51  ;;  %4417 = vperm.xlu1 %27358, %v2589_v4  }
 0x371   : > { %v28347_v56 = vpack.c.bf16 %v3769_v2, %v3762_v23 }
 0x373   : > { %4422 = vperm.xlu1 %27358, %v2590_v5  }
 0x377   : > { %4427 = vperm.xlu1 %27358, %v2591_v13  }
 0x37b   : > { %4432 = vperm.xlu1 %27358, %v2592_v22  }
 0x37f   : > { %4437 = vperm.xlu1 %27358, %v2593_v11  }
 0x430   : > { %v23003_v14 = vpop.f32.mrb[0].mxu1 }
 0x431   : > { %v26381_v15 = vadd.f32 %v23003_v14, %v21062_v12  ;;  %v3468_v17 = vpop.f32.mrb[1].mxu1 }
 0x432   : > { %v26382_v20 = vadd.f32 %v21062_v12, %v3468_v17 }
 0x433   : > { %v3515_v21 = vmax.f32 %v26381_v15, 0.0 }
 0x434   : > { %v3514_v10 = vmax.f32 %v26382_v20, 0.0  ;;  %v23006_v49 = vpop.f32.mrb[2].mxu1 }
 0x435   : > { %v3542_v8 = vsel %vm3537_vm5, %v3515_v21, 0  ;;  %v26383_v38 = vadd.f32 %v23006_v49, %v21062_v12  ;;  %v3480_v9 = vpop.f32.mrb[3].mxu1 }
 0x436   : > { %v28373_v28 = vand.u32 4294901760, %v3542_v8  ;;  %v3539_v7 = vsel %vm3537_vm5, %v3514_v10, 0  ;;  %v26384_v39 = vadd.f32 %v21062_v12, %v3480_v9 }
 0x437   : > { %v28376_v32 = vand.u32 4294901760, %v3539_v7  ;;  %v3517_v33 = vmax.f32 %v26383_v38, 0.0 }
 0x438   : > { %v28379_v6 = vsub.f32 %v3542_v8, %v28373_v28  ;;  %v3516_v35 = vmax.f32 %v26384_v39, 0.0  ;;  %v23009_v37 = vpop.f32.mrb[4].mxu1 }
 0x439   : > { %v28382_v16 = vsub.f32 %v3539_v7, %v28376_v32  ;;  %v3548_v26 = vsel %vm3537_vm5, %v3517_v33, 0  ;;  %v26385_v27 = vadd.f32 %v23009_v37, %v21062_v12  ;;  %v3492_v30 = vpop.f32.mrb[5].mxu1 }
 0x43a   : > { %v3647_v34 = vand.u32 4294901760, %v28379_v6  ;;  %v28386_v31 = vand.u32 4294901760, %v3548_v26  ;;  %v3545_v43 = vsel %vm3537_vm5, %v3516_v35, 0  ;;  %v26386_v44 = vadd.f32 %v21062_v12, %v3492_v30 }
 0x43b   : > { %v28389_v36 = vand.u32 4294901760, %v3545_v43  ;;  %v3519_v51 = vmax.f32 %v26385_v27, 0.0  ;;  %v3637_v23 = vand.u32 4294901760, %v28382_v16 }
 0x43c   : > { %v3648_v2 = vsub.f32 %v28379_v6, %v3647_v34  ;;  %v28396_v19 = vsub.f32 %v3548_v26, %v28386_v31  ;;  %v3518_v59 = vmax.f32 %v26386_v44, 0.0  ;;  %v23012_v61 = vpop.f32.mrb[6].mxu1 }
 0x43d   : > { %v28399_v25 = vsub.f32 %v3545_v43, %v28389_v36  ;;  %v3554_v4 = vsel %vm3537_vm5, %v3519_v51, 0  ;;  %v26387_v5 = vadd.f32 %v23012_v61, %v21062_v12  ;;  %v3504_v13 = vpop.f32.mrb[7].mxu1  ;;  %v3638_v14 = vsub.f32 %v28382_v16, %v3637_v23 }
 0x43e   : > { %v28405_v15 = vand.u32 4294901760, %v3554_v4  ;;  %v3551_v17 = vsel %vm3537_vm5, %v3518_v59, 0  ;;  %v26388_v22 = vadd.f32 %v21062_v12, %v3504_v13  ;;  %v3649_v8 = vand.u32 4294901760, %v3648_v2 }
 0x43f   : > { %v28408_v20 = vand.u32 4294901760, %v3551_v17  ;;  %v3521_v21 = vmax.f32 %v26387_v5, 0.0  ;;  %v3639_v10 = vand.u32 4294901760, %v3638_v14  ;;  %v3657_v49 = vand.u32 4294901760, %v28399_v25 }
 0x440   : > { %v28412_v38 = vsub.f32 %v3554_v4, %v28405_v15  ;;  %v3520_v9 = vmax.f32 %v26388_v22, 0.0  ;;  %v3667_v11 = vand.u32 4294901760, %v28396_v19 }
 0x441   : > { %v28416_v7 = vsub.f32 %v3551_v17, %v28408_v20  ;;  %v3560_v39 = vsel %vm3537_vm5, %v3521_v21, 0  ;;  %23029 = vmatprep.mubr.f32.mxu1 %v3639_v10  ;;  %v3658_v12 = vsub.f32 %v28399_v25, %v3657_v49 }
 0x442   : > { %v28422_v33 = vand.u32 4294901760, %v3560_v39  ;;  %v3557_v35 = vsel %vm3537_vm5, %v3520_v9, 0  ;;  %23030 = vmatmul.mubr.f32.vlgmr.msra.gmra.mrb[8].mxu1 %v3649_v8  ;;  %v3668_v37 = vsub.f32 %v28396_v19, %v3667_v11  ;;  %v3687_v26 = vand.u32 4294901760, %v28412_v38 }
 0x443   : > { %v28429_v27 = vand.u32 4294901760, %v3557_v35  ;;  %25516 = vmatpush3.bf16.msra.mxu1 %v28340_v0  ;;  %v3659_v30 = vand.u32 4294901760, %v3658_v12  ;;  %v3677_v43 = vand.u32 4294901760, %v28416_v7 }
 0x444   : > { %v28434_v44 = vsub.f32 %v3560_v39, %v28422_v33  ;;  %v3669_v51 = vand.u32 4294901760, %v3668_v37  ;;  %25518 = vmatprep.subr.bf16.mxu1 %v28343_v40  ;;  %v3688_v2 = vsub.f32 %v28412_v38, %v3687_v26 }
 0x445   : > { %v28441_v59 = vsub.f32 %v3557_v35, %v28429_v27  ;;  %23032 = vmatprep.mubr.f32.mxu1 %v3659_v30  ;;  %v3678_v0 = vsub.f32 %v28416_v7, %v3677_v43 }
 0x446   : > { %23033 = vmatmul.mubr.f32.gmra.mrb[10].mxu1 %v3669_v51  ;;  %v3707_v61 = vand.u32 4294901760, %v28434_v44  ;;  %v3689_v13 = vand.u32 4294901760, %v3688_v2 }
 0x447   : > { %25520 = vmatpush3.bf16.msra.mxu1 %v28343_v40  ;;  %v3679_v4 = vand.u32 4294901760, %v3678_v0  ;;  %v3697_v5 = vand.u32 4294901760, %v28441_v59 }
 0x448   : > { %25522 = vmatprep.subr.bf16.mxu1 %v28345_v47  ;;  %v3708_v14 = vsub.f32 %v28434_v44, %v3707_v61 }
 0x449   : > { %23035 = vmatprep.mubr.f32.mxu1 %v3679_v4  ;;  %v3698_v17 = vsub.f32 %v28441_v59, %v3697_v5 }
 0x44a   : > { %23036 = vmatmul.mubr.f32.gmra.mrb[12].mxu1 %v3689_v13  ;;  %v3709_v21 = vand.u32 4294901760, %v3708_v14 }
 0x44b   : > { %25524 = vmatpush3.bf16.msra.mxu1 %v28345_v47  ;;  %v3699_v22 = vand.u32 4294901760, %v3698_v17  ;;  %v2596_v47 = vld [vmem:[%s31949_s7] sm:$0xff] }
 0x44c   : > { %25526 = vmatprep.subr.bf16.mxu1 %v28347_v56 }
 0x44d   : > { %23038 = vmatprep.mubr.f32.mxu1 %v3699_v22 }
 0x44e   : > { %23039 = vmatmul.mubr.f32.gmra.mrb[14].mxu1 %v3709_v21 }
 0x44f   : > { %25528 = vmatpush3.bf16.msra.mxu1 %v28347_v56  ;;  %23057 = vmatprep.mubr.f32.mxu1 %v28376_v32 }
 0x450   : > { %25530 = vmatprep.subr.bf16.mxu1 %v28349_v55 }
 0x452   : > { %23058 = vmatmul.mubr.f32.vlgmr.msra.gmra.mrb[8].mxu1 %v28373_v28 }
 0x453   : > { %23060 = vmatprep.mubr.f32.mxu1 %v28389_v36  ;;  %25532 = vmatpush3.bf16.msra.mxu1 %v28349_v55  ;;  %v4449_v55 = vsel %vm3537_vm5, %v2596_v47, 0 }
 0x454   : > { %25534 = vmatprep.subr.bf16.mxu1 %v28351_v3 }
 0x456   : > { %23061 = vmatmul.mubr.f32.gmra.mrb[10].mxu1 %v28386_v31 }
 0x457   : > { %23063 = vmatprep.mubr.f32.mxu1 %v28408_v20  ;;  %25536 = vmatpush3.bf16.msra.mxu1 %v28351_v3  ;;  %v21063_v3 = vld [vmem:[%s31778_s18] ss:$0 sm:$0xff] }
 0x458   : > { %25538 = vmatprep.subr.bf16.mxu1 %v28353_v29 }
 0x45a   : > { %23064 = vmatmul.mubr.f32.gmra.mrb[12].mxu1 %v28405_v15 }
 0x45b   : > { %23066 = vmatprep.mubr.f32.mxu1 %v28429_v27  ;;  %25540 = vmatpush3.bf16.msra.mxu1 %v28353_v29  ;;  %v28552_v29 = vand.u32 4294901760, %v4449_v55 }
 0x45c   : > { %25542 = vmatprep.subr.bf16.mxu1 %v28355_v42 }
 0x45d   : > { %31950 = vst [vmem:[#allocation12_spill] sm:$0xff] %v28552_v29 }
 0x45e   : > { %23067 = vmatmul.mubr.f32.gmra.mrb[14].mxu1 %v28422_v33 }
 0x45f   : > { %25544 = vmatpush3.bf16.msra.mxu1 %v28355_v42  ;;  %23085 = vmatprep.mubr.f32.mxu1 %v28382_v16 }
 0x460   : > { %25546 = vmatprep.subr.bf16.mxu1 %v28306_v46 }
 0x462   : > { %23086 = vmatmul.mubr.f32.vlgmr.msra.gmra.mrb[8].mxu1 %v28379_v6  ;;  %v28560_v6 = vsub.f32 %v4449_v55, %v28552_v29 }
 0x463   : > { %23088 = vmatprep.mubr.f32.mxu1 %v28399_v25  ;;  %25548 = vmatpush3.bf16.msra.mxu1 %v28306_v46 }
 0x464   : > { %25550 = vmatprep.subr.bf16.mxu1 %v28316_v24  ;;  %31951 = vst [vmem:[#allocation13_spill] sm:$0xff] %v28560_v6  ;;  %v28569_v10 = vand.u32 4294901760, %v28560_v6 }
 0x466   : > { %23089 = vmatmul.mubr.f32.gmra.mrb[10].mxu1 %v28396_v19  ;;  %31952 = vst [vmem:[#allocation14_spill] sm:$0xff] %v28569_v10 }
 0x467   : > { %23091 = vmatprep.mubr.f32.mxu1 %v28416_v7  ;;  %25552 = vmatpush3.bf16.msra.mxu1 %v28316_v24 }
 0x468   : > { %25554 = vmatprep.subr.bf16.mxu1 %v28326_v62 }
 0x46a   : > { %23092 = vmatmul.mubr.f32.gmra.mrb[12].mxu1 %v28412_v38 }
 0x46b   : > { %23094 = vmatprep.mubr.f32.mxu1 %v28441_v59  ;;  %25556 = vmatpush3.bf16.msra.mxu1 %v28326_v62 }
 0x46c   : > { %25558 = vmatprep.subr.bf16.mxu1 %v28336_v18 }
 0x46e   : > { %23095 = vmatmul.mubr.f32.gmra.mrb[14].mxu1 %v28434_v44  ;;  %v4527_v44 = vsub.f32 %v28560_v6, %v28569_v10 }
 0x46f   : > { %25560 = vmatpush3.bf16.msra.mxu1 %v28336_v18  ;;  %23113 = vmatprep.mubr.f32.mxu1 %v3637_v23 }
 0x470   : > { %25562 = vmatprep.subr.bf16.mxu1 %v28357_v53 }
 0x472   : > { %23114 = vmatmul.mubr.f32.vlgmr.msra.gmra.mrb[8].mxu1 %v3647_v34 }
 0x473   : > { %23116 = vmatprep.mubr.f32.mxu1 %v3657_v49  ;;  %25564 = vmatpush3.bf16.msra.mxu1 %v28357_v53 }
 0x474   : > { %25566 = vmatprep.subr.bf16.mxu1 %v28359_v54 }
 0x476   : > { %23117 = vmatmul.mubr.f32.gmra.mrb[10].mxu1 %v3667_v11 }
 0x477   : > { %23119 = vmatprep.mubr.f32.mxu1 %v3677_v43  ;;  %25568 = vmatpush3.bf16.msra.mxu1 %v28359_v54 }
 0x478   : > { %25570 = vmatprep.subr.bf16.mxu1 %v28361_v58 }
 0x47a   : > { %23120 = vmatmul.mubr.f32.gmra.mrb[12].mxu1 %v3687_v26 }
 0x47b   : > { %23122 = vmatprep.mubr.f32.mxu1 %v3697_v5  ;;  %25572 = vmatpush3.bf16.msra.mxu1 %v28361_v58  ;;  %v28554_v58 = vpop.permute.xlu0 %4402 }
 0x47c   : > { %25574 = vmatprep.subr.bf16.mxu1 %v28363_v48 }
 0x47e   : > { %23123 = vmatmul.mubr.f32.gmra.mrb[14].mxu1 %v3707_v61 }
 0x47f   : > { %25576 = vmatpush3.bf16.msra.mxu1 %v28363_v48  ;;  %23141 = vmatprep.mubr.f32.mxu1 %v28376_v32 }
 0x480   : > { %25578 = vmatprep.subr.bf16.mxu1 %v28306_v46 }
 0x482   : > { %23142 = vmatmul.mubr.f32.vlgmr.msra.gmra.mrb[8].mxu1 %v28373_v28 }
 0x483   : > { %23144 = vmatprep.mubr.f32.mxu1 %v28389_v36  ;;  %25580 = vmatpush3.bf16.msra.mxu1 %v28306_v46  ;;  %v31801_v46 = vmov 0.0|0.0  }
 0x484   : > { %25582 = vmatprep.subr.bf16.mxu1 %v28316_v24  ;;  %25737 = vmatprep.subr.bf16.mxu0 %v31801_v46 }
 0x486   : > { %23145 = vmatmul.mubr.f32.gmra.mrb[10].mxu1 %v28386_v31 }
 0x487   : > { %23147 = vmatprep.mubr.f32.mxu1 %v28408_v20  ;;  %25584 = vmatpush3.bf16.msra.mxu1 %v28316_v24  ;;  %v31799_v24 = vmov 0.0  }
 0x488   : > { %25586 = vmatprep.subr.bf16.mxu1 %v28326_v62  ;;  %23413 = vmatprep.mubr.msk.f32.mxu0 %vm27526_vm6, %v31799_v24 }
 0x48a   : > { %23148 = vmatmul.mubr.f32.gmra.mrb[12].mxu1 %v28405_v15 }
 0x48b   : > { %23150 = vmatprep.mubr.f32.mxu1 %v28429_v27  ;;  %25588 = vmatpush3.bf16.msra.mxu1 %v28326_v62  ;;  %v28537_v62 = vpop.permute.xlu1 %4407 }
 0x48c   : > { %25590 = vmatprep.subr.bf16.mxu1 %v28336_v18 }
 0x48e   : > { %23151 = vmatmul.mubr.f32.gmra.mrb[14].mxu1 %v28422_v33 }
 0x48f   : > { %25592 = vmatpush3.bf16.msra.mxu1 %v28336_v18  ;;  %23169 = vmatprep.mubr.f32.mxu1 %v28376_v32  ;;  %v28539_v18 = vpop.permute.xlu1 %4412 }
 0x490   : > { %25593 = vmatprep.subr.bf16.mxu1 %v31801_v46 }
 0x492   : > { %23170 = vmatmul.mubr.f32.vlgmr.msra.gmra.mrb[8].mxu1 %v28373_v28 }
 0x493   : > { %23172 = vmatprep.mubr.f32.mxu1 %v28389_v36  ;;  %v28541_v40 = vpop.permute.xlu1 %4417 }
 0x496   : > { %23173 = vmatmul.mubr.f32.gmra.mrb[10].mxu1 %v28386_v31 }
 0x497   : > { %23175 = vmatprep.mubr.f32.mxu1 %v28408_v20  ;;  %v28546_v56 = vpop.permute.xlu1 %4422 }
 0x49a   : > { %23176 = vmatmul.mubr.f32.gmra.mrb[12].mxu1 %v28405_v15 }
 0x49b   : > { %23178 = vmatprep.mubr.f32.mxu1 %v28429_v27  ;;  %v28556_v48 = vpop.permute.xlu1 %4427 }
 0x49e   : > { %23179 = vmatmul.mubr.f32.gmra.mrb[14].mxu1 %v28422_v33 }
 0x49f   : > { %23197 = vmatprep.mubr.msk.f32.mxu1 %vm27526_vm6, %v31799_v24  ;;  %v28571_v49 = vpop.permute.xlu1 %4432 }
 0x4a3   : > { %v28600_v21 = vpop.permute.xlu1 %4437 }
 0x565   : > { %v23171_v42 = vpop.f32.mrb[8].mxu1 }
 0x566   : > { %v26389_v53 = vadd.f32 %v23171_v42, %v21063_v3  ;;  %v4354_v54 = vpop.f32.mrb[9].mxu1 }
 0x567   : > { %v26390_v28 = vadd.f32 %v21063_v3, %v4354_v54 }
 0x568   : > { %v4441_v32 = vmul.f32 %v26389_v53, %v28537_v62 }
 0x569   : > { %v4440_v16 = vmul.f32 %v26390_v28, %v28554_v58  ;;  %v23174_v34 = vpop.f32.mrb[10].mxu1 }
 0x56a   : > { %v4455_v31 = vand.u32 4294901760, %v4441_v32  ;;  %v26391_v36 = vadd.f32 %v23174_v34, %v21063_v3  ;;  %4999 = vrot.lane.b32.xlu0 %v4441_v32, %s31797_s1  ;;  %v4366_v23 = vpop.f32.mrb[11].mxu1 }
 0x56b   : > { %v4452_v19 = vand.u32 4294901760, %v4440_v16  ;;  %v26392_v25 = vadd.f32 %v21063_v3, %v4366_v23  ;;  %4997 = vrot.lane.b32.xlu1 %v4440_v16, %s31797_s1 }
 0x56c   : > { %v28565_v15 = vsub.f32 %v4441_v32, %v4455_v31  ;;  %v4443_v20 = vmul.f32 %v26391_v36, %v28541_v40 }
 0x56d   : > { %v28573_v8 = vsub.f32 %v4440_v16, %v4452_v19  ;;  %v4442_v38 = vmul.f32 %v26392_v25, %v28539_v18  ;;  %v23177_v9 = vpop.f32.mrb[12].mxu1  ;;  %v28576_v11 = vpack.c.bf16 %v4455_v31, %v4452_v19 }
 0x56e   : > { %v4544_v7 = vand.u32 4294901760, %v28565_v15  ;;  %v4461_v39 = vand.u32 4294901760, %v4443_v20  ;;  %v26393_v12 = vadd.f32 %v23177_v9, %v21063_v3  ;;  %5003 = vrot.lane.b32.xlu0 %v4443_v20, %s31797_s1  ;;  %v4378_v33 = vpop.f32.mrb[13].mxu1 }
 0x56f   : > { %v4537_v35 = vand.u32 4294901760, %v28573_v8  ;;  %v4458_v37 = vand.u32 4294901760, %v4442_v38  ;;  %v26394_v26 = vadd.f32 %v21063_v3, %v4378_v33  ;;  %5001 = vrot.lane.b32.xlu1 %v4442_v38, %s31797_s1  ;;  %25595 = vmatpush3.bf16.msra.mxu1 %v28576_v11  ;;  %v25618_v27 = vpack.c.bf16 %v28565_v15, %v28573_v8 }
 0x570   : > { %v28585_v30 = vsub.f32 %v4443_v20, %v4461_v39  ;;  %v4445_v43 = vmul.f32 %v26393_v12, %v28556_v48  ;;  %25596 = vmatprep.subr.bf16.mxu1 %v31801_v46  ;;  %v4545_v51 = vsub.f32 %v28565_v15, %v4544_v7  ;;  %v2595_v15 = vld [vmem:[%s31953_s10] sm:$0xff]  ;;  %s923_s10 = scalar_lea.vmem %s31960_s0, %s21056_s12  ;;  %s32037_s0 = sld [smem:[#allocation103_spill]] }
 0x571   : > { %v28592_v2 = vsub.f32 %v4442_v38, %v4458_v37  ;;  %v4444_v59 = vmul.f32 %v26394_v26, %v28546_v56  ;;  %v23180_v0 = vpop.f32.mrb[14].mxu1  ;;  %v28595_v61 = vpack.c.bf16 %v4461_v39, %v4458_v37  ;;  %v4538_v4 = vsub.f32 %v28573_v8, %v4537_v35 }
 0x572   : > { %v4558_v5 = vand.u32 4294901760, %v28585_v30  ;;  %v4467_v13 = vand.u32 4294901760, %v4445_v43  ;;  %v26395_v14 = vadd.f32 %v23180_v0, %v21063_v3  ;;  %5007 = vrot.lane.b32.xlu0 %v4445_v43, %s31797_s1  ;;  %v4390_v17 = vpop.f32.mrb[15].mxu1  ;;  %v4546_v22 = vand.u32 4294901760, %v4545_v51 }
 0x573   : > { %v4551_v47 = vand.u32 4294901760, %v28592_v2  ;;  %v4464_v55 = vand.u32 4294901760, %v4444_v59  ;;  %v26396_v42 = vadd.f32 %v21063_v3, %v4390_v17  ;;  %5005 = vrot.lane.b32.xlu1 %v4444_v59, %s31797_s1  ;;  %25598 = vmatpush3.bf16.msra.mxu1 %v28595_v61  ;;  %v4539_v53 = vand.u32 4294901760, %v4538_v4 }
 0x574   : > { %v4571_v54 = vsub.f32 %v4445_v43, %v4467_v13  ;;  %v4447_v28 = vmul.f32 %v26395_v14, %v28600_v21  ;;  %25599 = vmatprep.subr.bf16.mxu1 %v31801_v46  ;;  %v4559_v32 = vsub.f32 %v28585_v30, %v4558_v5  ;;  %v25621_v16 = vpack.c.bf16 %v28585_v30, %v28592_v2 }
 0x575   : > { %v4564_v34 = vsub.f32 %v4444_v59, %v4464_v55  ;;  %v4446_v31 = vmul.f32 %v26396_v42, %v28571_v49  ;;  %v28611_v36 = vpack.c.bf16 %v4467_v13, %v4464_v55  ;;  %v25606_v3 = vpack.c.bf16 %v4546_v22, %v4539_v53 }
 0x576   : > { %v4572_v23 = vand.u32 4294901760, %v4571_v54  ;;  %v4473_v19 = vand.u32 4294901760, %v4447_v28  ;;  %5011 = vrot.lane.b32.xlu0 %v4447_v28, %s31797_s1  ;;  %v4552_v25 = vsub.f32 %v28592_v2, %v4551_v47  ;;  %v4560_v20 = vand.u32 4294901760, %v4559_v32 }
 0x577   : > { %v4565_v38 = vand.u32 4294901760, %v4564_v34  ;;  %v4470_v9 = vand.u32 4294901760, %v4446_v31  ;;  %5009 = vrot.lane.b32.xlu1 %v4446_v31, %s31797_s1  ;;  %25601 = vmatpush3.bf16.msra.mxu1 %v28611_v36  ;;  %v25624_v39 = vpack.c.bf16 %v4571_v54, %v4564_v34  ;;  %v25642_v12 = vpack.c.bf16 %v4544_v7, %v4537_v35  ;;  %s32029_s1 = sld [smem:[#allocation102_spill]] }
 0x578   : > { %v4585_v33 = vsub.f32 %v4447_v28, %v4473_v19  ;;  %25602 = vmatprep.subr.bf16.mxu1 %v31801_v46  ;;  %v4553_v37 = vand.u32 4294901760, %v4552_v25  ;;  %v4573_v26 = vsub.f32 %v4571_v54, %v4572_v23  ;;  %v25645_v30 = vpack.c.bf16 %v4558_v5, %v4551_v47 }
 0x579   : > { %v4578_v43 = vsub.f32 %v4446_v31, %v4470_v9  ;;  %v28618_v51 = vpack.c.bf16 %v4473_v19, %v4470_v9  ;;  %v4566_v59 = vsub.f32 %v4564_v34, %v4565_v38  ;;  %v25648_v2 = vpack.c.bf16 %v4572_v23, %v4565_v38 }
 0x57a   : > { %v4586_v0 = vand.u32 4294901760, %v4585_v33  ;;  %v28620_v4 = vand.u32 4294901760, %v4527_v44  ;;  %v25609_v13 = vpack.c.bf16 %v4560_v20, %v4553_v37  ;;  %v4574_v14 = vand.u32 4294901760, %v4573_v26 }
 0x57b   : > { %v4579_v17 = vand.u32 4294901760, %v4578_v43  ;;  %25604 = vmatpush3.bf16.msra.mxu1 %v28618_v51  ;;  %v4567_v7 = vand.u32 4294901760, %v4566_v59  ;;  %v25627_v35 = vpack.c.bf16 %v4585_v33, %v4578_v43  ;;  %v5022_v8 = vsel %vm3537_vm5, %v2595_v15, 0 }
 0x57c   : > { %25605 = vmatprep.subr.bf16.mxu1 %v31801_v46  ;;  %v4587_v22 = vsub.f32 %v4585_v33, %v4586_v0  ;;  %v28677_v54 = vand.u32 4294901760, %v5022_v8 }
 0x57d   : > { %v25612_v55 = vpack.c.bf16 %v4574_v14, %v4567_v7  ;;  %v4580_v5 = vsub.f32 %v4578_v43, %v4579_v17  ;;  %v25651_v47 = vpack.c.bf16 %v4586_v0, %v4579_v17 }
 0x57e   : > { %23198 = vmatmul.mubr.f32.vlgmr.msra.gmra.mrb[16].mxu1 %v28620_v4  ;;  %v4588_v42 = vand.u32 4294901760, %v4587_v22  ;;  %31954 = vst [vmem:[#allocation15_spill] sm:$0xff] %v28677_v54  ;;  %v28686_v23 = vsub.f32 %v5022_v8, %v28677_v54 }
 0x57f   : > { %25607 = vmatpush3.bf16.msra.mxu1 %v25606_v3  ;;  %v4581_v53 = vand.u32 4294901760, %v4580_v5  ;;  %23216 = vmatprep.mubr.msk.f32.mxu1 %vm27526_vm6, %v31799_v24 }
 0x580   : > { %25608 = vmatprep.subr.bf16.mxu1 %v31801_v46  ;;  %31955 = vst [vmem:[#allocation16_spill] sm:$0xff] %v28686_v23  ;;  %v28699_v26 = vand.u32 4294901760, %v28686_v23 }
 0x581   : > { %v25615_v44 = vpack.c.bf16 %v4588_v42, %v4581_v53 }
 0x582   : > { %31956 = vst [vmem:[#allocation17_spill] sm:$0xff] %v28699_v26  ;;  %v5100_v22 = vsub.f32 %v28686_v23, %v28699_v26 }
 0x583   : > { %25610 = vmatpush3.bf16.msra.mxu1 %v25609_v13 }
 0x584   : > { %25611 = vmatprep.subr.bf16.mxu1 %v31801_v46 }
 0x587   : > { %25613 = vmatpush3.bf16.msra.mxu1 %v25612_v55 }
 0x588   : > { %25614 = vmatprep.subr.bf16.mxu1 %v31801_v46 }
 0x58b   : > { %25616 = vmatpush3.bf16.msra.mxu1 %v25615_v44 }
 0x58c   : > { %25617 = vmatprep.subr.bf16.mxu1 %v31801_v46 }
 0x58e   : > { %23217 = vmatmul.mubr.f32.vlgmr.msra.gmra.mrb[16].mxu1 %v28552_v29 }
 0x58f   : > { %25619 = vmatpush3.bf16.msra.mxu1 %v25618_v27  ;;  %23235 = vmatprep.mubr.msk.f32.mxu1 %vm27526_vm6, %v31799_v24 }
 0x590   : > { %25620 = vmatprep.subr.bf16.mxu1 %v31801_v46 }
 0x593   : > { %25622 = vmatpush3.bf16.msra.mxu1 %v25621_v16 }
 0x594   : > { %25623 = vmatprep.subr.bf16.mxu1 %v31801_v46 }
 0x597   : > { %25625 = vmatpush3.bf16.msra.mxu1 %v25624_v39 }
 0x598   : > { %25626 = vmatprep.subr.bf16.mxu1 %v31801_v46 }
 0x59b   : > { %25628 = vmatpush3.bf16.msra.mxu1 %v25627_v35 }
 0x59c   : > { %25629 = vmatprep.subr.bf16.mxu1 %v31801_v46 }
 0x59e   : > { %23236 = vmatmul.mubr.f32.vlgmr.msra.gmra.mrb[16].mxu1 %v28560_v6 }
 0x59f   : > { %25631 = vmatpush3.bf16.msra.mxu1 %v28576_v11  ;;  %23254 = vmatprep.mubr.msk.f32.mxu1 %vm27526_vm6, %v31799_v24 }
 0x5a0   : > { %25632 = vmatprep.subr.bf16.mxu1 %v31801_v46 }
 0x5a3   : > { %25634 = vmatpush3.bf16.msra.mxu1 %v28595_v61 }
 0x5a4   : > { %25635 = vmatprep.subr.bf16.mxu1 %v31801_v46 }
 0x5a7   : > { %25637 = vmatpush3.bf16.msra.mxu1 %v28611_v36 }
 0x5a8   : > { %25638 = vmatprep.subr.bf16.mxu1 %v31801_v46 }
 0x5ab   : > { %25640 = vmatpush3.bf16.msra.mxu1 %v28618_v51 }
 0x5ac   : > { %25641 = vmatprep.subr.bf16.mxu1 %v31801_v46 }
 0x5ae   : > { %23255 = vmatmul.mubr.f32.vlgmr.msra.gmra.mrb[16].mxu1 %v28569_v10 }
 0x5af   : > { %25643 = vmatpush3.bf16.msra.mxu1 %v25642_v12  ;;  %23273 = vmatprep.mubr.msk.f32.mxu1 %vm27526_vm6, %v31799_v24 }
 0x5b0   : > { %25644 = vmatprep.subr.bf16.mxu1 %v31801_v46 }
 0x5b3   : > { %25646 = vmatpush3.bf16.msra.mxu1 %v25645_v30 }
 0x5b4   : > { %25647 = vmatprep.subr.bf16.mxu1 %v31801_v46 }
 0x5b7   : > { %25649 = vmatpush3.bf16.msra.mxu1 %v25648_v2 }
 0x5b8   : > { %25650 = vmatprep.subr.bf16.mxu1 %v31801_v46 }
 0x5bb   : > { %25652 = vmatpush3.bf16.msra.mxu1 %v25651_v47 }
 0x5bc   : > { %25653 = vmatprep.subr.bf16.mxu1 %v31801_v46 }
 0x5be   : > { %23274 = vmatmul.mubr.f32.vlgmr.msra.gmra.mrb[16].mxu1 %v28552_v29 }
 0x5bf   : > { %25655 = vmatpush3.bf16.msra.mxu1 %v28576_v11  ;;  %23292 = vmatprep.mubr.msk.f32.mxu1 %vm27526_vm6, %v31799_v24 }
 0x5c0   : > { %25656 = vmatprep.subr.bf16.mxu1 %v31801_v46 }
 0x5c3   : > { %25658 = vmatpush3.bf16.msra.mxu1 %v28595_v61 }
 0x5c4   : > { %25659 = vmatprep.subr.bf16.mxu1 %v31801_v46 }
 0x5c7   : > { %25661 = vmatpush3.bf16.msra.mxu1 %v28611_v36 }
 0x5c8   : > { %25662 = vmatprep.subr.bf16.mxu1 %v31801_v46 }
 0x5cb   : > { %25664 = vmatpush3.bf16.msra.mxu1 %v28618_v51 }
 0x5cc   : > { %25665 = vmatprep.subr.bf16.mxu1 %v31801_v46 }
 0x5ce   : > { %23293 = vmatmul.mubr.f32.vlgmr.msra.gmra.mrb[16].mxu1 %v28552_v29 }
 0x5cf   : > { %23311 = vmatprep.mubr.msk.f32.mxu1 %vm27526_vm6, %v31799_v24 }
 0x5dc   : > { %v5000_v11 = vpop.permute.xlu0 %4999 }
 0x5dd   : > { %v5028_v27 = vand.u32 4294901760, %v5000_v11  ;;  %v4998_v61 = vpop.permute.xlu1 %4997 }
 0x5de   : > { %v5025_v28 = vand.u32 4294901760, %v4998_v61 }
 0x5df   : > { %v28679_v32 = vsub.f32 %v5000_v11, %v5028_v27 }
 0x5e0   : > { %v28681_v16 = vpack.c.bf16 %v5028_v27, %v5025_v28  ;;  %v28683_v34 = vsub.f32 %v4998_v61, %v5025_v28  ;;  %v5004_v31 = vpop.permute.xlu0 %5003  ;;  %v28735_v61 = vand.u32 4294901760, %v5100_v22 }
 0x5e1   : > { %v5034_v36 = vand.u32 4294901760, %v5004_v31  ;;  %v5002_v3 = vpop.permute.xlu1 %5001  ;;  %v5117_v19 = vand.u32 4294901760, %v28679_v32 }
 0x5e2   : > { %v5031_v25 = vand.u32 4294901760, %v5002_v3  ;;  %25667 = vmatpush3.bf16.msra.mxu1 %v28681_v16  ;;  %v5110_v20 = vand.u32 4294901760, %v28683_v34  ;;  %31957 = vst [vmem:[#allocation18_spill] sm:$0xff] %v28735_v61 }
 0x5e3   : > { %v28691_v38 = vsub.f32 %v5004_v31, %v5034_v36  ;;  %25668 = vmatprep.subr.bf16.mxu1 %v31801_v46  ;;  %v5118_v30 = vsub.f32 %v28679_v32, %v5117_v19 }
 0x5e4   : > { %v28694_v9 = vpack.c.bf16 %v5034_v36, %v5031_v25  ;;  %v28696_v39 = vsub.f32 %v5002_v3, %v5031_v25  ;;  %v5008_v12 = vpop.permute.xlu0 %5007  ;;  %v5111_v51 = vsub.f32 %v28683_v34, %v5110_v20 }
 0x5e5   : > { %v5040_v33 = vand.u32 4294901760, %v5008_v12  ;;  %v5006_v37 = vpop.permute.xlu1 %5005  ;;  %v5131_v59 = vand.u32 4294901760, %v28691_v38  ;;  %v5119_v55 = vand.u32 4294901760, %v5118_v30 }
 0x5e6   : > { %v5037_v43 = vand.u32 4294901760, %v5006_v37  ;;  %25670 = vmatpush3.bf16.msra.mxu1 %v28694_v9  ;;  %v5124_v2 = vand.u32 4294901760, %v28696_v39  ;;  %v5112_v47 = vand.u32 4294901760, %v5111_v51 }
 0x5e7   : > { %v28710_v0 = vsub.f32 %v5008_v12, %v5040_v33  ;;  %25671 = vmatprep.subr.bf16.mxu1 %v31801_v46  ;;  %v5132_v42 = vsub.f32 %v28691_v38, %v5131_v59 }
 0x5e8   : > { %v28713_v13 = vpack.c.bf16 %v5040_v33, %v5037_v43  ;;  %v28715_v14 = vsub.f32 %v5006_v37, %v5037_v43  ;;  %v5012_v17 = vpop.permute.xlu0 %5011  ;;  %v5125_v53 = vsub.f32 %v28696_v39, %v5124_v2  ;;  %v25678_v36 = vpack.c.bf16 %v5119_v55, %v5112_v47 }
 0x5e9   : > { %v5046_v7 = vand.u32 4294901760, %v5012_v17  ;;  %v5010_v35 = vpop.permute.xlu1 %5009  ;;  %v5145_v44 = vand.u32 4294901760, %v28710_v0  ;;  %v5133_v28 = vand.u32 4294901760, %v5132_v42  ;;  %v25693_v47 = vpack.c.bf16 %v28691_v38, %v28696_v39 }
 0x5ea   : > { %v5043_v5 = vand.u32 4294901760, %v5010_v35  ;;  %25673 = vmatpush3.bf16.msra.mxu1 %v28713_v13  ;;  %v5138_v15 = vand.u32 4294901760, %v28715_v14  ;;  %v5126_v31 = vand.u32 4294901760, %v5125_v53  ;;  %v25696_v42 = vpack.c.bf16 %v28710_v0, %v28715_v14 }
 0x5eb   : > { %25674 = vmatprep.subr.bf16.mxu1 %v31801_v46  ;;  %v28729_v8 = vsub.f32 %v5012_v17, %v5046_v7  ;;  %v5146_v3 = vsub.f32 %v28710_v0, %v5145_v44 }
 0x5ec   : > { %v28731_v11 = vpack.c.bf16 %v5046_v7, %v5043_v5  ;;  %v28733_v27 = vsub.f32 %v5010_v35, %v5043_v5  ;;  %v5139_v25 = vsub.f32 %v28715_v14, %v5138_v15  ;;  %v25681_v37 = vpack.c.bf16 %v5133_v28, %v5126_v31  ;;  %v2594_v14 = vld [vmem:[%s923_s10] sm:$0xff] }
 0x5ed   : > { %v5159_v12 = vand.u32 4294901760, %v28729_v8  ;;  %v5147_v30 = vand.u32 4294901760, %v5146_v3  ;;  %v25690_v5 = vpack.c.bf16 %v28679_v32, %v28683_v34  ;;  %v25720_v32 = vpack.c.bf16 %v5145_v44, %v5138_v15  ;;  %v5575_v44 = vld [vmem:[%s31779_s19] sm:$0xff]  ;;  %v5576_v15 = vld [vmem:[%s31779_s19 + $0x8] sm:$0xff] }
 0x5ee   : > { %25676 = vmatpush3.bf16.msra.mxu1 %v28731_v11  ;;  %v5152_v33 = vand.u32 4294901760, %v28733_v27  ;;  %v5140_v43 = vand.u32 4294901760, %v5139_v25  ;;  %v25699_v53 = vpack.c.bf16 %v28729_v8, %v28733_v27  ;;  %v5591_v28 = vand.u32 4294901760, %v5576_v15 }
 0x5ef   : > { %25677 = vmatprep.subr.bf16.mxu1 %v31801_v46  ;;  %v5160_v51 = vsub.f32 %v28729_v8, %v5159_v12  ;;  %v25714_v8 = vpack.c.bf16 %v5117_v19, %v5110_v20 }
 0x5f0   : > { %v5153_v17 = vsub.f32 %v28733_v27, %v5152_v33  ;;  %v25684_v22 = vpack.c.bf16 %v5147_v30, %v5140_v43  ;;  %v25717_v27 = vpack.c.bf16 %v5131_v59, %v5124_v2  ;;  %v25723_v34 = vpack.c.bf16 %v5159_v12, %v5152_v33 }
 0x5f1   : > { %23312 = vmatmul.mubr.f32.vlgmr.msra.gmra.mrb[16].mxu1 %v28735_v61  ;;  %v5161_v7 = vand.u32 4294901760, %v5160_v51  ;;  %v5673_v3 = vsub.f32 %v5576_v15, %v5591_v28  ;;  %v2600_v15 = vld [vmem:[%s31962_s6 + $0x18] sm:$0xff] }
 0x5f2   : > { %25679 = vmatpush3.bf16.msra.mxu1 %v25678_v36  ;;  %23330 = vmatprep.mubr.msk.f32.mxu1 %vm27526_vm6, %v31799_v24  ;;  %v5154_v35 = vand.u32 4294901760, %v5153_v17 }
 0x5f3   : > { %25680 = vmatprep.subr.bf16.mxu1 %v31801_v46  ;;  %v5674_v12 = vand.u32 4294901760, %v5673_v3 }
 0x5f4   : > { %v25687_v55 = vpack.c.bf16 %v5161_v7, %v5154_v35 }
 0x5f6   : > { %25682 = vmatpush3.bf16.msra.mxu1 %v25681_v37  ;;  %v5675_v37 = vsub.f32 %v5673_v3, %v5674_v12 }
 0x5f7   : > { %25683 = vmatprep.subr.bf16.mxu1 %v31801_v46 }
 0x5f8   : > { %v5676_v43 = vand.u32 4294901760, %v5675_v37 }
 0x5fa   : > { %25685 = vmatpush3.bf16.msra.mxu1 %v25684_v22 }
 0x5fb   : > { %25686 = vmatprep.subr.bf16.mxu1 %v31801_v46 }
 0x5fe   : > { %25688 = vmatpush3.bf16.msra.mxu1 %v25687_v55 }
 0x5ff   : > { %25689 = vmatprep.subr.bf16.mxu1 %v31801_v46 }
 0x601   : > { %23331 = vmatmul.mubr.f32.vlgmr.msra.gmra.mrb[16].mxu1 %v28677_v54 }
 0x602   : > { %25691 = vmatpush3.bf16.msra.mxu1 %v25690_v5  ;;  %23349 = vmatprep.mubr.msk.f32.mxu1 %vm27526_vm6, %v31799_v24 }
 0x603   : > { %25692 = vmatprep.subr.bf16.mxu1 %v31801_v46 }
 0x606   : > { %25694 = vmatpush3.bf16.msra.mxu1 %v25693_v47 }
 0x607   : > { %25695 = vmatprep.subr.bf16.mxu1 %v31801_v46 }
 0x60a   : > { %25697 = vmatpush3.bf16.msra.mxu1 %v25696_v42 }
 0x60b   : > { %25698 = vmatprep.subr.bf16.mxu1 %v31801_v46 }
 0x60e   : > { %25700 = vmatpush3.bf16.msra.mxu1 %v25699_v53 }
 0x60f   : > { %25701 = vmatprep.subr.bf16.mxu1 %v31801_v46 }
 0x611   : > { %23350 = vmatmul.mubr.f32.vlgmr.msra.gmra.mrb[16].mxu1 %v28686_v23 }
 0x612   : > { %25703 = vmatpush3.bf16.msra.mxu1 %v28681_v16  ;;  %23368 = vmatprep.mubr.msk.f32.mxu1 %vm27526_vm6, %v31799_v24 }
 0x613   : > { %25704 = vmatprep.subr.bf16.mxu1 %v31801_v46 }
 0x616   : > { %25706 = vmatpush3.bf16.msra.mxu1 %v28694_v9 }
 0x617   : > { %25707 = vmatprep.subr.bf16.mxu1 %v31801_v46 }
 0x61a   : > { %25709 = vmatpush3.bf16.msra.mxu1 %v28713_v13 }
 0x61b   : > { %25710 = vmatprep.subr.bf16.mxu1 %v31801_v46 }
 0x61e   : > { %25712 = vmatpush3.bf16.msra.mxu1 %v28731_v11 }
 0x61f   : > { %25713 = vmatprep.subr.bf16.mxu1 %v31801_v46 }
 0x621   : > { %23369 = vmatmul.mubr.f32.vlgmr.msra.gmra.mrb[16].mxu1 %v28699_v26 }
 0x622   : > { %25715 = vmatpush3.bf16.msra.mxu1 %v25714_v8  ;;  %23387 = vmatprep.mubr.msk.f32.mxu1 %vm27526_vm6, %v31799_v24 }
 0x623   : > { %25716 = vmatprep.subr.bf16.mxu1 %v31801_v46 }
 0x626   : > { %25718 = vmatpush3.bf16.msra.mxu1 %v25717_v27 }
 0x627   : > { %25719 = vmatprep.subr.bf16.mxu1 %v31801_v46 }
 0x62a   : > { %25721 = vmatpush3.bf16.msra.mxu1 %v25720_v32 }
 0x62b   : > { %25722 = vmatprep.subr.bf16.mxu1 %v31801_v46 }
 0x62e   : > { %25724 = vmatpush3.bf16.msra.mxu1 %v25723_v34 }
 0x62f   : > { %25725 = vmatprep.subr.bf16.mxu1 %v31801_v46 }
 0x631   : > { %23388 = vmatmul.mubr.f32.vlgmr.msra.gmra.mrb[16].mxu1 %v28677_v54 }
 0x632   : > { %25727 = vmatpush3.bf16.msra.mxu1 %v28681_v16  ;;  %23406 = vmatprep.mubr.msk.f32.mxu1 %vm27526_vm6, %v31799_v24  ;;  %v2585_v16 = vld [vmem:[%s28816_s29] sm:$0xff] }
 0x633   : > { %25728 = vmatprep.subr.bf16.mxu1 %v31801_v46 }
 0x636   : > { %25730 = vmatpush3.bf16.msra.mxu1 %v28694_v9 }
 0x637   : > { %25731 = vmatprep.subr.bf16.mxu1 %v31801_v46 }
 0x63a   : > { %25733 = vmatpush3.bf16.msra.mxu1 %v28713_v13 }
 0x63b   : > { %25734 = vmatprep.subr.bf16.mxu1 %v31801_v46 }
 0x63e   : > { %25736 = vmatpush3.bf16.msra.mxu1 %v28731_v11  ;;  %v5588_v11 = vand.u32 4294901760, %v5575_v44 }
 0x640   : > { %v25738_v31 = vpack.c.bf16 %v5591_v28, %v5588_v11  ;;  %v5666_v36 = vsub.f32 %v5575_v44, %v5588_v11  ;;  %v2601_v28 = vld [vmem:[%s31962_s6 + $0x20] sm:$0xff] }
 0x641   : > { %23407 = vmatmul.mubr.f32.vlgmr.msra.gmra.mrb[16].mxu1 %v28677_v54 }
 0x642   : > { %25739 = vmatpush3.bf16.msra.mxu0 %v25738_v31  ;;  %v5667_v25 = vand.u32 4294901760, %v5666_v36  ;;  %v25744_v17 = vpack.c.bf16 %v5673_v3, %v5666_v36  ;;  %v6063_v3 = vsel %vm6052_vm7, %v2600_v15, 0 }
 0x643   : > { %25740 = vmatprep.subr.bf16.mxu0 %v31801_v46 }
 0x644   : > { %v5668_v33 = vsub.f32 %v5666_v36, %v5667_v25  ;;  %v25750_v7 = vpack.c.bf16 %v5674_v12, %v5667_v25  ;;  %v6066_v12 = vsel %vm6052_vm7, %v2601_v28, 0 }
 0x646   : > { %v5669_v30 = vand.u32 4294901760, %v5668_v33  ;;  %v2602_v33 = vld [vmem:[%s31962_s6 + $0x28] sm:$0xff] }
 0x648   : > { %v25741_v51 = vpack.c.bf16 %v5676_v43, %v5669_v30  ;;  %v2603_v43 = vld [vmem:[%s31962_s6 + $0x30] sm:$0xff] }
 0x714   : > { %v28819_v19 = vpop.f32.mrb[16].mxu1 }
 0x715   : > { %31959 = vst [vmem:[#allocation19_spill] sm:$0xff] %v28819_v19  ;;  %v26397_v20 = vadd.f32 %v28819_v19, %v2585_v16  ;;  %v23408_v38 = vpop.f32.mrb[17].mxu1  ;;  %v2597_v16 = vld [vmem:[%s31961_s9] sm:$0xff] }
 0x717   : > { %v5562_v9 = vsel %vm2615_vm4, %v26397_v20, 0.0 }
 0x718   : > { %5563 = vadd.xlane.f32.xlu1 %v5562_v9 }
 0x7a5   : > { %v5564_v39 = vpop.xlane.xlu1 %5563 }
 0x7a6   : > { %v5565_v59 = vmul.f32 0.0625, %v5564_v39 }
 0x7a8   : > { %v5566_v2 = vsub.f32 %v26397_v20, %v5565_v59  ;;  %v6054_v20 = vsel %vm6052_vm7, %v2597_v16, 0 }
 0x7a9   : > { %v28853_v38 = vand.u32 4294901760, %v6054_v20 }
 0x7aa   : > { %v5567_v0 = vmul.f32 %v5566_v2, %v5566_v2 }
 0x7ab   : > { %31963 = vst [vmem:[#allocation20_spill] sm:$0xff] %v28853_v38  ;;  %v28856_v9 = vsub.f32 %v6054_v20, %v28853_v38 }
 0x7ac   : > { %v5568_v13 = vsel %vm2615_vm4, %v5567_v0, 0.0  ;;  %v2598_v0 = vld [vmem:[%s31962_s6 + $0x8] sm:$0xff] }
 0x7ad   : > { %5569 = vadd.xlane.f32.xlu0 %v5568_v13  ;;  %31964 = vst [vmem:[#allocation21_spill] sm:$0xff] %v28856_v9  ;;  %v28859_v39 = vand.u32 4294901760, %v28856_v9  ;;  %v2599_v13 = vld [vmem:[%s31962_s6 + $0x10] sm:$0xff] }
 0x7ae   : > { %v6060_v44 = vsel %vm6052_vm7, %v2599_v13, 0 }
 0x7af   : > { %31965 = vst [vmem:[#allocation22_spill] sm:$0xff] %v28859_v39  ;;  %v6146_v59 = vsub.f32 %v28856_v9, %v28859_v39  ;;  %v28885_v36 = vand.u32 4294901760, %v6060_v44 }
 0x7b1   : > { %31969 = vst [vmem:[#allocation25_spill] sm:$0xff] %v28885_v36 }
 0x7c3   : > { %6048 = vperm.xlu0 %27357, %v2594_v14   ;;  %v6057_v14 = vsel %vm6052_vm7, %v2598_v0, 0 }
 0x7c4   : > { %v28877_v11 = vand.u32 4294901760, %v6057_v14 }
 0x7c6   : > { %31967 = vst [vmem:[#allocation24_spill] sm:$0xff] %v28877_v11  ;;  %v28896_v30 = vsub.f32 %v6057_v14, %v28877_v11 }
 0x7c8   : > { %31971 = vst [vmem:[#allocation27_spill] sm:$0xff] %v28896_v30 }
 0x83a   : > { %v5570_v35 = vpop.xlane.xlu0 %5569 }
 0x83b   : > { %v5571_v22 = vmul.f32 0.0625, %v5570_v35  ;;  %v28909_v35 = vand.u32 4294901760, %v6066_v12 }
 0x83d   : > { %v5572_v55 = vadd.f32 1e-05, %v5571_v22  ;;  %31975 = vst [vmem:[#allocation31_spill] sm:$0xff] %v28909_v35  ;;  %v6069_v22 = vsel %vm6052_vm7, %v2602_v33, 0  ;;  %v28936_v16 = vsub.f32 %v6066_v12, %v28909_v35 }
 0x83f   : > { %27375 = vrsqrt.f32 %v5572_v55  ;;  %v6072_v55 = vsel %vm6052_vm7, %v2603_v43, 0  ;;  %31981 = vst [vmem:[#allocation37_spill] sm:$0xff] %v28936_v16  ;;  %v28959_v33 = vand.u32 4294901760, %v28936_v16 }
 0x840   : > { %v28938_v20 = vand.u32 4294901760, %v6072_v55 }
 0x841   : > { %31988 = vst [vmem:[#allocation44_spill] sm:$0xff] %v28959_v33 }
 0x842   : > { %31982 = vst [vmem:[#allocation38_spill] sm:$0xff] %v28938_v20  ;;  %v28962_v43 = vsub.f32 %v6072_v55, %v28938_v20 }
 0x844   : > { %31989 = vst [vmem:[#allocation45_spill] sm:$0xff] %v28962_v43 }
 0x849   : > { %v27376_v5 = vpop.eup %27375 }
 0x84a   : > { %v5574_v47 = vmul.f32 %v27376_v5, %v5566_v2  ;;  %v28863_v2 = vand.u32 4294901760, %v6146_v59  ;;  %v2604_v5 = vld [vmem:[%s31962_s6 + $0x38] sm:$0xff] }
 0x84b   : > { %v6075_v59 = vsel %vm6052_vm7, %v2604_v5, 0 }
 0x84c   : > { %v5585_v42 = vsel %vm2615_vm4, %v5574_v47, 0  ;;  %31966 = vst [vmem:[#allocation23_spill] sm:$0xff] %v28863_v2 }
 0x84d   : > { %v5654_v53 = vand.u32 4294901760, %v5585_v42 }
 0x84f   : > { %v5655_v8 = vsub.f32 %v5585_v42, %v5654_v53  ;;  %v28920_v42 = vand.u32 4294901760, %v28896_v30 }
 0x851   : > { %v5656_v27 = vand.u32 4294901760, %v5655_v8  ;;  %31977 = vst [vmem:[#allocation33_spill] sm:$0xff] %v28920_v42  ;;  %v6156_v14 = vsub.f32 %v28896_v30, %v28920_v42 }
 0x853   : > { %v5657_v32 = vsub.f32 %v5655_v8, %v5656_v27 }
 0x855   : > { %v5658_v34 = vand.u32 4294901760, %v5657_v32  ;;  %v21064_v32 = vld [vmem:[%s31780_s20] ss:$0 sm:$0xff] }
 0x857   : > { %23414 = vmatmul.mubr.f32.vlgmr.msra.gmra.mrb[8].mxu0 %v5658_v34 }
 0x858   : > { %25742 = vmatpush3.bf16.msra.mxu0 %v25741_v51  ;;  %23420 = vmatprep.mubr.msk.f32.mxu0 %vm27526_vm6, %v31799_v24  ;;  %v28901_v51 = vand.u32 4294901760, %v6063_v3 }
 0x859   : > { %25743 = vmatprep.subr.bf16.mxu0 %v31801_v46 }
 0x85a   : > { %31972 = vst [vmem:[#allocation28_spill] sm:$0xff] %v28901_v51 }
 0x85f   : > { %23421 = vmatmul.mubr.f32.vlgmr.msra.gmra.mrb[8].mxu0 %v5654_v53 }
 0x860   : > { %25745 = vmatpush3.bf16.msra.mxu0 %v25744_v17  ;;  %23427 = vmatprep.mubr.msk.f32.mxu0 %vm27526_vm6, %v31799_v24 }
 0x861   : > { %25746 = vmatprep.subr.bf16.mxu0 %v31801_v46 }
 0x867   : > { %23428 = vmatmul.mubr.f32.vlgmr.msra.gmra.mrb[8].mxu0 %v5655_v8  ;;  %v28925_v8 = vand.u32 4294901760, %v6069_v22 }
 0x868   : > { %25748 = vmatpush3.bf16.msra.mxu0 %v25738_v31  ;;  %23434 = vmatprep.mubr.msk.f32.mxu0 %vm27526_vm6, %v31799_v24 }
 0x869   : > { %25749 = vmatprep.subr.bf16.mxu0 %v31801_v46  ;;  %31979 = vst [vmem:[#allocation35_spill] sm:$0xff] %v28925_v8 }
 0x86f   : > { %23435 = vmatmul.mubr.f32.vlgmr.msra.gmra.mrb[8].mxu0 %v5656_v27 }
 0x870   : > { %25751 = vmatpush3.bf16.msra.mxu0 %v25750_v7  ;;  %23441 = vmatprep.mubr.msk.f32.mxu0 %vm27526_vm6, %v31799_v24  ;;  %v28907_v7 = vsub.f32 %v6060_v44, %v28885_v36 }
 0x871   : > { %25752 = vmatprep.subr.bf16.mxu0 %v31801_v46 }
 0x872   : > { %31974 = vst [vmem:[#allocation30_spill] sm:$0xff] %v28907_v7  ;;  %v28933_v34 = vand.u32 4294901760, %v28907_v7 }
 0x874   : > { %31980 = vst [vmem:[#allocation36_spill] sm:$0xff] %v28933_v34  ;;  %v6166_v12 = vsub.f32 %v28907_v7, %v28933_v34 }
 0x876   : > { %v28978_v55 = vand.u32 4294901760, %v6166_v12 }
 0x877   : > { %23442 = vmatmul.mubr.f32.vlgmr.msra.gmra.mrb[8].mxu0 %v5654_v53 }
 0x878   : > { %25754 = vmatpush3.bf16.msra.mxu0 %v25738_v31  ;;  %23448 = vmatprep.mubr.msk.f32.mxu0 %vm27526_vm6, %v31799_v24  ;;  %v2605_v31 = vld [vmem:[%s31968_s13] sm:$0xff]  ;;  %31993 = vst [vmem:[#allocation49_spill] sm:$0xff] %v28978_v55 }
 0x879   : > { %v7600_v25 = vsel %vm6052_vm7, %v2605_v31, 0  ;;  %v28949_v31 = vsub.f32 %v6069_v22, %v28925_v8 }
 0x87a   : > { %v28893_v37 = vand.u32 4294901760, %v7600_v25 }
 0x87b   : > { %31985 = vst [vmem:[#allocation41_spill] sm:$0xff] %v28949_v31 }
 0x87c   : > { %31970 = vst [vmem:[#allocation26_spill] sm:$0xff] %v28893_v37  ;;  %v28904_v17 = vsub.f32 %v7600_v25, %v28893_v37  ;;  %v28954_v25 = vpop.permute.xlu0 %6048 }
 0x87d   : > { %31987 = vst [vmem:[#allocation43_spill] sm:$0xff] %v28954_v25 }
 0x87e   : > { %31973 = vst [vmem:[#allocation29_spill] sm:$0xff] %v28904_v17  ;;  %v28917_v47 = vand.u32 4294901760, %v28904_v17 }
 0x87f   : > { %23449 = vmatmul.mubr.f32.vlgmr.msra.gmra.mrb[8].mxu0 %v5654_v53  ;;  %v28923_v53 = vsub.f32 %v6063_v3, %v28901_v51  ;;  %v28951_v3 = vand.u32 4294901760, %v6075_v59 }
 0x880   : > { %23453 = vmatprep.mubr.f32.mxu0 %v28863_v2  ;;  %31976 = vst [vmem:[#allocation32_spill] sm:$0xff] %v28917_v47  ;;  %v7692_v27 = vsub.f32 %v28904_v17, %v28917_v47 }
 0x881   : > { %31978 = vst [vmem:[#allocation34_spill] sm:$0xff] %v28923_v53  ;;  %v28946_v28 = vand.u32 4294901760, %v28923_v53  ;;  %31986 = vst [vmem:[#allocation42_spill] sm:$0xff] %v28951_v3 }
 0x882   : > { %v28941_v0 = vand.u32 4294901760, %v7692_v27  ;;  %v28965_v27 = vand.u32 4294901760, %v6156_v14  ;;  %v6186_v14 = vsub.f32 %v28936_v16, %v28959_v33 }
 0x883   : > { %31984 = vst [vmem:[#allocation40_spill] sm:$0xff] %v28946_v28 }
 0x884   : > { %31983 = vst [vmem:[#allocation39_spill] sm:$0xff] %v28941_v0  ;;  %23621 = vmatprep.mubr.f32.mxu1 %v28941_v0  ;;  %31990 = vst [vmem:[#allocation46_spill] sm:$0xff] %v28965_v27  ;;  %v28997_v2 = vand.u32 4294901760, %v6186_v14 }
 0x886   : > { %31997 = vst [vmem:[#allocation53_spill] sm:$0xff] %v28997_v2 }
 0x952   : > { %v6042_v13 = vpop.f32.mrb[8].mxu0 }
 0x953   : > { %v26398_v44 = vadd.f32 %v21064_v32, %v6042_v13  ;;  %v23450_v15 = vpop.f32.mrb[9].mxu0  ;;  %v6176_v32 = vsub.f32 %v28923_v53, %v28946_v28  ;;  %v28973_v13 = vand.u32 4294901760, %v28949_v31 }
 0x954   : > { %v28976_v15 = vsub.f32 %v6075_v59, %v28951_v3 }
 0x955   : > { %v6051_v5 = vmul.f32 %v26398_v44, %v28954_v25  ;;  %31991 = vst [vmem:[#allocation47_spill] sm:$0xff] %v28973_v13  ;;  %v28983_v44 = vand.u32 4294901760, %v28962_v43  ;;  %v28989_v46 = vand.u32 4294901760, %v6176_v32  ;;  %v6196_v12 = vsub.f32 %v28949_v31, %v28973_v13 }
 0x956   : > { %31992 = vst [vmem:[#allocation48_spill] sm:$0xff] %v28976_v15  ;;  %v28994_v25 = vand.u32 4294901760, %v28976_v15 }
 0x957   : > { %v28967_v22 = vand.u32 4294901760, %v6051_v5  ;;  %7596 = vrot.lane.b32.xlu1 %v6051_v5, %s31895_s4  ;;  %31994 = vst [vmem:[#allocation50_spill] sm:$0xff] %v28983_v44  ;;  %31995 = vst [vmem:[#allocation51_spill] sm:$0xff] %v28989_v46  ;;  %v29002_v32 = vand.u32 4294901760, %v6196_v12  ;;  %v2609_v12 = vld [vmem:[%s31968_s13 + $0x20] sm:$0xff] }
 0x958   : > { %31996 = vst [vmem:[#allocation52_spill] sm:$0xff] %v28994_v25  ;;  %v6216_v0 = vsub.f32 %v28976_v15, %v28994_v25 }
 0x959   : > { %v6225_v24 = vsub.f32 %v6051_v5, %v28967_v22  ;;  %23451 = vmatprep.subr.mxu0 %v28967_v22  ;;  %v6206_v5 = vsub.f32 %v28962_v43, %v28983_v44  ;;  %31998 = vst [vmem:[#allocation54_spill] sm:$0xff] %v29002_v32 }
 0x95a   : > { %23452 = vmatpush3.msra.mxu0 %v28967_v22  ;;  %v29010_v14 = vand.u32 4294901760, %v6216_v0 }
 0x95b   : > { %23454 = vmatmul.mubr.f32.vlgmr.msra.gmra.mrb[10].mxu0 %v28965_v27  ;;  %v6226_v59 = vand.u32 4294901760, %v6225_v24  ;;  %v29007_v26 = vand.u32 4294901760, %v6206_v5 }
 0x95c   : > { %23456 = vmatprep.mubr.f32.mxu0 %v28978_v55  ;;  %32000 = vst [vmem:[#allocation56_spill] sm:$0xff] %v29010_v14 }
 0x95d   : > { %v6227_v19 = vsub.f32 %v6225_v24, %v6226_v59  ;;  %31999 = vst [vmem:[#allocation55_spill] sm:$0xff] %v29007_v26 }
 0x95f   : > { %23457 = vmatmul.mubr.f32.gmra.mrb[12].mxu0 %v28989_v46  ;;  %v6228_v27 = vand.u32 4294901760, %v6227_v19  ;;  %v2607_v19 = vld [vmem:[%s31968_s13 + $0x10] sm:$0xff] }
 0x960   : > { %23459 = vmatprep.mubr.f32.mxu0 %v28997_v2 }
 0x961   : > { %23465 = vmatprep.subr.mxu0 %v6228_v27 }
 0x962   : > { %23466 = vmatpush3.msra.mxu0 %v6228_v27  ;;  %v7606_v27 = vsel %vm6052_vm7, %v2607_v19, 0  ;;  %v2610_v19 = vld [vmem:[%s31968_s13 + $0x28] sm:$0xff] }
 0x963   : > { %23460 = vmatmul.mubr.f32.gmra.mrb[14].mxu0 %v29002_v32  ;;  %23479 = vmatprep.subr.mxu0 %v6225_v24  ;;  %v29074_v5 = vand.u32 4294901760, %v7606_v27 }
 0x964   : > { %23462 = vmatprep.mubr.f32.mxu0 %v29007_v26 }
 0x965   : > { %32002 = vst [vmem:[#allocation58_spill] sm:$0xff] %v29074_v5 }
 0x967   : > { %23463 = vmatmul.mubr.f32.gmra.mrb[16].mxu0 %v29010_v14 }
 0x968   : > { %23467 = vmatprep.mubr.f32.mxu0 %v28853_v38 }
 0x96b   : > { %23468 = vmatmul.mubr.f32.vlgmr.msra.gmra.mrb[10].mxu0 %v28877_v11 }
 0x96c   : > { %23480 = vmatpush3.msra.mxu0 %v6225_v24  ;;  %23470 = vmatprep.mubr.f32.mxu0 %v28885_v36  ;;  %v2606_v24 = vld [vmem:[%s31968_s13 + $0x8] sm:$0xff] }
 0x96d   : > { %23493 = vmatprep.subr.mxu0 %v28967_v22  ;;  %v7603_v0 = vsel %vm6052_vm7, %v2606_v24, 0  ;;  %v7612_v24 = vsel %vm6052_vm7, %v2609_v12, 0 }
 0x96f   : > { %23471 = vmatmul.mubr.f32.gmra.mrb[12].mxu0 %v28901_v51 }
 0x970   : > { %23473 = vmatprep.mubr.f32.mxu0 %v28909_v35 }
 0x973   : > { %23474 = vmatmul.mubr.f32.gmra.mrb[14].mxu0 %v28925_v8 }
 0x974   : > { %23476 = vmatprep.mubr.f32.mxu0 %v28938_v20 }
 0x977   : > { %23477 = vmatmul.mubr.f32.gmra.mrb[16].mxu0 %v28951_v3 }
 0x978   : > { %23481 = vmatprep.mubr.f32.mxu0 %v28856_v9 }
 0x97b   : > { %23482 = vmatmul.mubr.f32.vlgmr.msra.gmra.mrb[10].mxu0 %v28896_v30 }
 0x97c   : > { %23494 = vmatpush3.msra.mxu0 %v28967_v22  ;;  %23484 = vmatprep.mubr.f32.mxu0 %v28907_v7 }
 0x97d   : > { %23507 = vmatprep.subr.mxu0 %v6226_v59 }
 0x97f   : > { %23485 = vmatmul.mubr.f32.gmra.mrb[12].mxu0 %v28923_v53 }
 0x980   : > { %23487 = vmatprep.mubr.f32.mxu0 %v28936_v16 }
 0x983   : > { %23488 = vmatmul.mubr.f32.gmra.mrb[14].mxu0 %v28949_v31 }
 0x984   : > { %23490 = vmatprep.mubr.f32.mxu0 %v28962_v43 }
 0x987   : > { %23491 = vmatmul.mubr.f32.gmra.mrb[16].mxu0 %v28976_v15 }
 0x988   : > { %23495 = vmatprep.mubr.f32.mxu0 %v28859_v39 }
 0x98b   : > { %23496 = vmatmul.mubr.f32.vlgmr.msra.gmra.mrb[10].mxu0 %v28920_v42 }
 0x98c   : > { %23508 = vmatpush3.msra.mxu0 %v6226_v59  ;;  %23498 = vmatprep.mubr.f32.mxu0 %v28933_v34  ;;  %v29069_v59 = vand.u32 4294901760, %v7603_v0  ;;  %v29092_v34 = vand.u32 4294901760, %v7612_v24 }
 0x98d   : > { %23521 = vmatprep.subr.mxu0 %v28967_v22 }
 0x98e   : > { %32001 = vst [vmem:[#allocation57_spill] sm:$0xff] %v29069_v59  ;;  %32006 = vst [vmem:[#allocation62_spill] sm:$0xff] %v29092_v34  ;;  %v29111_v43 = vsub.f32 %v7612_v24, %v29092_v34 }
 0x98f   : > { %23499 = vmatmul.mubr.f32.gmra.mrb[12].mxu0 %v28946_v28  ;;  %v29090_v28 = vsub.f32 %v7606_v27, %v29074_v5 }
 0x990   : > { %23501 = vmatprep.mubr.f32.mxu0 %v28959_v33  ;;  %32011 = vst [vmem:[#allocation67_spill] sm:$0xff] %v29111_v43  ;;  %v29129_v24 = vand.u32 4294901760, %v29111_v43 }
 0x991   : > { %32005 = vst [vmem:[#allocation61_spill] sm:$0xff] %v29090_v28  ;;  %v29108_v27 = vand.u32 4294901760, %v29090_v28 }
 0x992   : > { %32016 = vst [vmem:[#allocation72_spill] sm:$0xff] %v29129_v24 }
 0x993   : > { %23502 = vmatmul.mubr.f32.gmra.mrb[14].mxu0 %v28973_v13  ;;  %v2611_v13 = vld [vmem:[%s31968_s13 + $0x30] sm:$0xff]  ;;  %32010 = vst [vmem:[#allocation66_spill] sm:$0xff] %v29108_v27  ;;  %v7712_v7 = vsub.f32 %v29090_v28, %v29108_v27 }
 0x994   : > { %23504 = vmatprep.mubr.f32.mxu0 %v28983_v44  ;;  %v29082_v44 = vsub.f32 %v7603_v0, %v29069_v59  ;;  %v7618_v12 = vsel %vm6052_vm7, %v2611_v13, 0  ;;  %v2612_v0 = vld [vmem:[%s31968_s13 + $0x38] sm:$0xff] }
 0x995   : > { %v7621_v13 = vsel %vm6052_vm7, %v2612_v0, 0 }
 0x996   : > { %32003 = vst [vmem:[#allocation59_spill] sm:$0xff] %v29082_v44  ;;  %v29100_v42 = vand.u32 4294901760, %v29082_v44  ;;  %v29124_v53 = vand.u32 4294901760, %v7621_v13 }
 0x997   : > { %23505 = vmatmul.mubr.f32.gmra.mrb[16].mxu0 %v28994_v25 }
 0x998   : > { %23509 = vmatprep.mubr.f32.mxu0 %v28853_v38  ;;  %32007 = vst [vmem:[#allocation63_spill] sm:$0xff] %v29100_v42  ;;  %v7702_v31 = vsub.f32 %v29082_v44, %v29100_v42  ;;  %32015 = vst [vmem:[#allocation71_spill] sm:$0xff] %v29124_v53 }
 0x99a   : > { %v29134_v9 = vand.u32 4294901760, %v7702_v31 }
 0x99b   : > { %23510 = vmatmul.mubr.f32.vlgmr.msra.gmra.mrb[10].mxu0 %v28877_v11 }
 0x99c   : > { %23522 = vmatpush3.msra.mxu0 %v28967_v22  ;;  %23512 = vmatprep.mubr.f32.mxu0 %v28885_v36  ;;  %v2608_v22 = vld [vmem:[%s31968_s13 + $0x18] sm:$0xff]  ;;  %32018 = vst [vmem:[#allocation74_spill] sm:$0xff] %v29134_v9 }
 0x99d   : > { %v7609_v25 = vsel %vm6052_vm7, %v2608_v22, 0  ;;  %v7615_v22 = vsel %vm6052_vm7, %v2610_v19, 0  ;;  %v29113_v19 = vand.u32 4294901760, %v7618_v12 }
 0x99e   : > { %v29087_v33 = vand.u32 4294901760, %v7609_v25  ;;  %v29105_v15 = vand.u32 4294901760, %v7615_v22 }
 0x99f   : > { %23513 = vmatmul.mubr.f32.gmra.mrb[12].mxu0 %v28901_v51  ;;  %32012 = vst [vmem:[#allocation68_spill] sm:$0xff] %v29113_v19  ;;  %v29132_v30 = vsub.f32 %v7618_v12, %v29113_v19  ;;  %v7732_v12 = vsub.f32 %v29111_v43, %v29129_v24 }
 0x9a0   : > { %23515 = vmatprep.mubr.f32.mxu0 %v28909_v35  ;;  %32004 = vst [vmem:[#allocation60_spill] sm:$0xff] %v29087_v33  ;;  %v29103_v39 = vsub.f32 %v7609_v25, %v29087_v33  ;;  %32009 = vst [vmem:[#allocation65_spill] sm:$0xff] %v29105_v15  ;;  %v29122_v25 = vsub.f32 %v7615_v22, %v29105_v15 }
 0x9a1   : > { %32017 = vst [vmem:[#allocation73_spill] sm:$0xff] %v29132_v30 }
 0x9a2   : > { %32008 = vst [vmem:[#allocation64_spill] sm:$0xff] %v29103_v39  ;;  %v29119_v16 = vand.u32 4294901760, %v29103_v39  ;;  %32014 = vst [vmem:[#allocation70_spill] sm:$0xff] %v29122_v25 }
 0x9a3   : > { %23516 = vmatmul.mubr.f32.gmra.mrb[14].mxu0 %v28925_v8 }
 0x9a4   : > { %23518 = vmatprep.mubr.f32.mxu0 %v28938_v20  ;;  %32013 = vst [vmem:[#allocation69_spill] sm:$0xff] %v29119_v16  ;;  %v7722_v22 = vsub.f32 %v29103_v39, %v29119_v16 }
 0x9a7   : > { %23519 = vmatmul.mubr.f32.gmra.mrb[16].mxu0 %v28951_v3 }
 0x9a8   : > { %23523 = vmatprep.mubr.f32.mxu0 %v28853_v38  ;;  %v29165_v38 = vand.u32 4294901760, %v7732_v12 }
 0x9aa   : > { %32025 = vst [vmem:[#allocation81_spill] sm:$0xff] %v29165_v38 }
 0x9ab   : > { %23524 = vmatmul.mubr.f32.vlgmr.msra.gmra.mrb[10].mxu0 %v28877_v11 }
 0x9ac   : > { %23526 = vmatprep.mubr.f32.mxu0 %v28885_v36  ;;  %v29157_v36 = vand.u32 4294901760, %v7722_v22 }
 0x9ae   : > { %32023 = vst [vmem:[#allocation79_spill] sm:$0xff] %v29157_v36 }
 0x9af   : > { %23527 = vmatmul.mubr.f32.gmra.mrb[12].mxu0 %v28901_v51  ;;  %v29151_v51 = vand.u32 4294901760, %v29132_v30 }
 0x9b0   : > { %23529 = vmatprep.mubr.f32.mxu0 %v28909_v35  ;;  %v29146_v35 = vand.u32 4294901760, %v7712_v7 }
 0x9b1   : > { %32022 = vst [vmem:[#allocation78_spill] sm:$0xff] %v29151_v51 }
 0x9b2   : > { %32021 = vst [vmem:[#allocation77_spill] sm:$0xff] %v29146_v35 }
 0x9b3   : > { %23530 = vmatmul.mubr.f32.gmra.mrb[14].mxu0 %v28925_v8  ;;  %v29144_v8 = vsub.f32 %v7621_v13, %v29124_v53 }
 0x9b4   : > { %23532 = vmatprep.mubr.f32.mxu0 %v28938_v20  ;;  %v29141_v20 = vand.u32 4294901760, %v29122_v25 }
 0x9b5   : > { %32020 = vst [vmem:[#allocation76_spill] sm:$0xff] %v29144_v8  ;;  %v29162_v11 = vand.u32 4294901760, %v29144_v8 }
 0x9b6   : > { %32019 = vst [vmem:[#allocation75_spill] sm:$0xff] %v29141_v20  ;;  %v7742_v7 = vsub.f32 %v29122_v25, %v29141_v20 }
 0x9b7   : > { %23533 = vmatmul.mubr.f32.gmra.mrb[16].mxu0 %v28951_v3  ;;  %32024 = vst [vmem:[#allocation80_spill] sm:$0xff] %v29162_v11  ;;  %v7762_v26 = vsub.f32 %v29144_v8, %v29162_v11 }
 0x9b8   : > { %v29170_v22 = vand.u32 4294901760, %v7742_v7 }
 0x9b9   : > { %v29178_v12 = vand.u32 4294901760, %v7762_v26  ;;  %v2613_v26 = vld [vmem:[%s32029_s1] sm:$0xff]  ;;  %s30735_s1 = sand.u32 1, %s27514_s5  }
 0x9ba   : > { %32026 = vst [vmem:[#allocation82_spill] sm:$0xff] %v29170_v22  ;;  %s21050_s4 = sshll.u32 %s30735_s1, 3  ;;  %s20873_s7 = scalar_lea.sflag [#allocation3], %s30735_s1 }
 0x9bb   : > { %32028 = vst [vmem:[#allocation84_spill] sm:$0xff] %v29178_v12  ;;  %s30741_s12 = scalar_lea.vmem [#allocation2], %s21050_s4  ;;  %s32061_s4 = smov 120  }
 0x9bc   : > { %s20891_s6 = sshll.u32 %s30741_s12, 4  ;;  %s20892_s6 = int_to_ptr.vmem [resolvable:$true] %s20891_s6 }
 0x9c9   : > { %v7597_v0 = vpop.permute.xlu1 %7596 }
 0x9ca   : > { %v29136_v3 = vand.u32 4294901760, %v7597_v0 }
 0x9cc   : > { %v7771_v31 = vsub.f32 %v7597_v0, %v29136_v3  ;;  %23619 = vmatprep.subr.mxu1 %v29136_v3  ;;  %v7752_v0 = vsub.f32 %v29132_v30, %v29151_v51 }
 0x9cd   : > { %23620 = vmatpush3.msra.mxu1 %v29136_v3 }
 0x9ce   : > { %23622 = vmatmul.mubr.f32.vlgmr.msra.gmra.mrb[18].mxu1 %v29134_v9  ;;  %v7772_v13 = vand.u32 4294901760, %v7771_v31  ;;  %v29175_v32 = vand.u32 4294901760, %v7752_v0 }
 0x9cf   : > { %23624 = vmatprep.mubr.f32.mxu1 %v29146_v35 }
 0x9d0   : > { %v7773_v14 = vsub.f32 %v7771_v31, %v7772_v13  ;;  %32027 = vst [vmem:[#allocation83_spill] sm:$0xff] %v29175_v32 }
 0x9d2   : > { %23625 = vmatmul.mubr.f32.gmra.mrb[20].mxu1 %v29157_v36  ;;  %v7774_v9 = vand.u32 4294901760, %v7773_v14 }
 0x9d3   : > { %23627 = vmatprep.mubr.f32.mxu1 %v29165_v38 }
 0x9d4   : > { %23633 = vmatprep.subr.mxu1 %v7774_v9 }
 0x9d5   : > { %23634 = vmatpush3.msra.mxu1 %v7774_v9  ;;  %v29214_v9 = vand.u32 4294901760, %v2613_v26 }
 0x9d6   : > { %23628 = vmatmul.mubr.f32.gmra.mrb[22].mxu1 %v29170_v22  ;;  %23647 = vmatprep.subr.mxu1 %v7771_v31 }
 0x9d7   : > { %23630 = vmatprep.mubr.f32.mxu1 %v29175_v32  ;;  %32030 = vst [vmem:[#allocation85_spill] sm:$0xff] %v29214_v9  ;;  %23535 = vmatprep.subr.mxu0 %v29214_v9  ;;  %v29225_v14 = vsub.f32 %v2613_v26, %v29214_v9 }
 0x9d8   : > { %23536 = vmatpush3.msra.mxu0 %v29214_v9 }
 0x9d9   : > { %32031 = vst [vmem:[#allocation86_spill] sm:$0xff] %v29225_v14 }
 0x9da   : > { %23631 = vmatmul.mubr.f32.gmra.mrb[24].mxu1 %v29178_v12 }
 0x9db   : > { %23635 = vmatprep.mubr.f32.mxu1 %v28893_v37 }
 0x9de   : > { %23636 = vmatmul.mubr.f32.vlgmr.msra.gmra.mrb[18].mxu1 %v29069_v59 }
 0x9df   : > { %23648 = vmatpush3.msra.mxu1 %v7771_v31  ;;  %23638 = vmatprep.mubr.f32.mxu1 %v29074_v5 }
 0x9e0   : > { %23661 = vmatprep.subr.mxu1 %v29136_v3 }
 0x9e2   : > { %23639 = vmatmul.mubr.f32.gmra.mrb[20].mxu1 %v29087_v33 }
 0x9e3   : > { %23641 = vmatprep.mubr.f32.mxu1 %v29092_v34 }
 0x9e6   : > { %23642 = vmatmul.mubr.f32.gmra.mrb[22].mxu1 %v29105_v15 }
 0x9e7   : > { %23644 = vmatprep.mubr.f32.mxu1 %v29113_v19 }
 0x9ea   : > { %23645 = vmatmul.mubr.f32.gmra.mrb[24].mxu1 %v29124_v53 }
 0x9eb   : > { %23649 = vmatprep.mubr.f32.mxu1 %v28904_v17 }
 0x9ee   : > { %23650 = vmatmul.mubr.f32.vlgmr.msra.gmra.mrb[18].mxu1 %v29082_v44 }
 0x9ef   : > { %23662 = vmatpush3.msra.mxu1 %v29136_v3  ;;  %23652 = vmatprep.mubr.f32.mxu1 %v29090_v28 }
 0x9f0   : > { %23675 = vmatprep.subr.mxu1 %v7772_v13 }
 0x9f2   : > { %23653 = vmatmul.mubr.f32.gmra.mrb[20].mxu1 %v29103_v39 }
 0x9f3   : > { %23655 = vmatprep.mubr.f32.mxu1 %v29111_v43 }
 0x9f6   : > { %23656 = vmatmul.mubr.f32.gmra.mrb[22].mxu1 %v29122_v25 }
 0x9f7   : > { %23658 = vmatprep.mubr.f32.mxu1 %v29132_v30 }
 0x9fa   : > { %23659 = vmatmul.mubr.f32.gmra.mrb[24].mxu1 %v29144_v8 }
 0x9fb   : > { %23663 = vmatprep.mubr.f32.mxu1 %v28917_v47 }
 0x9fe   : > { %23664 = vmatmul.mubr.f32.vlgmr.msra.gmra.mrb[18].mxu1 %v29100_v42 }
 0x9ff   : > { %23676 = vmatpush3.msra.mxu1 %v7772_v13  ;;  %23666 = vmatprep.mubr.f32.mxu1 %v29108_v27 }
 0xa00   : > { %23689 = vmatprep.subr.mxu1 %v29136_v3 }
 0xa02   : > { %23667 = vmatmul.mubr.f32.gmra.mrb[20].mxu1 %v29119_v16 }
 0xa03   : > { %23669 = vmatprep.mubr.f32.mxu1 %v29129_v24 }
 0xa06   : > { %23670 = vmatmul.mubr.f32.gmra.mrb[22].mxu1 %v29141_v20 }
 0xa07   : > { %23672 = vmatprep.mubr.f32.mxu1 %v29151_v51 }
 0xa0a   : > { %23673 = vmatmul.mubr.f32.gmra.mrb[24].mxu1 %v29162_v11 }
 0xa0b   : > { %23677 = vmatprep.mubr.f32.mxu1 %v28893_v37 }
 0xa0e   : > { %23678 = vmatmul.mubr.f32.vlgmr.msra.gmra.mrb[18].mxu1 %v29069_v59 }
 0xa0f   : > { %23690 = vmatpush3.msra.mxu1 %v29136_v3  ;;  %23680 = vmatprep.mubr.f32.mxu1 %v29074_v5  ;;  %v29229_v3 = vand.u32 4294901760, %v29225_v14 }
 0xa11   : > { %32032 = vst [vmem:[#allocation87_spill] sm:$0xff] %v29229_v3  ;;  %v6998_v31 = vsub.f32 %v29225_v14, %v29229_v3 }
 0xa12   : > { %23681 = vmatmul.mubr.f32.gmra.mrb[20].mxu1 %v29087_v33 }
 0xa13   : > { %23683 = vmatprep.mubr.f32.mxu1 %v29092_v34  ;;  %v29235_v13 = vand.u32 4294901760, %v6998_v31 }
 0xa15   : > { %32033 = vst [vmem:[#allocation88_spill] sm:$0xff] %v29235_v13  ;;  %23549 = vmatprep.subr.mxu0 %v29235_v13 }
 0xa16   : > { %23684 = vmatmul.mubr.f32.gmra.mrb[22].mxu1 %v29105_v15 }
 0xa17   : > { %23686 = vmatprep.mubr.f32.mxu1 %v29113_v19 }
 0xa1a   : > { %23687 = vmatmul.mubr.f32.gmra.mrb[24].mxu1 %v29124_v53 }
 0xa1b   : > { %23691 = vmatprep.mubr.f32.mxu1 %v28893_v37 }
 0xa1e   : > { %23692 = vmatmul.mubr.f32.vlgmr.msra.gmra.mrb[18].mxu1 %v29069_v59 }
 0xa1f   : > { %23694 = vmatprep.mubr.f32.mxu1 %v29074_v5 }
 0xa22   : > { %23695 = vmatmul.mubr.f32.gmra.mrb[20].mxu1 %v29087_v33 }
 0xa23   : > { %23697 = vmatprep.mubr.f32.mxu1 %v29092_v34 }
 0xa26   : > { %23698 = vmatmul.mubr.f32.gmra.mrb[22].mxu1 %v29105_v15 }
 0xa27   : > { %23700 = vmatprep.mubr.f32.mxu1 %v29113_v19 }
 0xa2a   : > { %23701 = vmatmul.mubr.f32.gmra.mrb[24].mxu1 %v29124_v53 }
 0xa7e   : > { %v23525_v7 = vpop.f32.mrb[10].mxu0 }
 0xa7f   : > { %v6828_v0 = vsel %vm6052_vm7, %v23525_v7, 0  ;;  %v6778_v26 = vpop.f32.mrb[11].mxu0 }
 0xa80   : > { %v29245_v31 = vand.u32 4294901760, %v6828_v0  ;;  %v6825_v11 = vsel %vm6052_vm7, %v6778_v26, 0 }
 0xa81   : > { %v29248_v51 = vand.u32 4294901760, %v6825_v11 }
 0xa82   : > { %v29251_v20 = vsub.f32 %v6828_v0, %v29245_v31  ;;  %v23528_v24 = vpop.f32.mrb[12].mxu0 }
 0xa83   : > { %v29254_v16 = vsub.f32 %v6825_v11, %v29248_v51  ;;  %v6834_v27 = vsel %vm6052_vm7, %v23528_v24, 0  ;;  %v6790_v42 = vpop.f32.mrb[13].mxu0 }
 0xa84   : > { %v31860_v47 = vand.u32 4294901760, %v29251_v20  ;;  %v29258_v7 = vand.u32 4294901760, %v6834_v27  ;;  %v6831_v8 = vsel %vm6052_vm7, %v6790_v42, 0 }
 0xa85   : > { %v31866_v26 = vand.u32 4294901760, %v29254_v16  ;;  %v29262_v30 = vand.u32 4294901760, %v6831_v8 }
 0xa86   : > { %v6927_v0 = vsub.f32 %v29251_v20, %v31860_v47  ;;  %v29268_v11 = vsub.f32 %v6834_v27, %v29258_v7  ;;  %v23531_v25 = vpop.f32.mrb[14].mxu0 }
 0xa87   : > { %v29271_v24 = vsub.f32 %v6831_v8, %v29262_v30  ;;  %v6840_v43 = vsel %vm6052_vm7, %v23531_v25, 0  ;;  %v6802_v39 = vpop.f32.mrb[15].mxu0  ;;  %v6917_v42 = vsub.f32 %v29254_v16, %v31866_v26 }
 0xa88   : > { %v31879_v28 = vand.u32 4294901760, %v29268_v11  ;;  %v29278_v44 = vand.u32 4294901760, %v6840_v43  ;;  %v6837_v47 = vsel %vm6052_vm7, %v6802_v39, 0  ;;  %v6928_v8 = vand.u32 4294901760, %v6927_v0 }
 0xa89   : > { %v6936_v27 = vand.u32 4294901760, %v29271_v24  ;;  %v29282_v17 = vand.u32 4294901760, %v6837_v47  ;;  %v6918_v53 = vand.u32 4294901760, %v6917_v42 }
 0xa8a   : > { %v29285_v19 = vsub.f32 %v6840_v43, %v29278_v44  ;;  %v23534_v25 = vpop.f32.mrb[16].mxu0  ;;  %v6947_v26 = vsub.f32 %v29268_v11, %v31879_v28 }
 0xa8b   : > { %v6955_v15 = vsub.f32 %v6837_v47, %v29282_v17  ;;  %v6846_v34 = vsel %vm6052_vm7, %v23534_v25, 0  ;;  %v6814_v33 = vpop.f32.mrb[17].mxu0  ;;  %23537 = vmatprep.mubr.f32.mxu0 %v6918_v53  ;;  %v6937_v39 = vsub.f32 %v29271_v24, %v6936_v27 }
 0xa8c   : > { %v6966_v5 = vand.u32 4294901760, %v29285_v19  ;;  %v29294_v42 = vand.u32 4294901760, %v6846_v34  ;;  %v6843_v43 = vsel %vm6052_vm7, %v6814_v33, 0  ;;  %23538 = vmatmul.mubr.f32.vlgmr.msra.gmra.mrb[18].mxu0 %v6928_v8  ;;  %v6948_v25 = vand.u32 4294901760, %v6947_v26 }
 0xa8d   : > { %v6956_v0 = vand.u32 4294901760, %v6955_v15  ;;  %v29297_v59 = vand.u32 4294901760, %v6843_v43  ;;  %v6938_v37 = vand.u32 4294901760, %v6937_v39  ;;  %23550 = vmatpush3.msra.mxu0 %v29235_v13 }
 0xa8e   : > { %v6985_v47 = vsub.f32 %v6846_v34, %v29294_v42  ;;  %v6967_v53 = vsub.f32 %v29285_v19, %v6966_v5  ;;  %23563 = vmatprep.subr.mxu0 %v29225_v14 }
 0xa8f   : > { %v6975_v28 = vsub.f32 %v6843_v43, %v29297_v59  ;;  %23540 = vmatprep.mubr.f32.mxu0 %v6938_v37  ;;  %v6957_v12 = vsub.f32 %v6955_v15, %v6956_v0  ;;  %v32036_v37 = vand.u32 4294901760, %v29268_v11 }
 0xa90   : > { %v6986_v32 = vand.u32 4294901760, %v6985_v47  ;;  %23541 = vmatmul.mubr.f32.gmra.mrb[20].mxu0 %v6948_v25  ;;  %v6968_v22 = vand.u32 4294901760, %v6967_v53 }
 0xa91   : > { %v6976_v33 = vand.u32 4294901760, %v6975_v28  ;;  %v6958_v8 = vand.u32 4294901760, %v6957_v12 }
 0xa92   : > { %v6987_v38 = vsub.f32 %v6985_v47, %v6986_v32 }
 0xa93   : > { %23543 = vmatprep.mubr.f32.mxu0 %v6958_v8  ;;  %v6977_v39 = vsub.f32 %v6975_v28, %v6976_v33 }
 0xa94   : > { %23544 = vmatmul.mubr.f32.gmra.mrb[22].mxu0 %v6968_v22  ;;  %v6988_v34 = vand.u32 4294901760, %v6987_v38  ;;  %v32034_v38 = vand.u32 4294901760, %v29254_v16 }
 0xa95   : > { %v6978_v36 = vand.u32 4294901760, %v6977_v39 }
 0xa97   : > { %23546 = vmatprep.mubr.f32.mxu0 %v6978_v36  ;;  %v32035_v36 = vand.u32 4294901760, %v29251_v20 }
 0xa98   : > { %23547 = vmatmul.mubr.f32.gmra.mrb[24].mxu0 %v6988_v34 }
 0xa99   : > { %23551 = vmatprep.mubr.f32.mxu0 %v29248_v51 }
 0xa9c   : > { %23552 = vmatmul.mubr.f32.vlgmr.msra.gmra.mrb[18].mxu0 %v29245_v31 }
 0xa9d   : > { %23554 = vmatprep.mubr.f32.mxu0 %v29262_v30  ;;  %23564 = vmatpush3.msra.mxu0 %v29225_v14 }
 0xa9e   : > { %23577 = vmatprep.subr.mxu0 %v29214_v9 }
 0xaa0   : > { %23555 = vmatmul.mubr.f32.gmra.mrb[20].mxu0 %v29258_v7 }
 0xaa1   : > { %23557 = vmatprep.mubr.f32.mxu0 %v29282_v17 }
 0xaa4   : > { %23558 = vmatmul.mubr.f32.gmra.mrb[22].mxu0 %v29278_v44 }
 0xaa5   : > { %23560 = vmatprep.mubr.f32.mxu0 %v29297_v59 }
 0xaa8   : > { %23561 = vmatmul.mubr.f32.gmra.mrb[24].mxu0 %v29294_v42 }
 0xaa9   : > { %23565 = vmatprep.mubr.f32.mxu0 %v29254_v16 }
 0xaac   : > { %23566 = vmatmul.mubr.f32.vlgmr.msra.gmra.mrb[18].mxu0 %v29251_v20 }
 0xaad   : > { %23568 = vmatprep.mubr.f32.mxu0 %v29271_v24  ;;  %23578 = vmatpush3.msra.mxu0 %v29214_v9 }
 0xaae   : > { %23591 = vmatprep.subr.mxu0 %v29229_v3 }
 0xab0   : > { %23569 = vmatmul.mubr.f32.gmra.mrb[20].mxu0 %v29268_v11 }
 0xab1   : > { %23571 = vmatprep.mubr.f32.mxu0 %v6955_v15 }
 0xab4   : > { %23572 = vmatmul.mubr.f32.gmra.mrb[22].mxu0 %v29285_v19 }
 0xab5   : > { %23574 = vmatprep.mubr.f32.mxu0 %v6975_v28  ;;  %v2614_v28 = vld [vmem:[%s32037_s0] sm:$0xff] }
 0xab6   : > { %v29333_v16 = vand.u32 4294901760, %v2614_v28 }
 0xab8   : > { %23575 = vmatmul.mubr.f32.gmra.mrb[24].mxu0 %v6985_v47  ;;  %32038 = vst [vmem:[#allocation89_spill] sm:$0xff] %v29333_v16  ;;  %v29340_v20 = vsub.f32 %v2614_v28, %v29333_v16 }
 0xab9   : > { %23579 = vmatprep.mubr.f32.mxu0 %v32034_v38 }
 0xaba   : > { %32039 = vst [vmem:[#allocation90_spill] sm:$0xff] %v29340_v20  ;;  %v29345_v15 = vand.u32 4294901760, %v29340_v20 }
 0xabc   : > { %23580 = vmatmul.mubr.f32.vlgmr.msra.gmra.mrb[18].mxu0 %v32035_v36  ;;  %32040 = vst [vmem:[#allocation91_spill] sm:$0xff] %v29345_v15 }
 0xabd   : > { %23582 = vmatprep.mubr.f32.mxu0 %v6936_v27  ;;  %23592 = vmatpush3.msra.mxu0 %v29229_v3 }
 0xabe   : > { %23605 = vmatprep.subr.mxu0 %v29214_v9 }
 0xac0   : > { %23583 = vmatmul.mubr.f32.gmra.mrb[20].mxu0 %v32036_v37 }
 0xac1   : > { %23585 = vmatprep.mubr.f32.mxu0 %v6956_v0 }
 0xac4   : > { %23586 = vmatmul.mubr.f32.gmra.mrb[22].mxu0 %v6966_v5 }
 0xac5   : > { %23588 = vmatprep.mubr.f32.mxu0 %v6976_v33 }
 0xac8   : > { %23589 = vmatmul.mubr.f32.gmra.mrb[24].mxu0 %v6986_v32  ;;  %v8544_v32 = vsub.f32 %v29340_v20, %v29345_v15 }
 0xac9   : > { %23593 = vmatprep.mubr.f32.mxu0 %v29248_v51 }
 0xaca   : > { %v29353_v5 = vand.u32 4294901760, %v8544_v32 }
 0xacc   : > { %23594 = vmatmul.mubr.f32.vlgmr.msra.gmra.mrb[18].mxu0 %v29245_v31  ;;  %32041 = vst [vmem:[#allocation92_spill] sm:$0xff] %v29353_v5 }
 0xacd   : > { %23596 = vmatprep.mubr.f32.mxu0 %v29262_v30  ;;  %23606 = vmatpush3.msra.mxu0 %v29214_v9 }
 0xace   : > { %23703 = vmatprep.subr.mxu0 %v29333_v16 }
 0xad0   : > { %23597 = vmatmul.mubr.f32.gmra.mrb[20].mxu0 %v29258_v7 }
 0xad1   : > { %23599 = vmatprep.mubr.f32.mxu0 %v29282_v17 }
 0xad4   : > { %23600 = vmatmul.mubr.f32.gmra.mrb[22].mxu0 %v29278_v44 }
 0xad5   : > { %23602 = vmatprep.mubr.f32.mxu0 %v29297_v59 }
 0xad8   : > { %23603 = vmatmul.mubr.f32.gmra.mrb[24].mxu0 %v29294_v42 }
 0xad9   : > { %23607 = vmatprep.mubr.f32.mxu0 %v29248_v51 }
 0xadc   : > { %23608 = vmatmul.mubr.f32.vlgmr.msra.gmra.mrb[18].mxu0 %v29245_v31 }
 0xadd   : > { %23610 = vmatprep.mubr.f32.mxu0 %v29262_v30  ;;  %23704 = vmatpush3.msra.mxu0 %v29333_v16 }
 0xade   : > { %23717 = vmatprep.subr.mxu0 %v29353_v5 }
 0xae0   : > { %23611 = vmatmul.mubr.f32.gmra.mrb[20].mxu0 %v29258_v7 }
 0xae1   : > { %23613 = vmatprep.mubr.f32.mxu0 %v29282_v17 }
 0xae4   : > { %23614 = vmatmul.mubr.f32.gmra.mrb[22].mxu0 %v29278_v44 }
 0xae5   : > { %23616 = vmatprep.mubr.f32.mxu0 %v29297_v59 }
 0xae8   : > { %23617 = vmatmul.mubr.f32.gmra.mrb[24].mxu0 %v29294_v42 }
 0xaf1   : > { %v23693_v51 = vpop.f32.mrb[18].mxu1 }
 0xaf2   : > { %v8374_v19 = vsel %vm6052_vm7, %v23693_v51, 0  ;;  %v8324_v22 = vpop.f32.mrb[19].mxu1 }
 0xaf3   : > { %v29365_v12 = vand.u32 4294901760, %v8374_v19  ;;  %v8371_v30 = vsel %vm6052_vm7, %v8324_v22, 0 }
 0xaf4   : > { %v29368_v31 = vand.u32 4294901760, %v8371_v30 }
 0xaf5   : > { %v29371_v7 = vsub.f32 %v8374_v19, %v29365_v12  ;;  %v23696_v17 = vpop.f32.mrb[20].mxu1 }
 0xaf6   : > { %v29374_v44 = vsub.f32 %v8371_v30, %v29368_v31  ;;  %v8380_v59 = vsel %vm6052_vm7, %v23696_v17, 0  ;;  %v8336_v26 = vpop.f32.mrb[21].mxu1 }
 0xaf7   : > { %v31885_v11 = vand.u32 4294901760, %v29371_v7  ;;  %v29378_v24 = vand.u32 4294901760, %v8380_v59  ;;  %v8377_v27 = vsel %vm6052_vm7, %v8336_v26, 0 }
 0xaf8   : > { %v31887_v42 = vand.u32 4294901760, %v29374_v44  ;;  %v29382_v43 = vand.u32 4294901760, %v8377_v27 }
 0xaf9   : > { %v8473_v0 = vsub.f32 %v29371_v7, %v31885_v11  ;;  %v29388_v47 = vsub.f32 %v8380_v59, %v29378_v24  ;;  %v23699_v25 = vpop.f32.mrb[22].mxu1 }
 0xafa   : > { %v29391_v53 = vsub.f32 %v8377_v27, %v29382_v43  ;;  %v8386_v33 = vsel %vm6052_vm7, %v23699_v25, 0  ;;  %v8348_v8 = vpop.f32.mrb[23].mxu1  ;;  %v8463_v39 = vsub.f32 %v29374_v44, %v31887_v42 }
 0xafb   : > { %v31886_v34 = vand.u32 4294901760, %v29388_v47  ;;  %v29398_v38 = vand.u32 4294901760, %v8386_v33  ;;  %v8383_v36 = vsel %vm6052_vm7, %v8348_v8, 0  ;;  %v8474_v51 = vand.u32 4294901760, %v8473_v0 }
 0xafc   : > { %v8482_v37 = vand.u32 4294901760, %v29391_v53  ;;  %v29402_v28 = vand.u32 4294901760, %v8383_v36  ;;  %v8464_v32 = vand.u32 4294901760, %v8463_v39 }
 0xafd   : > { %v29405_v19 = vsub.f32 %v8386_v33, %v29398_v38  ;;  %v23702_v22 = vpop.f32.mrb[24].mxu1  ;;  %v8493_v30 = vsub.f32 %v29388_v47, %v31886_v34 }
 0xafe   : > { %v8501_v17 = vsub.f32 %v8383_v36, %v29402_v28  ;;  %v8392_v59 = vsel %vm6052_vm7, %v23702_v22, 0  ;;  %v8360_v26 = vpop.f32.mrb[25].mxu1  ;;  %23705 = vmatprep.mubr.f32.mxu0 %v8464_v32  ;;  %v8483_v27 = vsub.f32 %v29391_v53, %v8482_v37 }
 0xaff   : > { %v8512_v25 = vand.u32 4294901760, %v29405_v19  ;;  %v29414_v8 = vand.u32 4294901760, %v8392_v59  ;;  %v8389_v0 = vsel %vm6052_vm7, %v8360_v26, 0  ;;  %23706 = vmatmul.mubr.f32.vlgmr.msra.gmra.mrb[26].mxu0 %v8474_v51  ;;  %v8494_v22 = vand.u32 4294901760, %v8493_v30 }
 0xb00   : > { %v8502_v33 = vand.u32 4294901760, %v8501_v17  ;;  %v29417_v39 = vand.u32 4294901760, %v8389_v0  ;;  %v8484_v11 = vand.u32 4294901760, %v8483_v27  ;;  %23718 = vmatpush3.msra.mxu0 %v29353_v5 }
 0xb01   : > { %v8531_v36 = vsub.f32 %v8392_v59, %v29414_v8  ;;  %v8513_v32 = vsub.f32 %v29405_v19, %v8512_v25  ;;  %23731 = vmatprep.subr.mxu0 %v29340_v20 }
 0xb02   : > { %v8521_v34 = vsub.f32 %v8389_v0, %v29417_v39  ;;  %23708 = vmatprep.mubr.f32.mxu0 %v8484_v11  ;;  %v8503_v42 = vsub.f32 %v8501_v17, %v8502_v33  ;;  %v9151_v11 = vld [vmem:[%s31781_s21 + $0x10] sm:$0xff] }
 0xb03   : > { %v8532_v3 = vand.u32 4294901760, %v8531_v36  ;;  %23709 = vmatmul.mubr.f32.gmra.mrb[28].mxu0 %v8494_v22  ;;  %v8514_v14 = vand.u32 4294901760, %v8513_v32 }
 0xb04   : > { %v8522_v51 = vand.u32 4294901760, %v8521_v34  ;;  %v8504_v26 = vand.u32 4294901760, %v8503_v42  ;;  %v9188_v42 = vand.u32 4294901760, %v9151_v11 }
 0xb05   : > { %v8533_v35 = vsub.f32 %v8531_v36, %v8532_v3 }
 0xb06   : > { %23711 = vmatprep.mubr.f32.mxu0 %v8504_v26  ;;  %v8523_v27 = vsub.f32 %v8521_v34, %v8522_v51 }
 0xb07   : > { %23712 = vmatmul.mubr.f32.gmra.mrb[30].mxu0 %v8514_v14  ;;  %v8534_v59 = vand.u32 4294901760, %v8533_v35  ;;  %v32042_v35 = vand.u32 4294901760, %v29374_v44  ;;  %v32043_v14 = vand.u32 4294901760, %v29371_v7 }
 0xb08   : > { %v8524_v5 = vand.u32 4294901760, %v8523_v27  ;;  %v9350_v27 = vsub.f32 %v9151_v11, %v9188_v42 }
 0xb0a   : > { %23714 = vmatprep.mubr.f32.mxu0 %v8524_v5  ;;  %v32044_v5 = vand.u32 4294901760, %v29388_v47 }
 0xb0b   : > { %23715 = vmatmul.mubr.f32.gmra.mrb[32].mxu0 %v8534_v59 }
 0xb0c   : > { %23719 = vmatprep.mubr.f32.mxu0 %v29368_v31 }
 0xb0f   : > { %23720 = vmatmul.mubr.f32.vlgmr.msra.gmra.mrb[26].mxu0 %v29365_v12 }
 0xb10   : > { %23722 = vmatprep.mubr.f32.mxu0 %v29382_v43  ;;  %23732 = vmatpush3.msra.mxu0 %v29340_v20 }
 0xb11   : > { %23745 = vmatprep.subr.mxu0 %v29333_v16 }
 0xb13   : > { %23723 = vmatmul.mubr.f32.gmra.mrb[28].mxu0 %v29378_v24 }
 0xb14   : > { %23725 = vmatprep.mubr.f32.mxu0 %v29402_v28 }
 0xb17   : > { %23726 = vmatmul.mubr.f32.gmra.mrb[30].mxu0 %v29398_v38 }
 0xb18   : > { %23728 = vmatprep.mubr.f32.mxu0 %v29417_v39 }
 0xb1b   : > { %23729 = vmatmul.mubr.f32.gmra.mrb[32].mxu0 %v29414_v8 }
 0xb1c   : > { %23733 = vmatprep.mubr.f32.mxu0 %v29374_v44 }
 0xb1f   : > { %23734 = vmatmul.mubr.f32.vlgmr.msra.gmra.mrb[26].mxu0 %v29371_v7 }
 0xb20   : > { %23736 = vmatprep.mubr.f32.mxu0 %v29391_v53  ;;  %23746 = vmatpush3.msra.mxu0 %v29333_v16  ;;  %v9153_v53 = vld [vmem:[%s31781_s21 + $0x20] sm:$0xff] }
 0xb21   : > { %23759 = vmatprep.subr.mxu0 %v29345_v15 }
 0xb23   : > { %23737 = vmatmul.mubr.f32.gmra.mrb[28].mxu0 %v29388_v47 }
 0xb24   : > { %23739 = vmatprep.mubr.f32.mxu0 %v8501_v17 }
 0xb27   : > { %23740 = vmatmul.mubr.f32.gmra.mrb[30].mxu0 %v29405_v19 }
 0xb28   : > { %23742 = vmatprep.mubr.f32.mxu0 %v8521_v34  ;;  %v9154_v34 = vld [vmem:[%s31781_s21 + $0x28] sm:$0xff] }
 0xb2b   : > { %23743 = vmatmul.mubr.f32.gmra.mrb[32].mxu0 %v8531_v36 }
 0xb2c   : > { %23747 = vmatprep.mubr.f32.mxu0 %v32042_v35 }
 0xb2f   : > { %23748 = vmatmul.mubr.f32.vlgmr.msra.gmra.mrb[26].mxu0 %v32043_v14 }
 0xb30   : > { %23750 = vmatprep.mubr.f32.mxu0 %v8482_v37  ;;  %23760 = vmatpush3.msra.mxu0 %v29345_v15  ;;  %v9197_v37 = vand.u32 4294901760, %v9154_v34 }
 0xb31   : > { %23773 = vmatprep.subr.mxu0 %v29333_v16 }
 0xb33   : > { %23751 = vmatmul.mubr.f32.gmra.mrb[28].mxu0 %v32044_v5 }
 0xb34   : > { %23753 = vmatprep.mubr.f32.mxu0 %v8502_v33 }
 0xb37   : > { %23754 = vmatmul.mubr.f32.gmra.mrb[30].mxu0 %v8512_v25  ;;  %v9155_v25 = vld [vmem:[%s31781_s21 + $0x30] sm:$0xff] }
 0xb38   : > { %23756 = vmatprep.mubr.f32.mxu0 %v8522_v51  ;;  %v9200_v33 = vand.u32 4294901760, %v9155_v25 }
 0xb3a   : > { %v9378_v46 = vsub.f32 %v9155_v25, %v9200_v33 }
 0xb3b   : > { %23757 = vmatmul.mubr.f32.gmra.mrb[32].mxu0 %v8532_v3  ;;  %v9149_v3 = vld [vmem:[%s31781_s21] sm:$0xff] }
 0xb3c   : > { %23761 = vmatprep.mubr.f32.mxu0 %v29368_v31 }
 0xb3f   : > { %23762 = vmatmul.mubr.f32.vlgmr.msra.gmra.mrb[26].mxu0 %v29365_v12 }
 0xb40   : > { %23764 = vmatprep.mubr.f32.mxu0 %v29382_v43  ;;  %23774 = vmatpush3.msra.mxu0 %v29333_v16  ;;  %v9371_v16 = vsub.f32 %v9154_v34, %v9197_v37  ;;  %v9379_v34 = vand.u32 4294901760, %v9378_v46 }
 0xb42   : > { %v9380_v61 = vsub.f32 %v9378_v46, %v9379_v34 }
 0xb43   : > { %23765 = vmatmul.mubr.f32.gmra.mrb[28].mxu0 %v29378_v24 }
 0xb44   : > { %23767 = vmatprep.mubr.f32.mxu0 %v29402_v28 }
 0xb47   : > { %23768 = vmatmul.mubr.f32.gmra.mrb[30].mxu0 %v29398_v38 }
 0xb48   : > { %23770 = vmatprep.mubr.f32.mxu0 %v29417_v39 }
 0xb4b   : > { %23771 = vmatmul.mubr.f32.gmra.mrb[32].mxu0 %v29414_v8 }
 0xb4c   : > { %23775 = vmatprep.mubr.f32.mxu0 %v29368_v31  ;;  %v9182_v31 = vand.u32 4294901760, %v9149_v3 }
 0xb4e   : > { %v9336_v19 = vsub.f32 %v9149_v3, %v9182_v31 }
 0xb4f   : > { %23776 = vmatmul.mubr.f32.vlgmr.msra.gmra.mrb[26].mxu0 %v29365_v12  ;;  %v9150_v12 = vld [vmem:[%s31781_s21 + $0x8] sm:$0xff] }
 0xb50   : > { %23778 = vmatprep.mubr.f32.mxu0 %v29382_v43  ;;  %v9185_v7 = vand.u32 4294901760, %v9150_v12  ;;  %v9337_v36 = vand.u32 4294901760, %v9336_v19 }
 0xb52   : > { %v29472_v44 = vpack.c.bf16 %v9185_v7, %v9182_v31  ;;  %v9343_v30 = vsub.f32 %v9150_v12, %v9185_v7  ;;  %v9338_v51 = vsub.f32 %v9336_v19, %v9337_v36  ;;  %v9351_v12 = vand.u32 4294901760, %v9350_v27 }
 0xb53   : > { %23779 = vmatmul.mubr.f32.gmra.mrb[28].mxu0 %v29378_v24  ;;  %v9152_v24 = vld [vmem:[%s31781_s21 + $0x18] sm:$0xff] }
 0xb54   : > { %23781 = vmatprep.mubr.f32.mxu0 %v29402_v28  ;;  %25756 = vmatprep.subr.bf16.mxu1 %v29472_v44  ;;  %v9191_v43 = vand.u32 4294901760, %v9152_v24  ;;  %v9344_v22 = vand.u32 4294901760, %v9343_v30  ;;  %v9339_v5 = vand.u32 4294901760, %v9338_v51  ;;  %v9352_v15 = vsub.f32 %v9350_v27, %v9351_v12 }
 0xb55   : > { %25758 = vmatpush3.bf16.msra.mxu1 %v29472_v44 }
 0xb56   : > { %v29482_v47 = vpack.c.bf16 %v9191_v43, %v9188_v42  ;;  %v9345_v26 = vsub.f32 %v9343_v30, %v9344_v22  ;;  %v9357_v35 = vsub.f32 %v9152_v24, %v9191_v43  ;;  %v9353_v11 = vand.u32 4294901760, %v9352_v15 }
 0xb57   : > { %23782 = vmatmul.mubr.f32.gmra.mrb[30].mxu0 %v29398_v38  ;;  %v9194_v38 = vand.u32 4294901760, %v9153_v53  ;;  %v9372_v42 = vand.u32 4294901760, %v9371_v16  ;;  %v9381_v15 = vand.u32 4294901760, %v9380_v61 }
 0xb58   : > { %23784 = vmatprep.mubr.f32.mxu0 %v29417_v39  ;;  %25760 = vmatprep.subr.bf16.mxu1 %v29482_v47  ;;  %v9346_v3 = vand.u32 4294901760, %v9345_v26  ;;  %v9358_v31 = vand.u32 4294901760, %v9357_v35  ;;  %v29517_v25 = vpack.c.bf16 %v9357_v35, %v9350_v27 }
 0xb59   : > { %25762 = vmatpush3.bf16.msra.mxu1 %v29482_v47  ;;  %v29492_v28 = vpack.c.bf16 %v9197_v37, %v9194_v38  ;;  %v9364_v20 = vsub.f32 %v9153_v53, %v9194_v38  ;;  %v9373_v26 = vsub.f32 %v9371_v16, %v9372_v42 }
 0xb5a   : > { %v29506_v7 = vpack.c.bf16 %v9346_v3, %v9339_v5  ;;  %v9359_v9 = vsub.f32 %v9357_v35, %v9358_v31 }
 0xb5b   : > { %23785 = vmatmul.mubr.f32.gmra.mrb[32].mxu0 %v29414_v8  ;;  %v9156_v8 = vld [vmem:[%s31781_s21 + $0x38] sm:$0xff]  ;;  %25764 = vmatprep.subr.bf16.mxu1 %v29492_v28  ;;  %v9365_v24 = vand.u32 4294901760, %v9364_v20  ;;  %v9374_v53 = vand.u32 4294901760, %v9373_v26 }
 0xb5c   : > { %v9203_v39 = vand.u32 4294901760, %v9156_v8  ;;  %v9360_v43 = vand.u32 4294901760, %v9359_v9  ;;  %v29515_v9 = vpack.c.bf16 %v9343_v30, %v9336_v19 }
 0xb5d   : > { %25766 = vmatpush3.bf16.msra.mxu1 %v29492_v28  ;;  %v9366_v51 = vsub.f32 %v9364_v20, %v9365_v24 }
 0xb5e   : > { %v29502_v32 = vpack.c.bf16 %v9203_v39, %v9200_v33  ;;  %v9385_v55 = vsub.f32 %v9156_v8, %v9203_v39  ;;  %v29509_v54 = vpack.c.bf16 %v9360_v43, %v9353_v11  ;;  %v29519_v8 = vpack.c.bf16 %v9371_v16, %v9364_v20 }
 0xb5f   : > { %v9367_v3 = vand.u32 4294901760, %v9366_v51  ;;  %v29523_v39 = vpack.c.bf16 %v9344_v22, %v9337_v36  ;;  %v29525_v11 = vpack.c.bf16 %v9358_v31, %v9351_v12  ;;  %v29527_v43 = vpack.c.bf16 %v9372_v42, %v9365_v24 }
 0xb60   : > { %25768 = vmatprep.subr.bf16.mxu1 %v29502_v32  ;;  %v9386_v38 = vand.u32 4294901760, %v9385_v55  ;;  %v29521_v33 = vpack.c.bf16 %v9385_v55, %v9378_v46 }
 0xb61   : > { %25770 = vmatpush3.bf16.msra.mxu1 %v29502_v32  ;;  %v29511_v37 = vpack.c.bf16 %v9374_v53, %v9367_v3 }
 0xb62   : > { %25772 = vmatprep.subr.bf16.mxu1 %v29506_v7  ;;  %v9387_v10 = vsub.f32 %v9385_v55, %v9386_v38  ;;  %v29529_v51 = vpack.c.bf16 %v9386_v38, %v9379_v34 }
 0xb64   : > { %v9388_v6 = vand.u32 4294901760, %v9387_v10 }
 0xb66   : > { %v29513_v29 = vpack.c.bf16 %v9388_v6, %v9381_v15 }
 0xbaf   : > { %v23609_v17 = vpop.f32.mrb[18].mxu0 }
 0xbb0   : > { %v7549_v0 = vpop.f32.mrb[19].mxu0 }
 0xbb3   : > { %v23612_v59 = vpop.f32.mrb[20].mxu0 }
 0xbb4   : > { %v7561_v14 = vpop.f32.mrb[21].mxu0 }
 0xbb7   : > { %v23615_v13 = vpop.f32.mrb[22].mxu0 }
 0xbb8   : > { %v7573_v2 = vpop.f32.mrb[23].mxu0 }
 0xbbb   : > { %v23618_v23 = vpop.f32.mrb[24].mxu0 }
 0xbbc   : > { %v7585_v5 = vpop.f32.mrb[25].mxu0 }
 0xc22   : > { %v23777_v61 = vpop.f32.mrb[26].mxu0 }
 0xc23   : > { %v9142_v10 = vmul.f32 %v23777_v61, %v23609_v17  ;;  %v9095_v6 = vpop.f32.mrb[27].mxu0 }
 0xc24   : > { %v9141_v26 = vmul.f32 %v9095_v6, %v7549_v0 }
 0xc25   : > { %v9161_v19 = vsel %vm3537_vm5, %v9142_v10, 0 }
 0xc26   : > { %v29532_v30 = vand.u32 4294901760, %v9161_v19  ;;  %v9158_v16 = vsel %vm3537_vm5, %v9141_v26, 0  ;;  %v23780_v46 = vpop.f32.mrb[28].mxu0 }
 0xc27   : > { %v29535_v55 = vand.u32 4294901760, %v9158_v16  ;;  %v9144_v20 = vmul.f32 %v23780_v46, %v23612_v59  ;;  %v9107_v36 = vpop.f32.mrb[29].mxu0 }
 0xc28   : > { %v29538_v22 = vsub.f32 %v9161_v19, %v29532_v30  ;;  %v9143_v27 = vmul.f32 %v9107_v36, %v7561_v14 }
 0xc29   : > { %v29541_v35 = vsub.f32 %v9158_v16, %v29535_v55  ;;  %v9167_v17 = vsel %vm3537_vm5, %v9144_v20, 0 }
 0xc2a   : > { %v9266_v0 = vand.u32 4294901760, %v29538_v22  ;;  %v29545_v12 = vand.u32 4294901760, %v9167_v17  ;;  %v9164_v31 = vsel %vm3537_vm5, %v9143_v27, 0  ;;  %v23783_v24 = vpop.f32.mrb[30].mxu0 }
 0xc2b   : > { %v29548_v42 = vand.u32 4294901760, %v9164_v31  ;;  %v9146_v59 = vmul.f32 %v23783_v24, %v23615_v13  ;;  %v9119_v3 = vpop.f32.mrb[31].mxu0  ;;  %v9256_v53 = vand.u32 4294901760, %v29541_v35 }
 0xc2c   : > { %v9267_v14 = vsub.f32 %v29538_v22, %v9266_v0  ;;  %v29555_v34 = vsub.f32 %v9167_v17, %v29545_v12  ;;  %v9145_v38 = vmul.f32 %v9119_v3, %v7573_v2 }
 0xc2d   : > { %v29558_v15 = vsub.f32 %v9164_v31, %v29548_v42  ;;  %v9173_v61 = vsel %vm3537_vm5, %v9146_v59, 0  ;;  %v9257_v13 = vsub.f32 %v29541_v35, %v9256_v53 }
 0xc2e   : > { %v29564_v10 = vand.u32 4294901760, %v9173_v61  ;;  %v9170_v6 = vsel %vm3537_vm5, %v9145_v38, 0  ;;  %v23786_v26 = vpop.f32.mrb[32].mxu0  ;;  %v9286_v19 = vand.u32 4294901760, %v29555_v34  ;;  %v9268_v27 = vand.u32 4294901760, %v9267_v14 }
 0xc2f   : > { %v29568_v16 = vand.u32 4294901760, %v9170_v6  ;;  %v9148_v46 = vmul.f32 %v23786_v26, %v23618_v23  ;;  %v9131_v2 = vpop.f32.mrb[33].mxu0  ;;  %v9258_v20 = vand.u32 4294901760, %v9257_v13  ;;  %v9276_v36 = vand.u32 4294901760, %v29558_v15 }
 0xc30   : > { %v29572_v17 = vsub.f32 %v9173_v61, %v29564_v10  ;;  %v9147_v31 = vmul.f32 %v9131_v2, %v7585_v5  ;;  %v9287_v24 = vsub.f32 %v29555_v34, %v9286_v19 }
 0xc31   : > { %v29578_v59 = vsub.f32 %v9170_v6, %v29568_v16  ;;  %v9179_v3 = vsel %vm3537_vm5, %v9148_v46, 0  ;;  %23803 = vmatprep.mubr.f32.mxu1 %v9258_v20  ;;  %v9277_v23 = vsub.f32 %v29558_v15, %v9276_v36 }
 0xc32   : > { %v29584_v38 = vand.u32 4294901760, %v9179_v3  ;;  %v9176_v14 = vsel %vm3537_vm5, %v9147_v31, 0  ;;  %23804 = vmatmul.mubr.f32.vlgmr.msra.gmra.mrb[26].mxu1 %v9268_v27  ;;  %v9306_v5 = vand.u32 4294901760, %v29572_v17  ;;  %v9288_v46 = vand.u32 4294901760, %v9287_v24 }
 0xc33   : > { %v29588_v61 = vand.u32 4294901760, %v9176_v14  ;;  %25774 = vmatpush3.bf16.msra.mxu1 %v29506_v7  ;;  %v9278_v13 = vand.u32 4294901760, %v9277_v23  ;;  %v9296_v6 = vand.u32 4294901760, %v29578_v59 }
 0xc34   : > { %v29593_v26 = vsub.f32 %v9179_v3, %v29584_v38  ;;  %25776 = vmatprep.subr.bf16.mxu1 %v29509_v54  ;;  %v9307_v2 = vsub.f32 %v29572_v17, %v9306_v5 }
 0xc35   : > { %v29600_v20 = vsub.f32 %v9176_v14, %v29588_v61  ;;  %23806 = vmatprep.mubr.f32.mxu1 %v9278_v13  ;;  %v9297_v7 = vsub.f32 %v29578_v59, %v9296_v6 }
 0xc36   : > { %23807 = vmatmul.mubr.f32.gmra.mrb[28].mxu1 %v9288_v46  ;;  %v9326_v27 = vand.u32 4294901760, %v29593_v26  ;;  %v9308_v3 = vand.u32 4294901760, %v9307_v2 }
 0xc37   : > { %25778 = vmatpush3.bf16.msra.mxu1 %v29509_v54  ;;  %v9298_v31 = vand.u32 4294901760, %v9297_v7  ;;  %v9316_v24 = vand.u32 4294901760, %v29600_v20  ;;  %v21065_v54 = vld [vmem:[%s31782_s22] ss:$0 sm:$0xff] }
 0xc38   : > { %25780 = vmatprep.subr.bf16.mxu1 %v29511_v37  ;;  %v9327_v23 = vsub.f32 %v29593_v26, %v9326_v27 }
 0xc39   : > { %23809 = vmatprep.mubr.f32.mxu1 %v9298_v31  ;;  %v9317_v14 = vsub.f32 %v29600_v20, %v9316_v24 }
 0xc3a   : > { %23810 = vmatmul.mubr.f32.gmra.mrb[30].mxu1 %v9308_v3  ;;  %v9328_v46 = vand.u32 4294901760, %v9327_v23 }
 0xc3b   : > { %25782 = vmatpush3.bf16.msra.mxu1 %v29511_v37  ;;  %v9318_v13 = vand.u32 4294901760, %v9317_v14 }
 0xc3c   : > { %25784 = vmatprep.subr.bf16.mxu1 %v29513_v29 }
 0xc3d   : > { %23812 = vmatprep.mubr.f32.mxu1 %v9318_v13 }
 0xc3e   : > { %23813 = vmatmul.mubr.f32.gmra.mrb[32].mxu1 %v9328_v46 }
 0xc3f   : > { %25786 = vmatpush3.bf16.msra.mxu1 %v29513_v29  ;;  %23831 = vmatprep.mubr.f32.mxu1 %v29535_v55 }
 0xc40   : > { %25788 = vmatprep.subr.bf16.mxu1 %v29515_v9 }
 0xc42   : > { %23832 = vmatmul.mubr.f32.vlgmr.msra.gmra.mrb[26].mxu1 %v29532_v30 }
 0xc43   : > { %23834 = vmatprep.mubr.f32.mxu1 %v29548_v42  ;;  %25790 = vmatpush3.bf16.msra.mxu1 %v29515_v9 }
 0xc44   : > { %25792 = vmatprep.subr.bf16.mxu1 %v29517_v25 }
 0xc46   : > { %23835 = vmatmul.mubr.f32.gmra.mrb[28].mxu1 %v29545_v12 }
 0xc47   : > { %23837 = vmatprep.mubr.f32.mxu1 %v29568_v16  ;;  %25794 = vmatpush3.bf16.msra.mxu1 %v29517_v25 }
 0xc48   : > { %25796 = vmatprep.subr.bf16.mxu1 %v29519_v8 }
 0xc4a   : > { %23838 = vmatmul.mubr.f32.gmra.mrb[30].mxu1 %v29564_v10 }
 0xc4b   : > { %23840 = vmatprep.mubr.f32.mxu1 %v29588_v61  ;;  %25798 = vmatpush3.bf16.msra.mxu1 %v29519_v8 }
 0xc4c   : > { %25800 = vmatprep.subr.bf16.mxu1 %v29521_v33 }
 0xc4e   : > { %23841 = vmatmul.mubr.f32.gmra.mrb[32].mxu1 %v29584_v38 }
 0xc4f   : > { %25802 = vmatpush3.bf16.msra.mxu1 %v29521_v33  ;;  %23859 = vmatprep.mubr.f32.mxu1 %v29541_v35 }
 0xc50   : > { %25804 = vmatprep.subr.bf16.mxu1 %v29472_v44 }
 0xc52   : > { %23860 = vmatmul.mubr.f32.vlgmr.msra.gmra.mrb[26].mxu1 %v29538_v22 }
 0xc53   : > { %23862 = vmatprep.mubr.f32.mxu1 %v29558_v15  ;;  %25806 = vmatpush3.bf16.msra.mxu1 %v29472_v44 }
 0xc54   : > { %25808 = vmatprep.subr.bf16.mxu1 %v29482_v47 }
 0xc56   : > { %23863 = vmatmul.mubr.f32.gmra.mrb[28].mxu1 %v29555_v34 }
 0xc57   : > { %23865 = vmatprep.mubr.f32.mxu1 %v29578_v59  ;;  %25810 = vmatpush3.bf16.msra.mxu1 %v29482_v47 }
 0xc58   : > { %25812 = vmatprep.subr.bf16.mxu1 %v29492_v28 }
 0xc5a   : > { %23866 = vmatmul.mubr.f32.gmra.mrb[30].mxu1 %v29572_v17 }
 0xc5b   : > { %23868 = vmatprep.mubr.f32.mxu1 %v29600_v20  ;;  %25814 = vmatpush3.bf16.msra.mxu1 %v29492_v28 }
 0xc5c   : > { %25816 = vmatprep.subr.bf16.mxu1 %v29502_v32 }
 0xc5e   : > { %23869 = vmatmul.mubr.f32.gmra.mrb[32].mxu1 %v29593_v26 }
 0xc5f   : > { %25818 = vmatpush3.bf16.msra.mxu1 %v29502_v32  ;;  %23887 = vmatprep.mubr.f32.mxu1 %v9256_v53 }
 0xc60   : > { %25820 = vmatprep.subr.bf16.mxu1 %v29523_v39 }
 0xc62   : > { %23888 = vmatmul.mubr.f32.vlgmr.msra.gmra.mrb[26].mxu1 %v9266_v0 }
 0xc63   : > { %23890 = vmatprep.mubr.f32.mxu1 %v9276_v36  ;;  %25822 = vmatpush3.bf16.msra.mxu1 %v29523_v39 }
 0xc64   : > { %25824 = vmatprep.subr.bf16.mxu1 %v29525_v11 }
 0xc66   : > { %23891 = vmatmul.mubr.f32.gmra.mrb[28].mxu1 %v9286_v19 }
 0xc67   : > { %23893 = vmatprep.mubr.f32.mxu1 %v9296_v6  ;;  %25826 = vmatpush3.bf16.msra.mxu1 %v29525_v11 }
 0xc68   : > { %25828 = vmatprep.subr.bf16.mxu1 %v29527_v43 }
 0xc6a   : > { %23894 = vmatmul.mubr.f32.gmra.mrb[30].mxu1 %v9306_v5 }
 0xc6b   : > { %23896 = vmatprep.mubr.f32.mxu1 %v9316_v24  ;;  %25830 = vmatpush3.bf16.msra.mxu1 %v29527_v43 }
 0xc6c   : > { %25832 = vmatprep.subr.bf16.mxu1 %v29529_v51 }
 0xc6e   : > { %23897 = vmatmul.mubr.f32.gmra.mrb[32].mxu1 %v9326_v27 }
 0xc6f   : > { %25834 = vmatpush3.bf16.msra.mxu1 %v29529_v51  ;;  %23915 = vmatprep.mubr.f32.mxu1 %v29535_v55 }
 0xc70   : > { %25836 = vmatprep.subr.bf16.mxu1 %v29472_v44 }
 0xc72   : > { %23916 = vmatmul.mubr.f32.vlgmr.msra.gmra.mrb[26].mxu1 %v29532_v30 }
 0xc73   : > { %23918 = vmatprep.mubr.f32.mxu1 %v29548_v42  ;;  %25838 = vmatpush3.bf16.msra.mxu1 %v29472_v44 }
 0xc74   : > { %25840 = vmatprep.subr.bf16.mxu1 %v29482_v47 }
 0xc76   : > { %23919 = vmatmul.mubr.f32.gmra.mrb[28].mxu1 %v29545_v12 }
 0xc77   : > { %23921 = vmatprep.mubr.f32.mxu1 %v29568_v16  ;;  %25842 = vmatpush3.bf16.msra.mxu1 %v29482_v47 }
 0xc78   : > { %25844 = vmatprep.subr.bf16.mxu1 %v29492_v28 }
 0xc7a   : > { %23922 = vmatmul.mubr.f32.gmra.mrb[30].mxu1 %v29564_v10 }
 0xc7b   : > { %23924 = vmatprep.mubr.f32.mxu1 %v29588_v61  ;;  %25846 = vmatpush3.bf16.msra.mxu1 %v29492_v28 }
 0xc7c   : > { %25848 = vmatprep.subr.bf16.mxu1 %v29502_v32 }
 0xc7e   : > { %23925 = vmatmul.mubr.f32.gmra.mrb[32].mxu1 %v29584_v38 }
 0xc7f   : > { %25850 = vmatpush3.bf16.msra.mxu1 %v29502_v32  ;;  %23943 = vmatprep.mubr.f32.mxu1 %v29535_v55 }
 0xc82   : > { %23944 = vmatmul.mubr.f32.vlgmr.msra.gmra.mrb[26].mxu1 %v29532_v30 }
 0xc83   : > { %23946 = vmatprep.mubr.f32.mxu1 %v29548_v42 }
 0xc86   : > { %23947 = vmatmul.mubr.f32.gmra.mrb[28].mxu1 %v29545_v12 }
 0xc87   : > { %23949 = vmatprep.mubr.f32.mxu1 %v29568_v16 }
 0xc8a   : > { %23950 = vmatmul.mubr.f32.gmra.mrb[30].mxu1 %v29564_v10 }
 0xc8b   : > { %23952 = vmatprep.mubr.f32.mxu1 %v29588_v61 }
 0xc8e   : > { %23953 = vmatmul.mubr.f32.gmra.mrb[32].mxu1 %v29584_v38 }
 0xd55   : > { %v23945_v29 = vpop.f32.mrb[26].mxu1 }
 0xd56   : > { %v10020_v44 = vadd.f32 %v23945_v29, %v28101_v45  ;;  %v9973_v47 = vpop.f32.mrb[27].mxu1 }
 0xd57   : > { %v10019_v28 = vadd.f32 %v9973_v47, %v28099_v41 }
 0xd58   : > { %v29695_v32 = vadd.f32 %v21065_v54, %v10020_v44 }
 0xd59   : > { %v29697_v37 = vadd.f32 %v21065_v54, %v10019_v28  ;;  %v23948_v9 = vpop.f32.mrb[28].mxu1 }
 0xd5a   : > { %v10022_v25 = vadd.f32 %v23948_v9, %v28107_v52  ;;  %v9985_v8 = vpop.f32.mrb[29].mxu1  ;;  %v10045_v33 = vsel %vm2615_vm4, %v29695_v32, 0.0 }
 0xd5b   : > { %v10021_v39 = vadd.f32 %v9985_v8, %v28105_v50  ;;  %10046 = vadd.xlane.f32.xlu0 %v10045_v33  ;;  %v10042_v45 = vsel %vm2615_vm4, %v29697_v37, 0.0 }
 0xd5c   : > { %v29705_v11 = vadd.f32 %v21065_v54, %v10022_v25  ;;  %10043 = vadd.xlane.f32.xlu1 %v10042_v45 }
 0xd5d   : > { %v29707_v41 = vadd.f32 %v21065_v54, %v10021_v39  ;;  %v23951_v43 = vpop.f32.mrb[30].mxu1 }
 0xd5e   : > { %v10024_v51 = vadd.f32 %v23951_v43, %v28117_v60  ;;  %v9997_v30 = vpop.f32.mrb[31].mxu1  ;;  %v10051_v52 = vsel %vm2615_vm4, %v29705_v11, 0.0 }
 0xd5f   : > { %v10023_v55 = vadd.f32 %v9997_v30, %v28113_v57  ;;  %v10048_v50 = vsel %vm2615_vm4, %v29707_v41, 0.0 }
 0xd60   : > { %v29715_v22 = vadd.f32 %v21065_v54, %v10024_v51  ;;  %10052 = vadd.xlane.f32.xlu1 %v10051_v52  ;;  %10049 = vadd.xlane.f32.xlu0 %v10048_v50 }
 0xd61   : > { %v29717_v35 = vadd.f32 %v21065_v54, %v10023_v55  ;;  %v23954_v0 = vpop.f32.mrb[32].mxu1 }
 0xd62   : > { %v10026_v12 = vadd.f32 %v23954_v0, %v28123_v1  ;;  %v10009_v42 = vpop.f32.mrb[33].mxu1  ;;  %v10057_v60 = vsel %vm2615_vm4, %v29715_v22, 0.0 }
 0xd63   : > { %v10025_v53 = vadd.f32 %v10009_v42, %v28121_v63  ;;  %v10054_v57 = vsel %vm2615_vm4, %v29717_v35, 0.0  ;;  %v10147_v42 = vld [vmem:[%s31783_s23 + $0x8] sm:$0xff] }
 0xd64   : > { %v29725_v34 = vadd.f32 %v21065_v54, %v10026_v12  ;;  %10058 = vadd.xlane.f32.xlu1 %v10057_v60  ;;  %10055 = vadd.xlane.f32.xlu0 %v10054_v57  ;;  %v10146_v12 = vld [vmem:[%s31783_s23] sm:$0xff] }
 0xd65   : > { %v29727_v15 = vadd.f32 %v21065_v54, %v10025_v53  ;;  %v10180_v60 = vand.u32 4294901760, %v10146_v12  ;;  %v10183_v53 = vand.u32 4294901760, %v10147_v42 }
 0xd66   : > { %v10063_v10 = vsel %vm2615_vm4, %v29725_v34, 0.0 }
 0xd67   : > { %v10060_v1 = vsel %vm2615_vm4, %v29727_v15, 0.0  ;;  %v29787_v57 = vpack.c.bf16 %v10183_v53, %v10180_v60 }
 0xd68   : > { %10064 = vadd.xlane.f32.xlu1 %v10063_v10  ;;  %10061 = vadd.xlane.f32.xlu0 %v10060_v1  ;;  %v10328_v10 = vsub.f32 %v10146_v12, %v10180_v60  ;;  %v10335_v1 = vsub.f32 %v10147_v42, %v10183_v53 }
 0xd69   : > { %25852 = vmatprep.subr.bf16.mxu0 %v29787_v57 }
 0xd6a   : > { %25854 = vmatpush3.bf16.msra.mxu0 %v29787_v57 }
 0xde8   : > { %v10047_v19 = vpop.xlane.xlu0 %10046 }
 0xde9   : > { %v10067_v16 = vmul.f32 0.0625, %v10047_v19  ;;  %v10044_v63 = vpop.xlane.xlu1 %10043  ;;  %v10329_v19 = vand.u32 4294901760, %v10328_v10 }
 0xdea   : > { %v10066_v36 = vmul.f32 0.0625, %v10044_v63 }
 0xdeb   : > { %v29734_v17 = vsub.f32 %v29695_v32, %v10067_v16  ;;  %v10336_v16 = vand.u32 4294901760, %v10335_v1  ;;  %v10330_v63 = vsub.f32 %v10328_v10, %v10329_v19 }
 0xdec   : > { %v29737_v59 = vsub.f32 %v29697_v37, %v10066_v36 }
 0xded   : > { %v10053_v38 = vpop.xlane.xlu1 %10052  ;;  %v10050_v5 = vpop.xlane.xlu0 %10049  ;;  %v10083_v61 = vmul.f32 %v29734_v17, %v29734_v17  ;;  %v10337_v36 = vsub.f32 %v10335_v1, %v10336_v16 }
 0xdee   : > { %v10069_v6 = vmul.f32 0.0625, %v10053_v38  ;;  %v10068_v26 = vmul.f32 0.0625, %v10050_v5  ;;  %v10082_v2 = vmul.f32 %v29737_v59, %v29737_v59  ;;  %v10331_v38 = vand.u32 4294901760, %v10330_v63 }
 0xdef   : > { %v10093_v20 = vsel %vm2615_vm4, %v10083_v61, 0.0  ;;  %v10338_v5 = vand.u32 4294901760, %v10337_v36 }
 0xdf0   : > { %v29745_v7 = vsub.f32 %v29705_v11, %v10069_v6  ;;  %v29748_v27 = vsub.f32 %v29707_v41, %v10068_v26  ;;  %10094 = vadd.xlane.f32.xlu1 %v10093_v20  ;;  %v10090_v31 = vsel %vm2615_vm4, %v10082_v2, 0.0  ;;  %v29794_v6 = vpack.c.bf16 %v10335_v1, %v10328_v10 }
 0xdf1   : > { %v10059_v24 = vpop.xlane.xlu1 %10058  ;;  %v10056_v3 = vpop.xlane.xlu0 %10055  ;;  %10091 = vadd.xlane.f32.xlu0 %v10090_v31  ;;  %v29791_v61 = vpack.c.bf16 %v10338_v5, %v10331_v38  ;;  %v29796_v26 = vpack.c.bf16 %v10336_v16, %v10329_v19 }
 0xdf2   : > { %v10071_v23 = vmul.f32 0.0625, %v10059_v24  ;;  %v10070_v14 = vmul.f32 0.0625, %v10056_v3  ;;  %v10085_v13 = vmul.f32 %v29745_v7, %v29745_v7  ;;  %v10084_v46 = vmul.f32 %v29748_v27, %v29748_v27 }
 0xdf3   : > { %25856 = vmatprep.subr.bf16.mxu0 %v29791_v61 }
 0xdf4   : > { %v29756_v29 = vsub.f32 %v29715_v22, %v10071_v23  ;;  %v29759_v54 = vsub.f32 %v29717_v35, %v10070_v14  ;;  %v10099_v44 = vsel %vm2615_vm4, %v10085_v13, 0.0  ;;  %v10096_v47 = vsel %vm2615_vm4, %v10084_v46, 0.0 }
 0xdf5   : > { %10100 = vadd.xlane.f32.xlu1 %v10099_v44  ;;  %v10065_v28 = vpop.xlane.xlu1 %10064  ;;  %10097 = vadd.xlane.f32.xlu0 %v10096_v47  ;;  %v10062_v9 = vpop.xlane.xlu0 %10061 }
 0xdf6   : > { %v10073_v25 = vmul.f32 0.0625, %v10065_v28  ;;  %v10072_v8 = vmul.f32 0.0625, %v10062_v9  ;;  %v10087_v33 = vmul.f32 %v29756_v29, %v29756_v29  ;;  %v10086_v39 = vmul.f32 %v29759_v54, %v29759_v54 }
 0xdf8   : > { %v29768_v45 = vsub.f32 %v29725_v34, %v10073_v25  ;;  %v29771_v43 = vsub.f32 %v29727_v15, %v10072_v8  ;;  %v10105_v51 = vsel %vm2615_vm4, %v10087_v33, 0.0  ;;  %v10102_v30 = vsel %vm2615_vm4, %v10086_v39, 0.0 }
 0xdf9   : > { %10106 = vadd.xlane.f32.xlu1 %v10105_v51  ;;  %10103 = vadd.xlane.f32.xlu0 %v10102_v30 }
 0xdfa   : > { %v10089_v52 = vmul.f32 %v29768_v45, %v29768_v45  ;;  %v10088_v55 = vmul.f32 %v29771_v43, %v29771_v43 }
 0xdfc   : > { %v10111_v50 = vsel %vm2615_vm4, %v10089_v52, 0.0  ;;  %v10108_v0 = vsel %vm2615_vm4, %v10088_v55, 0.0 }
 0xdfd   : > { %10112 = vadd.xlane.f32.xlu1 %v10111_v50  ;;  %10109 = vadd.xlane.f32.xlu0 %v10108_v0 }
 0xe7d   : > { %v10095_v2 = vpop.xlane.xlu1 %10094 }
 0xe7e   : > { %v10115_v20 = vmul.f32 0.0625, %v10095_v2  ;;  %v10092_v31 = vpop.xlane.xlu0 %10091 }
 0xe7f   : > { %v10114_v24 = vmul.f32 0.0625, %v10092_v31 }
 0xe80   : > { %v10123_v3 = vadd.f32 1e-05, %v10115_v20 }
 0xe81   : > { %v10122_v23 = vadd.f32 1e-05, %v10114_v24 }
 0xe82   : > { %27377 = vrsqrt.f32 %v10123_v3  ;;  %v10101_v14 = vpop.xlane.xlu1 %10100  ;;  %v10098_v13 = vpop.xlane.xlu0 %10097 }
 0xe83   : > { %27379 = vrsqrt.f32 %v10122_v23  ;;  %v10117_v46 = vmul.f32 0.0625, %v10101_v14  ;;  %v10116_v44 = vmul.f32 0.0625, %v10098_v13 }
 0xe85   : > { %v10125_v47 = vadd.f32 1e-05, %v10117_v46  ;;  %v10124_v28 = vadd.f32 1e-05, %v10116_v44 }
 0xe86   : > { %v10107_v9 = vpop.xlane.xlu1 %10106  ;;  %v10104_v25 = vpop.xlane.xlu0 %10103 }
 0xe87   : > { %27381 = vrsqrt.f32 %v10125_v47  ;;  %v10119_v8 = vmul.f32 0.0625, %v10107_v9  ;;  %v10118_v33 = vmul.f32 0.0625, %v10104_v25 }
 0xe88   : > { %27383 = vrsqrt.f32 %v10124_v28 }
 0xe89   : > { %v10127_v39 = vadd.f32 1e-05, %v10119_v8  ;;  %v10126_v51 = vadd.f32 1e-05, %v10118_v33 }
 0xe8a   : > { %v10113_v30 = vpop.xlane.xlu1 %10112  ;;  %v10110_v52 = vpop.xlane.xlu0 %10109 }
 0xe8b   : > { %27385 = vrsqrt.f32 %v10127_v39  ;;  %v10121_v55 = vmul.f32 0.0625, %v10113_v30  ;;  %v10120_v50 = vmul.f32 0.0625, %v10110_v52 }
 0xe8c   : > { %v27378_v0 = vpop.eup %27377  ;;  %27387 = vrsqrt.f32 %v10126_v51 }
 0xe8d   : > { %v27380_v12 = vpop.eup %27379  ;;  %v10139_v42 = vmul.f32 %v27378_v0, %v29734_v17  ;;  %v10129_v60 = vadd.f32 1e-05, %v10121_v55  ;;  %v10128_v53 = vadd.f32 1e-05, %v10120_v50 }
 0xe8e   : > { %v10138_v10 = vmul.f32 %v27380_v12, %v29737_v59 }
 0xe8f   : > { %v10159_v1 = vsel %vm2615_vm4, %v10139_v42, 0  ;;  %27389 = vrsqrt.f32 %v10129_v60 }
 0xe90   : > { %v29801_v19 = vand.u32 4294901760, %v10159_v1  ;;  %27391 = vrsqrt.f32 %v10128_v53  ;;  %v10156_v16 = vsel %vm2615_vm4, %v10138_v10, 0 }
 0xe91   : > { %v27382_v63 = vpop.eup %27381  ;;  %v29804_v36 = vand.u32 4294901760, %v10156_v16 }
 0xe92   : > { %v27384_v38 = vpop.eup %27383  ;;  %v29807_v5 = vsub.f32 %v10159_v1, %v29801_v19  ;;  %v10141_v17 = vmul.f32 %v27382_v63, %v29745_v7 }
 0xe93   : > { %v29811_v2 = vsub.f32 %v10156_v16, %v29804_v36  ;;  %v10140_v59 = vmul.f32 %v27384_v38, %v29748_v27 }
 0xe94   : > { %v10258_v20 = vand.u32 4294901760, %v29807_v5  ;;  %v10165_v31 = vsel %vm2615_vm4, %v10141_v17, 0 }
 0xe95   : > { %v27386_v24 = vpop.eup %27385  ;;  %v10248_v3 = vand.u32 4294901760, %v29811_v2  ;;  %v10162_v23 = vsel %vm2615_vm4, %v10140_v59, 0  ;;  %v29818_v14 = vand.u32 4294901760, %v10165_v31 }
 0xe96   : > { %v27388_v13 = vpop.eup %27387  ;;  %v10259_v7 = vsub.f32 %v29807_v5, %v10258_v20  ;;  %v29823_v46 = vand.u32 4294901760, %v10162_v23  ;;  %v10143_v27 = vmul.f32 %v27386_v24, %v29756_v29 }
 0xe97   : > { %v10249_v44 = vsub.f32 %v29811_v2, %v10248_v3  ;;  %v29830_v47 = vsub.f32 %v10165_v31, %v29818_v14  ;;  %v10142_v28 = vmul.f32 %v27388_v13, %v29759_v54 }
 0xe98   : > { %v29834_v9 = vsub.f32 %v10162_v23, %v29823_v46  ;;  %v10171_v25 = vsel %vm2615_vm4, %v10143_v27, 0  ;;  %v10260_v52 = vand.u32 4294901760, %v10259_v7 }
 0xe99   : > { %v27390_v8 = vpop.eup %27389  ;;  %v10250_v33 = vand.u32 4294901760, %v10249_v44  ;;  %v10278_v39 = vand.u32 4294901760, %v29830_v47  ;;  %v10168_v29 = vsel %vm2615_vm4, %v10142_v28, 0  ;;  %v29839_v51 = vand.u32 4294901760, %v10171_v25 }
 0xe9a   : > { %v27392_v30 = vpop.eup %27391  ;;  %v10268_v55 = vand.u32 4294901760, %v29834_v9  ;;  %v29842_v50 = vand.u32 4294901760, %v10168_v29  ;;  %v10145_v54 = vmul.f32 %v27390_v8, %v29768_v45 }
 0xe9b   : > { %23959 = vmatprep.mubr.f32.mxu0 %v10250_v33  ;;  %v10279_v0 = vsub.f32 %v29830_v47, %v10278_v39  ;;  %v10297_v12 = vsub.f32 %v10171_v25, %v29839_v51  ;;  %v10144_v42 = vmul.f32 %v27392_v30, %v29771_v43 }
 0xe9c   : > { %23960 = vmatmul.mubr.f32.vlgmr.msra.gmra.mrb[34].mxu0 %v10260_v52  ;;  %v10269_v60 = vsub.f32 %v29834_v9, %v10268_v55  ;;  %v10287_v53 = vsub.f32 %v10168_v29, %v29842_v50  ;;  %v10177_v10 = vsel %vm2615_vm4, %v10145_v54, 0 }
 0xe9d   : > { %v10280_v1 = vand.u32 4294901760, %v10279_v0  ;;  %25858 = vmatpush3.bf16.msra.mxu0 %v29791_v61  ;;  %v10298_v45 = vand.u32 4294901760, %v10297_v12  ;;  %v10174_v16 = vsel %vm2615_vm4, %v10144_v42, 0  ;;  %v29855_v63 = vand.u32 4294901760, %v10177_v10 }
 0xe9e   : > { %v10270_v38 = vand.u32 4294901760, %v10269_v60  ;;  %v10288_v17 = vand.u32 4294901760, %v10287_v53  ;;  %v29857_v59 = vand.u32 4294901760, %v10174_v16  ;;  %25860 = vmatprep.subr.bf16.mxu0 %v29794_v6 }
 0xe9f   : > { %v10299_v43 = vsub.f32 %v10297_v12, %v10298_v45  ;;  %v10317_v31 = vsub.f32 %v10177_v10, %v29855_v63 }
 0xea0   : > { %23962 = vmatprep.mubr.f32.mxu0 %v10270_v38  ;;  %v10289_v24 = vsub.f32 %v10287_v53, %v10288_v17  ;;  %v10307_v23 = vsub.f32 %v10174_v16, %v29857_v59  ;;  %v21066_v38 = vld [vmem:[%s31784_s24] ss:$0 sm:$0xff] }
 0xea1   : > { %23963 = vmatmul.mubr.f32.gmra.mrb[36].mxu0 %v10280_v1  ;;  %v10300_v61 = vand.u32 4294901760, %v10299_v43  ;;  %v10318_v13 = vand.u32 4294901760, %v10317_v31 }
 0xea2   : > { %v10290_v7 = vand.u32 4294901760, %v10289_v24  ;;  %v10308_v27 = vand.u32 4294901760, %v10307_v23 }
 0xea3   : > { %v10319_v44 = vsub.f32 %v10317_v31, %v10318_v13 }
 0xea4   : > { %23965 = vmatprep.mubr.f32.mxu0 %v10290_v7  ;;  %v10309_v28 = vsub.f32 %v10307_v23, %v10308_v27 }
 0xea5   : > { %23966 = vmatmul.mubr.f32.gmra.mrb[38].mxu0 %v10300_v61  ;;  %v10320_v25 = vand.u32 4294901760, %v10319_v44 }
 0xea6   : > { %v10310_v8 = vand.u32 4294901760, %v10309_v28 }
 0xea8   : > { %23968 = vmatprep.mubr.f32.mxu0 %v10310_v8 }
 0xea9   : > { %23969 = vmatmul.mubr.f32.gmra.mrb[40].mxu0 %v10320_v25 }
 0xeaa   : > { %23975 = vmatprep.mubr.f32.mxu0 %v29804_v36 }
 0xead   : > { %23976 = vmatmul.mubr.f32.vlgmr.msra.gmra.mrb[34].mxu0 %v29801_v19 }
 0xeae   : > { %23978 = vmatprep.mubr.f32.mxu0 %v29823_v46  ;;  %25862 = vmatpush3.bf16.msra.mxu0 %v29794_v6  ;;  %v10948_v6 = vld [vmem:[%s31785_s25 + $0x8] sm:$0xff] }
 0xeaf   : > { %25864 = vmatprep.subr.bf16.mxu0 %v29787_v57 }
 0xeb1   : > { %23979 = vmatmul.mubr.f32.gmra.mrb[36].mxu0 %v29818_v14 }
 0xeb2   : > { %23981 = vmatprep.mubr.f32.mxu0 %v29842_v50 }
 0xeb5   : > { %23982 = vmatmul.mubr.f32.gmra.mrb[38].mxu0 %v29839_v51 }
 0xeb6   : > { %23984 = vmatprep.mubr.f32.mxu0 %v29857_v59 }
 0xeb9   : > { %23985 = vmatmul.mubr.f32.gmra.mrb[40].mxu0 %v29855_v63 }
 0xeba   : > { %23991 = vmatprep.mubr.f32.mxu0 %v29811_v2  ;;  %v10950_v2 = vld [vmem:[%s31785_s25 + $0x18] sm:$0xff] }
 0xebd   : > { %23992 = vmatmul.mubr.f32.vlgmr.msra.gmra.mrb[34].mxu0 %v29807_v5  ;;  %v10949_v5 = vld [vmem:[%s31785_s25 + $0x10] sm:$0xff] }
 0xebe   : > { %23994 = vmatprep.mubr.f32.mxu0 %v29834_v9  ;;  %25866 = vmatpush3.bf16.msra.mxu0 %v29787_v57 }
 0xebf   : > { %25868 = vmatprep.subr.bf16.mxu0 %v29796_v26 }
 0xec1   : > { %23995 = vmatmul.mubr.f32.gmra.mrb[36].mxu0 %v29830_v47 }
 0xec2   : > { %23997 = vmatprep.mubr.f32.mxu0 %v10287_v53 }
 0xec5   : > { %23998 = vmatmul.mubr.f32.gmra.mrb[38].mxu0 %v10297_v12 }
 0xec6   : > { %24000 = vmatprep.mubr.f32.mxu0 %v10307_v23 }
 0xec9   : > { %24001 = vmatmul.mubr.f32.gmra.mrb[40].mxu0 %v10317_v31 }
 0xeca   : > { %24007 = vmatprep.mubr.f32.mxu0 %v10248_v3  ;;  %v10986_v3 = vand.u32 4294901760, %v10950_v2 }
 0xecc   : > { %v11148_v30 = vsub.f32 %v10950_v2, %v10986_v3 }
 0xecd   : > { %24008 = vmatmul.mubr.f32.vlgmr.msra.gmra.mrb[34].mxu0 %v10258_v20  ;;  %v10983_v20 = vand.u32 4294901760, %v10949_v5 }
 0xece   : > { %24010 = vmatprep.mubr.f32.mxu0 %v10268_v55  ;;  %25870 = vmatpush3.bf16.msra.mxu0 %v29796_v26  ;;  %v11149_v54 = vand.u32 4294901760, %v11148_v30 }
 0xecf   : > { %25872 = vmatprep.subr.bf16.mxu0 %v29787_v57 }
 0xed0   : > { %v11150_v42 = vsub.f32 %v11148_v30, %v11149_v54 }
 0xed1   : > { %24011 = vmatmul.mubr.f32.gmra.mrb[36].mxu0 %v10278_v39 }
 0xed2   : > { %24013 = vmatprep.mubr.f32.mxu0 %v10288_v17  ;;  %v11151_v53 = vand.u32 4294901760, %v11150_v42 }
 0xed5   : > { %24014 = vmatmul.mubr.f32.gmra.mrb[38].mxu0 %v10298_v45 }
 0xed6   : > { %24016 = vmatprep.mubr.f32.mxu0 %v10308_v27 }
 0xed9   : > { %24017 = vmatmul.mubr.f32.gmra.mrb[40].mxu0 %v10318_v13 }
 0xeda   : > { %24023 = vmatprep.mubr.f32.mxu0 %v29804_v36 }
 0xedd   : > { %24024 = vmatmul.mubr.f32.vlgmr.msra.gmra.mrb[34].mxu0 %v29801_v19 }
 0xede   : > { %24026 = vmatprep.mubr.f32.mxu0 %v29823_v46  ;;  %25874 = vmatpush3.bf16.msra.mxu0 %v29787_v57  ;;  %v10947_v57 = vld [vmem:[%s31785_s25] sm:$0xff] }
 0xedf   : > { %v10977_v26 = vand.u32 4294901760, %v10947_v57 }
 0xee1   : > { %24027 = vmatmul.mubr.f32.gmra.mrb[36].mxu0 %v29818_v14 }
 0xee2   : > { %24029 = vmatprep.mubr.f32.mxu0 %v29842_v50 }
 0xee5   : > { %24030 = vmatmul.mubr.f32.gmra.mrb[38].mxu0 %v29839_v51 }
 0xee6   : > { %24032 = vmatprep.mubr.f32.mxu0 %v29857_v59 }
 0xee9   : > { %24033 = vmatmul.mubr.f32.gmra.mrb[40].mxu0 %v29855_v63 }
 0xeea   : > { %24039 = vmatprep.mubr.f32.mxu0 %v29804_v36 }
 0xeed   : > { %24040 = vmatmul.mubr.f32.vlgmr.msra.gmra.mrb[34].mxu0 %v29801_v19  ;;  %v10980_v19 = vand.u32 4294901760, %v10948_v6 }
 0xeee   : > { %24042 = vmatprep.mubr.f32.mxu0 %v29823_v46  ;;  %v11127_v46 = vsub.f32 %v10947_v57, %v10977_v26 }
 0xeef   : > { %v29909_v36 = vpack.c.bf16 %v10980_v19, %v10977_v26  ;;  %v11134_v47 = vsub.f32 %v10948_v6, %v10980_v19 }
 0xef0   : > { %v11128_v9 = vand.u32 4294901760, %v11127_v46 }
 0xef1   : > { %24043 = vmatmul.mubr.f32.gmra.mrb[36].mxu0 %v29818_v14  ;;  %25876 = vmatprep.subr.bf16.mxu1 %v29909_v36  ;;  %v29919_v14 = vpack.c.bf16 %v10986_v3, %v10983_v20  ;;  %v11135_v33 = vand.u32 4294901760, %v11134_v47  ;;  %v29928_v1 = vpack.c.bf16 %v11134_v47, %v11127_v46 }
 0xef2   : > { %24045 = vmatprep.mubr.f32.mxu0 %v29842_v50  ;;  %25878 = vmatpush3.bf16.msra.mxu1 %v29909_v36  ;;  %v11129_v39 = vsub.f32 %v11127_v46, %v11128_v9 }
 0xef3   : > { %25880 = vmatprep.subr.bf16.mxu1 %v29919_v14  ;;  %v11136_v29 = vsub.f32 %v11134_v47, %v11135_v33  ;;  %v29932_v16 = vpack.c.bf16 %v11135_v33, %v11128_v9 }
 0xef4   : > { %v11130_v52 = vand.u32 4294901760, %v11129_v39 }
 0xef5   : > { %24046 = vmatmul.mubr.f32.gmra.mrb[38].mxu0 %v29839_v51  ;;  %v11141_v51 = vsub.f32 %v10949_v5, %v10983_v20  ;;  %v11137_v55 = vand.u32 4294901760, %v11136_v29 }
 0xef6   : > { %24048 = vmatprep.mubr.f32.mxu0 %v29857_v59  ;;  %25882 = vmatpush3.bf16.msra.mxu1 %v29919_v14 }
 0xef7   : > { %v11142_v50 = vand.u32 4294901760, %v11141_v51  ;;  %v29923_v0 = vpack.c.bf16 %v11137_v55, %v11130_v52  ;;  %v29930_v45 = vpack.c.bf16 %v11148_v30, %v11141_v51 }
 0xef9   : > { %24049 = vmatmul.mubr.f32.gmra.mrb[40].mxu0 %v29855_v63  ;;  %v11143_v12 = vsub.f32 %v11141_v51, %v11142_v50  ;;  %25884 = vmatprep.subr.bf16.mxu1 %v29923_v0  ;;  %v29934_v63 = vpack.c.bf16 %v11149_v54, %v11142_v50 }
 0xefb   : > { %v11144_v60 = vand.u32 4294901760, %v11143_v12 }
 0xefd   : > { %v29926_v10 = vpack.c.bf16 %v11151_v53, %v11144_v60 }
 0xfc0   : > { %v24041_v17 = vpop.f32.mrb[34].mxu0 }
 0xfc1   : > { %v26399_v59 = vadd.f32 %v24041_v17, %v21066_v38  ;;  %v10893_v43 = vpop.f32.mrb[35].mxu0 }
 0xfc2   : > { %v26400_v31 = vadd.f32 %v21066_v38, %v10893_v43 }
 0xfc3   : > { %v10940_v24 = vmax.f32 %v26399_v59, 0.0 }
 0xfc4   : > { %v10939_v23 = vmax.f32 %v26400_v31, 0.0  ;;  %v24044_v61 = vpop.f32.mrb[36].mxu0 }
 0xfc5   : > { %v10956_v13 = vsel %vm10951_vm8, %v10940_v24, 0  ;;  %v26401_v7 = vadd.f32 %v24044_v61, %v21066_v38  ;;  %v10905_v27 = vpop.f32.mrb[37].mxu0 }
 0xfc6   : > { %v29940_v44 = vand.u32 4294901760, %v10956_v13  ;;  %v10953_v28 = vsel %vm10951_vm8, %v10939_v23, 0  ;;  %v26402_v25 = vadd.f32 %v21066_v38, %v10905_v27 }
 0xfc7   : > { %v29943_v8 = vand.u32 4294901760, %v10953_v28  ;;  %v10942_v57 = vmax.f32 %v26401_v7, 0.0 }
 0xfc8   : > { %v29946_v6 = vsub.f32 %v10956_v13, %v29940_v44  ;;  %v10941_v26 = vmax.f32 %v26402_v25, 0.0  ;;  %v24047_v19 = vpop.f32.mrb[38].mxu0 }
 0xfc9   : > { %v29949_v5 = vsub.f32 %v10953_v28, %v29943_v8  ;;  %v10962_v2 = vsel %vm10951_vm8, %v10942_v57, 0  ;;  %v26403_v20 = vadd.f32 %v24047_v19, %v21066_v38  ;;  %v10917_v3 = vpop.f32.mrb[39].mxu0 }
 0xfca   : > { %v11057_v46 = vand.u32 4294901760, %v29946_v6  ;;  %v29953_v47 = vand.u32 4294901760, %v10962_v2  ;;  %v10959_v9 = vsel %vm10951_vm8, %v10941_v26, 0  ;;  %v26404_v33 = vadd.f32 %v21066_v38, %v10917_v3 }
 0xfcb   : > { %v29956_v39 = vand.u32 4294901760, %v10959_v9  ;;  %v10944_v29 = vmax.f32 %v26403_v20, 0.0  ;;  %v11047_v51 = vand.u32 4294901760, %v29949_v5 }
 0xfcc   : > { %v11058_v30 = vsub.f32 %v29946_v6, %v11057_v46  ;;  %v29963_v52 = vsub.f32 %v10962_v2, %v29953_v47  ;;  %v10943_v55 = vmax.f32 %v26404_v33, 0.0  ;;  %v24050_v50 = vpop.f32.mrb[40].mxu0 }
 0xfcd   : > { %v29966_v54 = vsub.f32 %v10959_v9, %v29956_v39  ;;  %v10968_v12 = vsel %vm10951_vm8, %v10944_v29, 0  ;;  %v26405_v42 = vadd.f32 %v24050_v50, %v21066_v38  ;;  %v10929_v60 = vpop.f32.mrb[41].mxu0  ;;  %v11048_v53 = vsub.f32 %v29949_v5, %v11047_v51 }
 0xfce   : > { %v29972_v17 = vand.u32 4294901760, %v10968_v12  ;;  %v10965_v59 = vsel %vm10951_vm8, %v10943_v55, 0  ;;  %v26406_v43 = vadd.f32 %v21066_v38, %v10929_v60  ;;  %v11059_v13 = vand.u32 4294901760, %v11058_v30 }
 0xfcf   : > { %v29975_v31 = vand.u32 4294901760, %v10965_v59  ;;  %v10946_v24 = vmax.f32 %v26405_v42, 0.0  ;;  %v11049_v23 = vand.u32 4294901760, %v11048_v53  ;;  %v11067_v61 = vand.u32 4294901760, %v29966_v54 }
 0xfd0   : > { %v29979_v7 = vsub.f32 %v10968_v12, %v29972_v17  ;;  %v10945_v27 = vmax.f32 %v26406_v43, 0.0  ;;  %v11077_v28 = vand.u32 4294901760, %v29963_v52 }
 0xfd1   : > { %v29983_v25 = vsub.f32 %v10965_v59, %v29975_v31  ;;  %v10974_v57 = vsel %vm10951_vm8, %v10946_v24, 0  ;;  %24059 = vmatprep.mubr.f32.mxu1 %v11049_v23  ;;  %v11068_v38 = vsub.f32 %v29966_v54, %v11067_v61 }
 0xfd2   : > { %v29989_v26 = vand.u32 4294901760, %v10974_v57  ;;  %v10971_v19 = vsel %vm10951_vm8, %v10945_v27, 0  ;;  %24060 = vmatmul.mubr.f32.vlgmr.msra.gmra.mrb[34].mxu1 %v11059_v13  ;;  %v11078_v2 = vsub.f32 %v29963_v52, %v11077_v28  ;;  %v11097_v20 = vand.u32 4294901760, %v29979_v7 }
 0xfd3   : > { %v29996_v3 = vand.u32 4294901760, %v10971_v19  ;;  %v11069_v9 = vand.u32 4294901760, %v11068_v38  ;;  %v11087_v33 = vand.u32 4294901760, %v29983_v25  ;;  %25886 = vmatpush3.bf16.msra.mxu1 %v29923_v0 }
 0xfd4   : > { %v11116_v29 = vsub.f32 %v10974_v57, %v29989_v26  ;;  %v11079_v30 = vand.u32 4294901760, %v11078_v2  ;;  %v11098_v55 = vsub.f32 %v29979_v7, %v11097_v20  ;;  %25888 = vmatprep.subr.bf16.mxu1 %v29926_v10 }
 0xfd5   : > { %v11106_v50 = vsub.f32 %v10971_v19, %v29996_v3  ;;  %24062 = vmatprep.mubr.f32.mxu1 %v11069_v9  ;;  %v11088_v12 = vsub.f32 %v29983_v25, %v11087_v33 }
 0xfd6   : > { %24063 = vmatmul.mubr.f32.gmra.mrb[36].mxu1 %v11079_v30  ;;  %v11117_v42 = vand.u32 4294901760, %v11116_v29  ;;  %v11099_v59 = vand.u32 4294901760, %v11098_v55 }
 0xfd7   : > { %v11089_v60 = vand.u32 4294901760, %v11088_v12  ;;  %v11107_v53 = vand.u32 4294901760, %v11106_v50  ;;  %25890 = vmatpush3.bf16.msra.mxu1 %v29926_v10 }
 0xfd8   : > { %v11118_v0 = vsub.f32 %v11116_v29, %v11117_v42  ;;  %25892 = vmatprep.subr.bf16.mxu1 %v29928_v1 }
 0xfd9   : > { %24065 = vmatprep.mubr.f32.mxu1 %v11089_v60  ;;  %v11108_v43 = vsub.f32 %v11106_v50, %v11107_v53 }
 0xfda   : > { %24066 = vmatmul.mubr.f32.gmra.mrb[38].mxu1 %v11099_v59  ;;  %v11119_v23 = vand.u32 4294901760, %v11118_v0 }
 0xfdb   : > { %v11109_v24 = vand.u32 4294901760, %v11108_v43 }
 0xfdd   : > { %24068 = vmatprep.mubr.f32.mxu1 %v11109_v24 }
 0xfde   : > { %24069 = vmatmul.mubr.f32.gmra.mrb[40].mxu1 %v11119_v23 }
 0xfdf   : > { %24079 = vmatprep.mubr.f32.mxu1 %v29943_v8 }
 0xfe2   : > { %24080 = vmatmul.mubr.f32.vlgmr.msra.gmra.mrb[34].mxu1 %v29940_v44 }
 0xfe3   : > { %24082 = vmatprep.mubr.f32.mxu1 %v29956_v39  ;;  %25894 = vmatpush3.bf16.msra.mxu1 %v29928_v1 }
 0xfe4   : > { %25896 = vmatprep.subr.bf16.mxu1 %v29930_v45 }
 0xfe6   : > { %24083 = vmatmul.mubr.f32.gmra.mrb[36].mxu1 %v29953_v47 }
 0xfe7   : > { %24085 = vmatprep.mubr.f32.mxu1 %v29975_v31  ;;  %25898 = vmatpush3.bf16.msra.mxu1 %v29930_v45 }
 0xfe8   : > { %25900 = vmatprep.subr.bf16.mxu1 %v29909_v36 }
 0xfea   : > { %24086 = vmatmul.mubr.f32.gmra.mrb[38].mxu1 %v29972_v17 }
 0xfeb   : > { %24088 = vmatprep.mubr.f32.mxu1 %v29996_v3 }
 0xfee   : > { %24089 = vmatmul.mubr.f32.gmra.mrb[40].mxu1 %v29989_v26 }
 0xfef   : > { %24099 = vmatprep.mubr.f32.mxu1 %v29949_v5 }
 0xff2   : > { %24100 = vmatmul.mubr.f32.vlgmr.msra.gmra.mrb[34].mxu1 %v29946_v6 }
 0xff3   : > { %24102 = vmatprep.mubr.f32.mxu1 %v29966_v54  ;;  %25902 = vmatpush3.bf16.msra.mxu1 %v29909_v36 }
 0xff4   : > { %25904 = vmatprep.subr.bf16.mxu1 %v29919_v14 }
 0xff6   : > { %24103 = vmatmul.mubr.f32.gmra.mrb[36].mxu1 %v29963_v52 }
 0xff7   : > { %24105 = vmatprep.mubr.f32.mxu1 %v29983_v25  ;;  %25906 = vmatpush3.bf16.msra.mxu1 %v29919_v14 }
 0xff8   : > { %25908 = vmatprep.subr.bf16.mxu1 %v29932_v16 }
 0xffa   : > { %24106 = vmatmul.mubr.f32.gmra.mrb[38].mxu1 %v29979_v7 }
 0xffb   : > { %24108 = vmatprep.mubr.f32.mxu1 %v11106_v50 }
 0xffe   : > { %24109 = vmatmul.mubr.f32.gmra.mrb[40].mxu1 %v11116_v29 }
 0xfff   : > { %24119 = vmatprep.mubr.f32.mxu1 %v11047_v51 }
0x1002   : > { %24120 = vmatmul.mubr.f32.vlgmr.msra.gmra.mrb[34].mxu1 %v11057_v46 }
0x1003   : > { %24122 = vmatprep.mubr.f32.mxu1 %v11067_v61  ;;  %25910 = vmatpush3.bf16.msra.mxu1 %v29932_v16 }
0x1004   : > { %25912 = vmatprep.subr.bf16.mxu1 %v29934_v63 }
0x1006   : > { %24123 = vmatmul.mubr.f32.gmra.mrb[36].mxu1 %v11077_v28 }
0x1007   : > { %24125 = vmatprep.mubr.f32.mxu1 %v11087_v33  ;;  %25914 = vmatpush3.bf16.msra.mxu1 %v29934_v63 }
0x1008   : > { %25916 = vmatprep.subr.bf16.mxu1 %v29909_v36 }
0x100a   : > { %24126 = vmatmul.mubr.f32.gmra.mrb[38].mxu1 %v11097_v20 }
0x100b   : > { %24128 = vmatprep.mubr.f32.mxu1 %v11107_v53 }
0x100e   : > { %24129 = vmatmul.mubr.f32.gmra.mrb[40].mxu1 %v11117_v42 }
0x100f   : > { %24139 = vmatprep.mubr.f32.mxu1 %v29943_v8 }
0x1012   : > { %24140 = vmatmul.mubr.f32.vlgmr.msra.gmra.mrb[34].mxu1 %v29940_v44 }
0x1013   : > { %24142 = vmatprep.mubr.f32.mxu1 %v29956_v39  ;;  %25918 = vmatpush3.bf16.msra.mxu1 %v29909_v36 }
0x1014   : > { %25920 = vmatprep.subr.bf16.mxu1 %v29919_v14 }
0x1016   : > { %24143 = vmatmul.mubr.f32.gmra.mrb[36].mxu1 %v29953_v47 }
0x1017   : > { %24145 = vmatprep.mubr.f32.mxu1 %v29975_v31  ;;  %25922 = vmatpush3.bf16.msra.mxu1 %v29919_v14  ;;  %v21067_v14 = vld [vmem:[%s31786_s26] ss:$0 sm:$0xff] }
0x101a   : > { %24146 = vmatmul.mubr.f32.gmra.mrb[38].mxu1 %v29972_v17 }
0x101b   : > { %24148 = vmatprep.mubr.f32.mxu1 %v29996_v3 }
0x101e   : > { %24149 = vmatmul.mubr.f32.gmra.mrb[40].mxu1 %v29989_v26 }
0x101f   : > { %24159 = vmatprep.mubr.f32.mxu1 %v29943_v8 }
0x1022   : > { %24160 = vmatmul.mubr.f32.vlgmr.msra.gmra.mrb[34].mxu1 %v29940_v44 }
0x1023   : > { %24162 = vmatprep.mubr.f32.mxu1 %v29956_v39 }
0x1026   : > { %24163 = vmatmul.mubr.f32.gmra.mrb[36].mxu1 %v29953_v47 }
0x1027   : > { %24165 = vmatprep.mubr.f32.mxu1 %v29975_v31 }
0x102a   : > { %24166 = vmatmul.mubr.f32.gmra.mrb[38].mxu1 %v29972_v17 }
0x102b   : > { %24168 = vmatprep.mubr.f32.mxu1 %v29996_v3 }
0x102e   : > { %24169 = vmatmul.mubr.f32.gmra.mrb[40].mxu1 %v29989_v26 }
0x10f5   : > { %v24161_v36 = vpop.f32.mrb[34].mxu1 }
0x10f6   : > { %v11763_v10 = vadd.f32 %v24161_v36, %v29695_v32  ;;  %v11716_v1 = vpop.f32.mrb[35].mxu1 }
0x10f7   : > { %v11762_v45 = vadd.f32 %v11716_v1, %v29697_v37 }
0x10f8   : > { %v30065_v16 = vadd.f32 %v21067_v14, %v11763_v10 }
0x10f9   : > { %v30067_v63 = vadd.f32 %v21067_v14, %v11762_v45  ;;  %v24164_v44 = vpop.f32.mrb[36].mxu1 }
0x10fa   : > { %v11765_v8 = vadd.f32 %v24164_v44, %v29705_v11  ;;  %v11728_v6 = vpop.f32.mrb[37].mxu1  ;;  %v11788_v5 = vsel %vm2615_vm4, %v30065_v16, 0.0 }
0x10fb   : > { %v11764_v46 = vadd.f32 %v11728_v6, %v29707_v41  ;;  %11789 = vadd.xlane.f32.xlu1 %v11788_v5  ;;  %v11785_v32 = vsel %vm2615_vm4, %v30067_v63, 0.0 }
0x10fc   : > { %v30075_v47 = vadd.f32 %v21067_v14, %v11765_v8  ;;  %11786 = vadd.xlane.f32.xlu0 %v11785_v32 }
0x10fd   : > { %v30077_v37 = vadd.f32 %v21067_v14, %v11764_v46  ;;  %v24167_v39 = vpop.f32.mrb[38].mxu1 }
0x10fe   : > { %v11767_v51 = vadd.f32 %v24167_v39, %v29715_v22  ;;  %v11740_v52 = vpop.f32.mrb[39].mxu1  ;;  %v11794_v11 = vsel %vm2615_vm4, %v30075_v47, 0.0 }
0x10ff   : > { %v11766_v54 = vadd.f32 %v11740_v52, %v29717_v35  ;;  %11795 = vadd.xlane.f32.xlu1 %v11794_v11  ;;  %v11791_v41 = vsel %vm2615_vm4, %v30077_v37, 0.0 }
0x1100   : > { %v30085_v17 = vadd.f32 %v21067_v14, %v11767_v51  ;;  %11792 = vadd.xlane.f32.xlu0 %v11791_v41 }
0x1101   : > { %v30087_v31 = vadd.f32 %v21067_v14, %v11766_v54  ;;  %v24170_v61 = vpop.f32.mrb[40].mxu1 }
0x1102   : > { %v11769_v13 = vadd.f32 %v24170_v61, %v29725_v34  ;;  %v11752_v7 = vpop.f32.mrb[41].mxu1  ;;  %v11800_v22 = vsel %vm2615_vm4, %v30085_v17, 0.0 }
0x1103   : > { %v11768_v27 = vadd.f32 %v11752_v7, %v29727_v15  ;;  %11801 = vadd.xlane.f32.xlu1 %v11800_v22  ;;  %v11797_v35 = vsel %vm2615_vm4, %v30087_v31, 0.0  ;;  %v21069_v7 = vld [vmem:[%s31775_s15 + $0x18] sm:$0xff] }
0x1104   : > { %v30095_v28 = vadd.f32 %v21067_v14, %v11769_v13  ;;  %11798 = vadd.xlane.f32.xlu0 %v11797_v35  ;;  %v21068_v13 = vld [vmem:[%s31775_s15 + $0x10] sm:$0xff] }
0x1105   : > { %v30097_v25 = vadd.f32 %v21067_v14, %v11768_v27  ;;  %v11925_v22 = vand.u32 4294901760, %v21068_v13  ;;  %v11928_v27 = vand.u32 4294901760, %v21069_v7 }
0x1106   : > { %v11806_v57 = vsel %vm2615_vm4, %v30095_v28, 0.0 }
0x1107   : > { %11807 = vadd.xlane.f32.xlu1 %v11806_v57  ;;  %v11803_v34 = vsel %vm2615_vm4, %v30097_v25, 0.0  ;;  %v30157_v35 = vpack.c.bf16 %v11928_v27, %v11925_v22  ;;  %v12073_v57 = vsub.f32 %v21068_v13, %v11925_v22 }
0x1108   : > { %11804 = vadd.xlane.f32.xlu0 %v11803_v34  ;;  %v12080_v34 = vsub.f32 %v21069_v7, %v11928_v27 }
0x1109   : > { %25924 = vmatprep.subr.bf16.mxu0 %v30157_v35 }
0x110a   : > { %25926 = vmatpush3.bf16.msra.mxu0 %v30157_v35 }
0x1188   : > { %v11790_v38 = vpop.xlane.xlu1 %11789 }
0x1189   : > { %v11810_v26 = vmul.f32 0.0625, %v11790_v38  ;;  %v11787_v15 = vpop.xlane.xlu0 %11786  ;;  %v12074_v38 = vand.u32 4294901760, %v12073_v57 }
0x118a   : > { %v11809_v19 = vmul.f32 0.0625, %v11787_v15 }
0x118b   : > { %v30104_v2 = vsub.f32 %v30065_v16, %v11810_v26  ;;  %v12081_v26 = vand.u32 4294901760, %v12080_v34  ;;  %v12075_v15 = vsub.f32 %v12073_v57, %v12074_v38 }
0x118c   : > { %v30107_v20 = vsub.f32 %v30067_v63, %v11809_v19  ;;  %v11796_v3 = vpop.xlane.xlu1 %11795 }
0x118d   : > { %v11812_v9 = vmul.f32 0.0625, %v11796_v3  ;;  %v11793_v33 = vpop.xlane.xlu0 %11792  ;;  %v11826_v29 = vmul.f32 %v30104_v2, %v30104_v2  ;;  %v12082_v19 = vsub.f32 %v12080_v34, %v12081_v26  ;;  %v12076_v3 = vand.u32 4294901760, %v12075_v15 }
0x118e   : > { %v11811_v30 = vmul.f32 0.0625, %v11793_v33  ;;  %v11825_v55 = vmul.f32 %v30107_v20, %v30107_v20 }
0x118f   : > { %v30114_v50 = vsub.f32 %v30075_v47, %v11812_v9  ;;  %v11836_v12 = vsel %vm2615_vm4, %v11826_v29, 0.0  ;;  %v12083_v9 = vand.u32 4294901760, %v12082_v19  ;;  %v30164_v29 = vpack.c.bf16 %v12080_v34, %v12073_v57 }
0x1190   : > { %v30118_v42 = vsub.f32 %v30077_v37, %v11811_v30  ;;  %v11802_v60 = vpop.xlane.xlu1 %11801  ;;  %11837 = vadd.xlane.f32.xlu1 %v11836_v12  ;;  %v11833_v53 = vsel %vm2615_vm4, %v11825_v55, 0.0  ;;  %v30166_v30 = vpack.c.bf16 %v12081_v26, %v12074_v38 }
0x1191   : > { %v11814_v59 = vmul.f32 0.0625, %v11802_v60  ;;  %v11799_v0 = vpop.xlane.xlu0 %11798  ;;  %11834 = vadd.xlane.f32.xlu0 %v11833_v53  ;;  %v11828_v43 = vmul.f32 %v30114_v50, %v30114_v50  ;;  %v30161_v33 = vpack.c.bf16 %v12083_v9, %v12076_v3 }
0x1192   : > { %v11813_v24 = vmul.f32 0.0625, %v11799_v0  ;;  %v11827_v23 = vmul.f32 %v30118_v42, %v30118_v42 }
0x1193   : > { %v30126_v36 = vsub.f32 %v30085_v17, %v11814_v59  ;;  %v11842_v14 = vsel %vm2615_vm4, %v11828_v43, 0.0  ;;  %25928 = vmatprep.subr.bf16.mxu0 %v30161_v33 }
0x1194   : > { %v30130_v10 = vsub.f32 %v30087_v31, %v11813_v24  ;;  %11843 = vadd.xlane.f32.xlu1 %v11842_v14  ;;  %v11808_v1 = vpop.xlane.xlu1 %11807  ;;  %v11839_v45 = vsel %vm2615_vm4, %v11827_v23, 0.0 }
0x1195   : > { %v11816_v44 = vmul.f32 0.0625, %v11808_v1  ;;  %11840 = vadd.xlane.f32.xlu0 %v11839_v45  ;;  %v11805_v8 = vpop.xlane.xlu0 %11804  ;;  %v11830_v6 = vmul.f32 %v30126_v36, %v30126_v36 }
0x1196   : > { %v11815_v5 = vmul.f32 0.0625, %v11805_v8  ;;  %v11829_v46 = vmul.f32 %v30130_v10, %v30130_v10 }
0x1197   : > { %v30138_v32 = vsub.f32 %v30095_v28, %v11816_v44  ;;  %v11848_v39 = vsel %vm2615_vm4, %v11830_v6, 0.0 }
0x1198   : > { %v30142_v51 = vsub.f32 %v30097_v25, %v11815_v5  ;;  %11849 = vadd.xlane.f32.xlu1 %v11848_v39  ;;  %v11845_v52 = vsel %vm2615_vm4, %v11829_v46, 0.0 }
0x1199   : > { %11846 = vadd.xlane.f32.xlu0 %v11845_v52  ;;  %v11832_v11 = vmul.f32 %v30138_v32, %v30138_v32 }
0x119a   : > { %v11831_v54 = vmul.f32 %v30142_v51, %v30142_v51 }
0x119b   : > { %v11854_v41 = vsel %vm2615_vm4, %v11832_v11, 0.0 }
0x119c   : > { %11855 = vadd.xlane.f32.xlu1 %v11854_v41  ;;  %v11851_v61 = vsel %vm2615_vm4, %v11831_v54, 0.0 }
0x119d   : > { %11852 = vadd.xlane.f32.xlu0 %v11851_v61 }
0x121d   : > { %v11838_v55 = vpop.xlane.xlu1 %11837 }
0x121e   : > { %v11858_v12 = vmul.f32 0.0625, %v11838_v55  ;;  %v11835_v60 = vpop.xlane.xlu0 %11834 }
0x121f   : > { %v11857_v53 = vmul.f32 0.0625, %v11835_v60 }
0x1220   : > { %v11866_v59 = vadd.f32 1e-05, %v11858_v12 }
0x1221   : > { %v11865_v0 = vadd.f32 1e-05, %v11857_v53  ;;  %v11844_v43 = vpop.xlane.xlu1 %11843 }
0x1222   : > { %27393 = vrsqrt.f32 %v11866_v59  ;;  %v11860_v24 = vmul.f32 0.0625, %v11844_v43  ;;  %v11841_v23 = vpop.xlane.xlu0 %11840 }
0x1223   : > { %27395 = vrsqrt.f32 %v11865_v0  ;;  %v11859_v14 = vmul.f32 0.0625, %v11841_v23 }
0x1224   : > { %v11868_v1 = vadd.f32 1e-05, %v11860_v24 }
0x1225   : > { %v11867_v45 = vadd.f32 1e-05, %v11859_v14  ;;  %v11850_v44 = vpop.xlane.xlu1 %11849 }
0x1226   : > { %27397 = vrsqrt.f32 %v11868_v1  ;;  %v11862_v8 = vmul.f32 0.0625, %v11850_v44  ;;  %v11847_v6 = vpop.xlane.xlu0 %11846 }
0x1227   : > { %27399 = vrsqrt.f32 %v11867_v45  ;;  %v11861_v5 = vmul.f32 0.0625, %v11847_v6 }
0x1228   : > { %v11870_v46 = vadd.f32 1e-05, %v11862_v8 }
0x1229   : > { %v11869_v39 = vadd.f32 1e-05, %v11861_v5  ;;  %v11856_v52 = vpop.xlane.xlu1 %11855 }
0x122a   : > { %27401 = vrsqrt.f32 %v11870_v46  ;;  %v11864_v11 = vmul.f32 0.0625, %v11856_v52  ;;  %v11853_v54 = vpop.xlane.xlu0 %11852 }
0x122b   : > { %27403 = vrsqrt.f32 %v11869_v39  ;;  %v11863_v41 = vmul.f32 0.0625, %v11853_v54 }
0x122c   : > { %v27394_v61 = vpop.eup %27393  ;;  %v11872_v13 = vadd.f32 1e-05, %v11864_v11 }
0x122d   : > { %v27396_v7 = vpop.eup %27395  ;;  %v11882_v22 = vmul.f32 %v27394_v61, %v30104_v2  ;;  %v11871_v27 = vadd.f32 1e-05, %v11863_v41 }
0x122e   : > { %27405 = vrsqrt.f32 %v11872_v13  ;;  %v11881_v57 = vmul.f32 %v27396_v7, %v30107_v20 }
0x122f   : > { %v11904_v34 = vsel %vm2615_vm4, %v11882_v22, 0  ;;  %27407 = vrsqrt.f32 %v11871_v27 }
0x1230   : > { %v27398_v38 = vpop.eup %27397  ;;  %v30171_v26 = vand.u32 4294901760, %v11904_v34  ;;  %v11901_v15 = vsel %vm2615_vm4, %v11881_v57, 0 }
0x1231   : > { %v27400_v19 = vpop.eup %27399  ;;  %v30174_v3 = vand.u32 4294901760, %v11901_v15  ;;  %v11884_v9 = vmul.f32 %v27398_v38, %v30114_v50 }
0x1232   : > { %v30178_v55 = vsub.f32 %v11904_v34, %v30171_v26  ;;  %v11883_v2 = vmul.f32 %v27400_v19, %v30118_v42 }
0x1233   : > { %v30182_v20 = vsub.f32 %v11901_v15, %v30174_v3  ;;  %v11910_v12 = vsel %vm2615_vm4, %v11884_v9, 0 }
0x1234   : > { %v27402_v60 = vpop.eup %27401  ;;  %v12003_v53 = vand.u32 4294901760, %v30178_v55  ;;  %v11907_v59 = vsel %vm2615_vm4, %v11883_v2, 0  ;;  %v30187_v0 = vand.u32 4294901760, %v11910_v12 }
0x1235   : > { %v27404_v43 = vpop.eup %27403  ;;  %v11993_v50 = vand.u32 4294901760, %v30182_v20  ;;  %v30190_v24 = vand.u32 4294901760, %v11907_v59  ;;  %v11886_v23 = vmul.f32 %v27402_v60, %v30126_v36 }
0x1236   : > { %v12004_v42 = vsub.f32 %v30178_v55, %v12003_v53  ;;  %v30197_v14 = vsub.f32 %v11910_v12, %v30187_v0  ;;  %v11885_v1 = vmul.f32 %v27404_v43, %v30130_v10 }
0x1237   : > { %v11994_v45 = vsub.f32 %v30182_v20, %v11993_v50  ;;  %v30204_v44 = vsub.f32 %v11907_v59, %v30190_v24  ;;  %v11916_v8 = vsel %vm2615_vm4, %v11886_v23, 0 }
0x1238   : > { %v27406_v6 = vpop.eup %27405  ;;  %v12023_v36 = vand.u32 4294901760, %v30197_v14  ;;  %v11913_v5 = vsel %vm2615_vm4, %v11885_v1, 0  ;;  %v30209_v46 = vand.u32 4294901760, %v11916_v8  ;;  %v12005_v41 = vand.u32 4294901760, %v12004_v42 }
0x1239   : > { %v27408_v39 = vpop.eup %27407  ;;  %v11995_v52 = vand.u32 4294901760, %v11994_v45  ;;  %v12013_v10 = vand.u32 4294901760, %v30204_v44  ;;  %v30212_v11 = vand.u32 4294901760, %v11913_v5  ;;  %v11888_v54 = vmul.f32 %v27406_v6, %v30138_v32 }
0x123a   : > { %v12024_v61 = vsub.f32 %v30197_v14, %v12023_v36  ;;  %v12042_v13 = vsub.f32 %v11916_v8, %v30209_v46  ;;  %v11887_v7 = vmul.f32 %v27408_v39, %v30142_v51 }
0x123b   : > { %24175 = vmatprep.mubr.f32.mxu0 %v11995_v52  ;;  %v12014_v22 = vsub.f32 %v30204_v44, %v12013_v10  ;;  %v12032_v27 = vsub.f32 %v11913_v5, %v30212_v11  ;;  %v11922_v57 = vsel %vm2615_vm4, %v11888_v54, 0  ;;  %v21079_v54 = vld [vmem:[%s31777_s17 + $0x78] sm:$0xff] }
0x123c   : > { %24176 = vmatmul.mubr.f32.vlgmr.msra.gmra.mrb[42].mxu0 %v12005_v41  ;;  %v12043_v34 = vand.u32 4294901760, %v12042_v13  ;;  %v11919_v32 = vsel %vm2615_vm4, %v11887_v7, 0  ;;  %v30224_v38 = vand.u32 4294901760, %v11922_v57  ;;  %v12025_v51 = vand.u32 4294901760, %v12024_v61 }
0x123d   : > { %v12015_v15 = vand.u32 4294901760, %v12014_v22  ;;  %v12033_v19 = vand.u32 4294901760, %v12032_v27  ;;  %25930 = vmatpush3.bf16.msra.mxu0 %v30161_v33  ;;  %v30227_v9 = vand.u32 4294901760, %v11919_v32  ;;  %v12755_v61 = vand.u32 4294901760, %v21079_v54 }
0x123e   : > { %v12044_v2 = vsub.f32 %v12042_v13, %v12043_v34  ;;  %v12062_v12 = vsub.f32 %v11922_v57, %v30224_v38  ;;  %25932 = vmatprep.subr.bf16.mxu0 %v30164_v29 }
0x123f   : > { %24178 = vmatprep.mubr.f32.mxu0 %v12015_v15  ;;  %v12034_v60 = vsub.f32 %v12032_v27, %v12033_v19  ;;  %v12052_v59 = vsub.f32 %v11919_v32, %v30227_v9 }
0x1240   : > { %24179 = vmatmul.mubr.f32.gmra.mrb[44].mxu0 %v12025_v51  ;;  %v12063_v43 = vand.u32 4294901760, %v12062_v12  ;;  %v12045_v1 = vand.u32 4294901760, %v12044_v2 }
0x1241   : > { %v12035_v23 = vand.u32 4294901760, %v12034_v60  ;;  %v12053_v42 = vand.u32 4294901760, %v12052_v59 }
0x1242   : > { %v12064_v45 = vsub.f32 %v12062_v12, %v12063_v43 }
0x1243   : > { %24181 = vmatprep.mubr.f32.mxu0 %v12035_v23  ;;  %v12054_v33 = vsub.f32 %v12052_v59, %v12053_v42 }
0x1244   : > { %24182 = vmatmul.mubr.f32.gmra.mrb[46].mxu0 %v12045_v1  ;;  %v12065_v6 = vand.u32 4294901760, %v12064_v45 }
0x1245   : > { %v12055_v8 = vand.u32 4294901760, %v12054_v33 }
0x1247   : > { %24184 = vmatprep.mubr.f32.mxu0 %v12055_v8 }
0x1248   : > { %24185 = vmatmul.mubr.f32.gmra.mrb[48].mxu0 %v12065_v6  ;;  %v12937_v6 = vsub.f32 %v21079_v54, %v12755_v61 }
0x1249   : > { %24191 = vmatprep.mubr.f32.mxu0 %v30174_v3 }
0x124c   : > { %24192 = vmatmul.mubr.f32.vlgmr.msra.gmra.mrb[42].mxu0 %v30171_v26 }
0x124d   : > { %24194 = vmatprep.mubr.f32.mxu0 %v30190_v24  ;;  %25934 = vmatpush3.bf16.msra.mxu0 %v30164_v29  ;;  %v32045_v29 = vmov 0.0|0.0  }
0x124e   : > { %25936 = vmatprep.subr.bf16.mxu0 %v30157_v35 }
0x1250   : > { %24195 = vmatmul.mubr.f32.gmra.mrb[44].mxu0 %v30187_v0 }
0x1251   : > { %24197 = vmatprep.mubr.f32.mxu0 %v30212_v11 }
0x1254   : > { %24198 = vmatmul.mubr.f32.gmra.mrb[46].mxu0 %v30209_v46 }
0x1255   : > { %24200 = vmatprep.mubr.f32.mxu0 %v30227_v9 }
0x1258   : > { %24201 = vmatmul.mubr.f32.gmra.mrb[48].mxu0 %v30224_v38 }
0x1259   : > { %24207 = vmatprep.mubr.f32.mxu0 %v30182_v20 }
0x125c   : > { %24208 = vmatmul.mubr.f32.vlgmr.msra.gmra.mrb[42].mxu0 %v30178_v55 }
0x125d   : > { %24210 = vmatprep.mubr.f32.mxu0 %v30204_v44  ;;  %25938 = vmatpush3.bf16.msra.mxu0 %v30157_v35  ;;  %v21076_v44 = vld [vmem:[%s31777_s17 + $0x60] sm:$0xff] }
0x125e   : > { %25940 = vmatprep.subr.bf16.mxu0 %v30166_v30  ;;  %v12746_v5 = vand.u32 4294901760, %v21076_v44 }
0x1260   : > { %24211 = vmatmul.mubr.f32.gmra.mrb[44].mxu0 %v30197_v14 }
0x1261   : > { %24213 = vmatprep.mubr.f32.mxu0 %v12032_v27 }
0x1264   : > { %24214 = vmatmul.mubr.f32.gmra.mrb[46].mxu0 %v12042_v13 }
0x1265   : > { %24216 = vmatprep.mubr.f32.mxu0 %v12052_v59 }
0x1268   : > { %24217 = vmatmul.mubr.f32.gmra.mrb[48].mxu0 %v12062_v12  ;;  %v12916_v12 = vsub.f32 %v21076_v44, %v12746_v5 }
0x1269   : > { %24223 = vmatprep.mubr.f32.mxu0 %v11993_v50 }
0x126a   : > { %v12917_v23 = vand.u32 4294901760, %v12916_v12 }
0x126c   : > { %24224 = vmatmul.mubr.f32.vlgmr.msra.gmra.mrb[42].mxu0 %v12003_v53  ;;  %v21074_v53 = vld [vmem:[%s31777_s17 + $0x50] sm:$0xff]  ;;  %v12918_v45 = vsub.f32 %v12916_v12, %v12917_v23 }
0x126d   : > { %24226 = vmatprep.mubr.f32.mxu0 %v12013_v10  ;;  %25942 = vmatpush3.bf16.msra.mxu0 %v30166_v30  ;;  %v21072_v30 = vld [vmem:[%s31777_s17 + $0x40] sm:$0xff]  ;;  %v12740_v50 = vand.u32 4294901760, %v21074_v53 }
0x126e   : > { %25944 = vmatprep.subr.bf16.mxu0 %v30157_v35 }
0x1270   : > { %24227 = vmatmul.mubr.f32.gmra.mrb[44].mxu0 %v12023_v36  ;;  %v21077_v36 = vld [vmem:[%s31777_s17 + $0x68] sm:$0xff] }
0x1271   : > { %24229 = vmatprep.mubr.f32.mxu0 %v12033_v19 }
0x1274   : > { %24230 = vmatmul.mubr.f32.gmra.mrb[46].mxu0 %v12043_v34  ;;  %v12902_v34 = vsub.f32 %v21074_v53, %v12740_v50  ;;  %v12938_v53 = vand.u32 4294901760, %v12937_v6 }
0x1275   : > { %24232 = vmatprep.mubr.f32.mxu0 %v12053_v42 }
0x1276   : > { %v12903_v19 = vand.u32 4294901760, %v12902_v34 }
0x1278   : > { %24233 = vmatmul.mubr.f32.gmra.mrb[48].mxu0 %v12063_v43  ;;  %v12904_v2 = vsub.f32 %v12902_v34, %v12903_v19 }
0x1279   : > { %24239 = vmatprep.mubr.f32.mxu0 %v30174_v3 }
0x127a   : > { %v12905_v43 = vand.u32 4294901760, %v12904_v2 }
0x127c   : > { %24240 = vmatmul.mubr.f32.vlgmr.msra.gmra.mrb[42].mxu0 %v30171_v26 }
0x127d   : > { %24242 = vmatprep.mubr.f32.mxu0 %v30190_v24  ;;  %25946 = vmatpush3.bf16.msra.mxu0 %v30157_v35  ;;  %v32046_v35 = vmov 0.0  }
0x127e   : > { %26043 = vmatprep.subr.bf16.mxu0 %v32045_v29 }
0x1280   : > { %24243 = vmatmul.mubr.f32.gmra.mrb[44].mxu0 %v30187_v0 }
0x1281   : > { %24245 = vmatprep.mubr.f32.mxu0 %v30212_v11 }
0x1284   : > { %24246 = vmatmul.mubr.f32.gmra.mrb[46].mxu0 %v30209_v46 }
0x1285   : > { %24248 = vmatprep.mubr.f32.mxu0 %v30227_v9 }
0x1288   : > { %24249 = vmatmul.mubr.f32.gmra.mrb[48].mxu0 %v30224_v38 }
0x1289   : > { %24255 = vmatprep.mubr.f32.mxu0 %v30174_v3  ;;  %v12734_v3 = vand.u32 4294901760, %v21072_v30 }
0x128b   : > { %v12888_v52 = vsub.f32 %v21072_v30, %v12734_v3 }
0x128c   : > { %24256 = vmatmul.mubr.f32.vlgmr.msra.gmra.mrb[42].mxu0 %v30171_v26  ;;  %v21073_v26 = vld [vmem:[%s31777_s17 + $0x48] sm:$0xff] }
0x128d   : > { %24258 = vmatprep.mubr.f32.mxu0 %v30190_v24  ;;  %v12737_v55 = vand.u32 4294901760, %v21073_v26  ;;  %v12889_v13 = vand.u32 4294901760, %v12888_v52 }
0x128f   : > { %v30282_v20 = vpack.c.bf16 %v12737_v55, %v12734_v3  ;;  %v12895_v10 = vsub.f32 %v21073_v26, %v12737_v55  ;;  %v12890_v27 = vsub.f32 %v12888_v52, %v12889_v13  ;;  %v12919_v26 = vand.u32 4294901760, %v12918_v45 }
0x1290   : > { %24259 = vmatmul.mubr.f32.gmra.mrb[44].mxu0 %v30187_v0  ;;  %v21075_v0 = vld [vmem:[%s31777_s17 + $0x58] sm:$0xff] }
0x1291   : > { %24261 = vmatprep.mubr.f32.mxu0 %v30212_v11  ;;  %25948 = vmatprep.subr.bf16.mxu1 %v30282_v20  ;;  %v12743_v24 = vand.u32 4294901760, %v21075_v0  ;;  %v21078_v11 = vld [vmem:[%s31777_s17 + $0x70] sm:$0xff]  ;;  %v12896_v7 = vand.u32 4294901760, %v12895_v10 }
0x1292   : > { %25950 = vmatpush3.bf16.msra.mxu1 %v30282_v20  ;;  %v12752_v41 = vand.u32 4294901760, %v21078_v11 }
0x1293   : > { %v30292_v14 = vpack.c.bf16 %v12743_v24, %v12740_v50  ;;  %v12897_v57 = vsub.f32 %v12895_v10, %v12896_v7  ;;  %v12909_v32 = vsub.f32 %v21075_v0, %v12743_v24  ;;  %v12939_v24 = vsub.f32 %v12937_v6, %v12938_v53 }
0x1294   : > { %24262 = vmatmul.mubr.f32.gmra.mrb[46].mxu0 %v30209_v46  ;;  %v12749_v46 = vand.u32 4294901760, %v21077_v36  ;;  %v30312_v22 = vpack.c.bf16 %v12755_v61, %v12752_v41  ;;  %v12930_v8 = vsub.f32 %v21078_v11, %v12752_v41  ;;  %v30333_v41 = vpack.c.bf16 %v12896_v7, %v12889_v13 }
0x1295   : > { %24264 = vmatprep.mubr.f32.mxu0 %v30227_v9  ;;  %25952 = vmatprep.subr.bf16.mxu1 %v30292_v14  ;;  %v12898_v15 = vand.u32 4294901760, %v12897_v57  ;;  %v12910_v9 = vand.u32 4294901760, %v12909_v32 }
0x1296   : > { %25954 = vmatpush3.bf16.msra.mxu1 %v30292_v14  ;;  %v30302_v39 = vpack.c.bf16 %v12749_v46, %v12746_v5  ;;  %v12923_v60 = vsub.f32 %v21077_v36, %v12749_v46  ;;  %v12931_v55 = vand.u32 4294901760, %v12930_v8  ;;  %v12940_v36 = vand.u32 4294901760, %v12939_v24 }
0x1297   : > { %v12911_v59 = vsub.f32 %v12909_v32, %v12910_v9  ;;  %v30325_v46 = vpack.c.bf16 %v12895_v10, %v12888_v52  ;;  %v30331_v54 = vpack.c.bf16 %v12937_v6, %v12930_v8  ;;  %v30335_v61 = vpack.c.bf16 %v12910_v9, %v12903_v19 }
0x1298   : > { %24265 = vmatmul.mubr.f32.gmra.mrb[48].mxu0 %v30224_v38  ;;  %25956 = vmatprep.subr.bf16.mxu1 %v30302_v39  ;;  %v12891_v38 = vand.u32 4294901760, %v12890_v27  ;;  %v12924_v42 = vand.u32 4294901760, %v12923_v60  ;;  %v12932_v50 = vsub.f32 %v12930_v8, %v12931_v55  ;;  %v30327_v27 = vpack.c.bf16 %v12909_v32, %v12902_v34 }
0x1299   : > { %24451 = vmatprep.mubr.msk.f32.mxu0 %vm27526_vm6, %v32046_v35  ;;  %v12912_v1 = vand.u32 4294901760, %v12911_v59  ;;  %v30329_v11 = vpack.c.bf16 %v12923_v60, %v12916_v12 }
0x129a   : > { %25958 = vmatpush3.bf16.msra.mxu1 %v30302_v39  ;;  %v30316_v51 = vpack.c.bf16 %v12898_v15, %v12891_v38  ;;  %v12925_v33 = vsub.f32 %v12923_v60, %v12924_v42  ;;  %v12933_v44 = vand.u32 4294901760, %v12932_v50  ;;  %v30337_v57 = vpack.c.bf16 %v12924_v42, %v12917_v23  ;;  %v21071_v15 = vld [vmem:[%s31776_s16 + $0x1] ss:$0 sm:$0xff] }
0x129b   : > { %25960 = vmatprep.subr.bf16.mxu1 %v30312_v22  ;;  %v30319_v30 = vpack.c.bf16 %v12912_v1, %v12905_v43  ;;  %v30339_v38 = vpack.c.bf16 %v12938_v53, %v12931_v55 }
0x129c   : > { %v12926_v3 = vand.u32 4294901760, %v12925_v33  ;;  %v30323_v5 = vpack.c.bf16 %v12940_v36, %v12933_v44 }
0x129e   : > { %25962 = vmatpush3.bf16.msra.mxu1 %v30312_v22  ;;  %v30321_v0 = vpack.c.bf16 %v12926_v3, %v12919_v26 }
0x129f   : > { %25964 = vmatprep.subr.bf16.mxu1 %v30316_v51 }
0x135f   : > { %v24257_v52 = vpop.f32.mrb[42].mxu0 }
0x1360   : > { %v26407_v10 = vadd.f32 %v24257_v52, %v21071_v15  ;;  %v12638_v34 = vpop.f32.mrb[43].mxu0 }
0x1361   : > { %v26408_v32 = vadd.f32 %v21071_v15, %v12638_v34 }
0x1362   : > { %v12685_v2 = vmax.f32 %v26407_v10, 0.0 }
0x1363   : > { %v12684_v12 = vmax.f32 %v26408_v32, 0.0  ;;  %v24260_v60 = vpop.f32.mrb[44].mxu0 }
0x1364   : > { %v12713_v13 = vsel %vm3537_vm5, %v12685_v2, 0  ;;  %v26409_v7 = vadd.f32 %v24260_v60, %v21071_v15  ;;  %v12650_v19 = vpop.f32.mrb[45].mxu0 }
0x1365   : > { %v30345_v9 = vand.u32 4294901760, %v12713_v13  ;;  %v12710_v59 = vsel %vm3537_vm5, %v12684_v12, 0  ;;  %v26410_v43 = vadd.f32 %v21071_v15, %v12650_v19 }
0x1366   : > { %v30348_v23 = vand.u32 4294901760, %v12710_v59  ;;  %v12687_v42 = vmax.f32 %v26409_v7, 0.0 }
0x1367   : > { %v30351_v1 = vsub.f32 %v12713_v13, %v30345_v9  ;;  %v12686_v45 = vmax.f32 %v26410_v43, 0.0  ;;  %v24263_v33 = vpop.f32.mrb[46].mxu0 }
0x1368   : > { %v30354_v8 = vsub.f32 %v12710_v59, %v30348_v23  ;;  %v12719_v6 = vsel %vm3537_vm5, %v12687_v42, 0  ;;  %v26411_v26 = vadd.f32 %v24263_v33, %v21071_v15  ;;  %v12662_v3 = vpop.f32.mrb[47].mxu0 }
0x1369   : > { %v31917_v55 = vand.u32 4294901760, %v30351_v1  ;;  %v30358_v53 = vand.u32 4294901760, %v12719_v6  ;;  %v12716_v50 = vsel %vm3537_vm5, %v12686_v45, 0  ;;  %v26412_v24 = vadd.f32 %v21071_v15, %v12662_v3 }
0x136a   : > { %v30361_v44 = vand.u32 4294901760, %v12716_v50  ;;  %v12689_v36 = vmax.f32 %v26411_v26, 0.0  ;;  %v12808_v52 = vand.u32 4294901760, %v30354_v8 }
0x136b   : > { %v12819_v10 = vsub.f32 %v30351_v1, %v31917_v55  ;;  %v30368_v34 = vsub.f32 %v12719_v6, %v30358_v53  ;;  %v12688_v32 = vmax.f32 %v26412_v24, 0.0  ;;  %v24266_v2 = vpop.f32.mrb[48].mxu0 }
0x136c   : > { %v30371_v12 = vsub.f32 %v12716_v50, %v30361_v44  ;;  %v12725_v60 = vsel %vm3537_vm5, %v12689_v36, 0  ;;  %v26413_v13 = vadd.f32 %v24266_v2, %v21071_v15  ;;  %v12674_v7 = vpop.f32.mrb[49].mxu0  ;;  %v12809_v19 = vsub.f32 %v30354_v8, %v12808_v52 }
0x136d   : > { %v30377_v59 = vand.u32 4294901760, %v12725_v60  ;;  %v12722_v43 = vsel %vm3537_vm5, %v12688_v32, 0  ;;  %v26414_v42 = vadd.f32 %v21071_v15, %v12674_v7  ;;  %v12820_v3 = vand.u32 4294901760, %v12819_v10 }
0x136e   : > { %v30380_v45 = vand.u32 4294901760, %v12722_v43  ;;  %v12691_v33 = vmax.f32 %v26413_v13, 0.0  ;;  %v12810_v6 = vand.u32 4294901760, %v12809_v19  ;;  %v12828_v26 = vand.u32 4294901760, %v30371_v12 }
0x136f   : > { %v30384_v50 = vsub.f32 %v12725_v60, %v30377_v59  ;;  %v12690_v24 = vmax.f32 %v26414_v42, 0.0  ;;  %v12838_v36 = vand.u32 4294901760, %v30368_v34 }
0x1370   : > { %v30388_v2 = vsub.f32 %v12722_v43, %v30380_v45  ;;  %v12731_v55 = vsel %vm3537_vm5, %v12691_v33, 0  ;;  %24283 = vmatprep.mubr.f32.mxu1 %v12810_v6  ;;  %v12829_v15 = vsub.f32 %v30371_v12, %v12828_v26 }
0x1371   : > { %v30394_v32 = vand.u32 4294901760, %v12731_v55  ;;  %v12728_v10 = vsel %vm3537_vm5, %v12690_v24, 0  ;;  %24284 = vmatmul.mubr.f32.vlgmr.msra.gmra.mrb[42].mxu1 %v12820_v3  ;;  %v12839_v60 = vsub.f32 %v30368_v34, %v12838_v36  ;;  %v31918_v13 = vand.u32 4294901760, %v30384_v50 }
0x1372   : > { %v30401_v7 = vand.u32 4294901760, %v12728_v10  ;;  %25966 = vmatpush3.bf16.msra.mxu1 %v30316_v51  ;;  %v12830_v19 = vand.u32 4294901760, %v12829_v15  ;;  %v12848_v43 = vand.u32 4294901760, %v30388_v2 }
0x1373   : > { %v30406_v42 = vsub.f32 %v12731_v55, %v30394_v32  ;;  %v12840_v33 = vand.u32 4294901760, %v12839_v60  ;;  %25968 = vmatprep.subr.bf16.mxu1 %v30319_v30  ;;  %v12859_v6 = vsub.f32 %v30384_v50, %v31918_v13 }
0x1374   : > { %v30413_v3 = vsub.f32 %v12728_v10, %v30401_v7  ;;  %24286 = vmatprep.mubr.f32.mxu1 %v12830_v19  ;;  %v12849_v51 = vsub.f32 %v30388_v2, %v12848_v43 }
0x1375   : > { %24287 = vmatmul.mubr.f32.gmra.mrb[44].mxu1 %v12840_v33  ;;  %v12878_v24 = vand.u32 4294901760, %v30406_v42  ;;  %v12860_v60 = vand.u32 4294901760, %v12859_v6 }
0x1376   : > { %25970 = vmatpush3.bf16.msra.mxu1 %v30319_v30  ;;  %v12850_v55 = vand.u32 4294901760, %v12849_v51  ;;  %v12868_v15 = vand.u32 4294901760, %v30413_v3  ;;  %v32047_v30 = vand.u32 4294901760, %v30351_v1 }
0x1377   : > { %25972 = vmatprep.subr.bf16.mxu1 %v30321_v0  ;;  %v12879_v13 = vsub.f32 %v30406_v42, %v12878_v24 }
0x1378   : > { %24289 = vmatprep.mubr.f32.mxu1 %v12850_v55  ;;  %v12869_v10 = vsub.f32 %v30413_v3, %v12868_v15 }
0x1379   : > { %24290 = vmatmul.mubr.f32.gmra.mrb[46].mxu1 %v12860_v60  ;;  %v12880_v33 = vand.u32 4294901760, %v12879_v13 }
0x137a   : > { %25974 = vmatpush3.bf16.msra.mxu1 %v30321_v0  ;;  %v12870_v19 = vand.u32 4294901760, %v12869_v10  ;;  %v32048_v0 = vand.u32 4294901760, %v30384_v50 }
0x137b   : > { %25976 = vmatprep.subr.bf16.mxu1 %v30323_v5 }
0x137c   : > { %24292 = vmatprep.mubr.f32.mxu1 %v12870_v19 }
0x137d   : > { %24293 = vmatmul.mubr.f32.gmra.mrb[48].mxu1 %v12880_v33 }
0x137e   : > { %25978 = vmatpush3.bf16.msra.mxu1 %v30323_v5  ;;  %24311 = vmatprep.mubr.f32.mxu1 %v30348_v23 }
0x137f   : > { %25980 = vmatprep.subr.bf16.mxu1 %v30325_v46 }
0x1381   : > { %24312 = vmatmul.mubr.f32.vlgmr.msra.gmra.mrb[42].mxu1 %v30345_v9 }
0x1382   : > { %24314 = vmatprep.mubr.f32.mxu1 %v30361_v44  ;;  %25982 = vmatpush3.bf16.msra.mxu1 %v30325_v46 }
0x1383   : > { %25984 = vmatprep.subr.bf16.mxu1 %v30327_v27 }
0x1385   : > { %24315 = vmatmul.mubr.f32.gmra.mrb[44].mxu1 %v30358_v53 }
0x1386   : > { %24317 = vmatprep.mubr.f32.mxu1 %v30380_v45  ;;  %25986 = vmatpush3.bf16.msra.mxu1 %v30327_v27 }
0x1387   : > { %25988 = vmatprep.subr.bf16.mxu1 %v30329_v11 }
0x1389   : > { %24318 = vmatmul.mubr.f32.gmra.mrb[46].mxu1 %v30377_v59 }
0x138a   : > { %24320 = vmatprep.mubr.f32.mxu1 %v30401_v7  ;;  %25990 = vmatpush3.bf16.msra.mxu1 %v30329_v11 }
0x138b   : > { %25992 = vmatprep.subr.bf16.mxu1 %v30331_v54 }
0x138d   : > { %24321 = vmatmul.mubr.f32.gmra.mrb[48].mxu1 %v30394_v32 }
0x138e   : > { %25994 = vmatpush3.bf16.msra.mxu1 %v30331_v54  ;;  %24339 = vmatprep.mubr.f32.mxu1 %v30354_v8 }
0x138f   : > { %25996 = vmatprep.subr.bf16.mxu1 %v30282_v20 }
0x1391   : > { %24340 = vmatmul.mubr.f32.vlgmr.msra.gmra.mrb[42].mxu1 %v30351_v1 }
0x1392   : > { %24342 = vmatprep.mubr.f32.mxu1 %v30371_v12  ;;  %25998 = vmatpush3.bf16.msra.mxu1 %v30282_v20 }
0x1393   : > { %26000 = vmatprep.subr.bf16.mxu1 %v30292_v14 }
0x1395   : > { %24343 = vmatmul.mubr.f32.gmra.mrb[44].mxu1 %v30368_v34 }
0x1396   : > { %24345 = vmatprep.mubr.f32.mxu1 %v30388_v2  ;;  %26002 = vmatpush3.bf16.msra.mxu1 %v30292_v14 }
0x1397   : > { %26004 = vmatprep.subr.bf16.mxu1 %v30302_v39 }
0x1399   : > { %24346 = vmatmul.mubr.f32.gmra.mrb[46].mxu1 %v30384_v50 }
0x139a   : > { %24348 = vmatprep.mubr.f32.mxu1 %v30413_v3  ;;  %26006 = vmatpush3.bf16.msra.mxu1 %v30302_v39 }
0x139b   : > { %26008 = vmatprep.subr.bf16.mxu1 %v30312_v22 }
0x139d   : > { %24349 = vmatmul.mubr.f32.gmra.mrb[48].mxu1 %v30406_v42 }
0x139e   : > { %26010 = vmatpush3.bf16.msra.mxu1 %v30312_v22  ;;  %24367 = vmatprep.mubr.f32.mxu1 %v12808_v52 }
0x139f   : > { %26012 = vmatprep.subr.bf16.mxu1 %v30333_v41 }
0x13a1   : > { %24368 = vmatmul.mubr.f32.vlgmr.msra.gmra.mrb[42].mxu1 %v32047_v30 }
0x13a2   : > { %24370 = vmatprep.mubr.f32.mxu1 %v12828_v26  ;;  %26014 = vmatpush3.bf16.msra.mxu1 %v30333_v41 }
0x13a3   : > { %26016 = vmatprep.subr.bf16.mxu1 %v30335_v61 }
0x13a5   : > { %24371 = vmatmul.mubr.f32.gmra.mrb[44].mxu1 %v12838_v36 }
0x13a6   : > { %24373 = vmatprep.mubr.f32.mxu1 %v12848_v43  ;;  %26018 = vmatpush3.bf16.msra.mxu1 %v30335_v61 }
0x13a7   : > { %26020 = vmatprep.subr.bf16.mxu1 %v30337_v57 }
0x13a9   : > { %24374 = vmatmul.mubr.f32.gmra.mrb[46].mxu1 %v32048_v0 }
0x13aa   : > { %24376 = vmatprep.mubr.f32.mxu1 %v12868_v15  ;;  %26022 = vmatpush3.bf16.msra.mxu1 %v30337_v57 }
0x13ab   : > { %26024 = vmatprep.subr.bf16.mxu1 %v30339_v38 }
0x13ad   : > { %24377 = vmatmul.mubr.f32.gmra.mrb[48].mxu1 %v12878_v24 }
0x13ae   : > { %26026 = vmatpush3.bf16.msra.mxu1 %v30339_v38  ;;  %24395 = vmatprep.mubr.f32.mxu1 %v30348_v23 }
0x13af   : > { %26028 = vmatprep.subr.bf16.mxu1 %v30282_v20 }
0x13b1   : > { %24396 = vmatmul.mubr.f32.vlgmr.msra.gmra.mrb[42].mxu1 %v30345_v9 }
0x13b2   : > { %24398 = vmatprep.mubr.f32.mxu1 %v30361_v44  ;;  %26030 = vmatpush3.bf16.msra.mxu1 %v30282_v20  ;;  %v21081_v20 = vld [vmem:[%s31778_s18 + $0x1] ss:$0 sm:$0xff] }
0x13b3   : > { %26032 = vmatprep.subr.bf16.mxu1 %v30292_v14 }
0x13b5   : > { %24399 = vmatmul.mubr.f32.gmra.mrb[44].mxu1 %v30358_v53 }
0x13b6   : > { %24401 = vmatprep.mubr.f32.mxu1 %v30380_v45  ;;  %26034 = vmatpush3.bf16.msra.mxu1 %v30292_v14 }
0x13b7   : > { %26036 = vmatprep.subr.bf16.mxu1 %v30302_v39 }
0x13b9   : > { %24402 = vmatmul.mubr.f32.gmra.mrb[46].mxu1 %v30377_v59 }
0x13ba   : > { %24404 = vmatprep.mubr.f32.mxu1 %v30401_v7  ;;  %26038 = vmatpush3.bf16.msra.mxu1 %v30302_v39 }
0x13bb   : > { %26040 = vmatprep.subr.bf16.mxu1 %v30312_v22 }
0x13bd   : > { %24405 = vmatmul.mubr.f32.gmra.mrb[48].mxu1 %v30394_v32 }
0x13be   : > { %26042 = vmatpush3.bf16.msra.mxu1 %v30312_v22  ;;  %24423 = vmatprep.mubr.f32.mxu1 %v30348_v23 }
0x13bf   : > { %26187 = vmatprep.subr.bf16.mxu1 %v32045_v29 }
0x13c1   : > { %24424 = vmatmul.mubr.f32.vlgmr.msra.gmra.mrb[42].mxu1 %v30345_v9 }
0x13c2   : > { %24426 = vmatprep.mubr.f32.mxu1 %v30361_v44 }
0x13c5   : > { %24427 = vmatmul.mubr.f32.gmra.mrb[44].mxu1 %v30358_v53 }
0x13c6   : > { %24429 = vmatprep.mubr.f32.mxu1 %v30380_v45 }
0x13c9   : > { %24430 = vmatmul.mubr.f32.gmra.mrb[46].mxu1 %v30377_v59 }
0x13ca   : > { %24432 = vmatprep.mubr.f32.mxu1 %v30401_v7 }
0x13cd   : > { %24433 = vmatmul.mubr.f32.gmra.mrb[48].mxu1 %v30394_v32 }
0x13ce   : > { %24667 = vmatprep.mubr.msk.f32.mxu1 %vm27526_vm6, %v32046_v35 }
0x1494   : > { %v24425_v14 = vpop.f32.mrb[42].mxu1 }
0x1495   : > { %v26415_v39 = vadd.f32 %v24425_v14, %v21081_v20  ;;  %v13525_v22 = vpop.f32.mrb[43].mxu1 }
0x1496   : > { %v26416_v5 = vadd.f32 %v21081_v20, %v13525_v22 }
0x1497   : > { %v13572_v46 = vmul.f32 %v26415_v39, %v28537_v62 }
0x1498   : > { %v13571_v27 = vmul.f32 %v26416_v5, %v28554_v58  ;;  %v24428_v11 = vpop.f32.mrb[44].mxu1 }
0x1499   : > { %v13583_v54 = vand.u32 4294901760, %v13572_v46  ;;  %v26417_v41 = vadd.f32 %v24428_v11, %v21081_v20  ;;  %14127 = vrot.lane.b32.xlu1 %v13572_v46, %s32049_s11  ;;  %v13537_v61 = vpop.f32.mrb[45].mxu1 }
0x149a   : > { %v13580_v57 = vand.u32 4294901760, %v13571_v27  ;;  %v26418_v38 = vadd.f32 %v21081_v20, %v13537_v61  ;;  %14125 = vrot.lane.b32.xlu0 %v13571_v27, %s32049_s11 }
0x149b   : > { %v30513_v9 = vsub.f32 %v13572_v46, %v13583_v54  ;;  %v13574_v23 = vmul.f32 %v26417_v41, %v28541_v40 }
0x149c   : > { %v30516_v1 = vsub.f32 %v13571_v27, %v13580_v57  ;;  %v13573_v62 = vmul.f32 %v26418_v38, %v28539_v18  ;;  %v24431_v8 = vpop.f32.mrb[46].mxu1  ;;  %v30519_v58 = vpack.c.bf16 %v13583_v54, %v13580_v57 }
0x149d   : > { %v13672_v53 = vand.u32 4294901760, %v30513_v9  ;;  %v13589_v44 = vand.u32 4294901760, %v13574_v23  ;;  %v26419_v52 = vadd.f32 %v24431_v8, %v21081_v20  ;;  %v13549_v34 = vpop.f32.mrb[47].mxu1 }
0x149e   : > { %v13665_v12 = vand.u32 4294901760, %v30516_v1  ;;  %v13586_v59 = vand.u32 4294901760, %v13573_v62  ;;  %v26420_v45 = vadd.f32 %v21081_v20, %v13549_v34  ;;  %14129 = vrot.lane.b32.xlu1 %v13573_v62, %s32049_s11  ;;  %14131 = vrot.lane.b32.xlu0 %v13574_v23, %s32049_s11  ;;  %v26068_v40 = vpack.c.bf16 %v30513_v9, %v30516_v1 }
0x149f   : > { %v30527_v18 = vsub.f32 %v13574_v23, %v13589_v44  ;;  %v13576_v26 = vmul.f32 %v26419_v52, %v28556_v48  ;;  %26045 = vmatpush3.bf16.msra.mxu0 %v30519_v58  ;;  %v13673_v50 = vsub.f32 %v30513_v9, %v13672_v53  ;;  %v32052_v9 = vld [vmem:[#allocation14_spill] sm:$0xff] }
0x14a0   : > { %v30532_v36 = vsub.f32 %v13573_v62, %v13586_v59  ;;  %v13575_v2 = vmul.f32 %v26420_v45, %v28546_v56  ;;  %v24434_v32 = vpop.f32.mrb[48].mxu1  ;;  %26046 = vmatprep.subr.bf16.mxu0 %v32045_v29  ;;  %v30536_v13 = vpack.c.bf16 %v13589_v44, %v13586_v59  ;;  %v13666_v7 = vsub.f32 %v30516_v1, %v13665_v12 }
0x14a1   : > { %v13686_v43 = vand.u32 4294901760, %v30527_v18  ;;  %v13595_v42 = vand.u32 4294901760, %v13576_v26  ;;  %v26421_v6 = vadd.f32 %v24434_v32, %v21081_v20  ;;  %v13561_v48 = vpop.f32.mrb[49].mxu1  ;;  %v13674_v3 = vand.u32 4294901760, %v13673_v50  ;;  %v32050_v32 = vld [vmem:[#allocation12_spill] sm:$0xff] }
0x14a2   : > { %v13679_v51 = vand.u32 4294901760, %v30532_v36  ;;  %v13592_v24 = vand.u32 4294901760, %v13575_v2  ;;  %v26422_v55 = vadd.f32 %v21081_v20, %v13561_v48  ;;  %14133 = vrot.lane.b32.xlu1 %v13575_v2, %s32049_s11  ;;  %14135 = vrot.lane.b32.xlu0 %v13576_v26, %s32049_s11  ;;  %v13667_v56 = vand.u32 4294901760, %v13666_v7 }
0x14a3   : > { %v13699_v15 = vsub.f32 %v13576_v26, %v13595_v42  ;;  %v13578_v60 = vmul.f32 %v26421_v6, %v28600_v21  ;;  %26048 = vmatpush3.bf16.msra.mxu0 %v30536_v13  ;;  %v13687_v10 = vsub.f32 %v30527_v18, %v13686_v43  ;;  %v26071_v19 = vpack.c.bf16 %v30527_v18, %v30532_v36 }
0x14a4   : > { %v13692_v33 = vsub.f32 %v13575_v2, %v13592_v24  ;;  %v13577_v30 = vmul.f32 %v26422_v55, %v28571_v49  ;;  %26049 = vmatprep.subr.bf16.mxu0 %v32045_v29  ;;  %v30550_v0 = vpack.c.bf16 %v13595_v42, %v13592_v24  ;;  %v26056_v20 = vpack.c.bf16 %v13674_v3, %v13667_v56 }
0x14a5   : > { %v13700_v14 = vand.u32 4294901760, %v13699_v15  ;;  %v13601_v39 = vand.u32 4294901760, %v13578_v60  ;;  %v13680_v22 = vsub.f32 %v30532_v36, %v13679_v51  ;;  %v13688_v21 = vand.u32 4294901760, %v13687_v10 }
0x14a6   : > { %v13693_v5 = vand.u32 4294901760, %v13692_v33  ;;  %v13598_v46 = vand.u32 4294901760, %v13577_v30  ;;  %14137 = vrot.lane.b32.xlu1 %v13577_v30, %s32049_s11  ;;  %14139 = vrot.lane.b32.xlu0 %v13578_v60, %s32049_s11  ;;  %v26074_v27 = vpack.c.bf16 %v13699_v15, %v13692_v33  ;;  %v26092_v11 = vpack.c.bf16 %v13672_v53, %v13665_v12  ;;  %s27428_s11 = scalar_lea.vmem %s20892_s6, 128 }
0x14a7   : > { %v13713_v54 = vsub.f32 %v13578_v60, %v13601_v39  ;;  %26051 = vmatpush3.bf16.msra.mxu0 %v30550_v0  ;;  %v13681_v49 = vand.u32 4294901760, %v13680_v22  ;;  %v13701_v41 = vsub.f32 %v13699_v15, %v13700_v14  ;;  %v26095_v61 = vpack.c.bf16 %v13686_v43, %v13679_v51  ;;  %p27429_p11 = scmp.ne.s32.totalorder %s20892_s6, %s27428_s11 }
0x14a8   : > { %v13706_v57 = vsub.f32 %v13577_v30, %v13598_v46  ;;  %26052 = vmatprep.subr.bf16.mxu0 %v32045_v29  ;;  %v30557_v38 = vpack.c.bf16 %v13601_v39, %v13598_v46  ;;  %v13694_v23 = vsub.f32 %v13692_v33, %v13693_v5  ;;  %v26098_v62 = vpack.c.bf16 %v13700_v14, %v13693_v5 }
0x14a9   : > { %v13714_v8 = vand.u32 4294901760, %v13713_v54  ;;  %v26059_v44 = vpack.c.bf16 %v13688_v21, %v13681_v49  ;;  %v13702_v52 = vand.u32 4294901760, %v13701_v41  ;;  %p27430_p12 = pnand %p27429_p11, %p27717_p5 }
0x14aa   : > { %v13707_v34 = vand.u32 4294901760, %v13706_v57  ;;  %v13695_v59 = vand.u32 4294901760, %v13694_v23  ;;  %v26077_v45 = vpack.c.bf16 %v13713_v54, %v13706_v57 }
0x14ab   : > { %26054 = vmatpush3.bf16.msra.mxu0 %v30557_v38  ;;  %v13715_v53 = vsub.f32 %v13713_v54, %v13714_v8  ;;  %p27431_p13 = pneg %p27430_p12 }
0x14ac   : > { %26055 = vmatprep.subr.bf16.mxu0 %v32045_v29  ;;  %v26062_v12 = vpack.c.bf16 %v13702_v52, %v13695_v59  ;;  %v13708_v18 = vsub.f32 %v13706_v57, %v13707_v34  ;;  %v26101_v26 = vpack.c.bf16 %v13714_v8, %v13707_v34 }
0x14ad   : > { %v13716_v50 = vand.u32 4294901760, %v13715_v53 }
0x14ae   : > { %24452 = vmatmul.mubr.f32.vlgmr.msra.gmra.mrb[50].mxu0 %v28620_v4  ;;  %v13709_v36 = vand.u32 4294901760, %v13708_v18  ;;  %v32051_v4 = vld [vmem:[#allocation13_spill] sm:$0xff] }
0x14af   : > { %26057 = vmatpush3.bf16.msra.mxu0 %v26056_v20  ;;  %24470 = vmatprep.mubr.msk.f32.mxu0 %vm27526_vm6, %v32046_v35 }
0x14b0   : > { %26058 = vmatprep.subr.bf16.mxu0 %v32045_v29  ;;  %v26065_v2 = vpack.c.bf16 %v13716_v50, %v13709_v36 }
0x14b3   : > { %26060 = vmatpush3.bf16.msra.mxu0 %v26059_v44 }
0x14b4   : > { %26061 = vmatprep.subr.bf16.mxu0 %v32045_v29 }
0x14b7   : > { %26063 = vmatpush3.bf16.msra.mxu0 %v26062_v12 }
0x14b8   : > { %26064 = vmatprep.subr.bf16.mxu0 %v32045_v29 }
0x14bb   : > { %26066 = vmatpush3.bf16.msra.mxu0 %v26065_v2 }
0x14bc   : > { %26067 = vmatprep.subr.bf16.mxu0 %v32045_v29 }
0x14be   : > { %24471 = vmatmul.mubr.f32.vlgmr.msra.gmra.mrb[50].mxu0 %v32050_v32 }
0x14bf   : > { %26069 = vmatpush3.bf16.msra.mxu0 %v26068_v40  ;;  %24489 = vmatprep.mubr.msk.f32.mxu0 %vm27526_vm6, %v32046_v35 }
0x14c0   : > { %26070 = vmatprep.subr.bf16.mxu0 %v32045_v29 }
0x14c3   : > { %26072 = vmatpush3.bf16.msra.mxu0 %v26071_v19 }
0x14c4   : > { %26073 = vmatprep.subr.bf16.mxu0 %v32045_v29 }
0x14c7   : > { %26075 = vmatpush3.bf16.msra.mxu0 %v26074_v27 }
0x14c8   : > { %26076 = vmatprep.subr.bf16.mxu0 %v32045_v29 }
0x14cb   : > { %26078 = vmatpush3.bf16.msra.mxu0 %v26077_v45 }
0x14cc   : > { %26079 = vmatprep.subr.bf16.mxu0 %v32045_v29 }
0x14ce   : > { %24490 = vmatmul.mubr.f32.vlgmr.msra.gmra.mrb[50].mxu0 %v32051_v4 }
0x14cf   : > { %26081 = vmatpush3.bf16.msra.mxu0 %v30519_v58  ;;  %24508 = vmatprep.mubr.msk.f32.mxu0 %vm27526_vm6, %v32046_v35 }
0x14d0   : > { %26082 = vmatprep.subr.bf16.mxu0 %v32045_v29 }
0x14d3   : > { %26084 = vmatpush3.bf16.msra.mxu0 %v30536_v13 }
0x14d4   : > { %26085 = vmatprep.subr.bf16.mxu0 %v32045_v29 }
0x14d7   : > { %26087 = vmatpush3.bf16.msra.mxu0 %v30550_v0 }
0x14d8   : > { %26088 = vmatprep.subr.bf16.mxu0 %v32045_v29 }
0x14db   : > { %26090 = vmatpush3.bf16.msra.mxu0 %v30557_v38 }
0x14dc   : > { %26091 = vmatprep.subr.bf16.mxu0 %v32045_v29 }
0x14de   : > { %24509 = vmatmul.mubr.f32.vlgmr.msra.gmra.mrb[50].mxu0 %v32052_v9 }
0x14df   : > { %26093 = vmatpush3.bf16.msra.mxu0 %v26092_v11  ;;  %24527 = vmatprep.mubr.msk.f32.mxu0 %vm27526_vm6, %v32046_v35 }
0x14e0   : > { %26094 = vmatprep.subr.bf16.mxu0 %v32045_v29 }
0x14e3   : > { %26096 = vmatpush3.bf16.msra.mxu0 %v26095_v61 }
0x14e4   : > { %26097 = vmatprep.subr.bf16.mxu0 %v32045_v29 }
0x14e7   : > { %26099 = vmatpush3.bf16.msra.mxu0 %v26098_v62 }
0x14e8   : > { %26100 = vmatprep.subr.bf16.mxu0 %v32045_v29 }
0x14eb   : > { %26102 = vmatpush3.bf16.msra.mxu0 %v26101_v26  ;;  %v32053_v26 = vld [vmem:[#allocation18_spill] sm:$0xff] }
0x14ec   : > { %26103 = vmatprep.subr.bf16.mxu0 %v32045_v29 }
0x14ee   : > { %24528 = vmatmul.mubr.f32.vlgmr.msra.gmra.mrb[50].mxu0 %v32050_v32 }
0x14ef   : > { %26105 = vmatpush3.bf16.msra.mxu0 %v30519_v58  ;;  %24546 = vmatprep.mubr.msk.f32.mxu0 %vm27526_vm6, %v32046_v35 }
0x14f0   : > { %26106 = vmatprep.subr.bf16.mxu0 %v32045_v29 }
0x14f3   : > { %26108 = vmatpush3.bf16.msra.mxu0 %v30536_v13 }
0x14f4   : > { %26109 = vmatprep.subr.bf16.mxu0 %v32045_v29 }
0x14f7   : > { %26111 = vmatpush3.bf16.msra.mxu0 %v30550_v0 }
0x14f8   : > { %26112 = vmatprep.subr.bf16.mxu0 %v32045_v29 }
0x14fb   : > { %26114 = vmatpush3.bf16.msra.mxu0 %v30557_v38 }
0x14fc   : > { %26115 = vmatprep.subr.bf16.mxu0 %v32045_v29 }
0x14fe   : > { %24547 = vmatmul.mubr.f32.vlgmr.msra.gmra.mrb[50].mxu0 %v32050_v32 }
0x14ff   : > { %24565 = vmatprep.mubr.msk.f32.mxu0 %vm27526_vm6, %v32046_v35 }
0x150b   : > { %v14128_v1 = vpop.permute.xlu1 %14127 }
0x150c   : > { %v14153_v58 = vand.u32 4294901760, %v14128_v1  ;;  %v14126_v40 = vpop.permute.xlu0 %14125 }
0x150d   : > { %v14150_v7 = vand.u32 4294901760, %v14126_v40 }
0x150e   : > { %v30610_v13 = vsub.f32 %v14128_v1, %v14153_v58 }
0x150f   : > { %v30612_v43 = vpack.c.bf16 %v14153_v58, %v14150_v7  ;;  %v30614_v42 = vsub.f32 %v14126_v40, %v14150_v7 }
0x1510   : > { %v14130_v6 = vpop.permute.xlu1 %14129  ;;  %v14132_v48 = vpop.permute.xlu0 %14131  ;;  %v14242_v24 = vand.u32 4294901760, %v30610_v13 }
0x1511   : > { %v14156_v3 = vand.u32 4294901760, %v14130_v6  ;;  %v14159_v51 = vand.u32 4294901760, %v14132_v48  ;;  %26117 = vmatpush3.bf16.msra.mxu0 %v30612_v43  ;;  %v14235_v55 = vand.u32 4294901760, %v30614_v42  ;;  %v26140_v7 = vpack.c.bf16 %v30610_v13, %v30614_v42 }
0x1512   : > { %26118 = vmatprep.subr.bf16.mxu0 %v32045_v29  ;;  %v14243_v33 = vsub.f32 %v30610_v13, %v14242_v24 }
0x1513   : > { %v30620_v56 = vsub.f32 %v14130_v6, %v14156_v3  ;;  %v30622_v15 = vpack.c.bf16 %v14159_v51, %v14156_v3  ;;  %v30624_v60 = vsub.f32 %v14132_v48, %v14159_v51  ;;  %v14236_v20 = vsub.f32 %v30614_v42, %v14235_v55  ;;  %v32054_v6 = vld [vmem:[#allocation15_spill] sm:$0xff] }
0x1514   : > { %v14134_v10 = vpop.permute.xlu1 %14133  ;;  %v14136_v19 = vpop.permute.xlu0 %14135  ;;  %v14244_v49 = vand.u32 4294901760, %v14243_v33  ;;  %v32056_v33 = vld [vmem:[#allocation17_spill] sm:$0xff] }
0x1515   : > { %26120 = vmatpush3.bf16.msra.mxu0 %v30622_v15  ;;  %v14162_v30 = vand.u32 4294901760, %v14134_v10  ;;  %v14165_v0 = vand.u32 4294901760, %v14136_v19  ;;  %v14249_v14 = vand.u32 4294901760, %v30620_v56  ;;  %v14256_v39 = vand.u32 4294901760, %v30624_v60 }
0x1516   : > { %26121 = vmatprep.subr.bf16.mxu0 %v32045_v29  ;;  %v14237_v41 = vand.u32 4294901760, %v14236_v20  ;;  %v26143_v48 = vpack.c.bf16 %v30624_v60, %v30620_v56 }
0x1517   : > { %v30636_v22 = vsub.f32 %v14134_v10, %v14162_v30  ;;  %v30638_v21 = vpack.c.bf16 %v14165_v0, %v14162_v30  ;;  %v30640_v5 = vsub.f32 %v14136_v19, %v14165_v0  ;;  %v14250_v61 = vsub.f32 %v30620_v56, %v14249_v14  ;;  %v32055_v10 = vld [vmem:[#allocation16_spill] sm:$0xff]  ;;  %v32058_v56 = vld [vmem:[#allocation19_spill] sm:$0xff] }
0x1518   : > { %v14138_v46 = vpop.permute.xlu1 %14137  ;;  %v14140_v27 = vpop.permute.xlu0 %14139  ;;  %v14257_v57 = vsub.f32 %v30624_v60, %v14256_v39  ;;  %v26128_v59 = vpack.c.bf16 %v14244_v49, %v14237_v41  ;;  %v26164_v19 = vpack.c.bf16 %v14242_v24, %v14235_v55  ;;  %v26167_v30 = vpack.c.bf16 %v14256_v39, %v14249_v14  ;;  %v32057_v24 = vld [vmem:[#allocation39_spill] sm:$0xff] }
0x1519   : > { %v14168_v11 = vand.u32 4294901760, %v14138_v46  ;;  %v14171_v54 = vand.u32 4294901760, %v14140_v27  ;;  %26123 = vmatpush3.bf16.msra.mxu0 %v30638_v21  ;;  %v14263_v23 = vand.u32 4294901760, %v30636_v22  ;;  %v14270_v62 = vand.u32 4294901760, %v30640_v5 }
0x151a   : > { %26124 = vmatprep.subr.bf16.mxu0 %v32045_v29  ;;  %v14251_v52 = vand.u32 4294901760, %v14250_v61  ;;  %v14258_v34 = vand.u32 4294901760, %v14257_v57  ;;  %v26146_v3 = vpack.c.bf16 %v30640_v5, %v30636_v22  ;;  %v5558_v60 = vadd.f32 nan, %v32058_v56  ;;  %v32067_v56 = vld [vmem:[#allocation55_spill] sm:$0xff] }
0x151b   : > { %v30649_v38 = vpack.c.bf16 %v14171_v54, %v14168_v11  ;;  %v30654_v8 = vsub.f32 %v14138_v46, %v14168_v11  ;;  %v30656_v44 = vsub.f32 %v14140_v27, %v14171_v54  ;;  %v14264_v45 = vsub.f32 %v30636_v22, %v14263_v23  ;;  %v21082_v11 = vld [vmem:[%s31779_s19 + $0x10] sm:$0xff]  ;;  %v21083_v54 = vld [vmem:[%s31779_s19 + $0x18] sm:$0xff] }
0x151c   : > { %v14271_v53 = vsub.f32 %v30640_v5, %v14270_v62  ;;  %v26131_v50 = vpack.c.bf16 %v14258_v34, %v14251_v52  ;;  %v26170_v13 = vpack.c.bf16 %v14270_v62, %v14263_v23  ;;  %v14715_v49 = vand.u32 4294901760, %v21082_v11 }
0x151d   : > { %26126 = vmatpush3.bf16.msra.mxu0 %v30649_v38  ;;  %v14277_v12 = vand.u32 4294901760, %v30654_v8  ;;  %v14284_v18 = vand.u32 4294901760, %v30656_v44  ;;  %v14265_v36 = vand.u32 4294901760, %v14264_v45  ;;  %v26149_v51 = vpack.c.bf16 %v30656_v44, %v30654_v8 }
0x151e   : > { %26127 = vmatprep.subr.bf16.mxu0 %v32045_v29  ;;  %v14272_v2 = vand.u32 4294901760, %v14271_v53  ;;  %v14718_v41 = vand.u32 4294901760, %v21083_v54  ;;  %v14793_v57 = vsub.f32 %v21082_v11, %v14715_v49  ;;  %v32079_v11 = vld [vmem:[#allocation30_spill] sm:$0xff] }
0x151f   : > { %v14278_v32 = vsub.f32 %v30654_v8, %v14277_v12  ;;  %v14285_v4 = vsub.f32 %v30656_v44, %v14284_v18  ;;  %v26173_v42 = vpack.c.bf16 %v14284_v18, %v14277_v12 }
0x1520   : > { %24566 = vmatmul.mubr.f32.vlgmr.msra.gmra.mrb[50].mxu0 %v32053_v26  ;;  %v26134_v58 = vpack.c.bf16 %v14272_v2, %v14265_v36  ;;  %v26188_v61 = vpack.c.bf16 %v14718_v41, %v14715_v49  ;;  %v14794_v23 = vand.u32 4294901760, %v14793_v57  ;;  %v32081_v49 = vld [vmem:[#allocation37_spill] sm:$0xff] }
0x1521   : > { %26129 = vmatpush3.bf16.msra.mxu0 %v26128_v59  ;;  %24584 = vmatprep.mubr.msk.f32.mxu0 %vm27526_vm6, %v32046_v35  ;;  %v14279_v9 = vand.u32 4294901760, %v14278_v32  ;;  %v14286_v1 = vand.u32 4294901760, %v14285_v4 }
0x1522   : > { %26130 = vmatprep.subr.bf16.mxu0 %v32045_v29  ;;  %26189 = vmatpush3.bf16.msra.mxu1 %v26188_v61  ;;  %v14795_v8 = vsub.f32 %v14793_v57, %v14794_v23 }
0x1523   : > { %v26137_v40 = vpack.c.bf16 %v14286_v1, %v14279_v9  ;;  %26190 = vmatprep.subr.bf16.mxu1 %v32045_v29 }
0x1524   : > { %v14796_v52 = vand.u32 4294901760, %v14795_v8  ;;  %v32088_v8 = vld [vmem:[#allocation40_spill] sm:$0xff] }
0x1525   : > { %26132 = vmatpush3.bf16.msra.mxu0 %v26131_v50 }
0x1526   : > { %26133 = vmatprep.subr.bf16.mxu0 %v32045_v29 }
0x1529   : > { %26135 = vmatpush3.bf16.msra.mxu0 %v26134_v58 }
0x152a   : > { %26136 = vmatprep.subr.bf16.mxu0 %v32045_v29 }
0x152d   : > { %26138 = vmatpush3.bf16.msra.mxu0 %v26137_v40  ;;  %v32059_v40 = vld [vmem:[#allocation23_spill] sm:$0xff] }
0x152e   : > { %26139 = vmatprep.subr.bf16.mxu0 %v32045_v29 }
0x1530   : > { %24585 = vmatmul.mubr.f32.vlgmr.msra.gmra.mrb[50].mxu0 %v32054_v6 }
0x1531   : > { %26141 = vmatpush3.bf16.msra.mxu0 %v26140_v7  ;;  %24603 = vmatprep.mubr.msk.f32.mxu0 %vm27526_vm6, %v32046_v35  ;;  %v21085_v7 = vld [vmem:[%s31780_s20 + $0x1] ss:$0 sm:$0xff] }
0x1532   : > { %26142 = vmatprep.subr.bf16.mxu0 %v32045_v29 }
0x1535   : > { %26144 = vmatpush3.bf16.msra.mxu0 %v26143_v48 }
0x1536   : > { %26145 = vmatprep.subr.bf16.mxu0 %v32045_v29 }
0x1539   : > { %26147 = vmatpush3.bf16.msra.mxu0 %v26146_v3 }
0x153a   : > { %26148 = vmatprep.subr.bf16.mxu0 %v32045_v29 }
0x153d   : > { %26150 = vmatpush3.bf16.msra.mxu0 %v26149_v51  ;;  %v32060_v51 = vld [vmem:[#allocation43_spill] sm:$0xff] }
0x153e   : > { %26151 = vmatprep.subr.bf16.mxu0 %v32045_v29 }
0x1540   : > { %24604 = vmatmul.mubr.f32.vlgmr.msra.gmra.mrb[50].mxu0 %v32055_v10 }
0x1541   : > { %26153 = vmatpush3.bf16.msra.mxu0 %v30612_v43  ;;  %24622 = vmatprep.mubr.msk.f32.mxu0 %vm27526_vm6, %v32046_v35 }
0x1542   : > { %26154 = vmatprep.subr.bf16.mxu0 %v32045_v29 }
0x1545   : > { %26156 = vmatpush3.bf16.msra.mxu0 %v30622_v15 }
0x1546   : > { %26157 = vmatprep.subr.bf16.mxu0 %v32045_v29 }
0x1549   : > { %26159 = vmatpush3.bf16.msra.mxu0 %v30638_v21 }
0x154a   : > { %26160 = vmatprep.subr.bf16.mxu0 %v32045_v29 }
0x154d   : > { %26162 = vmatpush3.bf16.msra.mxu0 %v30649_v38 }
0x154e   : > { %26163 = vmatprep.subr.bf16.mxu0 %v32045_v29 }
0x1550   : > { %24623 = vmatmul.mubr.f32.vlgmr.msra.gmra.mrb[50].mxu0 %v32056_v33  ;;  %v32062_v33 = vld [vmem:[#allocation46_spill] sm:$0xff] }
0x1551   : > { %26165 = vmatpush3.bf16.msra.mxu0 %v26164_v19  ;;  %24641 = vmatprep.mubr.msk.f32.mxu0 %vm27526_vm6, %v32046_v35 }
0x1552   : > { %26166 = vmatprep.subr.bf16.mxu0 %v32045_v29 }
0x1555   : > { %26168 = vmatpush3.bf16.msra.mxu0 %v26167_v30  ;;  %v32063_v30 = vld [vmem:[#allocation49_spill] sm:$0xff] }
0x1556   : > { %26169 = vmatprep.subr.bf16.mxu0 %v32045_v29 }
0x1559   : > { %26171 = vmatpush3.bf16.msra.mxu0 %v26170_v13 }
0x155a   : > { %26172 = vmatprep.subr.bf16.mxu0 %v32045_v29 }
0x155d   : > { %26174 = vmatpush3.bf16.msra.mxu0 %v26173_v42  ;;  %v32064_v42 = vld [vmem:[#allocation51_spill] sm:$0xff] }
0x155e   : > { %26175 = vmatprep.subr.bf16.mxu0 %v32045_v29 }
0x1560   : > { %24642 = vmatmul.mubr.f32.vlgmr.msra.gmra.mrb[50].mxu0 %v32054_v6 }
0x1561   : > { %26177 = vmatpush3.bf16.msra.mxu0 %v30612_v43  ;;  %24660 = vmatprep.mubr.msk.f32.mxu0 %vm27526_vm6, %v32046_v35  ;;  %v27427_v43 = vld [vmem:[%s28816_s29] sm:$0xff]  ;;  %s21108_s29 = sshll.u32 %s27700_s3, 7 }
0x1562   : > { %26178 = vmatprep.subr.bf16.mxu0 %v32045_v29  ;;  %v4988_v55 = vadd.f32 nan, %v27427_v43  ;;  %v32065_v43 = vld [vmem:[#allocation53_spill] sm:$0xff]  ;;  %s31670_s10 = scalar_lea.hbm %s31787_s27, %s21108_s29 }
0x1565   : > { %26180 = vmatpush3.bf16.msra.mxu0 %v30622_v15  ;;  %v5561_v15 = vadd.f32 %v5558_v60, %v4988_v55  ;;  %v32066_v55 = vld [vmem:[#allocation54_spill] sm:$0xff]  ;;  %v32068_v60 = vld [vmem:[#allocation56_spill] sm:$0xff] }
0x1566   : > { %26181 = vmatprep.subr.bf16.mxu0 %v32045_v29 }
0x1569   : > { %26183 = vmatpush3.bf16.msra.mxu0 %v30638_v21 }
0x156a   : > { %26184 = vmatprep.subr.bf16.mxu0 %v32045_v29 }
0x156d   : > { %26186 = vmatpush3.bf16.msra.mxu0 %v30649_v38  ;;  %v14800_v38 = vsub.f32 %v21083_v54, %v14718_v41  ;;  %v32080_v54 = vld [vmem:[#allocation34_spill] sm:$0xff]  ;;  %v32082_v41 = vld [vmem:[#allocation41_spill] sm:$0xff] }
0x156f   : > { %v14801_v62 = vand.u32 4294901760, %v14800_v38  ;;  %v26194_v45 = vpack.c.bf16 %v14800_v38, %v14793_v57  ;;  %v32084_v57 = vld [vmem:[#allocation48_spill] sm:$0xff] }
0x1570   : > { %24661 = vmatmul.mubr.f32.vlgmr.msra.gmra.mrb[50].mxu0 %v32054_v6 }
0x1571   : > { %24875 = vmatprep.mubr.f32.mxu0 %v32057_v24  ;;  %v14802_v44 = vsub.f32 %v14800_v38, %v14801_v62  ;;  %v26200_v53 = vpack.c.bf16 %v14801_v62, %v14794_v23  ;;  %v32085_v38 = vld [vmem:[#allocation22_spill] sm:$0xff]  ;;  %v32086_v23 = vld [vmem:[#allocation33_spill] sm:$0xff]  ;;  %v32087_v62 = vld [vmem:[#allocation36_spill] sm:$0xff] }
0x1573   : > { %v14803_v34 = vand.u32 4294901760, %v14802_v44  ;;  %v32089_v44 = vld [vmem:[#allocation44_spill] sm:$0xff] }
0x1575   : > { %v26191_v59 = vpack.c.bf16 %v14803_v34, %v14796_v52  ;;  %v32090_v52 = vld [vmem:[#allocation47_spill] sm:$0xff]  ;;  %v32091_v34 = vld [vmem:[#allocation50_spill] sm:$0xff] }
0x1643   : > { %v14682_v0 = vpop.f32.mrb[50].mxu0 }
0x1644   : > { %v26423_v20 = vadd.f32 %v14682_v0, %v5561_v15  ;;  %v24662_v14 = vpop.f32.mrb[51].mxu0  ;;  %v32069_v15 = vld [vmem:[#allocation20_spill] sm:$0xff] }
0x1645   : > { %v32070_v0 = vld [vmem:[#allocation24_spill] sm:$0xff] }
0x1646   : > { %v14687_v39 = vsel %vm2615_vm4, %v26423_v20, 0.0  ;;  %20863 = vst.msk [vmem:[%s30741_s12] sm:$0xff] %vm2615_vm4, %v26423_v20  ;;  %v32072_v14 = vld [vmem:[#allocation28_spill] sm:$0xff] }
0x1647   : > { %14688 = vadd.xlane.f32.xlu1 %v14687_v39  ;;  %v32073_v39 = vld [vmem:[#allocation31_spill] sm:$0xff] }
0x16d4   : > { %v14689_v22 = vpop.xlane.xlu1 %14688 }
0x16d5   : > { %v14690_v21 = vmul.f32 0.0625, %v14689_v22  ;;  %v32074_v22 = vld [vmem:[#allocation35_spill] sm:$0xff] }
0x16d7   : > { %v14691_v5 = vsub.f32 %v26423_v20, %v14690_v21  ;;  %v32071_v20 = vld [vmem:[#allocation25_spill] sm:$0xff]  ;;  %v32075_v21 = vld [vmem:[#allocation38_spill] sm:$0xff] }
0x16d9   : > { %v14692_v46 = vmul.f32 %v14691_v5, %v14691_v5 }
0x16db   : > { %v14693_v27 = vsel %vm2615_vm4, %v14692_v46, 0.0  ;;  %v32077_v46 = vld [vmem:[#allocation21_spill] sm:$0xff] }
0x16dc   : > { %14694 = vadd.xlane.f32.xlu0 %v14693_v27  ;;  %v32078_v27 = vld [vmem:[#allocation27_spill] sm:$0xff] }
0x1769   : > { %v14695_v12 = vpop.xlane.xlu0 %14694 }
0x176a   : > { %v14696_v18 = vmul.f32 0.0625, %v14695_v12 }
0x176c   : > { %v14697_v26 = vadd.f32 1e-05, %v14696_v18 }
0x176e   : > { %27409 = vrsqrt.f32 %v14697_v26 }
0x1778   : > { %v27410_v50 = vpop.eup %27409 }
0x1779   : > { %v14699_v36 = vmul.f32 %v27410_v50, %v14691_v5  ;;  %v32076_v5 = vld [vmem:[#allocation42_spill] sm:$0xff] }
0x177a   : > { %v32095_v50 = vld [vmem:[#allocation74_spill] sm:$0xff] }
0x177b   : > { %v14712_v2 = vsel %vm2615_vm4, %v14699_v36, 0 }
0x177c   : > { %v14781_v32 = vand.u32 4294901760, %v14712_v2 }
0x177e   : > { %v14782_v4 = vsub.f32 %v14712_v2, %v14781_v32  ;;  %v32096_v2 = vld [vmem:[#allocation77_spill] sm:$0xff] }
0x1780   : > { %v14783_v9 = vand.u32 4294901760, %v14782_v4 }
0x1782   : > { %v14784_v1 = vsub.f32 %v14782_v4, %v14783_v9 }
0x1784   : > { %v14785_v58 = vand.u32 4294901760, %v14784_v1  ;;  %v32098_v1 = vld [vmem:[#allocation81_spill] sm:$0xff] }
0x1786   : > { %24668 = vmatmul.mubr.f32.vlgmr.msra.gmra.mrb[50].mxu1 %v14785_v58  ;;  %v32099_v58 = vld [vmem:[#allocation82_spill] sm:$0xff] }
0x1787   : > { %26192 = vmatpush3.bf16.msra.mxu1 %v26191_v59  ;;  %24674 = vmatprep.mubr.msk.f32.mxu1 %vm27526_vm6, %v32046_v35  ;;  %v32092_v59 = vld [vmem:[#allocation52_spill] sm:$0xff] }
0x1788   : > { %26193 = vmatprep.subr.bf16.mxu1 %v32045_v29 }
0x178e   : > { %24675 = vmatmul.mubr.f32.vlgmr.msra.gmra.mrb[50].mxu1 %v14781_v32 }
0x178f   : > { %26195 = vmatpush3.bf16.msra.mxu1 %v26194_v45  ;;  %24681 = vmatprep.mubr.msk.f32.mxu1 %vm27526_vm6, %v32046_v35  ;;  %v32093_v45 = vld [vmem:[#allocation85_spill] sm:$0xff] }
0x1790   : > { %26196 = vmatprep.subr.bf16.mxu1 %v32045_v29 }
0x1796   : > { %24682 = vmatmul.mubr.f32.vlgmr.msra.gmra.mrb[50].mxu1 %v14782_v4  ;;  %v32097_v4 = vld [vmem:[#allocation79_spill] sm:$0xff] }
0x1797   : > { %26198 = vmatpush3.bf16.msra.mxu1 %v26188_v61  ;;  %24688 = vmatprep.mubr.msk.f32.mxu1 %vm27526_vm6, %v32046_v35 }
0x1798   : > { %26199 = vmatprep.subr.bf16.mxu1 %v32045_v29 }
0x179e   : > { %24689 = vmatmul.mubr.f32.vlgmr.msra.gmra.mrb[50].mxu1 %v14783_v9 }
0x179f   : > { %26201 = vmatpush3.bf16.msra.mxu1 %v26200_v53  ;;  %24695 = vmatprep.mubr.msk.f32.mxu1 %vm27526_vm6, %v32046_v35  ;;  %v32094_v53 = vld [vmem:[#allocation88_spill] sm:$0xff] }
0x17a0   : > { %26202 = vmatprep.subr.bf16.mxu1 %v32045_v29 }
0x17a6   : > { %24696 = vmatmul.mubr.f32.vlgmr.msra.gmra.mrb[50].mxu1 %v14781_v32 }
0x17a7   : > { %26204 = vmatpush3.bf16.msra.mxu1 %v26188_v61  ;;  %24702 = vmatprep.mubr.msk.f32.mxu1 %vm27526_vm6, %v32046_v35  ;;  %v32083_v61 = vld [vmem:[#allocation45_spill] sm:$0xff] }
0x17ae   : > { %24703 = vmatmul.mubr.f32.vlgmr.msra.gmra.mrb[50].mxu1 %v14781_v32 }
0x17af   : > { %24707 = vmatprep.mubr.f32.mxu1 %v32059_v40  ;;  %v32100_v40 = vld [vmem:[#allocation83_spill] sm:$0xff] }
0x1881   : > { %v15169_v6 = vpop.f32.mrb[50].mxu1 }
0x1882   : > { %v26424_v48 = vadd.f32 %v21085_v7, %v15169_v6  ;;  %v24704_v3 = vpop.f32.mrb[51].mxu1  ;;  %v32101_v7 = vld [vmem:[#allocation84_spill] sm:$0xff]  ;;  %v32102_v6 = vld [vmem:[#allocation26_spill] sm:$0xff] }
0x1883   : > { %v32104_v3 = vld [vmem:[#allocation58_spill] sm:$0xff] }
0x1884   : > { %v15173_v10 = vmul.f32 %v26424_v48, %v32060_v51  ;;  %v32103_v48 = vld [vmem:[#allocation57_spill] sm:$0xff]  ;;  %v32105_v51 = vld [vmem:[#allocation60_spill] sm:$0xff] }
0x1886   : > { %v15175_v19 = vand.u32 4294901760, %v15173_v10  ;;  %16693 = vrot.lane.b32.xlu0 %v15173_v10, %s32061_s4  ;;  %s27530_s4 = smov [#allocation2]  }
0x1887   : > { %s27432_s13 = sshll.u32 %s27530_s4, 4  ;;  %s27433_s13 = int_to_ptr.vmem [resolvable:$false] %s27432_s13 }
0x1888   : > { %v15322_v29 = vsub.f32 %v15173_v10, %v15175_v19  ;;  %24705 = vmatprep.subr.mxu1 %v15175_v19  ;;  %v32106_v10 = vld [vmem:[#allocation62_spill] sm:$0xff]  ;;  %s27434_s14 = scalar_lea.vmem %s27433_s13, 256  ;;  %p27435_p0 = scmp.lt.s32.totalorder %s20892_s6, %s27433_s13 }
0x1889   : > { %24706 = vmatpush3.msra.mxu1 %v15175_v19  ;;  %p27436_p1 = scmp.lt.s32.totalorder %s27434_s14, %s27428_s11 }
0x188a   : > { %24708 = vmatmul.mubr.f32.vlgmr.msra.gmra.mrb[52].mxu1 %v32062_v33  ;;  %v15323_v35 = vand.u32 4294901760, %v15322_v29  ;;  %v32109_v33 = vld [vmem:[#allocation71_spill] sm:$0xff] }
0x188b   : > { %24710 = vmatprep.mubr.f32.mxu1 %v32063_v30  ;;  %v32111_v30 = vld [vmem:[#allocation59_spill] sm:$0xff]  ;;  %p27437_p2 = por %p27436_p1, %p27435_p0 }
0x188c   : > { %v15324_v13 = vsub.f32 %v15322_v29, %v15323_v35 }
0x188d   : > { %p27438_p3 = pnand %p27437_p2, %p27431_p13 }
0x188e   : > { %24711 = vmatmul.mubr.f32.gmra.mrb[54].mxu1 %v32064_v42  ;;  %v15325_v24 = vand.u32 4294901760, %v15324_v13  ;;  %v32112_v13 = vld [vmem:[#allocation61_spill] sm:$0xff]  ;;  %v32113_v42 = vld [vmem:[#allocation64_spill] sm:$0xff] }
0x188f   : > { %24713 = vmatprep.mubr.f32.mxu1 %v32065_v43  ;;  %v32115_v43 = vld [vmem:[#allocation70_spill] sm:$0xff] }
0x1890   : > { %24719 = vmatprep.subr.mxu1 %v15325_v24 }
0x1891   : > { %24720 = vmatpush3.msra.mxu1 %v15325_v24  ;;  %v32114_v24 = vld [vmem:[#allocation67_spill] sm:$0xff] }
0x1892   : > { %24714 = vmatmul.mubr.f32.gmra.mrb[56].mxu1 %v32066_v55  ;;  %24733 = vmatprep.subr.mxu1 %v15322_v29  ;;  %v32116_v55 = vld [vmem:[#allocation73_spill] sm:$0xff] }
0x1893   : > { %24716 = vmatprep.mubr.f32.mxu1 %v32067_v56  ;;  %v32117_v56 = vld [vmem:[#allocation76_spill] sm:$0xff] }
0x1896   : > { %24717 = vmatmul.mubr.f32.gmra.mrb[58].mxu1 %v32068_v60  ;;  %v32118_v60 = vld [vmem:[#allocation32_spill] sm:$0xff] }
0x1897   : > { %24721 = vmatprep.mubr.f32.mxu1 %v32069_v15 }
0x189a   : > { %24722 = vmatmul.mubr.f32.vlgmr.msra.gmra.mrb[52].mxu1 %v32070_v0 }
0x189b   : > { %24734 = vmatpush3.msra.mxu1 %v15322_v29  ;;  %24724 = vmatprep.mubr.f32.mxu1 %v32071_v20  ;;  %v32108_v29 = vld [vmem:[#allocation68_spill] sm:$0xff] }
0x189c   : > { %24747 = vmatprep.subr.mxu1 %v15175_v19 }
0x189e   : > { %24725 = vmatmul.mubr.f32.gmra.mrb[54].mxu1 %v32072_v14 }
0x189f   : > { %24727 = vmatprep.mubr.f32.mxu1 %v32073_v39 }
0x18a2   : > { %24728 = vmatmul.mubr.f32.gmra.mrb[56].mxu1 %v32074_v22 }
0x18a3   : > { %24730 = vmatprep.mubr.f32.mxu1 %v32075_v21 }
0x18a6   : > { %24731 = vmatmul.mubr.f32.gmra.mrb[58].mxu1 %v32076_v5 }
0x18a7   : > { %24735 = vmatprep.mubr.f32.mxu1 %v32077_v46 }
0x18aa   : > { %24736 = vmatmul.mubr.f32.vlgmr.msra.gmra.mrb[52].mxu1 %v32078_v27 }
0x18ab   : > { %24748 = vmatpush3.msra.mxu1 %v15175_v19  ;;  %24738 = vmatprep.mubr.f32.mxu1 %v32079_v11 }
0x18ac   : > { %24761 = vmatprep.subr.mxu1 %v15323_v35 }
0x18ae   : > { %24739 = vmatmul.mubr.f32.gmra.mrb[54].mxu1 %v32080_v54 }
0x18af   : > { %24741 = vmatprep.mubr.f32.mxu1 %v32081_v49 }
0x18b2   : > { %24742 = vmatmul.mubr.f32.gmra.mrb[56].mxu1 %v32082_v41 }
0x18b3   : > { %24744 = vmatprep.mubr.f32.mxu1 %v32083_v61 }
0x18b6   : > { %24745 = vmatmul.mubr.f32.gmra.mrb[58].mxu1 %v32084_v57 }
0x18b7   : > { %24749 = vmatprep.mubr.f32.mxu1 %v32085_v38 }
0x18ba   : > { %24750 = vmatmul.mubr.f32.vlgmr.msra.gmra.mrb[52].mxu1 %v32086_v23 }
0x18bb   : > { %24762 = vmatpush3.msra.mxu1 %v15323_v35  ;;  %24752 = vmatprep.mubr.f32.mxu1 %v32087_v62  ;;  %v32110_v35 = vld [vmem:[#allocation29_spill] sm:$0xff] }
0x18bc   : > { %24775 = vmatprep.subr.mxu1 %v15175_v19 }
0x18be   : > { %24753 = vmatmul.mubr.f32.gmra.mrb[54].mxu1 %v32088_v8 }
0x18bf   : > { %24755 = vmatprep.mubr.f32.mxu1 %v32089_v44 }
0x18c2   : > { %24756 = vmatmul.mubr.f32.gmra.mrb[56].mxu1 %v32090_v52 }
0x18c3   : > { %24758 = vmatprep.mubr.f32.mxu1 %v32091_v34 }
0x18c6   : > { %24759 = vmatmul.mubr.f32.gmra.mrb[58].mxu1 %v32092_v59 }
0x18c7   : > { %24763 = vmatprep.mubr.f32.mxu1 %v32069_v15 }
0x18ca   : > { %24764 = vmatmul.mubr.f32.vlgmr.msra.gmra.mrb[52].mxu1 %v32070_v0 }
0x18cb   : > { %24776 = vmatpush3.msra.mxu1 %v15175_v19  ;;  %24766 = vmatprep.mubr.f32.mxu1 %v32071_v20  ;;  %v32107_v19 = vld [vmem:[#allocation65_spill] sm:$0xff] }
0x18cc   : > { %24789 = vmatprep.subr.mxu1 %v32093_v45 }
0x18ce   : > { %24767 = vmatmul.mubr.f32.gmra.mrb[54].mxu1 %v32072_v14 }
0x18cf   : > { %24769 = vmatprep.mubr.f32.mxu1 %v32073_v39 }
0x18d2   : > { %24770 = vmatmul.mubr.f32.gmra.mrb[56].mxu1 %v32074_v22 }
0x18d3   : > { %24772 = vmatprep.mubr.f32.mxu1 %v32075_v21 }
0x18d6   : > { %24773 = vmatmul.mubr.f32.gmra.mrb[58].mxu1 %v32076_v5 }
0x18d7   : > { %24777 = vmatprep.mubr.f32.mxu1 %v32069_v15  ;;  %v32119_v15 = vld [vmem:[#allocation63_spill] sm:$0xff] }
0x18da   : > { %24778 = vmatmul.mubr.f32.vlgmr.msra.gmra.mrb[52].mxu1 %v32070_v0  ;;  %v32120_v0 = vld [vmem:[#allocation66_spill] sm:$0xff] }
0x18db   : > { %24780 = vmatprep.mubr.f32.mxu1 %v32071_v20  ;;  %24790 = vmatpush3.msra.mxu1 %v32093_v45  ;;  %v32121_v20 = vld [vmem:[#allocation69_spill] sm:$0xff] }
0x18dc   : > { %24803 = vmatprep.subr.mxu1 %v32094_v53 }
0x18de   : > { %24781 = vmatmul.mubr.f32.gmra.mrb[54].mxu1 %v32072_v14  ;;  %v32122_v14 = vld [vmem:[#allocation72_spill] sm:$0xff] }
0x18df   : > { %24783 = vmatprep.mubr.f32.mxu1 %v32073_v39  ;;  %v32123_v39 = vld [vmem:[#allocation75_spill] sm:$0xff] }
0x18e2   : > { %24784 = vmatmul.mubr.f32.gmra.mrb[56].mxu1 %v32074_v22  ;;  %v32124_v22 = vld [vmem:[#allocation78_spill] sm:$0xff] }
0x18e3   : > { %24786 = vmatprep.mubr.f32.mxu1 %v32075_v21  ;;  %v32125_v21 = vld [vmem:[#allocation80_spill] sm:$0xff] }
0x18e6   : > { %24787 = vmatmul.mubr.f32.gmra.mrb[58].mxu1 %v32076_v5 }
0x18f8   : > { %v16694_v12 = vpop.permute.xlu0 %16693 }
0x18f9   : > { %v16697_v18 = vand.u32 4294901760, %v16694_v12 }
0x18fb   : > { %v16844_v26 = vsub.f32 %v16694_v12, %v16697_v18  ;;  %24873 = vmatprep.subr.mxu0 %v16697_v18 }
0x18fc   : > { %24874 = vmatpush3.msra.mxu0 %v16697_v18 }
0x18fd   : > { %24876 = vmatmul.mubr.f32.vlgmr.msra.gmra.mrb[52].mxu0 %v32095_v50  ;;  %v16845_v36 = vand.u32 4294901760, %v16844_v26 }
0x18fe   : > { %24878 = vmatprep.mubr.f32.mxu0 %v32096_v2 }
0x18ff   : > { %v16846_v32 = vsub.f32 %v16844_v26, %v16845_v36 }
0x1901   : > { %24879 = vmatmul.mubr.f32.gmra.mrb[54].mxu0 %v32097_v4  ;;  %v16847_v9 = vand.u32 4294901760, %v16846_v32 }
0x1902   : > { %24881 = vmatprep.mubr.f32.mxu0 %v32098_v1 }
0x1903   : > { %24887 = vmatprep.subr.mxu0 %v16847_v9 }
0x1904   : > { %24888 = vmatpush3.msra.mxu0 %v16847_v9 }
0x1905   : > { %24882 = vmatmul.mubr.f32.gmra.mrb[56].mxu0 %v32099_v58  ;;  %24901 = vmatprep.subr.mxu0 %v16844_v26 }
0x1906   : > { %24884 = vmatprep.mubr.f32.mxu0 %v32100_v40 }
0x1909   : > { %24885 = vmatmul.mubr.f32.gmra.mrb[58].mxu0 %v32101_v7 }
0x190a   : > { %24889 = vmatprep.mubr.f32.mxu0 %v32102_v6 }
0x190d   : > { %24890 = vmatmul.mubr.f32.vlgmr.msra.gmra.mrb[52].mxu0 %v32103_v48 }
0x190e   : > { %24902 = vmatpush3.msra.mxu0 %v16844_v26  ;;  %24892 = vmatprep.mubr.f32.mxu0 %v32104_v3 }
0x190f   : > { %24915 = vmatprep.subr.mxu0 %v16697_v18 }
0x1911   : > { %24893 = vmatmul.mubr.f32.gmra.mrb[54].mxu0 %v32105_v51 }
0x1912   : > { %24895 = vmatprep.mubr.f32.mxu0 %v32106_v10 }
0x1915   : > { %24896 = vmatmul.mubr.f32.gmra.mrb[56].mxu0 %v32107_v19 }
0x1916   : > { %24898 = vmatprep.mubr.f32.mxu0 %v32108_v29 }
0x1919   : > { %24899 = vmatmul.mubr.f32.gmra.mrb[58].mxu0 %v32109_v33 }
0x191a   : > { %24903 = vmatprep.mubr.f32.mxu0 %v32110_v35 }
0x191d   : > { %24904 = vmatmul.mubr.f32.vlgmr.msra.gmra.mrb[52].mxu0 %v32111_v30 }
0x191e   : > { %24916 = vmatpush3.msra.mxu0 %v16697_v18  ;;  %24906 = vmatprep.mubr.f32.mxu0 %v32112_v13 }
0x191f   : > { %24929 = vmatprep.subr.mxu0 %v16845_v36 }
0x1921   : > { %24907 = vmatmul.mubr.f32.gmra.mrb[54].mxu0 %v32113_v42 }
0x1922   : > { %24909 = vmatprep.mubr.f32.mxu0 %v32114_v24 }
0x1925   : > { %24910 = vmatmul.mubr.f32.gmra.mrb[56].mxu0 %v32115_v43 }
0x1926   : > { %24912 = vmatprep.mubr.f32.mxu0 %v32116_v55 }
0x1929   : > { %24913 = vmatmul.mubr.f32.gmra.mrb[58].mxu0 %v32117_v56 }
0x192a   : > { %24917 = vmatprep.mubr.f32.mxu0 %v32118_v60  ;;  %v32126_v60 = vld [vmem:[#allocation86_spill] sm:$0xff] }
0x192d   : > { %24918 = vmatmul.mubr.f32.vlgmr.msra.gmra.mrb[52].mxu0 %v32119_v15 }
0x192e   : > { %24930 = vmatpush3.msra.mxu0 %v16845_v36  ;;  %24920 = vmatprep.mubr.f32.mxu0 %v32120_v0 }
0x192f   : > { %24943 = vmatprep.subr.mxu0 %v16697_v18 }
0x1931   : > { %24921 = vmatmul.mubr.f32.gmra.mrb[54].mxu0 %v32121_v20 }
0x1932   : > { %24923 = vmatprep.mubr.f32.mxu0 %v32122_v14 }
0x1935   : > { %24924 = vmatmul.mubr.f32.gmra.mrb[56].mxu0 %v32123_v39 }
0x1936   : > { %24926 = vmatprep.mubr.f32.mxu0 %v32124_v22 }
0x1939   : > { %24927 = vmatmul.mubr.f32.gmra.mrb[58].mxu0 %v32125_v21 }
0x193a   : > { %24931 = vmatprep.mubr.f32.mxu0 %v32102_v6 }
0x193d   : > { %24932 = vmatmul.mubr.f32.vlgmr.msra.gmra.mrb[52].mxu0 %v32103_v48 }
0x193e   : > { %24944 = vmatpush3.msra.mxu0 %v16697_v18  ;;  %24934 = vmatprep.mubr.f32.mxu0 %v32104_v3 }
0x1941   : > { %24935 = vmatmul.mubr.f32.gmra.mrb[54].mxu0 %v32105_v51 }
0x1942   : > { %24937 = vmatprep.mubr.f32.mxu0 %v32106_v10 }
0x1945   : > { %24938 = vmatmul.mubr.f32.gmra.mrb[56].mxu0 %v32107_v19 }
0x1946   : > { %24940 = vmatprep.mubr.f32.mxu0 %v32108_v29 }
0x1949   : > { %24941 = vmatmul.mubr.f32.gmra.mrb[58].mxu0 %v32109_v33 }
0x194a   : > { %24945 = vmatprep.mubr.f32.mxu0 %v32102_v6 }
0x194d   : > { %24946 = vmatmul.mubr.f32.vlgmr.msra.gmra.mrb[52].mxu0 %v32103_v48 }
0x194e   : > { %24948 = vmatprep.mubr.f32.mxu0 %v32104_v3 }
0x1951   : > { %24949 = vmatmul.mubr.f32.gmra.mrb[54].mxu0 %v32105_v51 }
0x1952   : > { %24951 = vmatprep.mubr.f32.mxu0 %v32106_v10 }
0x1955   : > { %24952 = vmatmul.mubr.f32.gmra.mrb[56].mxu0 %v32107_v19 }
0x1956   : > { %24954 = vmatprep.mubr.f32.mxu0 %v32108_v29 }
0x1959   : > { %24955 = vmatmul.mubr.f32.gmra.mrb[58].mxu0 %v32109_v33 }
0x19ad   : > { %v24779_v5 = vpop.f32.mrb[52].mxu1 }
0x19ae   : > { %v15925_v46 = vsel %vm6052_vm7, %v24779_v5, 0  ;;  %v15875_v27 = vpop.f32.mrb[53].mxu1 }
0x19af   : > { %v30872_v11 = vand.u32 4294901760, %v15925_v46  ;;  %v15922_v54 = vsel %vm6052_vm7, %v15875_v27, 0  ;;  %v32127_v27 = vld [vmem:[#allocation87_spill] sm:$0xff] }
0x19b0   : > { %v30875_v49 = vand.u32 4294901760, %v15922_v54 }
0x19b1   : > { %v30878_v41 = vsub.f32 %v15925_v46, %v30872_v11  ;;  %v24782_v61 = vpop.f32.mrb[54].mxu1 }
0x19b2   : > { %v30881_v57 = vsub.f32 %v15922_v54, %v30875_v49  ;;  %v15931_v38 = vsel %vm6052_vm7, %v24782_v61, 0  ;;  %v15887_v23 = vpop.f32.mrb[55].mxu1  ;;  %v32128_v54 = vld [vmem:[#allocation89_spill] sm:$0xff] }
0x19b3   : > { %v16023_v62 = vand.u32 4294901760, %v30878_v41  ;;  %v30885_v8 = vand.u32 4294901760, %v15931_v38  ;;  %v15928_v44 = vsel %vm6052_vm7, %v15887_v23, 0 }
0x19b4   : > { %v16013_v52 = vand.u32 4294901760, %v30881_v57  ;;  %v30889_v34 = vand.u32 4294901760, %v15928_v44 }
0x19b5   : > { %v16024_v59 = vsub.f32 %v30878_v41, %v16023_v62  ;;  %v30895_v12 = vsub.f32 %v15931_v38, %v30885_v8  ;;  %v24785_v18 = vpop.f32.mrb[56].mxu1 }
0x19b6   : > { %v30898_v26 = vsub.f32 %v15928_v44, %v30889_v34  ;;  %v15937_v50 = vsel %vm6052_vm7, %v24785_v18, 0  ;;  %v15899_v36 = vpop.f32.mrb[57].mxu1  ;;  %v16014_v2 = vsub.f32 %v30881_v57, %v16013_v52 }
0x19b7   : > { %v16043_v32 = vand.u32 4294901760, %v30895_v12  ;;  %v30905_v4 = vand.u32 4294901760, %v15937_v50  ;;  %v15934_v9 = vsel %vm6052_vm7, %v15899_v36, 0  ;;  %v16025_v7 = vand.u32 4294901760, %v16024_v59 }
0x19b8   : > { %v16033_v1 = vand.u32 4294901760, %v30898_v26  ;;  %v30909_v58 = vand.u32 4294901760, %v15934_v9  ;;  %v16015_v40 = vand.u32 4294901760, %v16014_v2 }
0x19b9   : > { %v30912_v6 = vsub.f32 %v15937_v50, %v30905_v4  ;;  %v24788_v48 = vpop.f32.mrb[58].mxu1  ;;  %v16044_v3 = vsub.f32 %v30895_v12, %v16043_v32 }
0x19ba   : > { %v16052_v51 = vsub.f32 %v15934_v9, %v30909_v58  ;;  %v15943_v10 = vsel %vm6052_vm7, %v24788_v48, 0  ;;  %v15911_v19 = vpop.f32.mrb[59].mxu1  ;;  %24791 = vmatprep.mubr.f32.mxu1 %v16015_v40  ;;  %v16034_v29 = vsub.f32 %v30898_v26, %v16033_v1 }
0x19bb   : > { %v16063_v33 = vand.u32 4294901760, %v30912_v6  ;;  %v30921_v35 = vand.u32 4294901760, %v15943_v10  ;;  %v15940_v30 = vsel %vm6052_vm7, %v15911_v19, 0  ;;  %24792 = vmatmul.mubr.f32.vlgmr.msra.gmra.mrb[60].mxu1 %v16025_v7  ;;  %v16045_v55 = vand.u32 4294901760, %v16044_v3 }
0x19bc   : > { %v16053_v13 = vand.u32 4294901760, %v16052_v51  ;;  %v30924_v42 = vand.u32 4294901760, %v15940_v30  ;;  %v16035_v24 = vand.u32 4294901760, %v16034_v29  ;;  %24804 = vmatpush3.msra.mxu1 %v32094_v53 }
0x19bd   : > { %v16082_v43 = vsub.f32 %v15943_v10, %v30921_v35  ;;  %v16064_v56 = vsub.f32 %v30912_v6, %v16063_v33  ;;  %24817 = vmatprep.subr.mxu1 %v32126_v60 }
0x19be   : > { %v16072_v15 = vsub.f32 %v15940_v30, %v30924_v42  ;;  %24794 = vmatprep.mubr.f32.mxu1 %v16035_v24  ;;  %v16054_v0 = vsub.f32 %v16052_v51, %v16053_v13 }
0x19bf   : > { %v16083_v20 = vand.u32 4294901760, %v16082_v43  ;;  %24795 = vmatmul.mubr.f32.gmra.mrb[62].mxu1 %v16045_v55  ;;  %v16065_v22 = vand.u32 4294901760, %v16064_v56 }
0x19c0   : > { %v16073_v14 = vand.u32 4294901760, %v16072_v15  ;;  %v16055_v39 = vand.u32 4294901760, %v16054_v0 }
0x19c1   : > { %v16084_v21 = vsub.f32 %v16082_v43, %v16083_v20 }
0x19c2   : > { %24797 = vmatprep.mubr.f32.mxu1 %v16055_v39  ;;  %v16074_v5 = vsub.f32 %v16072_v15, %v16073_v14 }
0x19c3   : > { %24798 = vmatmul.mubr.f32.gmra.mrb[64].mxu1 %v16065_v22  ;;  %v16085_v46 = vand.u32 4294901760, %v16084_v21 }
0x19c4   : > { %v16075_v53 = vand.u32 4294901760, %v16074_v5 }
0x19c6   : > { %24800 = vmatprep.mubr.f32.mxu1 %v16075_v53 }
0x19c7   : > { %24801 = vmatmul.mubr.f32.gmra.mrb[66].mxu1 %v16085_v46 }
0x19c8   : > { %24805 = vmatprep.mubr.f32.mxu1 %v30875_v49 }
0x19cb   : > { %24806 = vmatmul.mubr.f32.vlgmr.msra.gmra.mrb[60].mxu1 %v30872_v11 }
0x19cc   : > { %24808 = vmatprep.mubr.f32.mxu1 %v30889_v34  ;;  %24818 = vmatpush3.msra.mxu1 %v32126_v60 }
0x19cd   : > { %24831 = vmatprep.subr.mxu1 %v32093_v45 }
0x19cf   : > { %24809 = vmatmul.mubr.f32.gmra.mrb[62].mxu1 %v30885_v8 }
0x19d0   : > { %24811 = vmatprep.mubr.f32.mxu1 %v30909_v58 }
0x19d3   : > { %24812 = vmatmul.mubr.f32.gmra.mrb[64].mxu1 %v30905_v4 }
0x19d4   : > { %24814 = vmatprep.mubr.f32.mxu1 %v30924_v42 }
0x19d7   : > { %24815 = vmatmul.mubr.f32.gmra.mrb[66].mxu1 %v30921_v35 }
0x19d8   : > { %24819 = vmatprep.mubr.f32.mxu1 %v30881_v57 }
0x19db   : > { %24820 = vmatmul.mubr.f32.vlgmr.msra.gmra.mrb[60].mxu1 %v30878_v41 }
0x19dc   : > { %24822 = vmatprep.mubr.f32.mxu1 %v30898_v26  ;;  %24832 = vmatpush3.msra.mxu1 %v32093_v45 }
0x19dd   : > { %24845 = vmatprep.subr.mxu1 %v32127_v27 }
0x19df   : > { %24823 = vmatmul.mubr.f32.gmra.mrb[62].mxu1 %v30895_v12 }
0x19e0   : > { %24825 = vmatprep.mubr.f32.mxu1 %v16052_v51 }
0x19e3   : > { %24826 = vmatmul.mubr.f32.gmra.mrb[64].mxu1 %v30912_v6 }
0x19e4   : > { %24828 = vmatprep.mubr.f32.mxu1 %v16072_v15 }
0x19e7   : > { %24829 = vmatmul.mubr.f32.gmra.mrb[66].mxu1 %v16082_v43 }
0x19e8   : > { %24833 = vmatprep.mubr.f32.mxu1 %v16013_v52 }
0x19eb   : > { %24834 = vmatmul.mubr.f32.vlgmr.msra.gmra.mrb[60].mxu1 %v16023_v62 }
0x19ec   : > { %24836 = vmatprep.mubr.f32.mxu1 %v16033_v1  ;;  %24846 = vmatpush3.msra.mxu1 %v32127_v27 }
0x19ed   : > { %24859 = vmatprep.subr.mxu1 %v32093_v45 }
0x19ef   : > { %24837 = vmatmul.mubr.f32.gmra.mrb[62].mxu1 %v16043_v32 }
0x19f0   : > { %24839 = vmatprep.mubr.f32.mxu1 %v16053_v13 }
0x19f3   : > { %24840 = vmatmul.mubr.f32.gmra.mrb[64].mxu1 %v16063_v33 }
0x19f4   : > { %24842 = vmatprep.mubr.f32.mxu1 %v16073_v14  ;;  %v32130_v14 = vld [vmem:[#allocation90_spill] sm:$0xff] }
0x19f7   : > { %24843 = vmatmul.mubr.f32.gmra.mrb[66].mxu1 %v16083_v20 }
0x19f8   : > { %24847 = vmatprep.mubr.f32.mxu1 %v30875_v49 }
0x19fb   : > { %24848 = vmatmul.mubr.f32.vlgmr.msra.gmra.mrb[60].mxu1 %v30872_v11 }
0x19fc   : > { %24850 = vmatprep.mubr.f32.mxu1 %v30889_v34  ;;  %24860 = vmatpush3.msra.mxu1 %v32093_v45  ;;  %v32129_v45 = vld [vmem:[#allocation92_spill] sm:$0xff] }
0x19fd   : > { %24957 = vmatprep.subr.mxu1 %v32128_v54 }
0x19ff   : > { %24851 = vmatmul.mubr.f32.gmra.mrb[62].mxu1 %v30885_v8 }
0x1a00   : > { %24853 = vmatprep.mubr.f32.mxu1 %v30909_v58 }
0x1a03   : > { %24854 = vmatmul.mubr.f32.gmra.mrb[64].mxu1 %v30905_v4 }
0x1a04   : > { %24856 = vmatprep.mubr.f32.mxu1 %v30924_v42 }
0x1a07   : > { %24857 = vmatmul.mubr.f32.gmra.mrb[66].mxu1 %v30921_v35 }
0x1a08   : > { %24861 = vmatprep.mubr.f32.mxu1 %v30875_v49 }
0x1a0b   : > { %24862 = vmatmul.mubr.f32.vlgmr.msra.gmra.mrb[60].mxu1 %v30872_v11 }
0x1a0c   : > { %24864 = vmatprep.mubr.f32.mxu1 %v30889_v34  ;;  %24958 = vmatpush3.msra.mxu1 %v32128_v54 }
0x1a0d   : > { %24971 = vmatprep.subr.mxu1 %v32129_v45 }
0x1a0f   : > { %24865 = vmatmul.mubr.f32.gmra.mrb[62].mxu1 %v30885_v8 }
0x1a10   : > { %24867 = vmatprep.mubr.f32.mxu1 %v30909_v58 }
0x1a13   : > { %24868 = vmatmul.mubr.f32.gmra.mrb[64].mxu1 %v30905_v4 }
0x1a14   : > { %24870 = vmatprep.mubr.f32.mxu1 %v30924_v42 }
0x1a17   : > { %24871 = vmatmul.mubr.f32.gmra.mrb[66].mxu1 %v30921_v35 }
0x1a20   : > { %v24947_v41 = vpop.f32.mrb[52].mxu0 }
0x1a21   : > { %v17447_v49 = vsel %vm6052_vm7, %v24947_v41, 0  ;;  %v17397_v11 = vpop.f32.mrb[53].mxu0 }
0x1a22   : > { %v30977_v61 = vand.u32 4294901760, %v17447_v49  ;;  %v17444_v57 = vsel %vm6052_vm7, %v17397_v11, 0  ;;  %v32131_v11 = vld [vmem:[#allocation91_spill] sm:$0xff] }
0x1a23   : > { %v30980_v38 = vand.u32 4294901760, %v17444_v57 }
0x1a24   : > { %v30983_v23 = vsub.f32 %v17447_v49, %v30977_v61  ;;  %v24950_v62 = vpop.f32.mrb[54].mxu0 }
0x1a25   : > { %v30986_v8 = vsub.f32 %v17444_v57, %v30980_v38  ;;  %v17453_v44 = vsel %vm6052_vm7, %v24950_v62, 0  ;;  %v17409_v52 = vpop.f32.mrb[55].mxu0  ;;  %v21088_v62 = vld [vmem:[%s31781_s21 + $0x50] sm:$0xff] }
0x1a26   : > { %v17545_v34 = vand.u32 4294901760, %v30983_v23  ;;  %v30990_v59 = vand.u32 4294901760, %v17453_v44  ;;  %v17450_v12 = vsel %vm6052_vm7, %v17409_v52, 0 }
0x1a27   : > { %v17535_v18 = vand.u32 4294901760, %v30986_v8  ;;  %v30994_v26 = vand.u32 4294901760, %v17450_v12 }
0x1a28   : > { %v17546_v50 = vsub.f32 %v30983_v23, %v17545_v34  ;;  %v31000_v36 = vsub.f32 %v17453_v44, %v30990_v59  ;;  %v24953_v2 = vpop.f32.mrb[56].mxu0  ;;  %v18262_v44 = vand.u32 4294901760, %v21088_v62 }
0x1a29   : > { %v31003_v32 = vsub.f32 %v17450_v12, %v30994_v26  ;;  %v17459_v4 = vsel %vm6052_vm7, %v24953_v2, 0  ;;  %v17421_v9 = vpop.f32.mrb[57].mxu0  ;;  %v17536_v1 = vsub.f32 %v30986_v8, %v17535_v18  ;;  %v21091_v12 = vld [vmem:[%s31781_s21 + $0x68] sm:$0xff] }
0x1a2a   : > { %v17565_v58 = vand.u32 4294901760, %v31000_v36  ;;  %v31010_v40 = vand.u32 4294901760, %v17459_v4  ;;  %v17456_v7 = vsel %vm6052_vm7, %v17421_v9, 0  ;;  %v17547_v51 = vand.u32 4294901760, %v17546_v50 }
0x1a2b   : > { %v17555_v6 = vand.u32 4294901760, %v31003_v32  ;;  %v31014_v48 = vand.u32 4294901760, %v17456_v7  ;;  %v17537_v3 = vand.u32 4294901760, %v17536_v1 }
0x1a2c   : > { %v31017_v10 = vsub.f32 %v17459_v4, %v31010_v40  ;;  %v24956_v19 = vpop.f32.mrb[58].mxu0  ;;  %v17566_v29 = vsub.f32 %v31000_v36, %v17565_v58  ;;  %v21093_v4 = vld [vmem:[%s31781_s21 + $0x78] sm:$0xff] }
0x1a2d   : > { %v17574_v33 = vsub.f32 %v17456_v7, %v31014_v48  ;;  %v17465_v35 = vsel %vm6052_vm7, %v24956_v19, 0  ;;  %v17433_v30 = vpop.f32.mrb[59].mxu0  ;;  %24959 = vmatprep.mubr.f32.mxu1 %v17537_v3  ;;  %v17556_v13 = vsub.f32 %v31003_v32, %v17555_v6 }
0x1a2e   : > { %v17585_v42 = vand.u32 4294901760, %v31017_v10  ;;  %v31026_v24 = vand.u32 4294901760, %v17465_v35  ;;  %v17462_v43 = vsel %vm6052_vm7, %v17433_v30, 0  ;;  %24960 = vmatmul.mubr.f32.vlgmr.msra.gmra.mrb[68].mxu1 %v17547_v51  ;;  %v17567_v0 = vand.u32 4294901760, %v17566_v29 }
0x1a2f   : > { %v17575_v55 = vand.u32 4294901760, %v17574_v33  ;;  %v31029_v56 = vand.u32 4294901760, %v17462_v43  ;;  %v17557_v60 = vand.u32 4294901760, %v17556_v13  ;;  %24972 = vmatpush3.msra.mxu1 %v32129_v45 }
0x1a30   : > { %v17604_v15 = vsub.f32 %v17465_v35, %v31026_v24  ;;  %v17586_v20 = vsub.f32 %v31017_v10, %v17585_v42  ;;  %24985 = vmatprep.subr.mxu1 %v32130_v14 }
0x1a31   : > { %v17594_v39 = vsub.f32 %v17462_v43, %v31029_v56  ;;  %24962 = vmatprep.mubr.f32.mxu1 %v17557_v60  ;;  %v17576_v22 = vsub.f32 %v17574_v33, %v17575_v55 }
0x1a32   : > { %v17605_v21 = vand.u32 4294901760, %v17604_v15  ;;  %24963 = vmatmul.mubr.f32.gmra.mrb[70].mxu1 %v17567_v0  ;;  %v17587_v46 = vand.u32 4294901760, %v17586_v20 }
0x1a33   : > { %v17595_v5 = vand.u32 4294901760, %v17594_v39  ;;  %v17577_v53 = vand.u32 4294901760, %v17576_v22 }
0x1a34   : > { %v17606_v27 = vsub.f32 %v17604_v15, %v17605_v21 }
0x1a35   : > { %24965 = vmatprep.mubr.f32.mxu1 %v17577_v53  ;;  %v17596_v41 = vsub.f32 %v17594_v39, %v17595_v5 }
0x1a36   : > { %24966 = vmatmul.mubr.f32.gmra.mrb[72].mxu1 %v17587_v46  ;;  %v17607_v49 = vand.u32 4294901760, %v17606_v27 }
0x1a37   : > { %v17597_v45 = vand.u32 4294901760, %v17596_v41 }
0x1a39   : > { %24968 = vmatprep.mubr.f32.mxu1 %v17597_v45 }
0x1a3a   : > { %24969 = vmatmul.mubr.f32.gmra.mrb[74].mxu1 %v17607_v49 }
0x1a3b   : > { %24973 = vmatprep.mubr.f32.mxu1 %v30980_v38 }
0x1a3e   : > { %24974 = vmatmul.mubr.f32.vlgmr.msra.gmra.mrb[68].mxu1 %v30977_v61 }
0x1a3f   : > { %24976 = vmatprep.mubr.f32.mxu1 %v30994_v26  ;;  %24986 = vmatpush3.msra.mxu1 %v32130_v14 }
0x1a40   : > { %24999 = vmatprep.subr.mxu1 %v32128_v54 }
0x1a42   : > { %24977 = vmatmul.mubr.f32.gmra.mrb[70].mxu1 %v30990_v59 }
0x1a43   : > { %24979 = vmatprep.mubr.f32.mxu1 %v31014_v48 }
0x1a46   : > { %24980 = vmatmul.mubr.f32.gmra.mrb[72].mxu1 %v31010_v40 }
0x1a47   : > { %24982 = vmatprep.mubr.f32.mxu1 %v31029_v56 }
0x1a4a   : > { %24983 = vmatmul.mubr.f32.gmra.mrb[74].mxu1 %v31026_v24 }
0x1a4b   : > { %24987 = vmatprep.mubr.f32.mxu1 %v30986_v8  ;;  %v21089_v8 = vld [vmem:[%s31781_s21 + $0x58] sm:$0xff] }
0x1a4c   : > { %v18265_v52 = vand.u32 4294901760, %v21089_v8 }
0x1a4e   : > { %24988 = vmatmul.mubr.f32.vlgmr.msra.gmra.mrb[68].mxu1 %v30983_v23  ;;  %v18431_v19 = vsub.f32 %v21089_v8, %v18265_v52 }
0x1a4f   : > { %24990 = vmatprep.mubr.f32.mxu1 %v31003_v32  ;;  %25000 = vmatpush3.msra.mxu1 %v32128_v54  ;;  %v21092_v32 = vld [vmem:[%s31781_s21 + $0x70] sm:$0xff] }
0x1a50   : > { %25013 = vmatprep.subr.mxu1 %v32131_v11  ;;  %v18274_v1 = vand.u32 4294901760, %v21092_v32 }
0x1a52   : > { %24991 = vmatmul.mubr.f32.gmra.mrb[70].mxu1 %v31000_v36  ;;  %v18452_v53 = vsub.f32 %v21092_v32, %v18274_v1 }
0x1a53   : > { %24993 = vmatprep.mubr.f32.mxu1 %v17574_v33 }
0x1a56   : > { %24994 = vmatmul.mubr.f32.gmra.mrb[72].mxu1 %v31017_v10  ;;  %v18424_v10 = vsub.f32 %v21088_v62, %v18262_v44 }
0x1a57   : > { %24996 = vmatprep.mubr.f32.mxu1 %v17594_v39 }
0x1a58   : > { %v18425_v30 = vand.u32 4294901760, %v18424_v10 }
0x1a5a   : > { %24997 = vmatmul.mubr.f32.gmra.mrb[74].mxu1 %v17604_v15  ;;  %v18426_v43 = vsub.f32 %v18424_v10, %v18425_v30 }
0x1a5b   : > { %25001 = vmatprep.mubr.f32.mxu1 %v17535_v18 }
0x1a5c   : > { %v18427_v0 = vand.u32 4294901760, %v18426_v43 }
0x1a5e   : > { %25002 = vmatmul.mubr.f32.vlgmr.msra.gmra.mrb[68].mxu1 %v17545_v34  ;;  %v31094_v34 = vpack.c.bf16 %v18265_v52, %v18262_v44 }
0x1a5f   : > { %25004 = vmatprep.mubr.f32.mxu1 %v17555_v6  ;;  %25014 = vmatpush3.msra.mxu1 %v32131_v11  ;;  %v18453_v11 = vand.u32 4294901760, %v18452_v53 }
0x1a60   : > { %25027 = vmatprep.subr.mxu1 %v32128_v54 }
0x1a62   : > { %25005 = vmatmul.mubr.f32.gmra.mrb[70].mxu1 %v17565_v58  ;;  %v18277_v58 = vand.u32 4294901760, %v21093_v4 }
0x1a63   : > { %25007 = vmatprep.mubr.f32.mxu1 %v17575_v55 }
0x1a64   : > { %v18459_v46 = vsub.f32 %v21093_v4, %v18277_v58 }
0x1a66   : > { %25008 = vmatmul.mubr.f32.gmra.mrb[72].mxu1 %v17585_v42  ;;  %v18432_v42 = vand.u32 4294901760, %v18431_v19 }
0x1a67   : > { %25010 = vmatprep.mubr.f32.mxu1 %v17595_v5 }
0x1a68   : > { %v18433_v60 = vsub.f32 %v18431_v19, %v18432_v42  ;;  %v31137_v4 = vpack.c.bf16 %v18432_v42, %v18425_v30 }
0x1a6a   : > { %25011 = vmatmul.mubr.f32.gmra.mrb[74].mxu1 %v17605_v21  ;;  %v18434_v22 = vand.u32 4294901760, %v18433_v60 }
0x1a6b   : > { %25015 = vmatprep.mubr.f32.mxu1 %v30980_v38 }
0x1a6c   : > { %v31121_v27 = vpack.c.bf16 %v18434_v22, %v18427_v0 }
0x1a6e   : > { %25016 = vmatmul.mubr.f32.vlgmr.msra.gmra.mrb[68].mxu1 %v30977_v61 }
0x1a6f   : > { %25018 = vmatprep.mubr.f32.mxu1 %v30994_v26  ;;  %25028 = vmatpush3.msra.mxu1 %v32128_v54  ;;  %v21086_v54 = vld [vmem:[%s31781_s21 + $0x40] sm:$0xff] }
0x1a70   : > { %v18256_v57 = vand.u32 4294901760, %v21086_v54 }
0x1a72   : > { %25019 = vmatmul.mubr.f32.gmra.mrb[70].mxu1 %v30990_v59  ;;  %v18410_v36 = vsub.f32 %v21086_v54, %v18256_v57  ;;  %v18460_v54 = vand.u32 4294901760, %v18459_v46 }
0x1a73   : > { %25021 = vmatprep.mubr.f32.mxu1 %v31014_v48 }
0x1a74   : > { %v18461_v62 = vsub.f32 %v18459_v46, %v18460_v54 }
0x1a76   : > { %25022 = vmatmul.mubr.f32.gmra.mrb[72].mxu1 %v31010_v40  ;;  %v18462_v44 = vand.u32 4294901760, %v18461_v62 }
0x1a77   : > { %25024 = vmatprep.mubr.f32.mxu1 %v31029_v56 }
0x1a7a   : > { %25025 = vmatmul.mubr.f32.gmra.mrb[74].mxu1 %v31026_v24 }
0x1a7b   : > { %25029 = vmatprep.mubr.f32.mxu1 %v30980_v38 }
0x1a7e   : > { %25030 = vmatmul.mubr.f32.vlgmr.msra.gmra.mrb[68].mxu1 %v30977_v61  ;;  %v21087_v61 = vld [vmem:[%s31781_s21 + $0x48] sm:$0xff] }
0x1a7f   : > { %25032 = vmatprep.mubr.f32.mxu1 %v30994_v26  ;;  %v18259_v38 = vand.u32 4294901760, %v21087_v61  ;;  %v18271_v26 = vand.u32 4294901760, %v21091_v12 }
0x1a81   : > { %v31084_v23 = vpack.c.bf16 %v18259_v38, %v18256_v57  ;;  %v18417_v2 = vsub.f32 %v21087_v61, %v18259_v38  ;;  %v18454_v38 = vsub.f32 %v18452_v53, %v18453_v11 }
0x1a82   : > { %25033 = vmatmul.mubr.f32.gmra.mrb[70].mxu1 %v30990_v59  ;;  %v21090_v59 = vld [vmem:[%s31781_s21 + $0x60] sm:$0xff] }
0x1a83   : > { %25035 = vmatprep.mubr.f32.mxu1 %v31014_v48  ;;  %26206 = vmatprep.subr.bf16.mxu0 %v31084_v23  ;;  %v18268_v18 = vand.u32 4294901760, %v21090_v59  ;;  %v18418_v7 = vand.u32 4294901760, %v18417_v2  ;;  %v31114_v48 = vpack.c.bf16 %v18277_v58, %v18274_v1  ;;  %v18455_v8 = vand.u32 4294901760, %v18454_v38 }
0x1a84   : > { %26208 = vmatpush3.bf16.msra.mxu0 %v31084_v23  ;;  %v31141_v58 = vpack.c.bf16 %v18460_v54, %v18453_v11 }
0x1a85   : > { %26210 = vmatprep.subr.bf16.mxu0 %v31094_v34  ;;  %v31104_v50 = vpack.c.bf16 %v18271_v26, %v18268_v18  ;;  %v18419_v51 = vsub.f32 %v18417_v2, %v18418_v7  ;;  %v18438_v55 = vsub.f32 %v21090_v59, %v18268_v18  ;;  %v31125_v52 = vpack.c.bf16 %v18462_v44, %v18455_v8 }
0x1a86   : > { %25036 = vmatmul.mubr.f32.gmra.mrb[72].mxu1 %v31010_v40  ;;  %v18411_v40 = vand.u32 4294901760, %v18410_v36  ;;  %v31127_v59 = vpack.c.bf16 %v18417_v2, %v18410_v36 }
0x1a87   : > { %25038 = vmatprep.mubr.f32.mxu1 %v31029_v56  ;;  %v18420_v35 = vand.u32 4294901760, %v18419_v51  ;;  %v18445_v56 = vsub.f32 %v21091_v12, %v18271_v26  ;;  %v18439_v20 = vand.u32 4294901760, %v18438_v55  ;;  %v31129_v12 = vpack.c.bf16 %v18431_v19, %v18424_v10 }
0x1a88   : > { %26212 = vmatpush3.bf16.msra.mxu0 %v31094_v34  ;;  %v18412_v3 = vsub.f32 %v18410_v36, %v18411_v40  ;;  %v31133_v26 = vpack.c.bf16 %v18459_v46, %v18452_v53  ;;  %v31135_v32 = vpack.c.bf16 %v18418_v7, %v18411_v40 }
0x1a89   : > { %26214 = vmatprep.subr.bf16.mxu0 %v31104_v50  ;;  %v18446_v14 = vand.u32 4294901760, %v18445_v56  ;;  %v18440_v21 = vsub.f32 %v18438_v55, %v18439_v20  ;;  %v31131_v18 = vpack.c.bf16 %v18445_v56, %v18438_v55 }
0x1a8a   : > { %25039 = vmatmul.mubr.f32.gmra.mrb[74].mxu1 %v31026_v24  ;;  %v18413_v33 = vand.u32 4294901760, %v18412_v3 }
0x1a8b   : > { %v18447_v5 = vsub.f32 %v18445_v56, %v18446_v14  ;;  %v18441_v45 = vand.u32 4294901760, %v18440_v21  ;;  %v31139_v1 = vpack.c.bf16 %v18446_v14, %v18439_v20 }
0x1a8c   : > { %26216 = vmatpush3.bf16.msra.mxu0 %v31104_v50  ;;  %v31118_v24 = vpack.c.bf16 %v18420_v35, %v18413_v33 }
0x1a8d   : > { %26218 = vmatprep.subr.bf16.mxu0 %v31114_v48  ;;  %v18448_v49 = vand.u32 4294901760, %v18447_v5 }
0x1a8f   : > { %v31123_v57 = vpack.c.bf16 %v18448_v49, %v18441_v45 }
0x1a90   : > { %26220 = vmatpush3.bf16.msra.mxu0 %v31114_v48 }
0x1a91   : > { %26222 = vmatprep.subr.bf16.mxu0 %v31118_v24 }
0x1ade   : > { %v24863_v9 = vpop.f32.mrb[60].mxu1 }
0x1adf   : > { %v16646_v6 = vpop.f32.mrb[61].mxu1 }
0x1ae2   : > { %v24866_v29 = vpop.f32.mrb[62].mxu1 }
0x1ae3   : > { %v16658_v13 = vpop.f32.mrb[63].mxu1 }
0x1ae6   : > { %v24869_v15 = vpop.f32.mrb[64].mxu1 }
0x1ae7   : > { %v16670_v39 = vpop.f32.mrb[65].mxu1 }
0x1aea   : > { %v24872_v41 = vpop.f32.mrb[66].mxu1 }
0x1aeb   : > { %v16682_v61 = vpop.f32.mrb[67].mxu1 }
0x1b51   : > { %v25031_v3 = vpop.f32.mrb[68].mxu1 }
0x1b52   : > { %v18215_v51 = vmul.f32 %v25031_v3, %v24863_v9  ;;  %v18168_v33 = vpop.f32.mrb[69].mxu1 }
0x1b53   : > { %v18214_v35 = vmul.f32 %v18168_v33, %v16646_v6 }
0x1b54   : > { %v18235_v36 = vsel %vm3537_vm5, %v18215_v51, 0 }
0x1b55   : > { %v31144_v2 = vand.u32 4294901760, %v18235_v36  ;;  %v18232_v10 = vsel %vm3537_vm5, %v18214_v35, 0  ;;  %v25034_v19 = vpop.f32.mrb[70].mxu1 }
0x1b56   : > { %v31147_v43 = vand.u32 4294901760, %v18232_v10  ;;  %v18217_v40 = vmul.f32 %v25034_v19, %v24866_v29  ;;  %v18180_v7 = vpop.f32.mrb[71].mxu1 }
0x1b57   : > { %v31150_v30 = vsub.f32 %v18235_v36, %v31144_v2  ;;  %v18216_v42 = vmul.f32 %v18180_v7, %v16658_v13 }
0x1b58   : > { %v31153_v55 = vsub.f32 %v18232_v10, %v31147_v43  ;;  %v18241_v9 = vsel %vm3537_vm5, %v18217_v40, 0 }
0x1b59   : > { %v18340_v6 = vand.u32 4294901760, %v31150_v30  ;;  %v31157_v56 = vand.u32 4294901760, %v18241_v9  ;;  %v18238_v60 = vsel %vm3537_vm5, %v18216_v42, 0  ;;  %v25037_v0 = vpop.f32.mrb[72].mxu1 }
0x1b5a   : > { %v31160_v20 = vand.u32 4294901760, %v18238_v60  ;;  %v18219_v29 = vmul.f32 %v25037_v0, %v24869_v15  ;;  %v18192_v14 = vpop.f32.mrb[73].mxu1  ;;  %v18330_v22 = vand.u32 4294901760, %v31153_v55 }
0x1b5b   : > { %v18341_v13 = vsub.f32 %v31150_v30, %v18340_v6  ;;  %v31167_v21 = vsub.f32 %v18241_v9, %v31157_v56  ;;  %v18218_v5 = vmul.f32 %v18192_v14, %v16670_v39 }
0x1b5c   : > { %v31170_v53 = vsub.f32 %v18238_v60, %v31160_v20  ;;  %v18247_v46 = vsel %vm3537_vm5, %v18219_v29, 0  ;;  %v18331_v15 = vsub.f32 %v31153_v55, %v18330_v22 }
0x1b5d   : > { %v31176_v45 = vand.u32 4294901760, %v18247_v46  ;;  %v18244_v49 = vsel %vm3537_vm5, %v18218_v5, 0  ;;  %v25040_v11 = vpop.f32.mrb[74].mxu1  ;;  %v18360_v54 = vand.u32 4294901760, %v31167_v21  ;;  %v18342_v3 = vand.u32 4294901760, %v18341_v13 }
0x1b5e   : > { %v31180_v38 = vand.u32 4294901760, %v18244_v49  ;;  %v18221_v62 = vmul.f32 %v25040_v11, %v24872_v41  ;;  %v18204_v39 = vpop.f32.mrb[75].mxu1  ;;  %v18332_v8 = vand.u32 4294901760, %v18331_v15  ;;  %v18350_v44 = vand.u32 4294901760, %v31170_v53 }
0x1b5f   : > { %v31184_v51 = vsub.f32 %v18247_v46, %v31176_v45  ;;  %v18220_v33 = vmul.f32 %v18204_v39, %v16682_v61  ;;  %v18361_v35 = vsub.f32 %v31167_v21, %v18360_v54 }
0x1b60   : > { %v31190_v36 = vsub.f32 %v18244_v49, %v31180_v38  ;;  %v18253_v10 = vsel %vm3537_vm5, %v18221_v62, 0  ;;  %25057 = vmatprep.mubr.f32.mxu0 %v18332_v8  ;;  %v18351_v41 = vsub.f32 %v31170_v53, %v18350_v44 }
0x1b61   : > { %v31196_v19 = vand.u32 4294901760, %v18253_v10  ;;  %v18250_v40 = vsel %vm3537_vm5, %v18220_v33, 0  ;;  %25058 = vmatmul.mubr.f32.vlgmr.msra.gmra.mrb[60].mxu0 %v18342_v3  ;;  %v18380_v61 = vand.u32 4294901760, %v31184_v51  ;;  %v18362_v0 = vand.u32 4294901760, %v18361_v35 }
0x1b62   : > { %v31200_v7 = vand.u32 4294901760, %v18250_v40  ;;  %26224 = vmatpush3.bf16.msra.mxu0 %v31118_v24  ;;  %v18352_v42 = vand.u32 4294901760, %v18351_v41  ;;  %v18370_v9 = vand.u32 4294901760, %v31190_v36 }
0x1b63   : > { %v31205_v60 = vsub.f32 %v18253_v10, %v31196_v19  ;;  %26226 = vmatprep.subr.bf16.mxu0 %v31121_v27  ;;  %v18381_v29 = vsub.f32 %v31184_v51, %v18380_v61 }
0x1b64   : > { %v31212_v14 = vsub.f32 %v18250_v40, %v31200_v7  ;;  %25060 = vmatprep.mubr.f32.mxu0 %v18352_v42  ;;  %v18371_v24 = vsub.f32 %v31190_v36, %v18370_v9 }
0x1b65   : > { %25061 = vmatmul.mubr.f32.gmra.mrb[62].mxu0 %v18362_v0  ;;  %v18400_v13 = vand.u32 4294901760, %v31205_v60  ;;  %v18382_v15 = vand.u32 4294901760, %v18381_v29 }
0x1b66   : > { %26228 = vmatpush3.bf16.msra.mxu0 %v31121_v27  ;;  %v18372_v5 = vand.u32 4294901760, %v18371_v24  ;;  %v18390_v46 = vand.u32 4294901760, %v31212_v14 }
0x1b67   : > { %26230 = vmatprep.subr.bf16.mxu0 %v31123_v57  ;;  %v18401_v49 = vsub.f32 %v31205_v60, %v18400_v13 }
0x1b68   : > { %25063 = vmatprep.mubr.f32.mxu0 %v18372_v5  ;;  %v18391_v11 = vsub.f32 %v31212_v14, %v18390_v46 }
0x1b69   : > { %25064 = vmatmul.mubr.f32.gmra.mrb[64].mxu0 %v18382_v15  ;;  %v18402_v39 = vand.u32 4294901760, %v18401_v49 }
0x1b6a   : > { %26232 = vmatpush3.bf16.msra.mxu0 %v31123_v57  ;;  %v18392_v62 = vand.u32 4294901760, %v18391_v11 }
0x1b6b   : > { %26234 = vmatprep.subr.bf16.mxu0 %v31125_v52 }
0x1b6c   : > { %25066 = vmatprep.mubr.f32.mxu0 %v18392_v62 }
0x1b6d   : > { %25067 = vmatmul.mubr.f32.gmra.mrb[66].mxu0 %v18402_v39 }
0x1b6e   : > { %26236 = vmatpush3.bf16.msra.mxu0 %v31125_v52  ;;  %25085 = vmatprep.mubr.f32.mxu0 %v31147_v43 }
0x1b6f   : > { %26238 = vmatprep.subr.bf16.mxu0 %v31127_v59 }
0x1b71   : > { %25086 = vmatmul.mubr.f32.vlgmr.msra.gmra.mrb[60].mxu0 %v31144_v2 }
0x1b72   : > { %25088 = vmatprep.mubr.f32.mxu0 %v31160_v20  ;;  %26240 = vmatpush3.bf16.msra.mxu0 %v31127_v59 }
0x1b73   : > { %26242 = vmatprep.subr.bf16.mxu0 %v31129_v12 }
0x1b75   : > { %25089 = vmatmul.mubr.f32.gmra.mrb[62].mxu0 %v31157_v56 }
0x1b76   : > { %25091 = vmatprep.mubr.f32.mxu0 %v31180_v38  ;;  %26244 = vmatpush3.bf16.msra.mxu0 %v31129_v12 }
0x1b77   : > { %26246 = vmatprep.subr.bf16.mxu0 %v31131_v18 }
0x1b79   : > { %25092 = vmatmul.mubr.f32.gmra.mrb[64].mxu0 %v31176_v45 }
0x1b7a   : > { %25094 = vmatprep.mubr.f32.mxu0 %v31200_v7  ;;  %26248 = vmatpush3.bf16.msra.mxu0 %v31131_v18 }
0x1b7b   : > { %26250 = vmatprep.subr.bf16.mxu0 %v31133_v26 }
0x1b7d   : > { %25095 = vmatmul.mubr.f32.gmra.mrb[66].mxu0 %v31196_v19 }
0x1b7e   : > { %26252 = vmatpush3.bf16.msra.mxu0 %v31133_v26  ;;  %25113 = vmatprep.mubr.f32.mxu0 %v31153_v55 }
0x1b7f   : > { %26254 = vmatprep.subr.bf16.mxu0 %v31084_v23 }
0x1b81   : > { %25114 = vmatmul.mubr.f32.vlgmr.msra.gmra.mrb[60].mxu0 %v31150_v30 }
0x1b82   : > { %25116 = vmatprep.mubr.f32.mxu0 %v31170_v53  ;;  %26256 = vmatpush3.bf16.msra.mxu0 %v31084_v23 }
0x1b83   : > { %26258 = vmatprep.subr.bf16.mxu0 %v31094_v34 }
0x1b85   : > { %25117 = vmatmul.mubr.f32.gmra.mrb[62].mxu0 %v31167_v21 }
0x1b86   : > { %25119 = vmatprep.mubr.f32.mxu0 %v31190_v36  ;;  %26260 = vmatpush3.bf16.msra.mxu0 %v31094_v34 }
0x1b87   : > { %26262 = vmatprep.subr.bf16.mxu0 %v31104_v50 }
0x1b89   : > { %25120 = vmatmul.mubr.f32.gmra.mrb[64].mxu0 %v31184_v51 }
0x1b8a   : > { %25122 = vmatprep.mubr.f32.mxu0 %v31212_v14  ;;  %26264 = vmatpush3.bf16.msra.mxu0 %v31104_v50 }
0x1b8b   : > { %26266 = vmatprep.subr.bf16.mxu0 %v31114_v48 }
0x1b8d   : > { %25123 = vmatmul.mubr.f32.gmra.mrb[66].mxu0 %v31205_v60 }
0x1b8e   : > { %26268 = vmatpush3.bf16.msra.mxu0 %v31114_v48  ;;  %25141 = vmatprep.mubr.f32.mxu0 %v18330_v22 }
0x1b8f   : > { %26270 = vmatprep.subr.bf16.mxu0 %v31135_v32 }
0x1b91   : > { %25142 = vmatmul.mubr.f32.vlgmr.msra.gmra.mrb[60].mxu0 %v18340_v6 }
0x1b92   : > { %25144 = vmatprep.mubr.f32.mxu0 %v18350_v44  ;;  %26272 = vmatpush3.bf16.msra.mxu0 %v31135_v32 }
0x1b93   : > { %26274 = vmatprep.subr.bf16.mxu0 %v31137_v4 }
0x1b95   : > { %25145 = vmatmul.mubr.f32.gmra.mrb[62].mxu0 %v18360_v54 }
0x1b96   : > { %25147 = vmatprep.mubr.f32.mxu0 %v18370_v9  ;;  %26276 = vmatpush3.bf16.msra.mxu0 %v31137_v4 }
0x1b97   : > { %26278 = vmatprep.subr.bf16.mxu0 %v31139_v1 }
0x1b99   : > { %25148 = vmatmul.mubr.f32.gmra.mrb[64].mxu0 %v18380_v61 }
0x1b9a   : > { %25150 = vmatprep.mubr.f32.mxu0 %v18390_v46  ;;  %26280 = vmatpush3.bf16.msra.mxu0 %v31139_v1 }
0x1b9b   : > { %26282 = vmatprep.subr.bf16.mxu0 %v31141_v58 }
0x1b9d   : > { %25151 = vmatmul.mubr.f32.gmra.mrb[66].mxu0 %v18400_v13 }
0x1b9e   : > { %26284 = vmatpush3.bf16.msra.mxu0 %v31141_v58  ;;  %25169 = vmatprep.mubr.f32.mxu0 %v31147_v43 }
0x1b9f   : > { %26286 = vmatprep.subr.bf16.mxu0 %v31084_v23 }
0x1ba1   : > { %25170 = vmatmul.mubr.f32.vlgmr.msra.gmra.mrb[60].mxu0 %v31144_v2 }
0x1ba2   : > { %25172 = vmatprep.mubr.f32.mxu0 %v31160_v20  ;;  %26288 = vmatpush3.bf16.msra.mxu0 %v31084_v23 }
0x1ba3   : > { %26290 = vmatprep.subr.bf16.mxu0 %v31094_v34 }
0x1ba5   : > { %25173 = vmatmul.mubr.f32.gmra.mrb[62].mxu0 %v31157_v56 }
0x1ba6   : > { %25175 = vmatprep.mubr.f32.mxu0 %v31180_v38  ;;  %26292 = vmatpush3.bf16.msra.mxu0 %v31094_v34  ;;  %v21095_v34 = vld [vmem:[%s31782_s22 + $0x1] ss:$0 sm:$0xff] }
0x1ba7   : > { %26294 = vmatprep.subr.bf16.mxu0 %v31104_v50 }
0x1ba9   : > { %25176 = vmatmul.mubr.f32.gmra.mrb[64].mxu0 %v31176_v45 }
0x1baa   : > { %25178 = vmatprep.mubr.f32.mxu0 %v31200_v7  ;;  %26296 = vmatpush3.bf16.msra.mxu0 %v31104_v50 }
0x1bab   : > { %26298 = vmatprep.subr.bf16.mxu0 %v31114_v48 }
0x1bad   : > { %25179 = vmatmul.mubr.f32.gmra.mrb[66].mxu0 %v31196_v19 }
0x1bae   : > { %26300 = vmatpush3.bf16.msra.mxu0 %v31114_v48  ;;  %25197 = vmatprep.mubr.f32.mxu0 %v31147_v43 }
0x1bb1   : > { %25198 = vmatmul.mubr.f32.vlgmr.msra.gmra.mrb[60].mxu0 %v31144_v2 }
0x1bb2   : > { %25200 = vmatprep.mubr.f32.mxu0 %v31160_v20 }
0x1bb5   : > { %25201 = vmatmul.mubr.f32.gmra.mrb[62].mxu0 %v31157_v56 }
0x1bb6   : > { %25203 = vmatprep.mubr.f32.mxu0 %v31180_v38 }
0x1bb9   : > { %25204 = vmatmul.mubr.f32.gmra.mrb[64].mxu0 %v31176_v45 }
0x1bba   : > { %25206 = vmatprep.mubr.f32.mxu0 %v31200_v7 }
0x1bbd   : > { %25207 = vmatmul.mubr.f32.gmra.mrb[66].mxu0 %v31196_v19 }
0x1c84   : > { %v25199_v23 = vpop.f32.mrb[60].mxu0 }
0x1c85   : > { %v19094_v50 = vadd.f32 %v25199_v23, %v30065_v16  ;;  %v19047_v48 = vpop.f32.mrb[61].mxu0 }
0x1c86   : > { %v19093_v27 = vadd.f32 %v19047_v48, %v30067_v63 }
0x1c87   : > { %v31307_v57 = vadd.f32 %v21095_v34, %v19094_v50 }
0x1c88   : > { %v25202_v52 = vpop.f32.mrb[62].mxu0  ;;  %v31309_v59 = vadd.f32 %v21095_v34, %v19093_v27 }
0x1c89   : > { %v19096_v12 = vadd.f32 %v25202_v52, %v30075_v47  ;;  %v19059_v18 = vpop.f32.mrb[63].mxu0  ;;  %v19120_v26 = vsel %vm2615_vm4, %v31307_v57, 0.0 }
0x1c8a   : > { %19121 = vadd.xlane.f32.xlu1 %v19120_v26  ;;  %v19095_v16 = vadd.f32 %v19059_v18, %v30077_v37  ;;  %v19117_v58 = vsel %vm2615_vm4, %v31309_v59, 0.0 }
0x1c8b   : > { %v31314_v4 = vadd.f32 %v21095_v34, %v19096_v12 }
0x1c8c   : > { %v25205_v32 = vpop.f32.mrb[64].mxu0  ;;  %v31322_v43 = vadd.f32 %v21095_v34, %v19095_v16  ;;  %v21097_v16 = vld [vmem:[%s31783_s23 + $0x18] sm:$0xff] }
0x1c8d   : > { %v19098_v1 = vadd.f32 %v25205_v32, %v30085_v17  ;;  %v19071_v63 = vpop.f32.mrb[65].mxu0  ;;  %v19126_v6 = vsel %vm2615_vm4, %v31314_v4, 0.0  ;;  %v21096_v32 = vld [vmem:[%s31783_s23 + $0x10] sm:$0xff] }
0x1c8e   : > { %19118 = vadd.xlane.f32.xlu1 %v19117_v58  ;;  %v19097_v30 = vadd.f32 %v19071_v63, %v30087_v31  ;;  %v19123_v20 = vsel %vm2615_vm4, %v31322_v43, 0.0  ;;  %v19260_v63 = vand.u32 4294901760, %v21097_v16 }
0x1c8f   : > { %v31320_v2 = vadd.f32 %v21095_v34, %v19098_v1  ;;  %v19257_v1 = vand.u32 4294901760, %v21096_v32 }
0x1c90   : > { %v25208_v47 = vpop.f32.mrb[66].mxu0  ;;  %v31329_v17 = vadd.f32 %v21095_v34, %v19097_v30  ;;  %v19412_v30 = vsub.f32 %v21097_v16, %v19260_v63 }
0x1c91   : > { %v19083_v55 = vpop.f32.mrb[67].mxu0  ;;  %v19132_v37 = vsel %vm2615_vm4, %v31320_v2, 0.0  ;;  %v19100_v22 = vadd.f32 %v25208_v47, %v30095_v28  ;;  %v31399_v58 = vpack.c.bf16 %v19260_v63, %v19257_v1  ;;  %v19405_v47 = vsub.f32 %v21096_v32, %v19257_v1 }
0x1c92   : > { %19127 = vadd.xlane.f32.xlu1 %v19126_v6  ;;  %19133 = vadd.xlane.f32.xlu0 %v19132_v37  ;;  %v19099_v56 = vadd.f32 %v19083_v55, %v30097_v25  ;;  %v19129_v21 = vsel %vm2615_vm4, %v31329_v17, 0.0  ;;  %v19413_v6 = vand.u32 4294901760, %v19412_v30 }
0x1c93   : > { %v31339_v53 = vadd.f32 %v21095_v34, %v19100_v22  ;;  %26302 = vmatprep.subr.bf16.mxu1 %v31399_v58  ;;  %v19406_v55 = vand.u32 4294901760, %v19405_v47 }
0x1c94   : > { %v31335_v31 = vadd.f32 %v21095_v34, %v19099_v56  ;;  %26304 = vmatpush3.bf16.msra.mxu1 %v31399_v58  ;;  %v19414_v56 = vsub.f32 %v19412_v30, %v19413_v6 }
0x1c95   : > { %v19138_v25 = vsel %vm2615_vm4, %v31339_v53, 0.0  ;;  %v19407_v37 = vsub.f32 %v19405_v47, %v19406_v55 }
0x1c96   : > { %19124 = vadd.xlane.f32.xlu1 %v19123_v20  ;;  %v19135_v45 = vsel %vm2615_vm4, %v31335_v31, 0.0  ;;  %v19415_v22 = vand.u32 4294901760, %v19414_v56 }
0x1c97   : > { %v19408_v20 = vand.u32 4294901760, %v19407_v37 }
0x1c9a   : > { %19130 = vadd.xlane.f32.xlu1 %v19129_v21  ;;  %v31403_v21 = vpack.c.bf16 %v19415_v22, %v19408_v20 }
0x1c9c   : > { %26306 = vmatprep.subr.bf16.mxu1 %v31403_v21 }
0x1c9e   : > { %19136 = vadd.xlane.f32.xlu1 %v19135_v45  ;;  %v31406_v45 = vpack.c.bf16 %v19412_v30, %v19405_v47 }
0x1ca2   : > { %19139 = vadd.xlane.f32.xlu1 %v19138_v25  ;;  %v31408_v25 = vpack.c.bf16 %v19413_v6, %v19406_v55 }
0x1d17   : > { %v19122_v54 = vpop.xlane.xlu1 %19121 }
0x1d18   : > { %v19142_v38 = vmul.f32 0.0625, %v19122_v54 }
0x1d1a   : > { %v31346_v28 = vsub.f32 %v31307_v57, %v19142_v38 }
0x1d1b   : > { %v19119_v8 = vpop.xlane.xlu1 %19118 }
0x1d1c   : > { %v19141_v44 = vmul.f32 0.0625, %v19119_v8  ;;  %v19158_v3 = vmul.f32 %v31346_v28, %v31346_v28 }
0x1d1e   : > { %v31351_v51 = vsub.f32 %v31309_v59, %v19141_v44  ;;  %v19168_v33 = vsel %vm2615_vm4, %v19158_v3, 0.0 }
0x1d1f   : > { %v19128_v35 = vpop.xlane.xlu1 %19127  ;;  %19169 = vadd.xlane.f32.xlu1 %v19168_v33  ;;  %v19134_v40 = vpop.xlane.xlu0 %19133 }
0x1d20   : > { %v19144_v36 = vmul.f32 0.0625, %v19128_v35  ;;  %v19157_v10 = vmul.f32 %v31351_v51, %v31351_v51  ;;  %v19146_v9 = vmul.f32 0.0625, %v19134_v40 }
0x1d22   : > { %v31357_v41 = vsub.f32 %v31314_v4, %v19144_v36  ;;  %v19165_v19 = vsel %vm2615_vm4, %v19157_v10, 0.0  ;;  %v31369_v13 = vsub.f32 %v31320_v2, %v19146_v9 }
0x1d23   : > { %v19125_v61 = vpop.xlane.xlu1 %19124  ;;  %19166 = vadd.xlane.f32.xlu1 %v19165_v19 }
0x1d24   : > { %v19143_v7 = vmul.f32 0.0625, %v19125_v61  ;;  %v19160_v42 = vmul.f32 %v31357_v41, %v31357_v41  ;;  %v19162_v23 = vmul.f32 %v31369_v13, %v31369_v13 }
0x1d26   : > { %v31363_v60 = vsub.f32 %v31322_v43, %v19143_v7  ;;  %v19174_v0 = vsel %vm2615_vm4, %v19160_v42, 0.0  ;;  %v19180_v52 = vsel %vm2615_vm4, %v19162_v23, 0.0 }
0x1d27   : > { %v19131_v29 = vpop.xlane.xlu1 %19130  ;;  %19175 = vadd.xlane.f32.xlu1 %v19174_v0 }
0x1d28   : > { %v19145_v14 = vmul.f32 0.0625, %v19131_v29  ;;  %v19159_v24 = vmul.f32 %v31363_v60, %v31363_v60 }
0x1d2a   : > { %v31372_v5 = vsub.f32 %v31329_v17, %v19145_v14  ;;  %v19171_v46 = vsel %vm2615_vm4, %v19159_v24, 0.0 }
0x1d2b   : > { %19172 = vadd.xlane.f32.xlu1 %v19171_v46  ;;  %v19137_v15 = vpop.xlane.xlu1 %19136 }
0x1d2c   : > { %v19147_v49 = vmul.f32 0.0625, %v19137_v15  ;;  %v19161_v11 = vmul.f32 %v31372_v5, %v31372_v5 }
0x1d2e   : > { %v31378_v62 = vsub.f32 %v31335_v31, %v19147_v49  ;;  %v19177_v39 = vsel %vm2615_vm4, %v19161_v11, 0.0 }
0x1d2f   : > { %19178 = vadd.xlane.f32.xlu1 %v19177_v39  ;;  %v19140_v34 = vpop.xlane.xlu1 %19139 }
0x1d30   : > { %v19148_v50 = vmul.f32 0.0625, %v19140_v34  ;;  %v19163_v48 = vmul.f32 %v31378_v62, %v31378_v62 }
0x1d32   : > { %v31386_v27 = vsub.f32 %v31339_v53, %v19148_v50  ;;  %v19183_v12 = vsel %vm2615_vm4, %v19163_v48, 0.0 }
0x1d33   : > { %19181 = vadd.xlane.f32.xlu1 %v19180_v52  ;;  %19184 = vadd.xlane.f32.xlu0 %v19183_v12 }
0x1d34   : > { %v19164_v18 = vmul.f32 %v31386_v27, %v31386_v27 }
0x1d36   : > { %v19186_v26 = vsel %vm2615_vm4, %v19164_v18, 0.0 }
0x1d37   : > { %19187 = vadd.xlane.f32.xlu1 %v19186_v26 }
0x1dac   : > { %v19170_v54 = vpop.xlane.xlu1 %19169 }
0x1dad   : > { %v19190_v38 = vmul.f32 0.0625, %v19170_v54 }
0x1daf   : > { %v19198_v8 = vadd.f32 1e-05, %v19190_v38 }
0x1db0   : > { %v19167_v44 = vpop.xlane.xlu1 %19166 }
0x1db1   : > { %27411 = vrsqrt.f32 %v19198_v8  ;;  %v19189_v3 = vmul.f32 0.0625, %v19167_v44 }
0x1db3   : > { %v19197_v33 = vadd.f32 1e-05, %v19189_v3 }
0x1db4   : > { %v19176_v35 = vpop.xlane.xlu1 %19175 }
0x1db5   : > { %27413 = vrsqrt.f32 %v19197_v33  ;;  %v19192_v36 = vmul.f32 0.0625, %v19176_v35 }
0x1db7   : > { %v19200_v10 = vadd.f32 1e-05, %v19192_v36 }
0x1db8   : > { %v19173_v19 = vpop.xlane.xlu1 %19172 }
0x1db9   : > { %27415 = vrsqrt.f32 %v19200_v10  ;;  %v19191_v40 = vmul.f32 0.0625, %v19173_v19 }
0x1dbb   : > { %v27412_v61 = vpop.eup %27411  ;;  %v19199_v7 = vadd.f32 1e-05, %v19191_v40 }
0x1dbc   : > { %v19214_v42 = vmul.f32 %v27412_v61, %v31346_v28  ;;  %v19179_v9 = vpop.xlane.xlu1 %19178 }
0x1dbd   : > { %27417 = vrsqrt.f32 %v19199_v7  ;;  %v19193_v0 = vmul.f32 0.0625, %v19179_v9 }
0x1dbe   : > { %v19236_v29 = vsel %vm2615_vm4, %v19214_v42, 0 }
0x1dbf   : > { %v27414_v14 = vpop.eup %27413  ;;  %v31412_v24 = vand.u32 4294901760, %v19236_v29  ;;  %v19201_v46 = vadd.f32 1e-05, %v19193_v0 }
0x1dc0   : > { %v19185_v15 = vpop.xlane.xlu0 %19184  ;;  %v19182_v49 = vpop.xlane.xlu1 %19181  ;;  %v19213_v11 = vmul.f32 %v27414_v14, %v31351_v51 }
0x1dc1   : > { %v31416_v39 = vsub.f32 %v19236_v29, %v31412_v24  ;;  %27419 = vrsqrt.f32 %v19201_v46  ;;  %v19195_v23 = vmul.f32 0.0625, %v19185_v15  ;;  %v19194_v34 = vmul.f32 0.0625, %v19182_v49 }
0x1dc2   : > { %v19233_v28 = vsel %vm2615_vm4, %v19213_v11, 0 }
0x1dc3   : > { %v27416_v50 = vpop.eup %27415  ;;  %v19203_v48 = vadd.f32 1e-05, %v19195_v23  ;;  %v19202_v52 = vadd.f32 1e-05, %v19194_v34  ;;  %v31419_v12 = vand.u32 4294901760, %v19233_v28  ;;  %v19335_v26 = vand.u32 4294901760, %v31416_v39 }
0x1dc4   : > { %v19188_v18 = vpop.xlane.xlu1 %19187  ;;  %v19216_v32 = vmul.f32 %v27416_v50, %v31357_v41 }
0x1dc5   : > { %27421 = vrsqrt.f32 %v19203_v48  ;;  %v19196_v51 = vmul.f32 0.0625, %v19188_v18  ;;  %v31424_v16 = vsub.f32 %v19233_v28, %v31419_v12  ;;  %v19336_v6 = vsub.f32 %v31416_v39, %v19335_v26 }
0x1dc6   : > { %27423 = vrsqrt.f32 %v19202_v52  ;;  %v19242_v1 = vsel %vm2615_vm4, %v19216_v32, 0 }
0x1dc7   : > { %v27418_v63 = vpop.eup %27417  ;;  %v19204_v47 = vadd.f32 1e-05, %v19196_v51  ;;  %v19325_v30 = vand.u32 4294901760, %v31424_v16  ;;  %v31428_v55 = vand.u32 4294901760, %v19242_v1  ;;  %v19337_v8 = vand.u32 4294901760, %v19336_v6 }
0x1dc8   : > { %v19215_v41 = vmul.f32 %v27418_v63, %v31363_v60 }
0x1dc9   : > { %27425 = vrsqrt.f32 %v19204_v47  ;;  %v19326_v37 = vsub.f32 %v31424_v16, %v19325_v30  ;;  %v31438_v56 = vsub.f32 %v19242_v1, %v31428_v55 }
0x1dca   : > { %v19239_v20 = vsel %vm2615_vm4, %v19215_v41, 0 }
0x1dcb   : > { %v27420_v22 = vpop.eup %27419  ;;  %v19327_v54 = vand.u32 4294901760, %v19326_v37  ;;  %v31441_v38 = vand.u32 4294901760, %v19239_v20  ;;  %v19355_v44 = vand.u32 4294901760, %v31438_v56 }
0x1dcc   : > { %v19217_v3 = vmul.f32 %v27420_v22, %v31372_v5 }
0x1dcd   : > { %25213 = vmatprep.mubr.f32.mxu1 %v19327_v54  ;;  %v31446_v60 = vsub.f32 %v19239_v20, %v31441_v38  ;;  %v19356_v5 = vsub.f32 %v31438_v56, %v19355_v44 }
0x1dce   : > { %25214 = vmatmul.mubr.f32.vlgmr.msra.gmra.mrb[76].mxu1 %v19337_v8  ;;  %v19245_v33 = vsel %vm2615_vm4, %v19217_v3, 0 }
0x1dcf   : > { %v27422_v35 = vpop.eup %27421  ;;  %v19345_v36 = vand.u32 4294901760, %v31446_v60  ;;  %v31450_v10 = vand.u32 4294901760, %v19245_v33  ;;  %26308 = vmatpush3.bf16.msra.mxu1 %v31403_v21  ;;  %v19357_v15 = vand.u32 4294901760, %v19356_v5 }
0x1dd0   : > { %v27424_v19 = vpop.eup %27423  ;;  %v19219_v40 = vmul.f32 %v27422_v35, %v31378_v62  ;;  %26310 = vmatprep.subr.bf16.mxu1 %v31406_v45 }
0x1dd1   : > { %v19346_v61 = vsub.f32 %v31446_v60, %v19345_v36  ;;  %v19364_v7 = vsub.f32 %v19245_v33, %v31450_v10  ;;  %v19218_v42 = vmul.f32 %v27424_v19, %v31369_v13 }
0x1dd2   : > { %v19251_v9 = vsel %vm2615_vm4, %v19219_v40, 0 }
0x1dd3   : > { %v27426_v0 = vpop.eup %27425  ;;  %v19347_v29 = vand.u32 4294901760, %v19346_v61  ;;  %v19365_v21 = vand.u32 4294901760, %v19364_v7  ;;  %v19248_v14 = vsel %vm2615_vm4, %v19218_v42, 0  ;;  %v31463_v62 = vand.u32 4294901760, %v19251_v9 }
0x1dd4   : > { %v19220_v46 = vmul.f32 %v27426_v0, %v31386_v27  ;;  %v31466_v49 = vand.u32 4294901760, %v19248_v14  ;;  %v21099_v0 = vld [vmem:[%s31784_s24 + $0x1] ss:$0 sm:$0xff] }
0x1dd5   : > { %25216 = vmatprep.mubr.f32.mxu1 %v19347_v29  ;;  %v19366_v11 = vsub.f32 %v19364_v7, %v19365_v21  ;;  %v19384_v23 = vsub.f32 %v19251_v9, %v31463_v62 }
0x1dd6   : > { %25217 = vmatmul.mubr.f32.gmra.mrb[78].mxu1 %v19357_v15  ;;  %v19374_v13 = vsub.f32 %v19248_v14, %v31466_v49  ;;  %v19254_v34 = vsel %vm2615_vm4, %v19220_v46, 0 }
0x1dd7   : > { %v19367_v28 = vand.u32 4294901760, %v19366_v11  ;;  %v19385_v50 = vand.u32 4294901760, %v19384_v23  ;;  %v19393_v48 = vand.u32 4294901760, %v19254_v34 }
0x1dd8   : > { %v19375_v52 = vand.u32 4294901760, %v19374_v13 }
0x1dd9   : > { %25219 = vmatprep.mubr.f32.mxu1 %v19367_v28  ;;  %v19386_v18 = vsub.f32 %v19384_v23, %v19385_v50  ;;  %v19394_v32 = vsub.f32 %v19254_v34, %v19393_v48 }
0x1dda   : > { %v19376_v27 = vsub.f32 %v19374_v13, %v19375_v52 }
0x1ddb   : > { %v19387_v51 = vand.u32 4294901760, %v19386_v18  ;;  %v19395_v1 = vand.u32 4294901760, %v19394_v32 }
0x1ddc   : > { %v19377_v63 = vand.u32 4294901760, %v19376_v27 }
0x1ddd   : > { %v19396_v47 = vsub.f32 %v19394_v32, %v19395_v1 }
0x1dde   : > { %25220 = vmatmul.mubr.f32.gmra.mrb[80].mxu1 %v19377_v63 }
0x1ddf   : > { %25222 = vmatprep.mubr.f32.mxu1 %v19387_v51  ;;  %v19397_v6 = vand.u32 4294901760, %v19396_v47 }
0x1de2   : > { %25223 = vmatmul.mubr.f32.gmra.mrb[82].mxu1 %v19397_v6 }
0x1de3   : > { %25229 = vmatprep.mubr.f32.mxu1 %v31419_v12 }
0x1de6   : > { %25230 = vmatmul.mubr.f32.vlgmr.msra.gmra.mrb[76].mxu1 %v31412_v24 }
0x1de7   : > { %25232 = vmatprep.mubr.f32.mxu1 %v31441_v38  ;;  %26312 = vmatpush3.bf16.msra.mxu1 %v31406_v45  ;;  %v21101_v45 = vld [vmem:[%s31785_s25 + $0x28] sm:$0xff] }
0x1de8   : > { %26314 = vmatprep.subr.bf16.mxu1 %v31399_v58 }
0x1dea   : > { %25233 = vmatmul.mubr.f32.gmra.mrb[78].mxu1 %v31428_v55 }
0x1deb   : > { %25235 = vmatprep.mubr.f32.mxu1 %v31450_v10 }
0x1dee   : > { %25236 = vmatmul.mubr.f32.gmra.mrb[80].mxu1 %v31466_v49 }
0x1def   : > { %25238 = vmatprep.mubr.f32.mxu1 %v31463_v62 }
0x1df2   : > { %25239 = vmatmul.mubr.f32.gmra.mrb[82].mxu1 %v19393_v48 }
0x1df3   : > { %25245 = vmatprep.mubr.f32.mxu1 %v31424_v16 }
0x1df6   : > { %25246 = vmatmul.mubr.f32.vlgmr.msra.gmra.mrb[76].mxu1 %v31416_v39 }
0x1df7   : > { %25248 = vmatprep.mubr.f32.mxu1 %v31446_v60  ;;  %26316 = vmatpush3.bf16.msra.mxu1 %v31399_v58 }
0x1df8   : > { %26318 = vmatprep.subr.bf16.mxu1 %v31408_v25 }
0x1dfa   : > { %25249 = vmatmul.mubr.f32.gmra.mrb[78].mxu1 %v31438_v56 }
0x1dfb   : > { %25251 = vmatprep.mubr.f32.mxu1 %v19364_v7 }
0x1dfe   : > { %25252 = vmatmul.mubr.f32.gmra.mrb[80].mxu1 %v19374_v13 }
0x1dff   : > { %25254 = vmatprep.mubr.f32.mxu1 %v19384_v23 }
0x1e02   : > { %25255 = vmatmul.mubr.f32.gmra.mrb[82].mxu1 %v19394_v32 }
0x1e03   : > { %25261 = vmatprep.mubr.f32.mxu1 %v19325_v30 }
0x1e06   : > { %25262 = vmatmul.mubr.f32.vlgmr.msra.gmra.mrb[76].mxu1 %v19335_v26  ;;  %v21103_v26 = vld [vmem:[%s31785_s25 + $0x38] sm:$0xff] }
0x1e07   : > { %25264 = vmatprep.mubr.f32.mxu1 %v19345_v36  ;;  %26320 = vmatpush3.bf16.msra.mxu1 %v31408_v25  ;;  %v20063_v30 = vand.u32 4294901760, %v21103_v26 }
0x1e08   : > { %26322 = vmatprep.subr.bf16.mxu1 %v31399_v58 }
0x1e09   : > { %v20225_v8 = vsub.f32 %v21103_v26, %v20063_v30 }
0x1e0a   : > { %25265 = vmatmul.mubr.f32.gmra.mrb[78].mxu1 %v19355_v44 }
0x1e0b   : > { %25267 = vmatprep.mubr.f32.mxu1 %v19365_v21  ;;  %v20226_v33 = vand.u32 4294901760, %v20225_v8 }
0x1e0e   : > { %25268 = vmatmul.mubr.f32.gmra.mrb[80].mxu1 %v19375_v52 }
0x1e0f   : > { %25270 = vmatprep.mubr.f32.mxu1 %v19385_v50 }
0x1e12   : > { %25271 = vmatmul.mubr.f32.gmra.mrb[82].mxu1 %v19395_v1 }
0x1e13   : > { %25277 = vmatprep.mubr.f32.mxu1 %v31419_v12 }
0x1e16   : > { %25278 = vmatmul.mubr.f32.vlgmr.msra.gmra.mrb[76].mxu1 %v31412_v24 }
0x1e17   : > { %25280 = vmatprep.mubr.f32.mxu1 %v31441_v38  ;;  %26324 = vmatpush3.bf16.msra.mxu1 %v31399_v58  ;;  %v21100_v58 = vld [vmem:[%s31785_s25 + $0x20] sm:$0xff] }
0x1e18   : > { %v20054_v25 = vand.u32 4294901760, %v21100_v58 }
0x1e1a   : > { %25281 = vmatmul.mubr.f32.gmra.mrb[78].mxu1 %v31428_v55  ;;  %v20204_v41 = vsub.f32 %v21100_v58, %v20054_v25 }
0x1e1b   : > { %25283 = vmatprep.mubr.f32.mxu1 %v31450_v10 }
0x1e1c   : > { %v20205_v56 = vand.u32 4294901760, %v20204_v41 }
0x1e1e   : > { %25284 = vmatmul.mubr.f32.gmra.mrb[80].mxu1 %v31466_v49  ;;  %v20206_v22 = vsub.f32 %v20204_v41, %v20205_v56 }
0x1e1f   : > { %25286 = vmatprep.mubr.f32.mxu1 %v31463_v62 }
0x1e20   : > { %v20207_v44 = vand.u32 4294901760, %v20206_v22 }
0x1e22   : > { %25287 = vmatmul.mubr.f32.gmra.mrb[82].mxu1 %v19393_v48 }
0x1e23   : > { %25293 = vmatprep.mubr.f32.mxu1 %v31419_v12  ;;  %v21102_v12 = vld [vmem:[%s31785_s25 + $0x30] sm:$0xff] }
0x1e24   : > { %v20060_v16 = vand.u32 4294901760, %v21102_v12 }
0x1e26   : > { %25294 = vmatmul.mubr.f32.vlgmr.msra.gmra.mrb[76].mxu1 %v31412_v24  ;;  %v20057_v24 = vand.u32 4294901760, %v21101_v45 }
0x1e27   : > { %25296 = vmatprep.mubr.f32.mxu1 %v31441_v38  ;;  %v20218_v38 = vsub.f32 %v21102_v12, %v20060_v16 }
0x1e28   : > { %v31515_v39 = vpack.c.bf16 %v20057_v24, %v20054_v25  ;;  %v20211_v37 = vsub.f32 %v21101_v45, %v20057_v24 }
0x1e29   : > { %v20219_v60 = vand.u32 4294901760, %v20218_v38  ;;  %v31536_v7 = vpack.c.bf16 %v20225_v8, %v20218_v38 }
0x1e2a   : > { %25297 = vmatmul.mubr.f32.gmra.mrb[78].mxu1 %v31428_v55  ;;  %26326 = vmatprep.subr.bf16.mxu0 %v31515_v39  ;;  %v31525_v55 = vpack.c.bf16 %v20063_v30, %v20060_v16  ;;  %v20212_v20 = vand.u32 4294901760, %v20211_v37  ;;  %v31534_v61 = vpack.c.bf16 %v20211_v37, %v20204_v41 }
0x1e2b   : > { %25299 = vmatprep.mubr.f32.mxu1 %v31450_v10  ;;  %26328 = vmatpush3.bf16.msra.mxu0 %v31515_v39  ;;  %v20220_v36 = vsub.f32 %v20218_v38, %v20219_v60  ;;  %v20227_v10 = vsub.f32 %v20225_v8, %v20226_v33  ;;  %v31540_v9 = vpack.c.bf16 %v20226_v33, %v20219_v60 }
0x1e2c   : > { %26330 = vmatprep.subr.bf16.mxu0 %v31525_v55  ;;  %v20213_v54 = vsub.f32 %v20211_v37, %v20212_v20  ;;  %v31538_v42 = vpack.c.bf16 %v20212_v20, %v20205_v56 }
0x1e2d   : > { %v20221_v19 = vand.u32 4294901760, %v20220_v36  ;;  %v20228_v40 = vand.u32 4294901760, %v20227_v10 }
0x1e2e   : > { %25300 = vmatmul.mubr.f32.gmra.mrb[80].mxu1 %v31466_v49  ;;  %v20214_v3 = vand.u32 4294901760, %v20213_v54 }
0x1e2f   : > { %25302 = vmatprep.mubr.f32.mxu1 %v31463_v62  ;;  %26332 = vmatpush3.bf16.msra.mxu0 %v31525_v55  ;;  %v31532_v5 = vpack.c.bf16 %v20228_v40, %v20221_v19 }
0x1e30   : > { %v31529_v35 = vpack.c.bf16 %v20214_v3, %v20207_v44 }
0x1e32   : > { %25303 = vmatmul.mubr.f32.gmra.mrb[82].mxu1 %v19393_v48  ;;  %26334 = vmatprep.subr.bf16.mxu0 %v31529_v35 }
0x1ef9   : > { %v25295_v29 = vpop.f32.mrb[76].mxu1 }
0x1efa   : > { %v26425_v21 = vadd.f32 %v25295_v29, %v21099_v0  ;;  %v19970_v14 = vpop.f32.mrb[77].mxu1 }
0x1efb   : > { %v26426_v62 = vadd.f32 %v21099_v0, %v19970_v14 }
0x1efc   : > { %v20017_v46 = vmax.f32 %v26425_v21, 0.0 }
0x1efd   : > { %v20016_v15 = vmax.f32 %v26426_v62, 0.0  ;;  %v25298_v49 = vpop.f32.mrb[78].mxu1 }
0x1efe   : > { %v20033_v11 = vsel %vm10951_vm8, %v20017_v46, 0  ;;  %v26427_v23 = vadd.f32 %v25298_v49, %v21099_v0  ;;  %v19982_v13 = vpop.f32.mrb[79].mxu1 }
0x1eff   : > { %v31546_v34 = vand.u32 4294901760, %v20033_v11  ;;  %v20030_v28 = vsel %vm10951_vm8, %v20016_v15, 0  ;;  %v26428_v50 = vadd.f32 %v21099_v0, %v19982_v13 }
0x1f00   : > { %v31549_v48 = vand.u32 4294901760, %v20030_v28  ;;  %v20019_v52 = vmax.f32 %v26427_v23, 0.0 }
0x1f01   : > { %v31552_v18 = vsub.f32 %v20033_v11, %v31546_v34  ;;  %v20018_v32 = vmax.f32 %v26428_v50, 0.0  ;;  %v25301_v27 = vpop.f32.mrb[80].mxu1 }
0x1f02   : > { %v31555_v51 = vsub.f32 %v20030_v28, %v31549_v48  ;;  %v20039_v1 = vsel %vm10951_vm8, %v20019_v52, 0  ;;  %v26429_v63 = vadd.f32 %v25301_v27, %v21099_v0  ;;  %v19994_v47 = vpop.f32.mrb[81].mxu1 }
0x1f03   : > { %v20134_v6 = vand.u32 4294901760, %v31552_v18  ;;  %v31559_v58 = vand.u32 4294901760, %v20039_v1  ;;  %v20036_v45 = vsel %vm10951_vm8, %v20018_v32, 0  ;;  %v26430_v25 = vadd.f32 %v21099_v0, %v19994_v47 }
0x1f04   : > { %v31562_v24 = vand.u32 4294901760, %v20036_v45  ;;  %v20021_v12 = vmax.f32 %v26429_v63, 0.0  ;;  %v20124_v26 = vand.u32 4294901760, %v31555_v51 }
0x1f05   : > { %v20135_v16 = vsub.f32 %v31552_v18, %v20134_v6  ;;  %v31569_v30 = vsub.f32 %v20039_v1, %v31559_v58  ;;  %v20020_v41 = vmax.f32 %v26430_v25, 0.0  ;;  %v25304_v37 = vpop.f32.mrb[82].mxu1 }
0x1f06   : > { %v31572_v56 = vsub.f32 %v20036_v45, %v31562_v24  ;;  %v20045_v20 = vsel %vm10951_vm8, %v20021_v12, 0  ;;  %v26431_v22 = vadd.f32 %v25304_v37, %v21099_v0  ;;  %v20006_v54 = vpop.f32.mrb[83].mxu1  ;;  %v20125_v38 = vsub.f32 %v31555_v51, %v20124_v26 }
0x1f07   : > { %v31578_v8 = vand.u32 4294901760, %v20045_v20  ;;  %v20042_v44 = vsel %vm10951_vm8, %v20020_v41, 0  ;;  %v26432_v3 = vadd.f32 %v21099_v0, %v20006_v54  ;;  %v20136_v19 = vand.u32 4294901760, %v20135_v16 }
0x1f08   : > { %v31581_v60 = vand.u32 4294901760, %v20042_v44  ;;  %v20023_v33 = vmax.f32 %v26431_v22, 0.0  ;;  %v20126_v36 = vand.u32 4294901760, %v20125_v38  ;;  %v20144_v10 = vand.u32 4294901760, %v31572_v56 }
0x1f09   : > { %v31585_v40 = vsub.f32 %v20045_v20, %v31578_v8  ;;  %v20022_v29 = vmax.f32 %v26432_v3, 0.0  ;;  %v20154_v21 = vand.u32 4294901760, %v31569_v30 }
0x1f0a   : > { %v31589_v14 = vsub.f32 %v20042_v44, %v31581_v60  ;;  %v20051_v62 = vsel %vm10951_vm8, %v20023_v33, 0  ;;  %25313 = vmatprep.mubr.f32.mxu0 %v20126_v36  ;;  %v20145_v0 = vsub.f32 %v31572_v56, %v20144_v10 }
0x1f0b   : > { %v31595_v46 = vand.u32 4294901760, %v20051_v62  ;;  %v20048_v15 = vsel %vm10951_vm8, %v20022_v29, 0  ;;  %25314 = vmatmul.mubr.f32.vlgmr.msra.gmra.mrb[68].mxu0 %v20136_v19  ;;  %v20155_v49 = vsub.f32 %v31569_v30, %v20154_v21  ;;  %v20174_v11 = vand.u32 4294901760, %v31585_v40 }
0x1f0c   : > { %v31602_v23 = vand.u32 4294901760, %v20048_v15  ;;  %v20146_v13 = vand.u32 4294901760, %v20145_v0  ;;  %v20164_v28 = vand.u32 4294901760, %v31589_v14  ;;  %26336 = vmatpush3.bf16.msra.mxu0 %v31529_v35 }
0x1f0d   : > { %v20193_v50 = vsub.f32 %v20051_v62, %v31595_v46  ;;  %v20156_v52 = vand.u32 4294901760, %v20155_v49  ;;  %v20175_v32 = vsub.f32 %v31585_v40, %v20174_v11  ;;  %26338 = vmatprep.subr.bf16.mxu0 %v31532_v5 }
0x1f0e   : > { %v20183_v27 = vsub.f32 %v20048_v15, %v31602_v23  ;;  %25316 = vmatprep.mubr.f32.mxu0 %v20146_v13  ;;  %v20165_v1 = vsub.f32 %v31589_v14, %v20164_v28 }
0x1f0f   : > { %25317 = vmatmul.mubr.f32.gmra.mrb[70].mxu0 %v20156_v52  ;;  %v20194_v63 = vand.u32 4294901760, %v20193_v50  ;;  %v20176_v25 = vand.u32 4294901760, %v20175_v32 }
0x1f10   : > { %v20166_v47 = vand.u32 4294901760, %v20165_v1  ;;  %v20184_v45 = vand.u32 4294901760, %v20183_v27  ;;  %26340 = vmatpush3.bf16.msra.mxu0 %v31532_v5 }
0x1f11   : > { %v20195_v35 = vsub.f32 %v20193_v50, %v20194_v63  ;;  %26342 = vmatprep.subr.bf16.mxu0 %v31534_v61 }
0x1f12   : > { %25319 = vmatprep.mubr.f32.mxu0 %v20166_v47  ;;  %v20185_v12 = vsub.f32 %v20183_v27, %v20184_v45 }
0x1f13   : > { %25320 = vmatmul.mubr.f32.gmra.mrb[72].mxu0 %v20176_v25  ;;  %v20196_v41 = vand.u32 4294901760, %v20195_v35 }
0x1f14   : > { %v20186_v16 = vand.u32 4294901760, %v20185_v12 }
0x1f16   : > { %25322 = vmatprep.mubr.f32.mxu0 %v20186_v16 }
0x1f17   : > { %25323 = vmatmul.mubr.f32.gmra.mrb[74].mxu0 %v20196_v41 }
0x1f18   : > { %25333 = vmatprep.mubr.f32.mxu0 %v31549_v48 }
0x1f1b   : > { %25334 = vmatmul.mubr.f32.vlgmr.msra.gmra.mrb[68].mxu0 %v31546_v34 }
0x1f1c   : > { %25336 = vmatprep.mubr.f32.mxu0 %v31562_v24  ;;  %26344 = vmatpush3.bf16.msra.mxu0 %v31534_v61 }
0x1f1d   : > { %26346 = vmatprep.subr.bf16.mxu0 %v31536_v7 }
0x1f1f   : > { %25337 = vmatmul.mubr.f32.gmra.mrb[70].mxu0 %v31559_v58 }
0x1f20   : > { %25339 = vmatprep.mubr.f32.mxu0 %v31581_v60  ;;  %26348 = vmatpush3.bf16.msra.mxu0 %v31536_v7 }
0x1f21   : > { %26350 = vmatprep.subr.bf16.mxu0 %v31515_v39 }
0x1f23   : > { %25340 = vmatmul.mubr.f32.gmra.mrb[72].mxu0 %v31578_v8 }
0x1f24   : > { %25342 = vmatprep.mubr.f32.mxu0 %v31602_v23 }
0x1f27   : > { %25343 = vmatmul.mubr.f32.gmra.mrb[74].mxu0 %v31595_v46 }
0x1f28   : > { %25353 = vmatprep.mubr.f32.mxu0 %v31555_v51 }
0x1f2b   : > { %25354 = vmatmul.mubr.f32.vlgmr.msra.gmra.mrb[68].mxu0 %v31552_v18 }
0x1f2c   : > { %25356 = vmatprep.mubr.f32.mxu0 %v31572_v56  ;;  %26352 = vmatpush3.bf16.msra.mxu0 %v31515_v39 }
0x1f2d   : > { %26354 = vmatprep.subr.bf16.mxu0 %v31525_v55 }
0x1f2f   : > { %25357 = vmatmul.mubr.f32.gmra.mrb[70].mxu0 %v31569_v30 }
0x1f30   : > { %25359 = vmatprep.mubr.f32.mxu0 %v31589_v14  ;;  %26356 = vmatpush3.bf16.msra.mxu0 %v31525_v55 }
0x1f31   : > { %26358 = vmatprep.subr.bf16.mxu0 %v31538_v42 }
0x1f33   : > { %25360 = vmatmul.mubr.f32.gmra.mrb[72].mxu0 %v31585_v40 }
0x1f34   : > { %25362 = vmatprep.mubr.f32.mxu0 %v20183_v27 }
0x1f37   : > { %25363 = vmatmul.mubr.f32.gmra.mrb[74].mxu0 %v20193_v50 }
0x1f38   : > { %25373 = vmatprep.mubr.f32.mxu0 %v20124_v26 }
0x1f3b   : > { %25374 = vmatmul.mubr.f32.vlgmr.msra.gmra.mrb[68].mxu0 %v20134_v6 }
0x1f3c   : > { %25376 = vmatprep.mubr.f32.mxu0 %v20144_v10  ;;  %26360 = vmatpush3.bf16.msra.mxu0 %v31538_v42 }
0x1f3d   : > { %26362 = vmatprep.subr.bf16.mxu0 %v31540_v9 }
0x1f3f   : > { %25377 = vmatmul.mubr.f32.gmra.mrb[70].mxu0 %v20154_v21 }
0x1f40   : > { %25379 = vmatprep.mubr.f32.mxu0 %v20164_v28  ;;  %26364 = vmatpush3.bf16.msra.mxu0 %v31540_v9 }
0x1f41   : > { %26366 = vmatprep.subr.bf16.mxu0 %v31515_v39 }
0x1f43   : > { %25380 = vmatmul.mubr.f32.gmra.mrb[72].mxu0 %v20174_v11 }
0x1f44   : > { %25382 = vmatprep.mubr.f32.mxu0 %v20184_v45 }
0x1f47   : > { %25383 = vmatmul.mubr.f32.gmra.mrb[74].mxu0 %v20194_v63 }
0x1f48   : > { %25393 = vmatprep.mubr.f32.mxu0 %v31549_v48 }
0x1f4b   : > { %25394 = vmatmul.mubr.f32.vlgmr.msra.gmra.mrb[68].mxu0 %v31546_v34 }
0x1f4c   : > { %25396 = vmatprep.mubr.f32.mxu0 %v31562_v24  ;;  %26368 = vmatpush3.bf16.msra.mxu0 %v31515_v39 }
0x1f4d   : > { %26370 = vmatprep.subr.bf16.mxu0 %v31525_v55 }
0x1f4f   : > { %25397 = vmatmul.mubr.f32.gmra.mrb[70].mxu0 %v31559_v58 }
0x1f50   : > { %25399 = vmatprep.mubr.f32.mxu0 %v31581_v60  ;;  %26372 = vmatpush3.bf16.msra.mxu0 %v31525_v55 }
0x1f53   : > { %25400 = vmatmul.mubr.f32.gmra.mrb[72].mxu0 %v31578_v8 }
0x1f54   : > { %25402 = vmatprep.mubr.f32.mxu0 %v31602_v23 }
0x1f57   : > { %25403 = vmatmul.mubr.f32.gmra.mrb[74].mxu0 %v31595_v46 }
0x1f58   : > { %25413 = vmatprep.mubr.f32.mxu0 %v31549_v48 }
0x1f5b   : > { %25414 = vmatmul.mubr.f32.vlgmr.msra.gmra.mrb[68].mxu0 %v31546_v34 }
0x1f5c   : > { %25416 = vmatprep.mubr.f32.mxu0 %v31562_v24 }
0x1f5f   : > { %25417 = vmatmul.mubr.f32.gmra.mrb[70].mxu0 %v31559_v58 }
0x1f60   : > { %25419 = vmatprep.mubr.f32.mxu0 %v31581_v60 }
0x1f63   : > { %25420 = vmatmul.mubr.f32.gmra.mrb[72].mxu0 %v31578_v8 }
0x1f64   : > { %25422 = vmatprep.mubr.f32.mxu0 %v31602_v23 }
0x1f67   : > { %25423 = vmatmul.mubr.f32.gmra.mrb[74].mxu0 %v31595_v46 }
0x1f68   : > { %27441 = shalt.err (!%p27438_p3)
}
0x1f69   : > { %s27442_s12 = scalar_lea.hbm %s31670_s10, 128  ;;  %s27446_s0 = scalar_lea.hbm %s31787_s27, 256 }
0x1f6a   : > { %p27443_p4 = scmp.ne.s32.totalorder %s31670_s10, %s27442_s12  ;;  %p27447_p9 = scmp.lt.u32.totalorder %s31670_s10, %s31787_s27 }
0x1f6b   : > { %p27448_p10 = scmp.lt.u32.totalorder %s27446_s0, %s27442_s12  ;;  %p27450_p12 = scmp.lt.u32.totalorder %s27442_s12, %s31670_s10 }
0x1f6c   : > { %p27444_p7 = pnand %p27443_p4, %p27717_p5 }
0x1f6d   : > { %p27449_p11 = por %p27448_p10, %p27447_p9 }
0x1f6e   : > { %p27445_p8 = pneg %p27444_p7 }
0x1f6f   : > { %p27451_p13 = por %p27450_p12, %p27449_p11 }
0x1f71   : > { %p27452_p0 = pnand %p27451_p13, %p27445_p8 }
0x1f73   : > { %27455 = shalt.err (!%p27452_p0)
}
0x1f74   : > { %27305 = dma.vmem_to_hbm [thread:$0]  (%p27717_p5), %s20892_s6, 128, %s31670_s10, %s20873_s7   ;;  %v21105_v55 = vld [vmem:[%s31786_s26 + $0x1] ss:$0 sm:$0xff] }
0x1f75   : > { %s21051_s14 = sshll.u32 %s30735_s1, 6  ;;  %s21116_s10 = sshll.u32 %s27700_s3, 10 }
0x1f76   : > { %s905_s12 = scalar_lea.vmem [#allocation4], %s21051_s14  ;;  %s31713_s0 = scalar_lea.hbm %s31788_s28, %s21116_s10 }
0x1f77   : > { %s20904_s6 = sshll.u32 %s905_s12, 4  ;;  %s20878_s3 = scalar_lea.sflag [#allocation5], %s30735_s1  ;;  %s31715_s6 = int_to_ptr.vmem [resolvable:$true] %s20904_s6 }
0x1f78   : > { %s27456_s4 = scalar_lea.vmem %s31715_s6, 1024  ;;  %s27531_s13 = smov [#allocation4]  }
0x1f79   : > { %p27457_p1 = scmp.ne.s32.totalorder %s31715_s6, %s27456_s4  ;;  %s27460_s14 = sshll.u32 %s27531_s13, 4  ;;  %s27461_s14 = int_to_ptr.vmem [resolvable:$false] %s27460_s14 }
0x1f7a   : > { %s27462_s11 = scalar_lea.vmem %s27461_s14, 2048  ;;  %p27463_p4 = scmp.lt.s32.totalorder %s31715_s6, %s27461_s14 }
0x1f7b   : > { %p27458_p2 = pnand %p27457_p1, %p27717_p5  ;;  %p27464_p7 = scmp.lt.s32.totalorder %s27462_s11, %s27456_s4 }
0x1f7d   : > { %p27459_p3 = pneg %p27458_p2  ;;  %p27465_p8 = por %p27464_p7, %p27463_p4 }
0x1f7f   : > { %p27466_p9 = pnand %p27465_p8, %p27459_p3 }
0x202e   : > { %v25415_v39 = vpop.f32.mrb[68].mxu0 }
0x202f   : > { %v20840_v5 = vadd.f32 %v25415_v39, %v31307_v57  ;;  %v20793_v61 = vpop.f32.mrb[69].mxu0 }
0x2030   : > { %v20839_v7 = vadd.f32 %v20793_v61, %v31309_v59 }
0x2031   : > { %v20856_v42 = vadd.f32 %v21105_v55, %v20840_v5 }
0x2032   : > { %v20855_v9 = vadd.f32 %v21105_v55, %v20839_v7  ;;  %v25418_v34 = vpop.f32.mrb[70].mxu0 }
0x2033   : > { %20865 = vst.msk [vmem:[%s905_s12 + $0x8] sm:$0xff] %vm2615_vm4, %v20856_v42  ;;  %v20842_v48 = vadd.f32 %v25418_v34, %v31314_v4  ;;  %v20805_v18 = vpop.f32.mrb[71].mxu0 }
0x2034   : > { %20864 = vst.msk [vmem:[%s905_s12] sm:$0xff] %vm2615_vm4, %v20855_v9  ;;  %v20841_v51 = vadd.f32 %v20805_v18, %v31322_v43 }
0x2035   : > { %v20858_v6 = vadd.f32 %v21105_v55, %v20842_v48 }
0x2036   : > { %v20857_v58 = vadd.f32 %v21105_v55, %v20841_v51  ;;  %v25421_v57 = vpop.f32.mrb[72].mxu0 }
0x2037   : > { %20867 = vst.msk [vmem:[%s905_s12 + $0x18] sm:$0xff] %vm2615_vm4, %v20858_v6  ;;  %v20844_v59 = vadd.f32 %v25421_v57, %v31320_v2  ;;  %v20817_v24 = vpop.f32.mrb[73].mxu0 }
0x2038   : > { %20866 = vst.msk [vmem:[%s905_s12 + $0x10] sm:$0xff] %vm2615_vm4, %v20857_v58  ;;  %v20843_v26 = vadd.f32 %v20817_v24, %v31329_v17 }
0x2039   : > { %v20860_v30 = vadd.f32 %v21105_v55, %v20844_v59 }
0x203a   : > { %v20859_v4 = vadd.f32 %v21105_v55, %v20843_v26  ;;  %v25424_v37 = vpop.f32.mrb[74].mxu0 }
0x203b   : > { %20869 = vst.msk [vmem:[%s905_s12 + $0x28] sm:$0xff] %vm2615_vm4, %v20860_v30  ;;  %v20846_v43 = vadd.f32 %v25424_v37, %v31339_v53  ;;  %v20829_v56 = vpop.f32.mrb[75].mxu0 }
0x203c   : > { %20868 = vst.msk [vmem:[%s905_s12 + $0x20] sm:$0xff] %vm2615_vm4, %v20859_v4  ;;  %v20845_v2 = vadd.f32 %v20829_v56, %v31335_v31 }
0x203d   : > { %v20862_v20 = vadd.f32 %v21105_v55, %v20846_v43 }
0x203e   : > { %v20861_v17 = vadd.f32 %v21105_v55, %v20845_v2 }
0x203f   : > { %20871 = vst.msk [vmem:[%s905_s12 + $0x38] sm:$0xff] %vm2615_vm4, %v20862_v20 }
0x2040   : > { %20870 = vst.msk [vmem:[%s905_s12 + $0x30] sm:$0xff] %vm2615_vm4, %v20861_v17 }
0x2041   : > { %27469 = shalt.err (!%p27466_p9)
}
0x2042   : > { %s27470_s29 = scalar_lea.hbm %s31713_s0, 1024  ;;  %s27474_s7 = scalar_lea.hbm %s31788_s28, 2048 }
0x2043   : > { %p27471_p10 = scmp.ne.s32.totalorder %s31713_s0, %s27470_s29  ;;  %p27475_p13 = scmp.lt.u32.totalorder %s31713_s0, %s31788_s28 }
0x2044   : > { %p27476_p0 = scmp.lt.u32.totalorder %s27474_s7, %s27470_s29  ;;  %p27478_p2 = scmp.lt.u32.totalorder %s27470_s29, %s31713_s0 }
0x2045   : > { %p27472_p11 = pnand %p27471_p10, %p27717_p5 }
0x2046   : > { %p27477_p1 = por %p27476_p0, %p27475_p13 }
0x2047   : > { %p27473_p12 = pneg %p27472_p11 }
0x2048   : > { %p27479_p3 = por %p27478_p2, %p27477_p1 }
0x204a   : > { %p27480_p4 = pnand %p27479_p3, %p27473_p12 }
0x204c   : > { %27483 = shalt.err (!%p27480_p4)
}
0x204d   : > { %s27532_s4 = smov 128   ;;  %s27533_s14 = smov 8  }
0x204e   : > { %27306 = dma.vmem_to_hbm [thread:$0]  (%p27717_p5), %s31715_s6, 1024, %s31713_s0, %s20878_s3, %s27532_s4, %s27532_s4, %s27533_s14  }
0x204f PF: > { %p27316_p7 = scmp.ge.s32.totalorder %s27522_s30, 2  ;;  %s20919_s12 = sand.u32 1, %s27510_s8  }
0x2050   : > { %s20920_s29 = scalar_lea.sflag [#allocation3], %s20919_s12 }
0x2051   : > { %p27310_p8 = pnand %p27316_p7, %p27721_p6 }
0x2053   : > { %27501 = dma.done.wait (!%p27310_p8), %s20920_s29, 128  }
0x2054   : > { %27503 = vsyncadd (!%p27310_p8), %s20920_s29, 4294967168  ;;  %s20929_s10 = scalar_lea.sflag [#allocation5], %s20919_s12 }
0x2055   : > { %27505 = dma.done.wait (!%p27310_p8), %s20929_s10, 1024  }
0x2056   : > { %27507 = vsyncadd (!%p27310_p8), %s20929_s10, 4294966272  ;;  %s32133_s30 = sld [smem:[#allocation9_spill]]  ;;  %s32134_s7 = sld [smem:[#allocation8_spill]] }
0x2057   : > { %s32135_s9 = sld [smem:[#allocation10_spill]]  ;;  %s32136_s8 = smov %s27514_s5 }
0x205c   : > { %p42_p5 = scmp.ge.s32.totalorder %s32133_s30, 4   ;;  %s32137_s5 = smov %s32134_s7 }
0x205e   :  { %44 = sbr.rel (!%p42_p5) target bundleno = 21 (0x15), region = 204 }
0x2065   :  { %20934 = vsyncpa [#allocation3], 1 }
0x2066   :  { %20936 = vsyncpa [#allocation3 + $0x1], 1 }
0x2067   :  { %20937 = vsyncpa [#allocation5], 1 }
0x2068   :  { %20939 = vsyncpa [#allocation5 + $0x1], 1 }

</bundles_post_ra>
